<compile_context>
chip_gen: v6e
topology: v6e:2x2x1
jax: 0.10.0
libtpu: 0.0.40
codegen_flags: <defaults>
</compile_context>

<pallas_src>
import numpy as np
import jax
import jax.numpy as jnp
from jax import lax
from jax.experimental import pallas as pl
from jax.experimental.pallas import tpu as pltpu


# --------------------------------------------------------------------------
# Fused kernel
# --------------------------------------------------------------------------
def _margin(W):
    # zero margin (in flattened rows) on both sides of an image; >= W+1 and a
    # multiple of 16 so bf16 packed-tile interior writes stay aligned.
    return ((W + 1 + 15) // 16) * 16


def _make_fused_kernel(H, W):
    HW = H * W
    M = _margin(W)
    base = M - (W + 1)  # stage-1/2 tap (dy,dx) lives at offset base + dy*W + dx

    def kernel(x_ref,
               w1_ref, s1_ref, b1_ref,
               w2_ref, s2_ref, b2_ref,
               w3_ref, s3_ref, b3_ref,
               o_ref,
               xbuf, y1buf, y2buf):
        # x_ref : (1, HW, Cin) bf16         flattened NHWC image
        # w1/w2 : (3, 3, Cin, Cout) bf16    HWIO weights
        # w3    : (4, Cm, 4*Cout) bf16      parity-folded ConvTranspose blocks
        # sK,bK : (1, CoutK) f32            folded BN scale / bias (+conv bias)
        # o_ref : (1, HW, 4*Cout) f32       lane-dense parity slab [ee|eo|oe|oo]
        # *buf  : (HW + 2*M, C) bf16        zero-margined VMEM scratch

        # in-kernel edge masks (col index of each flattened row)
        col = lax.broadcasted_iota(jnp.int32, (HW, 1), 0) % W
        m0 = jnp.where(col != 0, 1.0, 0.0).astype(jnp.bfloat16)        # 0 at w==0
        mL = jnp.where(col != (W - 1), 1.0, 0.0).astype(jnp.bfloat16)  # 0 at w==W-1

        def zero_margins(buf, top=True):
            z = jnp.zeros((M, buf.shape[-1]), buf.dtype)
            if top:
                buf[pl.ds(0, M), :] = z
            buf[pl.ds(M + HW, M), :] = z

        def conv3x3(src_buf, w_ref, s_ref, b_ref):
            # TODO(synk): at production channel counts fold the 9 taps into one
            # im2col matmul; at demo widths (Cin=4/8) the MXU is far from the
            # bottleneck, so 9 small accumulated pushes are kept for safety.
            cout = w_ref.shape[-1]
            acc = jnp.zeros((HW, cout), jnp.float32)
            for dy in range(3):
                for dx in range(3):
                    patch = src_buf[pl.ds(base + dy * W + dx, HW), :]
                    if dx == 0:
                        patch = patch * m0       # left-edge wraparound -> 0
                    elif dx == 2:
                        patch = patch * mL       # right-edge wraparound -> 0
                    acc = acc + jnp.dot(patch, w_ref[dy, dx],
                                        preferred_element_type=jnp.float32)
            # folded BN affine + ReLU in f32, once on the whole-image slab
            return jnp.maximum(acc * s_ref[...] + b_ref[...], 0.0)

        # ---- stage 1: Conv(in -> 2*out) + BN + ReLU ----
        zero_margins(xbuf)
        xbuf[pl.ds(M, HW), :] = x_ref[0]
        y1 = conv3x3(xbuf, w1_ref, s1_ref, b1_ref)

        # ---- stage 2: Conv(2*out -> 2*out) + BN + ReLU ----
        zero_margins(y1buf)
        y1buf[pl.ds(M, HW), :] = y1.astype(jnp.bfloat16)
        y2 = conv3x3(y1buf, w2_ref, s2_ref, b2_ref)

        # ---- stage 3: ConvTranspose2d(3, s2, p1, op1) as 4 parity-folded
        #      block matmuls; result is already the lane-dense parity slab ----
        zero_margins(y2buf, top=False)          # rows < M are never read here
        y2_bf = y2.astype(jnp.bfloat16)
        y2buf[pl.ds(M, HW), :] = y2_bf
        t00 = y2_bf                                       # y2[i,   j  ]
        t01 = y2buf[pl.ds(M + 1, HW), :] * mL             # y2[i,   j+1]
        t10 = y2buf[pl.ds(M + W, HW), :]                  # y2[i+1, j  ]
        t11 = y2buf[pl.ds(M + W + 1, HW), :] * mL         # y2[i+1, j+1]

        acc = jnp.dot(t00, w3_ref[0], preferred_element_type=jnp.float32)
        acc = acc + jnp.dot(t01, w3_ref[1], preferred_element_type=jnp.float32)
        acc = acc + jnp.dot(t10, w3_ref[2], preferred_element_type=jnp.float32)
        acc = acc + jnp.dot(t11, w3_ref[3], preferred_element_type=jnp.float32)
        o_ref[0] = jnp.maximum(acc * s3_ref[...] + b3_ref[...], 0.0)

    return kernel


# --------------------------------------------------------------------------
# Module forward (single pallas_call) and pure-JAX reference.
# --------------------------------------------------------------------------
@jax.jit
def test_upsample_layer_forward(x_nchw, out_unused, params):
    del out_unused  # the PyTorch forward() ignores `out`
    N, Cin, H, W = x_nchw.shape
    Cm = params["w1"].shape[-1]
    Cout = params["w3"].shape[-1]
    HW = H * W
    M = _margin(W)

    # cast first so the NCHW->NHWC transpose moves half the bytes
    x_flat = jnp.transpose(x_nchw.astype(jnp.bfloat16),
                           (0, 2, 3, 1)).reshape(N, HW, Cin)

    w1 = params["w1"].astype(jnp.bfloat16)
    w2 = params["w2"].astype(jnp.bfloat16)

    # Fold the 4 parity sub-convolutions of the ConvTranspose into 4 block
    # weight matrices (Cm, 4*Cout); one accumulated matmul chain then emits
    # the [ee|eo|oe|oo] lane-dense slab directly.
    w3 = params["w3"].astype(jnp.bfloat16)     # (3,3,Cm,Cout) equiv. fwd kernel
    Z = jnp.zeros((Cm, Cout), jnp.bfloat16)
    w3_blk = jnp.stack([
        jnp.concatenate([w3[1, 1], w3[1, 0], w3[0, 1], w3[0, 0]], axis=-1),  # t00
        jnp.concatenate([Z,        w3[1, 2], Z,        w3[0, 2]], axis=-1),  # t01
        jnp.concatenate([Z,        Z,        w3[2, 1], w3[2, 0]], axis=-1),  # t10
        jnp.concatenate([Z,        Z,        Z,        w3[2, 2]], axis=-1),  # t11
    ], axis=0)                                           # (4, Cm, 4*Cout)
    s3 = jnp.tile(params["s3"], (1, 4))                  # (1, 4*Cout)
    b3 = jnp.tile(params["b3"], (1, 4))

    kernel = _make_fused_kernel(H, W)

    def full(*s):
        return pl.BlockSpec(s, lambda i, _n=len(s): (0,) * _n)

    flops = 2 * N * HW * (9 * Cin * Cm + 9 * Cm * Cm + 4 * Cm * 4 * Cout)
    bytes_accessed = (N * HW * Cin * 2 + N * HW * 4 * Cout * 4
                      + (9 * Cin * Cm + 9 * Cm * Cm + 4 * Cm * 4 * Cout) * 2
                      + (2 * 2 * Cm + 2 * 4 * Cout) * 4)

    parities = pl.pallas_call(
        kernel,
        out_shape=jax.ShapeDtypeStruct((N, HW, 4 * Cout), jnp.float32),
        grid=(N,),
        in_specs=[
            pl.BlockSpec((1, HW, Cin), lambda i: (i, 0, 0)),
            full(3, 3, Cin, Cm), full(1, Cm), full(1, Cm),
            full(3, 3, Cm, Cm), full(1, Cm), full(1, Cm),
            full(4, Cm, 4 * Cout), full(1, 4 * Cout), full(1, 4 * Cout),
        ],
        out_specs=pl.BlockSpec((1, HW, 4 * Cout), lambda i: (i, 0, 0)),
        scratch_shapes=[
            pltpu.VMEM((HW + 2 * M, Cin), jnp.bfloat16),
            pltpu.VMEM((HW + 2 * M, Cm), jnp.bfloat16),
            pltpu.VMEM((HW + 2 * M, Cm), jnp.bfloat16),
        ],
        compiler_params=pltpu.CompilerParams(
            dimension_semantics=("parallel",)),
        cost_estimate=pl.CostEstimate(flops=flops, transcendentals=0,
                                      bytes_accessed=bytes_accessed),
    )(x_flat, w1, params["s1"], params["b1"],
      w2, params["s2"], params["b2"],
      w3_blk, s3, b3)

    # (N, i*W+j, [ee|eo|oe|oo]*Cout) -> NCHW (N, c, 2i+pe, 2j+pw)
    y = parities.reshape(N, H, W, 2, 2, Cout)
    y = jnp.transpose(y, (0, 5, 1, 3, 2, 4)).reshape(N, Cout, 2 * H, 2 * W)
    return y


def _ref_forward(x_nchw, params):
    # Pure-JAX reference with the same bf16 matmul quantization as the kernel
    # (bf16 operands, f32 accumulation, f32 BN/ReLU epilogue).
    dn = ("NHWC", "HWIO", "NHWC")

    def cbr(x, w, s, b, **conv_kw):
        y = lax.conv_general_dilated(x.astype(jnp.bfloat16),
                                     w.astype(jnp.bfloat16),
                                     (1, 1), dimension_numbers=dn,
                                     preferred_element_type=jnp.float32,
                                     **conv_kw)
        return jnp.maximum(y * s + b, 0.0)

    x = jnp.transpose(x_nchw, (0, 2, 3, 1))
    y = cbr(x, params["w1"], params["s1"], params["b1"], padding="SAME")
    y = cbr(y, params["w2"], params["s2"], params["b2"], padding="SAME")
    y = cbr(y, params["w3"], params["s3"], params["b3"],
            padding=((1, 2), (1, 2)), lhs_dilation=(2, 2))
    return jnp.transpose(y, (0, 3, 1, 2))


# --------------------------------------------------------------------------
# Deterministic parameter construction (synthetic, PyTorch layouts converted).
# --------------------------------------------------------------------------
def _bn_params(c):
    i = jnp.arange(c, dtype=jnp.float32)
    d = max(c - 1, 1)
    gamma = 1.0 + 0.1 * i / d
    beta = 0.05 * i / d - 0.02
    mean = 0.01 * i
    var = 1.0 + 0.02 * i
    return gamma, beta, mean, var


def _fold_bn(conv_bias, gamma, beta, mean, var, eps=1e-5):
    scale = gamma / jnp.sqrt(var + eps)
    bias = (conv_bias - mean) * scale + beta
    return scale.reshape(1, -1), bias.reshape(1, -1)


def init_params(key, in_ch, out_ch):
    mid = out_ch * 2
    ks = jax.random.split(key, 6)

    def conv_w_oihw(k, cin, cout):
        std = (2.0 / (cin * 9)) ** 0.5
        return std * jax.random.normal(k, (cout, cin, 3, 3), jnp.float32)

    p = {}
    # Conv2d weights: PyTorch (O,I,kH,kW) -> HWIO
    w1 = conv_w_oihw(ks[0], in_ch, mid)
    p["w1"] = jnp.transpose(w1, (2, 3, 1, 0))
    b1 = 0.01 * jax.random.normal(ks[1], (mid,), jnp.float32)
    p["s1"], p["b1"] = _fold_bn(b1, *_bn_params(mid))

    w2 = conv_w_oihw(ks[2], mid, mid)
    p["w2"] = jnp.transpose(w2, (2, 3, 1, 0))
    b2 = 0.01 * jax.random.normal(ks[3], (mid,), jnp.float32)
    p["s2"], p["b2"] = _fold_bn(b2, *_bn_params(mid))

    # ConvTranspose2d weight in PyTorch layout (I=mid, O=out_ch, kH, kW);
    # equivalent forward-conv HWIO kernel = rot180 + (I,O,kH,kW)->(kH,kW,I,O).
    std3 = (2.0 / (mid * 9)) ** 0.5
    w3_t = std3 * jax.random.normal(ks[4], (mid, out_ch, 3, 3), jnp.float32)
    p["w3"] = jnp.transpose(w3_t[:, :, ::-1, ::-1], (2, 3, 0, 1))
    b3 = 0.01 * jax.random.normal(ks[5], (out_ch,), jnp.float32)
    p["s3"], p["b3"] = _fold_bn(b3, *_bn_params(out_ch))
    return p


if __name__ == "__main__":
    key = jax.random.PRNGKey(0)
    kx, ko, kp = jax.random.split(key, 3)

    in_ch, out_ch = 4, 4
    N, H, W = 2, 16, 16

    x = jax.random.normal(kx, (N, in_ch, H, W), jnp.float32)
    out_skip = jax.random.normal(ko, (N, out_ch, 2 * H, 2 * W), jnp.float32)
    params = init_params(kp, in_ch, out_ch)

    y = test_upsample_layer_forward(x, out_skip, params)
    y = jax.block_until_ready(y)
    assert y.shape == (N, out_ch, 2 * H, 2 * W), y.shape

    y_ref = _ref_forward(x, params)
    np.testing.assert_allclose(np.asarray(y), np.asarray(y_ref),
                               atol=1e-2, rtol=1e-2)
    print("KERNEL_OK")
</pallas_src>

<mosaic_0001>
module attributes {stable_mosaic.version = 11 : i64} {
  func.func @kernel(%arg0: i32, %arg1: memref<1x256x4xbf16, #tpu.memory_space<vmem>>, %arg2: memref<3x3x4x8xbf16, #tpu.memory_space<vmem>>, %arg3: memref<1x8xf32, #tpu.memory_space<vmem>>, %arg4: memref<1x8xf32, #tpu.memory_space<vmem>>, %arg5: memref<3x3x8x8xbf16, #tpu.memory_space<vmem>>, %arg6: memref<1x8xf32, #tpu.memory_space<vmem>>, %arg7: memref<1x8xf32, #tpu.memory_space<vmem>>, %arg8: memref<4x8x16xbf16, #tpu.memory_space<vmem>>, %arg9: memref<1x16xf32, #tpu.memory_space<vmem>>, %arg10: memref<1x16xf32, #tpu.memory_space<vmem>>, %arg11: memref<1x256x16xf32, #tpu.memory_space<vmem>>, %arg12: memref<320x4xbf16, #tpu.memory_space<vmem>>, %arg13: memref<320x8xbf16, #tpu.memory_space<vmem>>, %arg14: memref<320x8xbf16, #tpu.memory_space<vmem>>) attributes {dimension_semantics = [#tpu.dimension_semantics<parallel>], iteration_bounds = array<i64: 2>, scalar_prefetch = 0 : i64, scratch_operands = 3 : i64, tpu.core_type = #tpu.core_type<tc>, window_params = [{transform_indices = @transform_0, window_bounds = array<i64: 1, 256, 4>}, {pipeline_mode = #tpu.pipeline_mode<synchronous>, transform_indices = @transform_1, window_bounds = array<i64: 3, 3, 4, 8>}, {pipeline_mode = #tpu.pipeline_mode<synchronous>, transform_indices = @transform_2, window_bounds = array<i64: 1, 8>}, {pipeline_mode = #tpu.pipeline_mode<synchronous>, transform_indices = @transform_3, window_bounds = array<i64: 1, 8>}, {pipeline_mode = #tpu.pipeline_mode<synchronous>, transform_indices = @transform_4, window_bounds = array<i64: 3, 3, 8, 8>}, {pipeline_mode = #tpu.pipeline_mode<synchronous>, transform_indices = @transform_5, window_bounds = array<i64: 1, 8>}, {pipeline_mode = #tpu.pipeline_mode<synchronous>, transform_indices = @transform_6, window_bounds = array<i64: 1, 8>}, {pipeline_mode = #tpu.pipeline_mode<synchronous>, transform_indices = @transform_7, window_bounds = array<i64: 4, 8, 16>}, {pipeline_mode = #tpu.pipeline_mode<synchronous>, transform_indices = @transform_8, window_bounds = array<i64: 1, 16>}, {pipeline_mode = #tpu.pipeline_mode<synchronous>, transform_indices = @transform_9, window_bounds = array<i64: 1, 16>}, {transform_indices = @transform_10, window_bounds = array<i64: 1, 256, 16>}]} {
    %0 = tpu.iota {dimensions = array<i32: 0>} : vector<256x1xi32>
    %c16_i32 = arith.constant 16 : i32
    %c0_i32 = arith.constant 0 : i32
    %1 = arith.cmpi eq, %c16_i32, %c0_i32 : i32
    %c1_i32 = arith.constant 1 : i32
    %2 = arith.select %1, %c1_i32, %c16_i32 : i32
    %3 = vector.broadcast %2 : i32 to vector<256x1xi32>
    %4 = arith.remsi %0, %3 : vector<256x1xi32>
    %c0_i32_0 = arith.constant 0 : i32
    %5 = vector.broadcast %c0_i32_0 : i32 to vector<256x1xi32>
    %6 = arith.cmpi ne, %4, %5 : vector<256x1xi32>
    %c0_i32_1 = arith.constant 0 : i32
    %7 = vector.broadcast %c0_i32_1 : i32 to vector<256x1xi32>
    %8 = arith.cmpi slt, %4, %7 : vector<256x1xi32>
    %c0_i32_2 = arith.constant 0 : i32
    %9 = arith.cmpi slt, %2, %c0_i32_2 : i32
    %10 = vector.broadcast %9 : i1 to vector<256x1xi1>
    %11 = vector.broadcast %10 : vector<256x1xi1> to vector<256x1xi1>
    %12 = arith.xori %8, %11 : vector<256x1xi1>
    %13 = arith.andi %12, %6 : vector<256x1xi1>
    %14 = vector.broadcast %2 : i32 to vector<256x1xi32>
    %15 = arith.addi %4, %14 : vector<256x1xi32>
    %16 = arith.select %13, %15, %4 : vector<256x1xi1>, vector<256x1xi32>
    %c0_i32_3 = arith.constant 0 : i32
    %17 = vector.broadcast %c0_i32_3 : i32 to vector<256x1xi32>
    %18 = arith.cmpi ne, %16, %17 : vector<256x1xi32>
    %cst = arith.constant 1.000000e+00 : f32
    %cst_4 = arith.constant 0.000000e+00 : f32
    %19 = vector.broadcast %cst : f32 to vector<256x1xf32>
    %20 = vector.broadcast %cst_4 : f32 to vector<256x1xf32>
    %21 = arith.select %18, %19, %20 : vector<256x1xi1>, vector<256x1xf32>
    %22 = arith.truncf %21 : vector<256x1xf32> to vector<256x1xbf16>
    %c15_i32 = arith.constant 15 : i32
    %23 = vector.broadcast %c15_i32 : i32 to vector<256x1xi32>
    %24 = arith.cmpi ne, %16, %23 : vector<256x1xi32>
    %cst_5 = arith.constant 1.000000e+00 : f32
    %cst_6 = arith.constant 0.000000e+00 : f32
    %25 = vector.broadcast %cst_5 : f32 to vector<256x1xf32>
    %26 = vector.broadcast %cst_6 : f32 to vector<256x1xf32>
    %27 = arith.select %24, %25, %26 : vector<256x1xi1>, vector<256x1xf32>
    %28 = arith.truncf %27 : vector<256x1xf32> to vector<256x1xbf16>
    %cst_7 = arith.constant 0.000000e+00 : bf16
    %29 = vector.broadcast %cst_7 : bf16 to vector<32x4xbf16>
    %c0 = arith.constant 0 : index
    %c0_8 = arith.constant 0 : index
    %30 = vector.load %arg12[%c0, %c0_8] : memref<320x4xbf16, #tpu.memory_space<vmem>>, vector<32x4xbf16>
    tpu.vector_store %arg12[%c0, %c0_8], %29 {strides = array<i32>} : memref<320x4xbf16, #tpu.memory_space<vmem>>, vector<32x4xbf16>,
    %c288 = arith.constant 288 : index
    %c0_9 = arith.constant 0 : index
    %31 = vector.load %arg12[%c288, %c0_9] : memref<320x4xbf16, #tpu.memory_space<vmem>>, vector<32x4xbf16>
    tpu.vector_store %arg12[%c288, %c0_9], %29 {strides = array<i32>} : memref<320x4xbf16, #tpu.memory_space<vmem>>, vector<32x4xbf16>,
    %c0_10 = arith.constant 0 : index
    %c0_11 = arith.constant 0 : index
    %c0_12 = arith.constant 0 : index
    %32 = vector.load %arg1[%c0_10, %c0_11, %c0_12] : memref<1x256x4xbf16, #tpu.memory_space<vmem>>, vector<1x256x4xbf16>
    %33 = vector.shape_cast %32 : vector<1x256x4xbf16> to vector<256x4xbf16>
    %c32 = arith.constant 32 : index
    %c0_13 = arith.constant 0 : index
    %34 = vector.load %arg12[%c32, %c0_13] : memref<320x4xbf16, #tpu.memory_space<vmem>>, vector<256x4xbf16>
    tpu.vector_store %arg12[%c32, %c0_13], %33 {strides = array<i32>} : memref<320x4xbf16, #tpu.memory_space<vmem>>, vector<256x4xbf16>,
    %cst_14 = arith.constant 0.000000e+00 : f32
    %35 = vector.broadcast %cst_14 : f32 to vector<256x8xf32>
    %c15 = arith.constant 15 : index
    %c0_15 = arith.constant 0 : index
    %36 = vector.load %arg12[%c15, %c0_15] : memref<320x4xbf16, #tpu.memory_space<vmem>>, vector<256x4xbf16>
    %37 = vector.broadcast %22 : vector<256x1xbf16> to vector<256x4xbf16>
    %38 = arith.mulf %36, %37 : vector<256x4xbf16>
    %c0_16 = arith.constant 0 : index
    %c0_17 = arith.constant 0 : index
    %c0_18 = arith.constant 0 : index
    %c0_19 = arith.constant 0 : index
    %39 = vector.load %arg2[%c0_16, %c0_17, %c0_18, %c0_19] : memref<3x3x4x8xbf16, #tpu.memory_space<vmem>>, vector<1x1x4x8xbf16>
    %40 = vector.shape_cast %39 : vector<1x1x4x8xbf16> to vector<4x8xbf16>
    %cst_20 = arith.constant dense<0.000000e+00> : vector<256x8xf32>
    %41 = tpu.matmul %38, %40, %cst_20 {dimension_numbers = #tpu.dot_dimension_numbers<[1], [0], [0], [1], [0, 0, 1, 1], [], []>} : vector<256x4xbf16>, vector<4x8xbf16>, vector<256x8xf32> -> vector<256x8xf32>
    %42 = arith.addf %35, %41 : vector<256x8xf32>
    %c16 = arith.constant 16 : index
    %c0_21 = arith.constant 0 : index
    %43 = vector.load %arg12[%c16, %c0_21] : memref<320x4xbf16, #tpu.memory_space<vmem>>, vector<256x4xbf16>
    %c0_22 = arith.constant 0 : index
    %c1 = arith.constant 1 : index
    %c0_23 = arith.constant 0 : index
    %c0_24 = arith.constant 0 : index
    %44 = vector.load %arg2[%c0_22, %c1, %c0_23, %c0_24] : memref<3x3x4x8xbf16, #tpu.memory_space<vmem>>, vector<1x1x4x8xbf16>
    %45 = vector.shape_cast %44 : vector<1x1x4x8xbf16> to vector<4x8xbf16>
    %cst_25 = arith.constant dense<0.000000e+00> : vector<256x8xf32>
    %46 = tpu.matmul %43, %45, %cst_25 {dimension_numbers = #tpu.dot_dimension_numbers<[1], [0], [0], [1], [0, 0, 1, 1], [], []>} : vector<256x4xbf16>, vector<4x8xbf16>, vector<256x8xf32> -> vector<256x8xf32>
    %47 = arith.addf %42, %46 : vector<256x8xf32>
    %c17 = arith.constant 17 : index
    %c0_26 = arith.constant 0 : index
    %48 = vector.load %arg12[%c17, %c0_26] : memref<320x4xbf16, #tpu.memory_space<vmem>>, vector<256x4xbf16>
    %49 = vector.broadcast %28 : vector<256x1xbf16> to vector<256x4xbf16>
    %50 = arith.mulf %48, %49 : vector<256x4xbf16>
    %c0_27 = arith.constant 0 : index
    %c2 = arith.constant 2 : index
    %c0_28 = arith.constant 0 : index
    %c0_29 = arith.constant 0 : index
    %51 = vector.load %arg2[%c0_27, %c2, %c0_28, %c0_29] : memref<3x3x4x8xbf16, #tpu.memory_space<vmem>>, vector<1x1x4x8xbf16>
    %52 = vector.shape_cast %51 : vector<1x1x4x8xbf16> to vector<4x8xbf16>
    %cst_30 = arith.constant dense<0.000000e+00> : vector<256x8xf32>
    %53 = tpu.matmul %50, %52, %cst_30 {dimension_numbers = #tpu.dot_dimension_numbers<[1], [0], [0], [1], [0, 0, 1, 1], [], []>} : vector<256x4xbf16>, vector<4x8xbf16>, vector<256x8xf32> -> vector<256x8xf32>
    %54 = arith.addf %47, %53 : vector<256x8xf32>
    %c31 = arith.constant 31 : index
    %c0_31 = arith.constant 0 : index
    %55 = vector.load %arg12[%c31, %c0_31] : memref<320x4xbf16, #tpu.memory_space<vmem>>, vector<256x4xbf16>
    %56 = vector.broadcast %22 : vector<256x1xbf16> to vector<256x4xbf16>
    %57 = arith.mulf %55, %56 : vector<256x4xbf16>
    %c1_32 = arith.constant 1 : index
    %c0_33 = arith.constant 0 : index
    %c0_34 = arith.constant 0 : index
    %c0_35 = arith.constant 0 : index
    %58 = vector.load %arg2[%c1_32, %c0_33, %c0_34, %c0_35] : memref<3x3x4x8xbf16, #tpu.memory_space<vmem>>, vector<1x1x4x8xbf16>
    %59 = vector.shape_cast %58 : vector<1x1x4x8xbf16> to vector<4x8xbf16>
    %cst_36 = arith.constant dense<0.000000e+00> : vector<256x8xf32>
    %60 = tpu.matmul %57, %59, %cst_36 {dimension_numbers = #tpu.dot_dimension_numbers<[1], [0], [0], [1], [0, 0, 1, 1], [], []>} : vector<256x4xbf16>, vector<4x8xbf16>, vector<256x8xf32> -> vector<256x8xf32>
    %61 = arith.addf %54, %60 : vector<256x8xf32>
    %c32_37 = arith.constant 32 : index
    %c0_38 = arith.constant 0 : index
    %62 = vector.load %arg12[%c32_37, %c0_38] : memref<320x4xbf16, #tpu.memory_space<vmem>>, vector<256x4xbf16>
    %c1_39 = arith.constant 1 : index
    %c1_40 = arith.constant 1 : index
    %c0_41 = arith.constant 0 : index
    %c0_42 = arith.constant 0 : index
    %63 = vector.load %arg2[%c1_39, %c1_40, %c0_41, %c0_42] : memref<3x3x4x8xbf16, #tpu.memory_space<vmem>>, vector<1x1x4x8xbf16>
    %64 = vector.shape_cast %63 : vector<1x1x4x8xbf16> to vector<4x8xbf16>
    %cst_43 = arith.constant dense<0.000000e+00> : vector<256x8xf32>
    %65 = tpu.matmul %62, %64, %cst_43 {dimension_numbers = #tpu.dot_dimension_numbers<[1], [0], [0], [1], [0, 0, 1, 1], [], []>} : vector<256x4xbf16>, vector<4x8xbf16>, vector<256x8xf32> -> vector<256x8xf32>
    %66 = arith.addf %61, %65 : vector<256x8xf32>
    %c33 = arith.constant 33 : index
    %c0_44 = arith.constant 0 : index
    %67 = vector.load %arg12[%c33, %c0_44] : memref<320x4xbf16, #tpu.memory_space<vmem>>, vector<256x4xbf16>
    %68 = vector.broadcast %28 : vector<256x1xbf16> to vector<256x4xbf16>
    %69 = arith.mulf %67, %68 : vector<256x4xbf16>
    %c1_45 = arith.constant 1 : index
    %c2_46 = arith.constant 2 : index
    %c0_47 = arith.constant 0 : index
    %c0_48 = arith.constant 0 : index
    %70 = vector.load %arg2[%c1_45, %c2_46, %c0_47, %c0_48] : memref<3x3x4x8xbf16, #tpu.memory_space<vmem>>, vector<1x1x4x8xbf16>
    %71 = vector.shape_cast %70 : vector<1x1x4x8xbf16> to vector<4x8xbf16>
    %cst_49 = arith.constant dense<0.000000e+00> : vector<256x8xf32>
    %72 = tpu.matmul %69, %71, %cst_49 {dimension_numbers = #tpu.dot_dimension_numbers<[1], [0], [0], [1], [0, 0, 1, 1], [], []>} : vector<256x4xbf16>, vector<4x8xbf16>, vector<256x8xf32> -> vector<256x8xf32>
    %73 = arith.addf %66, %72 : vector<256x8xf32>
    %c47 = arith.constant 47 : index
    %c0_50 = arith.constant 0 : index
    %74 = vector.load %arg12[%c47, %c0_50] : memref<320x4xbf16, #tpu.memory_space<vmem>>, vector<256x4xbf16>
    %75 = vector.broadcast %22 : vector<256x1xbf16> to vector<256x4xbf16>
    %76 = arith.mulf %74, %75 : vector<256x4xbf16>
    %c2_51 = arith.constant 2 : index
    %c0_52 = arith.constant 0 : index
    %c0_53 = arith.constant 0 : index
    %c0_54 = arith.constant 0 : index
    %77 = vector.load %arg2[%c2_51, %c0_52, %c0_53, %c0_54] : memref<3x3x4x8xbf16, #tpu.memory_space<vmem>>, vector<1x1x4x8xbf16>
    %78 = vector.shape_cast %77 : vector<1x1x4x8xbf16> to vector<4x8xbf16>
    %cst_55 = arith.constant dense<0.000000e+00> : vector<256x8xf32>
    %79 = tpu.matmul %76, %78, %cst_55 {dimension_numbers = #tpu.dot_dimension_numbers<[1], [0], [0], [1], [0, 0, 1, 1], [], []>} : vector<256x4xbf16>, vector<4x8xbf16>, vector<256x8xf32> -> vector<256x8xf32>
    %80 = arith.addf %73, %79 : vector<256x8xf32>
    %c48 = arith.constant 48 : index
    %c0_56 = arith.constant 0 : index
    %81 = vector.load %arg12[%c48, %c0_56] : memref<320x4xbf16, #tpu.memory_space<vmem>>, vector<256x4xbf16>
    %c2_57 = arith.constant 2 : index
    %c1_58 = arith.constant 1 : index
    %c0_59 = arith.constant 0 : index
    %c0_60 = arith.constant 0 : index
    %82 = vector.load %arg2[%c2_57, %c1_58, %c0_59, %c0_60] : memref<3x3x4x8xbf16, #tpu.memory_space<vmem>>, vector<1x1x4x8xbf16>
    %83 = vector.shape_cast %82 : vector<1x1x4x8xbf16> to vector<4x8xbf16>
    %cst_61 = arith.constant dense<0.000000e+00> : vector<256x8xf32>
    %84 = tpu.matmul %81, %83, %cst_61 {dimension_numbers = #tpu.dot_dimension_numbers<[1], [0], [0], [1], [0, 0, 1, 1], [], []>} : vector<256x4xbf16>, vector<4x8xbf16>, vector<256x8xf32> -> vector<256x8xf32>
    %85 = arith.addf %80, %84 : vector<256x8xf32>
    %c49 = arith.constant 49 : index
    %c0_62 = arith.constant 0 : index
    %86 = vector.load %arg12[%c49, %c0_62] : memref<320x4xbf16, #tpu.memory_space<vmem>>, vector<256x4xbf16>
    %87 = vector.broadcast %28 : vector<256x1xbf16> to vector<256x4xbf16>
    %88 = arith.mulf %86, %87 : vector<256x4xbf16>
    %c2_63 = arith.constant 2 : index
    %c2_64 = arith.constant 2 : index
    %c0_65 = arith.constant 0 : index
    %c0_66 = arith.constant 0 : index
    %89 = vector.load %arg2[%c2_63, %c2_64, %c0_65, %c0_66] : memref<3x3x4x8xbf16, #tpu.memory_space<vmem>>, vector<1x1x4x8xbf16>
    %90 = vector.shape_cast %89 : vector<1x1x4x8xbf16> to vector<4x8xbf16>
    %cst_67 = arith.constant dense<0.000000e+00> : vector<256x8xf32>
    %91 = tpu.matmul %88, %90, %cst_67 {dimension_numbers = #tpu.dot_dimension_numbers<[1], [0], [0], [1], [0, 0, 1, 1], [], []>} : vector<256x4xbf16>, vector<4x8xbf16>, vector<256x8xf32> -> vector<256x8xf32>
    %92 = arith.addf %85, %91 : vector<256x8xf32>
    %c0_68 = arith.constant 0 : index
    %c0_69 = arith.constant 0 : index
    %93 = vector.load %arg3[%c0_68, %c0_69] : memref<1x8xf32, #tpu.memory_space<vmem>>, vector<1x8xf32>
    %94 = vector.broadcast %93 : vector<1x8xf32> to vector<256x8xf32>
    %95 = arith.mulf %92, %94 : vector<256x8xf32>
    %c0_70 = arith.constant 0 : index
    %c0_71 = arith.constant 0 : index
    %96 = vector.load %arg4[%c0_70, %c0_71] : memref<1x8xf32, #tpu.memory_space<vmem>>, vector<1x8xf32>
    %97 = vector.broadcast %96 : vector<1x8xf32> to vector<256x8xf32>
    %98 = arith.addf %95, %97 : vector<256x8xf32>
    %cst_72 = arith.constant 0.000000e+00 : f32
    %99 = vector.broadcast %cst_72 : f32 to vector<256x8xf32>
    %100 = arith.maximumf %98, %99 : vector<256x8xf32>
    %cst_73 = arith.constant 0.000000e+00 : bf16
    %101 = vector.broadcast %cst_73 : bf16 to vector<32x8xbf16>
    %c0_74 = arith.constant 0 : index
    %c0_75 = arith.constant 0 : index
    %102 = vector.load %arg13[%c0_74, %c0_75] : memref<320x8xbf16, #tpu.memory_space<vmem>>, vector<32x8xbf16>
    tpu.vector_store %arg13[%c0_74, %c0_75], %101 {strides = array<i32>} : memref<320x8xbf16, #tpu.memory_space<vmem>>, vector<32x8xbf16>,
    %c288_76 = arith.constant 288 : index
    %c0_77 = arith.constant 0 : index
    %103 = vector.load %arg13[%c288_76, %c0_77] : memref<320x8xbf16, #tpu.memory_space<vmem>>, vector<32x8xbf16>
    tpu.vector_store %arg13[%c288_76, %c0_77], %101 {strides = array<i32>} : memref<320x8xbf16, #tpu.memory_space<vmem>>, vector<32x8xbf16>,
    %104 = arith.truncf %100 : vector<256x8xf32> to vector<256x8xbf16>
    %c32_78 = arith.constant 32 : index
    %c0_79 = arith.constant 0 : index
    %105 = vector.load %arg13[%c32_78, %c0_79] : memref<320x8xbf16, #tpu.memory_space<vmem>>, vector<256x8xbf16>
    tpu.vector_store %arg13[%c32_78, %c0_79], %104 {strides = array<i32>} : memref<320x8xbf16, #tpu.memory_space<vmem>>, vector<256x8xbf16>,
    %cst_80 = arith.constant 0.000000e+00 : f32
    %106 = vector.broadcast %cst_80 : f32 to vector<256x8xf32>
    %c15_81 = arith.constant 15 : index
    %c0_82 = arith.constant 0 : index
    %107 = vector.load %arg13[%c15_81, %c0_82] : memref<320x8xbf16, #tpu.memory_space<vmem>>, vector<256x8xbf16>
    %108 = vector.broadcast %22 : vector<256x1xbf16> to vector<256x8xbf16>
    %109 = arith.mulf %107, %108 : vector<256x8xbf16>
    %c0_83 = arith.constant 0 : index
    %c0_84 = arith.constant 0 : index
    %c0_85 = arith.constant 0 : index
    %c0_86 = arith.constant 0 : index
    %110 = vector.load %arg5[%c0_83, %c0_84, %c0_85, %c0_86] : memref<3x3x8x8xbf16, #tpu.memory_space<vmem>>, vector<1x1x8x8xbf16>
    %111 = vector.shape_cast %110 : vector<1x1x8x8xbf16> to vector<8x8xbf16>
    %cst_87 = arith.constant dense<0.000000e+00> : vector<256x8xf32>
    %112 = tpu.matmul %109, %111, %cst_87 {dimension_numbers = #tpu.dot_dimension_numbers<[1], [0], [0], [1], [0, 0, 1, 1], [], []>} : vector<256x8xbf16>, vector<8x8xbf16>, vector<256x8xf32> -> vector<256x8xf32>
    %113 = arith.addf %106, %112 : vector<256x8xf32>
    %c16_88 = arith.constant 16 : index
    %c0_89 = arith.constant 0 : index
    %114 = vector.load %arg13[%c16_88, %c0_89] : memref<320x8xbf16, #tpu.memory_space<vmem>>, vector<256x8xbf16>
    %c0_90 = arith.constant 0 : index
    %c1_91 = arith.constant 1 : index
    %c0_92 = arith.constant 0 : index
    %c0_93 = arith.constant 0 : index
    %115 = vector.load %arg5[%c0_90, %c1_91, %c0_92, %c0_93] : memref<3x3x8x8xbf16, #tpu.memory_space<vmem>>, vector<1x1x8x8xbf16>
    %116 = vector.shape_cast %115 : vector<1x1x8x8xbf16> to vector<8x8xbf16>
    %cst_94 = arith.constant dense<0.000000e+00> : vector<256x8xf32>
    %117 = tpu.matmul %114, %116, %cst_94 {dimension_numbers = #tpu.dot_dimension_numbers<[1], [0], [0], [1], [0, 0, 1, 1], [], []>} : vector<256x8xbf16>, vector<8x8xbf16>, vector<256x8xf32> -> vector<256x8xf32>
    %118 = arith.addf %113, %117 : vector<256x8xf32>
    %c17_95 = arith.constant 17 : index
    %c0_96 = arith.constant 0 : index
    %119 = vector.load %arg13[%c17_95, %c0_96] : memref<320x8xbf16, #tpu.memory_space<vmem>>, vector<256x8xbf16>
    %120 = vector.broadcast %28 : vector<256x1xbf16> to vector<256x8xbf16>
    %121 = arith.mulf %119, %120 : vector<256x8xbf16>
    %c0_97 = arith.constant 0 : index
    %c2_98 = arith.constant 2 : index
    %c0_99 = arith.constant 0 : index
    %c0_100 = arith.constant 0 : index
    %122 = vector.load %arg5[%c0_97, %c2_98, %c0_99, %c0_100] : memref<3x3x8x8xbf16, #tpu.memory_space<vmem>>, vector<1x1x8x8xbf16>
    %123 = vector.shape_cast %122 : vector<1x1x8x8xbf16> to vector<8x8xbf16>
    %cst_101 = arith.constant dense<0.000000e+00> : vector<256x8xf32>
    %124 = tpu.matmul %121, %123, %cst_101 {dimension_numbers = #tpu.dot_dimension_numbers<[1], [0], [0], [1], [0, 0, 1, 1], [], []>} : vector<256x8xbf16>, vector<8x8xbf16>, vector<256x8xf32> -> vector<256x8xf32>
    %125 = arith.addf %118, %124 : vector<256x8xf32>
    %c31_102 = arith.constant 31 : index
    %c0_103 = arith.constant 0 : index
    %126 = vector.load %arg13[%c31_102, %c0_103] : memref<320x8xbf16, #tpu.memory_space<vmem>>, vector<256x8xbf16>
    %127 = vector.broadcast %22 : vector<256x1xbf16> to vector<256x8xbf16>
    %128 = arith.mulf %126, %127 : vector<256x8xbf16>
    %c1_104 = arith.constant 1 : index
    %c0_105 = arith.constant 0 : index
    %c0_106 = arith.constant 0 : index
    %c0_107 = arith.constant 0 : index
    %129 = vector.load %arg5[%c1_104, %c0_105, %c0_106, %c0_107] : memref<3x3x8x8xbf16, #tpu.memory_space<vmem>>, vector<1x1x8x8xbf16>
    %130 = vector.shape_cast %129 : vector<1x1x8x8xbf16> to vector<8x8xbf16>
    %cst_108 = arith.constant dense<0.000000e+00> : vector<256x8xf32>
    %131 = tpu.matmul %128, %130, %cst_108 {dimension_numbers = #tpu.dot_dimension_numbers<[1], [0], [0], [1], [0, 0, 1, 1], [], []>} : vector<256x8xbf16>, vector<8x8xbf16>, vector<256x8xf32> -> vector<256x8xf32>
    %132 = arith.addf %125, %131 : vector<256x8xf32>
    %c32_109 = arith.constant 32 : index
    %c0_110 = arith.constant 0 : index
    %133 = vector.load %arg13[%c32_109, %c0_110] : memref<320x8xbf16, #tpu.memory_space<vmem>>, vector<256x8xbf16>
    %c1_111 = arith.constant 1 : index
    %c1_112 = arith.constant 1 : index
    %c0_113 = arith.constant 0 : index
    %c0_114 = arith.constant 0 : index
    %134 = vector.load %arg5[%c1_111, %c1_112, %c0_113, %c0_114] : memref<3x3x8x8xbf16, #tpu.memory_space<vmem>>, vector<1x1x8x8xbf16>
    %135 = vector.shape_cast %134 : vector<1x1x8x8xbf16> to vector<8x8xbf16>
    %cst_115 = arith.constant dense<0.000000e+00> : vector<256x8xf32>
    %136 = tpu.matmul %133, %135, %cst_115 {dimension_numbers = #tpu.dot_dimension_numbers<[1], [0], [0], [1], [0, 0, 1, 1], [], []>} : vector<256x8xbf16>, vector<8x8xbf16>, vector<256x8xf32> -> vector<256x8xf32>
    %137 = arith.addf %132, %136 : vector<256x8xf32>
    %c33_116 = arith.constant 33 : index
    %c0_117 = arith.constant 0 : index
    %138 = vector.load %arg13[%c33_116, %c0_117] : memref<320x8xbf16, #tpu.memory_space<vmem>>, vector<256x8xbf16>
    %139 = vector.broadcast %28 : vector<256x1xbf16> to vector<256x8xbf16>
    %140 = arith.mulf %138, %139 : vector<256x8xbf16>
    %c1_118 = arith.constant 1 : index
    %c2_119 = arith.constant 2 : index
    %c0_120 = arith.constant 0 : index
    %c0_121 = arith.constant 0 : index
    %141 = vector.load %arg5[%c1_118, %c2_119, %c0_120, %c0_121] : memref<3x3x8x8xbf16, #tpu.memory_space<vmem>>, vector<1x1x8x8xbf16>
    %142 = vector.shape_cast %141 : vector<1x1x8x8xbf16> to vector<8x8xbf16>
    %cst_122 = arith.constant dense<0.000000e+00> : vector<256x8xf32>
    %143 = tpu.matmul %140, %142, %cst_122 {dimension_numbers = #tpu.dot_dimension_numbers<[1], [0], [0], [1], [0, 0, 1, 1], [], []>} : vector<256x8xbf16>, vector<8x8xbf16>, vector<256x8xf32> -> vector<256x8xf32>
    %144 = arith.addf %137, %143 : vector<256x8xf32>
    %c47_123 = arith.constant 47 : index
    %c0_124 = arith.constant 0 : index
    %145 = vector.load %arg13[%c47_123, %c0_124] : memref<320x8xbf16, #tpu.memory_space<vmem>>, vector<256x8xbf16>
    %146 = vector.broadcast %22 : vector<256x1xbf16> to vector<256x8xbf16>
    %147 = arith.mulf %145, %146 : vector<256x8xbf16>
    %c2_125 = arith.constant 2 : index
    %c0_126 = arith.constant 0 : index
    %c0_127 = arith.constant 0 : index
    %c0_128 = arith.constant 0 : index
    %148 = vector.load %arg5[%c2_125, %c0_126, %c0_127, %c0_128] : memref<3x3x8x8xbf16, #tpu.memory_space<vmem>>, vector<1x1x8x8xbf16>
    %149 = vector.shape_cast %148 : vector<1x1x8x8xbf16> to vector<8x8xbf16>
    %cst_129 = arith.constant dense<0.000000e+00> : vector<256x8xf32>
    %150 = tpu.matmul %147, %149, %cst_129 {dimension_numbers = #tpu.dot_dimension_numbers<[1], [0], [0], [1], [0, 0, 1, 1], [], []>} : vector<256x8xbf16>, vector<8x8xbf16>, vector<256x8xf32> -> vector<256x8xf32>
    %151 = arith.addf %144, %150 : vector<256x8xf32>
    %c48_130 = arith.constant 48 : index
    %c0_131 = arith.constant 0 : index
    %152 = vector.load %arg13[%c48_130, %c0_131] : memref<320x8xbf16, #tpu.memory_space<vmem>>, vector<256x8xbf16>
    %c2_132 = arith.constant 2 : index
    %c1_133 = arith.constant 1 : index
    %c0_134 = arith.constant 0 : index
    %c0_135 = arith.constant 0 : index
    %153 = vector.load %arg5[%c2_132, %c1_133, %c0_134, %c0_135] : memref<3x3x8x8xbf16, #tpu.memory_space<vmem>>, vector<1x1x8x8xbf16>
    %154 = vector.shape_cast %153 : vector<1x1x8x8xbf16> to vector<8x8xbf16>
    %cst_136 = arith.constant dense<0.000000e+00> : vector<256x8xf32>
    %155 = tpu.matmul %152, %154, %cst_136 {dimension_numbers = #tpu.dot_dimension_numbers<[1], [0], [0], [1], [0, 0, 1, 1], [], []>} : vector<256x8xbf16>, vector<8x8xbf16>, vector<256x8xf32> -> vector<256x8xf32>
    %156 = arith.addf %151, %155 : vector<256x8xf32>
    %c49_137 = arith.constant 49 : index
    %c0_138 = arith.constant 0 : index
    %157 = vector.load %arg13[%c49_137, %c0_138] : memref<320x8xbf16, #tpu.memory_space<vmem>>, vector<256x8xbf16>
    %158 = vector.broadcast %28 : vector<256x1xbf16> to vector<256x8xbf16>
    %159 = arith.mulf %157, %158 : vector<256x8xbf16>
    %c2_139 = arith.constant 2 : index
    %c2_140 = arith.constant 2 : index
    %c0_141 = arith.constant 0 : index
    %c0_142 = arith.constant 0 : index
    %160 = vector.load %arg5[%c2_139, %c2_140, %c0_141, %c0_142] : memref<3x3x8x8xbf16, #tpu.memory_space<vmem>>, vector<1x1x8x8xbf16>
    %161 = vector.shape_cast %160 : vector<1x1x8x8xbf16> to vector<8x8xbf16>
    %cst_143 = arith.constant dense<0.000000e+00> : vector<256x8xf32>
    %162 = tpu.matmul %159, %161, %cst_143 {dimension_numbers = #tpu.dot_dimension_numbers<[1], [0], [0], [1], [0, 0, 1, 1], [], []>} : vector<256x8xbf16>, vector<8x8xbf16>, vector<256x8xf32> -> vector<256x8xf32>
    %163 = arith.addf %156, %162 : vector<256x8xf32>
    %c0_144 = arith.constant 0 : index
    %c0_145 = arith.constant 0 : index
    %164 = vector.load %arg6[%c0_144, %c0_145] : memref<1x8xf32, #tpu.memory_space<vmem>>, vector<1x8xf32>
    %165 = vector.broadcast %164 : vector<1x8xf32> to vector<256x8xf32>
    %166 = arith.mulf %163, %165 : vector<256x8xf32>
    %c0_146 = arith.constant 0 : index
    %c0_147 = arith.constant 0 : index
    %167 = vector.load %arg7[%c0_146, %c0_147] : memref<1x8xf32, #tpu.memory_space<vmem>>, vector<1x8xf32>
    %168 = vector.broadcast %167 : vector<1x8xf32> to vector<256x8xf32>
    %169 = arith.addf %166, %168 : vector<256x8xf32>
    %cst_148 = arith.constant 0.000000e+00 : f32
    %170 = vector.broadcast %cst_148 : f32 to vector<256x8xf32>
    %171 = arith.maximumf %169, %170 : vector<256x8xf32>
    %cst_149 = arith.constant 0.000000e+00 : bf16
    %172 = vector.broadcast %cst_149 : bf16 to vector<32x8xbf16>
    %c288_150 = arith.constant 288 : index
    %c0_151 = arith.constant 0 : index
    %173 = vector.load %arg14[%c288_150, %c0_151] : memref<320x8xbf16, #tpu.memory_space<vmem>>, vector<32x8xbf16>
    tpu.vector_store %arg14[%c288_150, %c0_151], %172 {strides = array<i32>} : memref<320x8xbf16, #tpu.memory_space<vmem>>, vector<32x8xbf16>,
    %174 = arith.truncf %171 : vector<256x8xf32> to vector<256x8xbf16>
    %c32_152 = arith.constant 32 : index
    %c0_153 = arith.constant 0 : index
    %175 = vector.load %arg14[%c32_152, %c0_153] : memref<320x8xbf16, #tpu.memory_space<vmem>>, vector<256x8xbf16>
    tpu.vector_store %arg14[%c32_152, %c0_153], %174 {strides = array<i32>} : memref<320x8xbf16, #tpu.memory_space<vmem>>, vector<256x8xbf16>,
    %c33_154 = arith.constant 33 : index
    %c0_155 = arith.constant 0 : index
    %176 = vector.load %arg14[%c33_154, %c0_155] : memref<320x8xbf16, #tpu.memory_space<vmem>>, vector<256x8xbf16>
    %177 = vector.broadcast %28 : vector<256x1xbf16> to vector<256x8xbf16>
    %178 = arith.mulf %176, %177 : vector<256x8xbf16>
    %c48_156 = arith.constant 48 : index
    %c0_157 = arith.constant 0 : index
    %179 = vector.load %arg14[%c48_156, %c0_157] : memref<320x8xbf16, #tpu.memory_space<vmem>>, vector<256x8xbf16>
    %c49_158 = arith.constant 49 : index
    %c0_159 = arith.constant 0 : index
    %180 = vector.load %arg14[%c49_158, %c0_159] : memref<320x8xbf16, #tpu.memory_space<vmem>>, vector<256x8xbf16>
    %181 = vector.broadcast %28 : vector<256x1xbf16> to vector<256x8xbf16>
    %182 = arith.mulf %180, %181 : vector<256x8xbf16>
    %c0_160 = arith.constant 0 : index
    %c0_161 = arith.constant 0 : index
    %c0_162 = arith.constant 0 : index
    %183 = vector.load %arg8[%c0_160, %c0_161, %c0_162] : memref<4x8x16xbf16, #tpu.memory_space<vmem>>, vector<1x8x16xbf16>
    %184 = vector.shape_cast %183 : vector<1x8x16xbf16> to vector<8x16xbf16>
    %cst_163 = arith.constant dense<0.000000e+00> : vector<256x16xf32>
    %185 = tpu.matmul %174, %184, %cst_163 {dimension_numbers = #tpu.dot_dimension_numbers<[1], [0], [0], [1], [0, 0, 1, 1], [], []>} : vector<256x8xbf16>, vector<8x16xbf16>, vector<256x16xf32> -> vector<256x16xf32>
    %c1_164 = arith.constant 1 : index
    %c0_165 = arith.constant 0 : index
    %c0_166 = arith.constant 0 : index
    %186 = vector.load %arg8[%c1_164, %c0_165, %c0_166] : memref<4x8x16xbf16, #tpu.memory_space<vmem>>, vector<1x8x16xbf16>
    %187 = vector.shape_cast %186 : vector<1x8x16xbf16> to vector<8x16xbf16>
    %cst_167 = arith.constant dense<0.000000e+00> : vector<256x16xf32>
    %188 = tpu.matmul %178, %187, %cst_167 {dimension_numbers = #tpu.dot_dimension_numbers<[1], [0], [0], [1], [0, 0, 1, 1], [], []>} : vector<256x8xbf16>, vector<8x16xbf16>, vector<256x16xf32> -> vector<256x16xf32>
    %189 = arith.addf %185, %188 : vector<256x16xf32>
    %c2_168 = arith.constant 2 : index
    %c0_169 = arith.constant 0 : index
    %c0_170 = arith.constant 0 : index
    %190 = vector.load %arg8[%c2_168, %c0_169, %c0_170] : memref<4x8x16xbf16, #tpu.memory_space<vmem>>, vector<1x8x16xbf16>
    %191 = vector.shape_cast %190 : vector<1x8x16xbf16> to vector<8x16xbf16>
    %cst_171 = arith.constant dense<0.000000e+00> : vector<256x16xf32>
    %192 = tpu.matmul %179, %191, %cst_171 {dimension_numbers = #tpu.dot_dimension_numbers<[1], [0], [0], [1], [0, 0, 1, 1], [], []>} : vector<256x8xbf16>, vector<8x16xbf16>, vector<256x16xf32> -> vector<256x16xf32>
    %193 = arith.addf %189, %192 : vector<256x16xf32>
    %c3 = arith.constant 3 : index
    %c0_172 = arith.constant 0 : index
    %c0_173 = arith.constant 0 : index
    %194 = vector.load %arg8[%c3, %c0_172, %c0_173] : memref<4x8x16xbf16, #tpu.memory_space<vmem>>, vector<1x8x16xbf16>
    %195 = vector.shape_cast %194 : vector<1x8x16xbf16> to vector<8x16xbf16>
    %cst_174 = arith.constant dense<0.000000e+00> : vector<256x16xf32>
    %196 = tpu.matmul %182, %195, %cst_174 {dimension_numbers = #tpu.dot_dimension_numbers<[1], [0], [0], [1], [0, 0, 1, 1], [], []>} : vector<256x8xbf16>, vector<8x16xbf16>, vector<256x16xf32> -> vector<256x16xf32>
    %197 = arith.addf %193, %196 : vector<256x16xf32>
    %c0_175 = arith.constant 0 : index
    %c0_176 = arith.constant 0 : index
    %198 = vector.load %arg9[%c0_175, %c0_176] : memref<1x16xf32, #tpu.memory_space<vmem>>, vector<1x16xf32>
    %199 = vector.broadcast %198 : vector<1x16xf32> to vector<256x16xf32>
    %200 = arith.mulf %197, %199 : vector<256x16xf32>
    %c0_177 = arith.constant 0 : index
    %c0_178 = arith.constant 0 : index
    %201 = vector.load %arg10[%c0_177, %c0_178] : memref<1x16xf32, #tpu.memory_space<vmem>>, vector<1x16xf32>
    %202 = vector.broadcast %201 : vector<1x16xf32> to vector<256x16xf32>
    %203 = arith.addf %200, %202 : vector<256x16xf32>
    %cst_179 = arith.constant 0.000000e+00 : f32
    %204 = vector.broadcast %cst_179 : f32 to vector<256x16xf32>
    %205 = arith.maximumf %203, %204 : vector<256x16xf32>
    %c0_180 = arith.constant 0 : index
    %c0_181 = arith.constant 0 : index
    %c0_182 = arith.constant 0 : index
    %206 = vector.load %arg11[%c0_180, %c0_181, %c0_182] : memref<1x256x16xf32, #tpu.memory_space<vmem>>, vector<1x256x16xf32>
    %207 = vector.shape_cast %206 : vector<1x256x16xf32> to vector<256x16xf32>
    %208 = vector.shape_cast %205 : vector<256x16xf32> to vector<1x256x16xf32>
    tpu.vector_store %arg11[%c0_180, %c0_181, %c0_182], %208 {strides = array<i32>} : memref<1x256x16xf32, #tpu.memory_space<vmem>>, vector<1x256x16xf32>,
    return
  }
  func.func @transform_0(%arg0: i32) -> (i32, i32, i32) {
    %c0_i32 = arith.constant 0 : i32
    %c0_i32_0 = arith.constant 0 : i32
    %c0_i32_1 = arith.constant 0 : i32
    return %arg0, %c0_i32, %c0_i32_0 : i32, i32, i32
  }
  func.func @transform_1(%arg0: i32) -> (i32, i32, i32, i32) {
    %c0_i32 = arith.constant 0 : i32
    %c0_i32_0 = arith.constant 0 : i32
    %c0_i32_1 = arith.constant 0 : i32
    %c0_i32_2 = arith.constant 0 : i32
    %c0_i32_3 = arith.constant 0 : i32
    return %c0_i32, %c0_i32_0, %c0_i32_1, %c0_i32_2 : i32, i32, i32, i32
  }
  func.func @transform_2(%arg0: i32) -> (i32, i32) {
    %c0_i32 = arith.constant 0 : i32
    %c0_i32_0 = arith.constant 0 : i32
    %c0_i32_1 = arith.constant 0 : i32
    return %c0_i32, %c0_i32_0 : i32, i32
  }
  func.func @transform_3(%arg0: i32) -> (i32, i32) {
    %c0_i32 = arith.constant 0 : i32
    %c0_i32_0 = arith.constant 0 : i32
    %c0_i32_1 = arith.constant 0 : i32
    return %c0_i32, %c0_i32_0 : i32, i32
  }
  func.func @transform_4(%arg0: i32) -> (i32, i32, i32, i32) {
    %c0_i32 = arith.constant 0 : i32
    %c0_i32_0 = arith.constant 0 : i32
    %c0_i32_1 = arith.constant 0 : i32
    %c0_i32_2 = arith.constant 0 : i32
    %c0_i32_3 = arith.constant 0 : i32
    return %c0_i32, %c0_i32_0, %c0_i32_1, %c0_i32_2 : i32, i32, i32, i32
  }
  func.func @transform_5(%arg0: i32) -> (i32, i32) {
    %c0_i32 = arith.constant 0 : i32
    %c0_i32_0 = arith.constant 0 : i32
    %c0_i32_1 = arith.constant 0 : i32
    return %c0_i32, %c0_i32_0 : i32, i32
  }
  func.func @transform_6(%arg0: i32) -> (i32, i32) {
    %c0_i32 = arith.constant 0 : i32
    %c0_i32_0 = arith.constant 0 : i32
    %c0_i32_1 = arith.constant 0 : i32
    return %c0_i32, %c0_i32_0 : i32, i32
  }
  func.func @transform_7(%arg0: i32) -> (i32, i32, i32) {
    %c0_i32 = arith.constant 0 : i32
    %c0_i32_0 = arith.constant 0 : i32
    %c0_i32_1 = arith.constant 0 : i32
    %c0_i32_2 = arith.constant 0 : i32
    return %c0_i32, %c0_i32_0, %c0_i32_1 : i32, i32, i32
  }
  func.func @transform_8(%arg0: i32) -> (i32, i32) {
    %c0_i32 = arith.constant 0 : i32
    %c0_i32_0 = arith.constant 0 : i32
    %c0_i32_1 = arith.constant 0 : i32
    return %c0_i32, %c0_i32_0 : i32, i32
  }
  func.func @transform_9(%arg0: i32) -> (i32, i32) {
    %c0_i32 = arith.constant 0 : i32
    %c0_i32_0 = arith.constant 0 : i32
    %c0_i32_1 = arith.constant 0 : i32
    return %c0_i32, %c0_i32_0 : i32, i32
  }
  func.func @transform_10(%arg0: i32) -> (i32, i32, i32) {
    %c0_i32 = arith.constant 0 : i32
    %c0_i32_0 = arith.constant 0 : i32
    %c0_i32_1 = arith.constant 0 : i32
    return %arg0, %c0_i32, %c0_i32_0 : i32, i32, i32
  }
}

</mosaic_0001>

<bundles_post_ra>
// kernel: test_upsample_layer_forward.1
= control target key start
LH: loop header
LB: loop body
LE: loop exit
PB: predicated region body
PF: predicated region fallthrough
CT: control target
= control target key end

     0   :  { %s14912_s13 = smov 0   ;;  %s20174_s0 = inlined_call_operand.vmem [shape: bf16[2,256,4], index: 0, kind: input, shape index: {}]   ;;  %s20175_s1 = inlined_call_operand.vmem [shape: bf16[3,3,4,8], index: 1, kind: input, shape index: {}]   ;;  %s20176_s2 = inlined_call_operand.vmem [shape: f32[1,8], index: 2, kind: input, shape index: {}]   ;;  %s20177_s3 = inlined_call_operand.vmem [shape: f32[1,8], index: 3, kind: input, shape index: {}]   ;;  %s20178_s4 = inlined_call_operand.vmem [shape: bf16[3,3,8,8], index: 4, kind: input, shape index: {}]   ;;  %s20179_s5 = inlined_call_operand.vmem [shape: f32[1,8], index: 5, kind: input, shape index: {}]   ;;  %s20180_s6 = inlined_call_operand.vmem [shape: f32[1,8], index: 6, kind: input, shape index: {}]   ;;  %s20181_s7 = inlined_call_operand.vmem [shape: bf16[4,8,16], index: 7, kind: input, shape index: {}]   ;;  %s20182_s8 = inlined_call_operand.vmem [shape: f32[1,16], index: 8, kind: input, shape index: {}]   ;;  %s20183_s9 = inlined_call_operand.vmem [shape: f32[1,16], index: 9, kind: input, shape index: {}]   ;;  %s20184_s10 = inlined_call_operand.vmem [shape: f32[2,256,16], index: 10, kind: output, shape index: {}]  }
   0x1 LB: > { %s12727_s14 = sadd.s32 4294967295, %s14850_s13   ;;  %p12731_p0 = scmp.ge.s32.totalorder %s14850_s13, 1  ;;  %s14850_s13 = sphi %s14912_s13, %s20_s13  }
   0x2   : > { %p312_p1 = scmp.lt.s32.totalorder %s14850_s13, 3 }
   0x4   : > { %p313_p2 = pnand %p12731_p0, %p312_p1 }
   0x6   : > { %316 = sbr.rel (%p313_p2) target bundleno = 1506 (0x5e2), region = 60 }
   0xb   : > { %v12736_v0 = vld [vmem:[%s20175_s1 + $0x2] sm:$0x3]  ;;  %vm1804_vm0 = vcmask 1041408   ;;  %p350_p3 = scmp.lt.s32.totalorder %s12727_s14, 1  ;;  %v361_v1 = vlaneseq  ;;  %vm938_vm1 = vcmask 27648   ;;  %v14852_v4 = vmov 0  }
   0xc   : > { %14717 = vmatprep.subr.msk.bf16.mxu0 %vm1804_vm0, %v12736_v0  ;;  %v1806_v2 = vsel %vm1804_vm0, %v12736_v0, 0  ;;  %940 = vst.msk [vmem:[#allocation2 + $0x4] sm:$0xf] %vm938_vm1, %v14852_v4  ;;  %941 = vst.msk [vmem:[#allocation2 + $0x8] sm:$0xf] %vm938_vm1, %v14852_v4  ;;  %vm6418_vm2 = vcmask 60416  }
   0xd   : > { %13970 = vmatpush3.bf16.msra.mxu0 %v1806_v2  ;;  %s21319_s14 = smov (!%p350_p3, %s12727_s14), 1  ;;  %v14927_v3 = vshrl.u32 %v361_v1, 7  ;;  %942 = vst.msk [vmem:[#allocation2 + $0xc] sm:$0xf] %vm938_vm1, %v14852_v4  ;;  %v14853_v5 = vmov 839922192  }
   0xe   : > { %v1061_v6 = vunpack.c.l.s4 %v14853_v5  ;;  %943 = vst.msk [vmem:[#allocation2 + $0x90] sm:$0xf] %vm938_vm1, %v14852_v4  ;;  %944 = vst.msk [vmem:[#allocation2 + $0x94] sm:$0xf] %vm938_vm1, %v14852_v4  ;;  %v14854_v7 = vmov 1985246804  }
   0xf   : > { %945 = vst.msk [vmem:[#allocation2 + $0x98] sm:$0xf] %vm938_vm1, %v14852_v4  ;;  %v1068_v8 = vunpack.c.l.s4 %v14854_v7  ;;  %v12802_v9 = vld [vmem:[%s20175_s1 + $0x4] sm:$0x3]  ;;  %s13529_s19 = sshll.u32 %s21319_s14, 7  ;;  %v364_v10 = vadd.s32 16, %v14927_v3 }
  0x10   : > { %v398_v11 = vand.u32 15, %v14927_v3  ;;  %v1062_v12 = vunpack.c.0.s8 %v1061_v6  ;;  %6420 = vst.msk [vmem:[#allocation3 + $0x4] sm:$0xf] %vm6418_vm2, %v14852_v4  ;;  %6421 = vst.msk [vmem:[#allocation3 + $0x8] sm:$0xf] %vm6418_vm2, %v14852_v4  ;;  %14719 = vmatprep.subr.msk.bf16.mxu0 %vm1804_vm0, %v12802_v9  ;;  %v366_v13 = vadd.s32 32, %v14927_v3  ;;  %s14960_s24 = scalar_lea.vmem %s20174_s0, %s13529_s19 }
  0x11   : > { %6422 = vst.msk [vmem:[#allocation3 + $0xc] sm:$0xf] %vm6418_vm2, %v14852_v4  ;;  %6423 = vst.msk [vmem:[#allocation3 + $0x90] sm:$0xf] %vm6418_vm2, %v14852_v4  ;;  %v14955_v14 = vld [vmem:[%s20175_s1] sm:$0x3]  ;;  %v1069_v15 = vunpack.c.0.s8 %v1068_v8 }
  0x12   : > { %6424 = vst.msk [vmem:[#allocation3 + $0x94] sm:$0xf] %vm6418_vm2, %v14852_v4  ;;  %6425 = vst.msk [vmem:[#allocation3 + $0x98] sm:$0xf] %vm6418_vm2, %v14852_v4  ;;  %v368_v16 = vadd.s32 48, %v14927_v3  ;;  %v14964_v17 = vadd.s32 64, %v14927_v3  ;;  %14718 = vmatprep.subr.msk.bf16.mxu1 %vm1804_vm0, %v14955_v14  ;;  %v14970_v20 = vsub.s32 %v1062_v12, %v14927_v3 }
  0x13   : > { %10834 = vst.msk [vmem:[#allocation4 + $0x90] sm:$0xf] %vm6418_vm2, %v14852_v4  ;;  %10835 = vst.msk [vmem:[#allocation4 + $0x94] sm:$0xf] %vm6418_vm2, %v14852_v4  ;;  %v412_v18 = vand.u32 15, %v364_v10  ;;  %vm778_vm3 = vcmp.ne.s32.totalorder %v398_v11, 0  ;;  %v14975_v24 = vsub.s32 %v1069_v15, %v14927_v3 }
  0x14   : > { %10836 = vst.msk [vmem:[#allocation4 + $0x98] sm:$0xf] %vm6418_vm2, %v14852_v4  ;;  %v947_v19 = vld [vmem:[%s14960_s24] sm:$0xf]  ;;  %vm1284_vm4 = vsmask.f32 3328 }
  0x15   : > { %vm1285_vm5 = vsmask.f32 7440  ;;  %v426_v21 = vand.u32 15, %v366_v13  ;;  %v20193_v22 = vmov 0.0   ;;  %979 = vst.msk [vmem:[#allocation2 + $0x10] sm:$0xf] %vm938_vm1, %v947_v19 }
  0x16   : > { %v810_v23 = vsel %vm778_vm3, 1.0, %v20193_v22  ;;  %v948_v25 = vld [vmem:[%s14960_s24 + $0x4] sm:$0xf]  ;;  %v440_v26 = vand.u32 15, %v368_v16  ;;  %v949_v27 = vld [vmem:[%s14960_s24 + $0x8] sm:$0xf]  ;;  %vm15043_vm11 = vmor %vm1284_vm4, %vm1285_vm5 }
  0x17   : > { %vm780_vm6 = vcmp.ne.s32.totalorder %v412_v18, 0  ;;  %v20191_v28 = vmov 1.0   ;;  %vm1755_vm7 = vcmask 31744   ;;  %vm782_vm8 = vcmp.ne.s32.totalorder %v426_v21, 0  ;;  %980 = vst.msk [vmem:[#allocation2 + $0x14] sm:$0xf] %vm938_vm1, %v948_v25 }
  0x18   : > { %v842_v29 = vpack.c.bf16 %v20191_v28, %v810_v23  ;;  %v950_v30 = vld [vmem:[%s14960_s24 + $0xc] sm:$0xf]  ;;  %981 = vst.msk [vmem:[#allocation2 + $0x18] sm:$0xf] %vm938_vm1, %v949_v27  ;;  %v812_v31 = vsel %vm780_vm6, 1.0, %v20193_v22  ;;  %v814_v33 = vsel %vm782_vm8, 1.0, %v20193_v22 }
  0x19   : > { %v14984_v32 = vld [vmem:[#allocation2 + $0x8] sm:$0xf]  ;;  %v14988_v34 = vsel %vm1804_vm0, %v12802_v9, 0  ;;  %982 = vst.msk [vmem:[#allocation2 + $0x1c] sm:$0xf] %vm938_vm1, %v950_v30  ;;  %v454_v35 = vand.u32 15, %v14964_v17  ;;  %v843_v36 = vpack.c.bf16 %v20191_v28, %v812_v31  ;;  %v844_v40 = vpack.c.bf16 %v20191_v28, %v814_v33 }
  0x1a   : > { %v14993_v37 = vld [vmem:[#allocation2 + $0xc] sm:$0xf]  ;;  %v1066_v38 = vrot.slane %v842_v29, %v14970_v20  ;;  %v1073_v39 = vrot.slane %v842_v29, %v14975_v24  ;;  %v951_v41 = vld [vmem:[%s14960_s24 + $0x10] sm:$0xf]  ;;  %v952_v42 = vld [vmem:[%s14960_s24 + $0x14] sm:$0xf] }
  0x1b   : > { %v15000_v43 = vld [vmem:[#allocation2 + $0x4] sm:$0x8]  ;;  %v12737_v44 = vcombine.low %v14984_v32, %v14993_v37  ;;  %vm15004_vm9 = vcmp.ne.s32.totalorder %v440_v26, 0  ;;  %983 = vst.msk [vmem:[#allocation2 + $0x20] sm:$0xf] %vm938_vm1, %v951_v41  ;;  %v15011_v46 = vadd.s32 80, %v14927_v3  ;;  %v1080_v48 = vrot.slane %v843_v36, %v14970_v20 }
  0x1c   : > { %984 = vst.msk [vmem:[#allocation2 + $0x24] sm:$0xf] %vm938_vm1, %v952_v42  ;;  %v953_v47 = vld [vmem:[%s14960_s24 + $0x18] sm:$0xf]  ;;  %v1087_v49 = vrot.slane %v843_v36, %v14975_v24  ;;  %v1288_v50 = vshll.u32 %v1066_v38, 16  ;;  %v1291_v51 = vshrl.u32 %v1066_v38, 16  ;;  %v1094_v56 = vrot.slane %v844_v40, %v14970_v20 }
  0x1d   : > { %v954_v52 = vld [vmem:[%s14960_s24 + $0x1c] sm:$0xf]  ;;  %985 = vst.msk [vmem:[#allocation2 + $0x28] sm:$0xf] %vm938_vm1, %v953_v47  ;;  %v955_v53 = vld [vmem:[%s14960_s24 + $0x20] sm:$0xf]  ;;  %13971 = vmatprep.mubr.msk.bf16.mxu0 %vm1755_vm7, %v12737_v44  ;;  %v1101_v29 = vrot.slane %v844_v40, %v14975_v24 }
  0x1e   : > { %v1297_v54 = vshll.u32 %v1073_v39, 16  ;;  %v1301_v55 = vshrl.u32 %v1073_v39, 16  ;;  %v816_v57 = vsel %vm15004_vm9, 1.0, %v20193_v22  ;;  %986 = vst.msk [vmem:[#allocation2 + $0x2c] sm:$0xf] %vm938_vm1, %v954_v52  ;;  %v15029_v60 = vrot.slane %v1288_v50, 5 }
  0x1f   : > { %v956_v58 = vld [vmem:[%s14960_s24 + $0x24] sm:$0xf]  ;;  %987 = vst.msk [vmem:[#allocation2 + $0x30] sm:$0xf] %vm938_vm1, %v955_v53  ;;  %v15027_v59 = vld [vmem:[#allocation2 + $0x10] sm:$0xf]  ;;  %v845_v23 = vpack.c.bf16 %v20191_v28, %v816_v57 }
  0x20   : > { %20398 = vst [vmem:[#allocation5_spill] sm:$0xff] %v15029_v60  ;;  %v1293_v61 = vrot.slane %v1291_v51, 4  ;;  %v1307_v62 = vshll.u32 %v1080_v48, 16  ;;  %v1311_v63 = vshrl.u32 %v1080_v48, 16  ;;  %vm15031_vm10 = vcmp.ne.s32.totalorder %v454_v35, 0  ;;  %s13530_s25 = sshll.u32 %s21319_s14, 8 }
  0x21   : > { %988 = vst.msk [vmem:[#allocation2 + $0x34] sm:$0xf] %vm938_vm1, %v956_v58  ;;  %v1299_v1 = vrot.slane %v1297_v54, 5  ;;  %v1303_v2 = vrot.slane %v1301_v55, 4  ;;  %v1317_v4 = vshll.u32 %v1087_v49, 16  ;;  %v1321_v5 = vshrl.u32 %v1087_v49, 16  ;;  %s19958_s27 = scalar_lea.vmem %s20184_s10, %s13530_s25 }
  0x22   : > { %v15036_v6 = vld [vmem:[#allocation2 + $0x14] sm:$0xf]  ;;  %v1294_v7 = vor.u32 %v1293_v61, %v15029_v60  ;;  %v1309_v8 = vrot.slane %v1307_v62, 5  ;;  %v1313_v9 = vrot.slane %v1311_v63, 4  ;;  %v1639_v10 = vmul.bf16 %v15029_v60, %v15000_v43  ;;  %v957_v17 = vld [vmem:[%s14960_s24 + $0x28] sm:$0xf] }
  0x23   : > { %v1304_v12 = vor.u32 %v1303_v2, %v1299_v1  ;;  %v1319_v13 = vrot.slane %v1317_v4, 5  ;;  %v1323_v15 = vrot.slane %v1321_v5, 4  ;;  %v1327_v16 = vshll.u32 %v1094_v56, 16  ;;  %989 = vst.msk [vmem:[#allocation2 + $0x38] sm:$0xf] %vm938_vm1, %v957_v17 }
  0x24   : > { %v1295_v18 = vrot.slane %v1294_v7, 4  ;;  %v1314_v19 = vor.u32 %v1313_v9, %v1309_v8  ;;  %v12738_v21 = vcombine.low %v15027_v59, %v15036_v6  ;;  %v958_v30 = vld [vmem:[%s14960_s24 + $0x2c] sm:$0xf]  ;;  %v15059_v35 = vld [vmem:[#allocation2 + $0x18] sm:$0xf]  ;;  %v1108_v36 = vrot.slane %v845_v23, %v14970_v20 }
  0x25   : > { %v1305_v25 = vrot.slane %v1304_v12, 4  ;;  %v1324_v26 = vor.u32 %v1323_v15, %v1319_v13  ;;  %v1329_v27 = vrot.slane %v1327_v16, 5  ;;  %v1331_v38 = vshrl.u32 %v1094_v56, 16  ;;  %990 = vst.msk [vmem:[#allocation2 + $0x3c] sm:$0xf] %vm938_vm1, %v958_v30 }
  0x26   : > { %v15056_v31 = vsel %vm15043_vm11, %v1295_v18, %v1299_v1  ;;  %v1315_v33 = vrot.slane %v1314_v19, 4  ;;  %13972 = vmatmul.mubr.msk.bf16.vlgmr.msra.gmra.mxu0 %vm1755_vm7, %v12738_v21  ;;  %v15070_v42 = vld [vmem:[#allocation2 + $0x1c] sm:$0xf]  ;;  %v1337_v43 = vshll.u32 %v1101_v29, 16  ;;  %v959_v44 = vld [vmem:[%s14960_s24 + $0x30] sm:$0xf]  ;;  %v1115_v4 = vrot.slane %v845_v23, %v14975_v24 }
  0x27   : > { %20403 = vst [vmem:[#allocation6_spill] sm:$0xff] %v15056_v31  ;;  %v15065_v39 = vsel %vm15043_vm11, %v1305_v25, %v1309_v8  ;;  %v1640_v40 = vmul.bf16 %v15056_v31, %v14984_v32  ;;  %v1325_v41 = vrot.slane %v1324_v26, 4  ;;  %14038 = vmatpush3.bf16.msra.mxu0 %v14988_v34  ;;  %v1333_v47 = vrot.slane %v1331_v38, 4  ;;  %v15077_v49 = vld [vmem:[#allocation2 + $0x20] sm:$0xf] }
  0x28   : > { %20404 = vst [vmem:[#allocation7_spill] sm:$0xff] %v15065_v39  ;;  %v15075_v45 = vsel %vm15043_vm11, %v1315_v33, %v1319_v13  ;;  %v1341_v48 = vshrl.u32 %v1101_v29, 16  ;;  %v15079_v50 = vld [vmem:[#allocation2 + $0x24] sm:$0xf]  ;;  %v960_v32 = vld [vmem:[%s14960_s24 + $0x34] sm:$0xf]  ;;  %v1641_v51 = vmul.bf16 %v15065_v39, %v14993_v37  ;;  %v12739_v1 = vcombine.low %v15059_v35, %v15070_v42 }
  0x29   : > { %20405 = vst [vmem:[#allocation8_spill] sm:$0xff] %v15075_v45  ;;  %991 = vst.msk [vmem:[#allocation2 + $0x40] sm:$0xf] %vm938_vm1, %v959_v44  ;;  %v961_v34 = vld [vmem:[%s14960_s24 + $0x38] sm:$0xf]  ;;  %v1642_v52 = vmul.bf16 %v15075_v45, %v15027_v59  ;;  %v15090_v53 = vsel %vm15043_vm11, %v1325_v41, %v1329_v27  ;;  %v1339_v54 = vrot.slane %v1337_v43, 5  ;;  %v15096_v57 = vcombine.low %v1639_v10, %v1640_v40 }
  0x2a   : > { %20406 = vst [vmem:[#allocation9_spill] sm:$0xff] %v15090_v53  ;;  %992 = vst.msk [vmem:[#allocation2 + $0x44] sm:$0xf] %vm938_vm1, %v960_v32  ;;  %v962_v55 = vld [vmem:[%s14960_s24 + $0x3c] sm:$0xf]  ;;  %v1334_v58 = vor.u32 %v1333_v47, %v1329_v27  ;;  %v1343_v61 = vrot.slane %v1341_v48, 4  ;;  %v1643_v63 = vmul.bf16 %v15090_v53, %v15036_v6  ;;  %13975 = vmatprep.mubr.msk.bf16.mxu0 %vm1755_vm7, %v12739_v1 }
  0x2b   : > { %993 = vst.msk [vmem:[#allocation2 + $0x48] sm:$0xf] %vm938_vm1, %v961_v34  ;;  %v963_v56 = vld [vmem:[%s14960_s24 + $0x40] sm:$0xf]  ;;  %v1347_v37 = vshll.u32 %v1108_v36, 16  ;;  %v818_v2 = vsel %vm15031_vm10, 1.0, %v20193_v22  ;;  %v12740_v17 = vcombine.low %v15077_v49, %v15079_v50  ;;  %v15130_v27 = vcombine.low %v1641_v51, %v1642_v52 }
  0x2c   : > { %994 = vst.msk [vmem:[#allocation2 + $0x4c] sm:$0xf] %vm938_vm1, %v962_v55  ;;  %v964_v59 = vld [vmem:[%s14960_s24 + $0x44] sm:$0xf]  ;;  %995 = vst.msk [vmem:[#allocation2 + $0x50] sm:$0xf] %vm938_vm1, %v963_v56  ;;  %v1344_v8 = vor.u32 %v1343_v61, %v1339_v54  ;;  %v846_v10 = vpack.c.bf16 %v20191_v28, %v818_v2 }
  0x2d   : > { %v965_v62 = vld [vmem:[%s14960_s24 + $0x48] sm:$0xf]  ;;  %996 = vst.msk [vmem:[#allocation2 + $0x54] sm:$0xf] %vm938_vm1, %v964_v59  ;;  %v966_v5 = vld [vmem:[%s14960_s24 + $0x4c] sm:$0xf] }
  0x2e   : > { %997 = vst.msk [vmem:[#allocation2 + $0x58] sm:$0xf] %vm938_vm1, %v965_v62  ;;  %v1335_v7 = vrot.slane %v1334_v58, 4  ;;  %v1349_v9 = vrot.slane %v1347_v37, 5  ;;  %998 = vst.msk [vmem:[#allocation2 + $0x5c] sm:$0xf] %vm938_vm1, %v966_v5  ;;  %v1122_v21 = vrot.slane %v846_v10, %v14970_v20  ;;  %13976 = vmatmul.mubr.msk.bf16.gmra.mxu0 %vm1755_vm7, %v12740_v17 }
  0x2f   : > { %v967_v12 = vld [vmem:[%s14960_s24 + $0x50] sm:$0xf]  ;;  %v968_v13 = vld [vmem:[%s14960_s24 + $0x54] sm:$0xf]  ;;  %v1351_v0 = vshrl.u32 %v1108_v36, 16  ;;  %v1357_v15 = vshll.u32 %v1115_v4, 16 }
  0x30   : > { %v1361_v16 = vshrl.u32 %v1115_v4, 16  ;;  %999 = vst.msk [vmem:[#allocation2 + $0x60] sm:$0xf] %vm938_vm1, %v967_v12  ;;  %1000 = vst.msk [vmem:[#allocation2 + $0x64] sm:$0xf] %vm938_vm1, %v968_v13  ;;  %v15124_v18 = vsel %vm15043_vm11, %v1335_v7, %v1339_v54  ;;  %v1345_v19 = vrot.slane %v1344_v8, 4 }
  0x31   : > { %20407 = vst [vmem:[#allocation10_spill] sm:$0xff] %v15124_v18  ;;  %v468_v23 = vand.u32 15, %v15011_v46  ;;  %v969_v25 = vld [vmem:[%s14960_s24 + $0x58] sm:$0xf]  ;;  %v970_v26 = vld [vmem:[%s14960_s24 + $0x5c] sm:$0xf]  ;;  %v1129_v46 = vrot.slane %v846_v10, %v14975_v24  ;;  %v1644_v40 = vmul.bf16 %v15124_v18, %v15059_v35 }
  0x32   : > { %v1353_v29 = vrot.slane %v1351_v0, 4  ;;  %v1359_v30 = vrot.slane %v1357_v15, 5  ;;  %v1363_v33 = vrot.slane %v1361_v16, 4  ;;  %1001 = vst.msk [vmem:[#allocation2 + $0x68] sm:$0xf] %vm938_vm1, %v969_v25  ;;  %v15137_v36 = vsel %vm15043_vm11, %v1345_v19, %v1349_v9 }
  0x33   : > { %1002 = vst.msk [vmem:[#allocation2 + $0x6c] sm:$0xf] %vm938_vm1, %v970_v26  ;;  %20408 = vst [vmem:[#allocation11_spill] sm:$0xff] %v15137_v36  ;;  %v1367_v38 = vshll.u32 %v1122_v21, 16  ;;  %vm788_vm12 = vcmp.ne.s32.totalorder %v468_v23, 0  ;;  %v1645_v41 = vmul.bf16 %v15137_v36, %v15070_v42  ;;  %v1371_v52 = vshrl.u32 %v1122_v21, 16 }
  0x34   : > { %v1354_v43 = vor.u32 %v1353_v29, %v1349_v9  ;;  %v1364_v44 = vor.u32 %v1363_v33, %v1359_v30  ;;  %v15144_v47 = vld [vmem:[#allocation2 + $0x28] sm:$0xf]  ;;  %v15146_v48 = vld [vmem:[#allocation2 + $0x2c] sm:$0xf]  ;;  %v971_v32 = vld [vmem:[%s14960_s24 + $0x60] sm:$0xf] }
  0x35   : > { %v1369_v34 = vrot.slane %v1367_v38, 5  ;;  %v820_v51 = vsel %vm788_vm12, 1.0, %v20193_v22  ;;  %v1377_v54 = vshll.u32 %v1129_v46, 16  ;;  %1003 = vst.msk [vmem:[#allocation2 + $0x70] sm:$0xf] %vm938_vm1, %v971_v32  ;;  %v1381_v58 = vshrl.u32 %v1129_v46, 16 }
  0x36   : > { %v1355_v55 = vrot.slane %v1354_v43, 4  ;;  %v1365_v56 = vrot.slane %v1364_v44, 4  ;;  %v847_v35 = vpack.c.bf16 %v20191_v28, %v820_v51  ;;  %v15155_v42 = vld [vmem:[%s20175_s1 + $0x6] sm:$0x3]  ;;  %v1373_v61 = vrot.slane %v1371_v52, 4 }
  0x37   : > { %v1379_v37 = vrot.slane %v1377_v54, 5  ;;  %v12741_v59 = vcombine.low %v15144_v47, %v15146_v48  ;;  %v2254_v62 = vsel %vm1804_vm0, %v14955_v14, 0  ;;  %v1383_v5 = vrot.slane %v1381_v58, 4  ;;  %v15170_v7 = vld [vmem:[#allocation2 + $0x30] sm:$0xf] }
  0x38   : > { %v15163_v1 = vsel %vm15043_vm11, %v1355_v55, %v1359_v30  ;;  %v15167_v2 = vsel %vm15043_vm11, %v1365_v56, %v1369_v34  ;;  %v1136_v4 = vrot.slane %v847_v35, %v14970_v20  ;;  %14004 = vmatpush3.bf16.msra.mxu1 %v2254_v62  ;;  %v15172_v8 = vld [vmem:[#allocation2 + $0x34] sm:$0xf]  ;;  %v15177_v14 = vcombine.low %v1643_v63, %v1644_v40  ;;  %v972_v63 = vld [vmem:[%s14960_s24 + $0x64] sm:$0xf]  ;;  %v973_v16 = vld [vmem:[%s14960_s24 + $0x68] sm:$0xf] }
  0x39   : > { %20409 = vst [vmem:[#allocation12_spill] sm:$0xff] %v15163_v1  ;;  %20410 = vst [vmem:[#allocation13_spill] sm:$0xff] %v15167_v2  ;;  %v1646_v9 = vmul.bf16 %v15163_v1, %v15077_v49  ;;  %v1374_v10 = vor.u32 %v1373_v61, %v1369_v34  ;;  %13979 = vmatprep.mubr.msk.bf16.mxu0 %vm1755_vm7, %v12741_v59  ;;  %v374_v12 = vadd.s32 96, %v14927_v3  ;;  %14720 = vmatprep.subr.msk.bf16.mxu1 %vm1804_vm0, %v15155_v42  ;;  %v974_v23 = vld [vmem:[%s14960_s24 + $0x6c] sm:$0xf]  ;;  %v20436_v11 = vmov 1.0  }
  0x3a   : > { %v1384_v13 = vor.u32 %v1383_v5, %v1379_v37  ;;  %v1387_v0 = vshll.u32 %v1136_v4, 16  ;;  %v1143_v15 = vrot.slane %v847_v35, %v14975_v24  ;;  %v1391_v6 = vshrl.u32 %v1136_v4, 16  ;;  %1004 = vst.msk [vmem:[#allocation2 + $0x74] sm:$0xf] %vm938_vm1, %v972_v63  ;;  %1005 = vst.msk [vmem:[#allocation2 + $0x78] sm:$0xf] %vm938_vm1, %v973_v16 }
  0x3b   : > { %v1647_v49 = vmul.bf16 %v15167_v2, %v15079_v50  ;;  %v1375_v17 = vrot.slane %v1374_v10, 4  ;;  %v482_v19 = vand.u32 15, %v374_v12  ;;  %v12742_v21 = vcombine.low %v15170_v7, %v15172_v8  ;;  %v975_v25 = vld [vmem:[%s14960_s24 + $0x70] sm:$0xf]  ;;  %1006 = vst.msk [vmem:[#allocation2 + $0x7c] sm:$0xf] %vm938_vm1, %v974_v23 }
  0x3c   : > { %v1385_v26 = vrot.slane %v1384_v13, 4  ;;  %v1389_v29 = vrot.slane %v1387_v0, 5  ;;  %v1393_v30 = vrot.slane %v1391_v6, 4  ;;  %v1397_v33 = vshll.u32 %v1143_v15, 16  ;;  %1007 = vst.msk [vmem:[#allocation2 + $0x80] sm:$0xf] %vm938_vm1, %v975_v25 }
  0x3d   : > { %v15198_v50 = vcombine.low %v1645_v41, %v1646_v9  ;;  %v15202_v38 = vsel %vm15043_vm11, %v1375_v17, %v1379_v37  ;;  %vm790_vm13 = vcmp.ne.s32.totalorder %v482_v19, 0  ;;  %v1401_v46 = vshrl.u32 %v1143_v15, 16  ;;  %13980 = vmatmul.mubr.msk.bf16.gmra.mxu0 %vm1755_vm7, %v12742_v21  ;;  %v976_v40 = vld [vmem:[%s14960_s24 + $0x74] sm:$0xf]  ;;  %v15222_v58 = vld [vmem:[%s20175_s1 + $0x8] sm:$0x3] }
  0x3e   : > { %20411 = vst [vmem:[#allocation14_spill] sm:$0xff] %v15202_v38  ;;  %v15208_v43 = vsel %vm15043_vm11, %v1385_v26, %v1389_v29  ;;  %v822_v44 = vsel %vm790_vm13, 1.0, %v20193_v22  ;;  %v1394_v32 = vor.u32 %v1393_v30, %v1389_v29  ;;  %vm2052_vm14 = vsmask.f32 4352  ;;  %1008 = vst.msk [vmem:[#allocation2 + $0x84] sm:$0xf] %vm938_vm1, %v976_v40  ;;  %14721 = vmatprep.subr.msk.bf16.mxu0 %vm1804_vm0, %v15222_v58 }
  0x3f   : > { %20412 = vst [vmem:[#allocation15_spill] sm:$0xff] %v15208_v43  ;;  %v1648_v41 = vmul.bf16 %v15202_v38, %v15144_v47  ;;  %v848_v34 = vpack.c.bf16 %v20191_v28, %v822_v44  ;;  %v1399_v51 = vrot.slane %v1397_v33, 5  ;;  %v1403_v52 = vrot.slane %v1401_v46, 4  ;;  %v15234_v9 = vld [vmem:[#allocation2 + $0x38] sm:$0xf] }
  0x40   : > { %v1649_v54 = vmul.bf16 %v15208_v43, %v15146_v48  ;;  %v1395_v55 = vrot.slane %v1394_v32, 4  ;;  %v2054_v56 = vshrl.u32 %v15096_v57, 16  ;;  %v2057_v35 = vshll.u32 %v15096_v57, 16  ;;  %v15238_v15 = vld [vmem:[#allocation2 + $0x3c] sm:$0xf] }
  0x41   : > { %v1150_v61 = vrot.slane %v848_v34, %v14970_v20  ;;  %v1404_v47 = vor.u32 %v1403_v52, %v1399_v51  ;;  %v2062_v37 = vshrl.u32 %v15130_v27, 16  ;;  %v2065_v59 = vshll.u32 %v15130_v27, 16  ;;  %v15247_v30 = vld [vmem:[#allocation2 + $0x40] sm:$0xf] }
  0x42   : > { %v15231_v62 = vsel %vm15043_vm11, %v1395_v55, %v1399_v51  ;;  %v2056_v57 = vrot.slane %v2054_v56, 3  ;;  %v2059_v4 = vrot.slane %v2057_v35, 4  ;;  %v2071_v5 = vshrl.u32 %v15177_v14, 16 }
  0x43   : > { %20413 = vst [vmem:[#allocation16_spill] sm:$0xff] %v15231_v62  ;;  %v15236_v10 = vcombine.low %v1647_v49, %v1648_v41  ;;  %v1405_v12 = vrot.slane %v1404_v47, 4  ;;  %v1407_v13 = vshll.u32 %v1150_v61, 16  ;;  %v2064_v0 = vrot.slane %v2062_v37, 3 }
  0x44   : > { %v2060_v27 = vor.u32 %v2059_v4, %v2056_v57  ;;  %v2067_v6 = vrot.slane %v2065_v59, 4  ;;  %v2073_v63 = vrot.slane %v2071_v5, 3  ;;  %v2074_v16 = vshll.u32 %v15177_v14, 16 }
  0x45   : > { %v1409_v17 = vrot.slane %v1407_v13, 5  ;;  %v1650_v19 = vmul.bf16 %v15231_v62, %v15170_v7  ;;  %v376_v21 = vadd.s32 112, %v14927_v3  ;;  %v1157_v23 = vrot.slane %v848_v34, %v14975_v24  ;;  %v15253_v7 = vld [vmem:[#allocation2 + $0x44] sm:$0xf] }
  0x46   : > { %v2068_v49 = vor.u32 %v2067_v6, %v2064_v0  ;;  %v2076_v25 = vrot.slane %v2074_v16, 4  ;;  %v1411_v26 = vshrl.u32 %v1150_v61, 16  ;;  %v12743_v29 = vcombine.low %v15234_v9, %v15238_v15 }
  0x47   : > { %v15251_v33 = vsel %vm15043_vm11, %v1405_v12, %v1409_v17  ;;  %v496_v14 = vand.u32 15, %v376_v21  ;;  %v1417_v46 = vshll.u32 %v1157_v23, 16  ;;  %v1421_v40 = vshrl.u32 %v1157_v23, 16 }
  0x48   : > { %20414 = vst [vmem:[#allocation17_spill] sm:$0xff] %v15251_v33  ;;  %v1651_v44 = vmul.bf16 %v15251_v33, %v15172_v8  ;;  %v2069_v32 = vsel %vm2052_vm14, %v2060_v27, %v2068_v49  ;;  %v2077_v41 = vor.u32 %v2076_v25, %v2073_v63  ;;  %v1413_v34 = vrot.slane %v1411_v26, 4  ;;  %13983 = vmatprep.mubr.msk.bf16.mxu0 %vm1755_vm7, %v12743_v29 }
  0x49   : > { %14005 = vmatprep.mubr.msk.bf16.mxu1 %vm1755_vm7, %v2069_v32  ;;  %vm792_vm15 = vcmp.ne.s32.totalorder %v496_v14, 0  ;;  %v1419_v51 = vrot.slane %v1417_v46, 5  ;;  %v1423_v52 = vrot.slane %v1421_v40, 4  ;;  %v378_v55 = vadd.s32 128, %v14927_v3 }
  0x4a   : > { %v2078_v56 = vsel %vm2052_vm14, %v2068_v49, %v2077_v41  ;;  %v824_v35 = vsel %vm792_vm15, 1.0, %v20193_v22  ;;  %v1414_v61 = vor.u32 %v1413_v34, %v1409_v17  ;;  %v12744_v8 = vcombine.low %v15247_v30, %v15253_v7 }
  0x4b   : > { %14006 = vmatmul.mubr.msk.bf16.vlgmr.msra.gmra.mxu1 %vm1755_vm7, %v2078_v56  ;;  %v849_v47 = vpack.c.bf16 %v20191_v28, %v824_v35  ;;  %v1424_v37 = vor.u32 %v1423_v52, %v1419_v51  ;;  %v510_v59 = vand.u32 15, %v378_v55  ;;  %v2080_v57 = vshrl.u32 %v15198_v50, 16 }
  0x4c   : > { %v1415_v4 = vrot.slane %v1414_v61, 4  ;;  %13984 = vmatmul.mubr.msk.bf16.gmra.mxu0 %vm1755_vm7, %v12744_v8  ;;  %v2083_v5 = vshll.u32 %v15198_v50, 16  ;;  %v2089_v12 = vshrl.u32 %v15236_v10, 16  ;;  %v2092_v13 = vshll.u32 %v15236_v10, 16 }
  0x4d   : > { %v1164_v0 = vrot.slane %v849_v47, %v14970_v20  ;;  %v1425_v27 = vrot.slane %v1424_v37, 4  ;;  %vm794_vm3 = vcmp.ne.s32.totalorder %v510_v59, 0  ;;  %v1171_v6 = vrot.slane %v849_v47, %v14975_v24  ;;  %v1028_v47 = vld [vmem:[#allocation2 + $0x48] sm:$0xf]  ;;  %v15299_v37 = vld [vmem:[#allocation2 + $0x4c] sm:$0xf] }
  0x4e   : > { %v15276_v63 = vsel %vm15043_vm11, %v1415_v4, %v1419_v51  ;;  %v826_v16 = vsel %vm794_vm3, 1.0, %v20193_v22  ;;  %v2082_v17 = vrot.slane %v2080_v57, 3  ;;  %v2085_v21 = vrot.slane %v2083_v5, 4 }
  0x4f   : > { %20415 = vst [vmem:[#allocation18_spill] sm:$0xff] %v15276_v63  ;;  %v1427_v23 = vshll.u32 %v1164_v0, 16  ;;  %v1652_v50 = vmul.bf16 %v15276_v63, %v15234_v9  ;;  %v850_v10 = vpack.c.bf16 %v20191_v28, %v826_v16  ;;  %v1431_v49 = vshrl.u32 %v1164_v0, 16 }
  0x50   : > { %v1437_v25 = vshll.u32 %v1171_v6, 16  ;;  %v1441_v26 = vshrl.u32 %v1171_v6, 16  ;;  %v2086_v29 = vor.u32 %v2085_v21, %v2082_v17  ;;  %v2091_v14 = vrot.slane %v2089_v12, 3  ;;  %v15310_v17 = vld [vmem:[#allocation2 + $0x50] sm:$0xf] }
  0x51   : > { %v15285_v46 = vcombine.low %v1649_v54, %v1650_v19  ;;  %v1429_v40 = vrot.slane %v1427_v23, 5  ;;  %v1178_v32 = vrot.slane %v850_v10, %v14970_v20  ;;  %v1433_v34 = vrot.slane %v1431_v49, 4  ;;  %v15312_v21 = vld [vmem:[#allocation2 + $0x54] sm:$0xf] }
  0x52   : > { %v1439_v51 = vrot.slane %v1437_v25, 5  ;;  %v1443_v52 = vrot.slane %v1441_v26, 4  ;;  %v2087_v9 = vsel %vm2052_vm14, %v2077_v41, %v2086_v29  ;;  %v2094_v55 = vrot.slane %v2092_v13, 4 }
  0x53   : > { %v15289_v56 = vcombine.low %v1651_v44, %v1652_v50  ;;  %v1434_v35 = vor.u32 %v1433_v34, %v1429_v40  ;;  %v1447_v61 = vshll.u32 %v1178_v32, 16  ;;  %14009 = vmatprep.mubr.msk.bf16.mxu1 %vm1755_vm7, %v2087_v9  ;;  %v380_v8 = vadd.s32 144, %v14927_v3 }
  0x54   : > { %v15295_v48 = vsel %vm15043_vm11, %v1425_v27, %v1429_v40  ;;  %v1444_v54 = vor.u32 %v1443_v52, %v1439_v51  ;;  %v15297_v19 = vor.u32 %v2094_v55, %v2091_v14  ;;  %v1185_v41 = vrot.slane %v850_v10, %v14975_v24 }
  0x55   : > { %20416 = vst [vmem:[#allocation19_spill] sm:$0xff] %v15295_v48  ;;  %v1435_v44 = vrot.slane %v1434_v35, 4  ;;  %v1449_v59 = vrot.slane %v1447_v61, 5  ;;  %v524_v57 = vand.u32 15, %v380_v8  ;;  %v1451_v4 = vshrl.u32 %v1178_v32, 16 }
  0x56   : > { %v1445_v5 = vrot.slane %v1444_v54, 4  ;;  %v2096_v12 = vsel %vm2052_vm14, %v2086_v29, %v15297_v19  ;;  %v1457_v13 = vshll.u32 %v1185_v41, 16  ;;  %v1461_v0 = vshrl.u32 %v1185_v41, 16 }
  0x57   : > { %v15306_v27 = vsel %vm15043_vm11, %v1435_v44, %v1439_v51  ;;  %14010 = vmatmul.mubr.msk.bf16.gmra.mxu1 %vm1755_vm7, %v2096_v12  ;;  %vm796_vm4 = vcmp.ne.s32.totalorder %v524_v57, 0  ;;  %v1453_v6 = vrot.slane %v1451_v4, 4  ;;  %v12745_v16 = vcombine.low %v1028_v47, %v15299_v37 }
  0x58   : > { %20417 = vst [vmem:[#allocation20_spill] sm:$0xff] %v15306_v27  ;;  %v1653_v23 = vmul.bf16 %v15295_v48, %v15238_v15  ;;  %v15318_v50 = vsel %vm15043_vm11, %v1445_v5, %v1449_v59  ;;  %v1654_v10 = vmul.bf16 %v15306_v27, %v15247_v30  ;;  %v828_v49 = vsel %vm796_vm4, 1.0, %v20193_v22 }
  0x59   : > { %20418 = vst [vmem:[#allocation21_spill] sm:$0xff] %v15318_v50  ;;  %v851_v25 = vpack.c.bf16 %v20191_v28, %v828_v49  ;;  %v1454_v26 = vor.u32 %v1453_v6, %v1449_v59  ;;  %v1459_v29 = vrot.slane %v1457_v13, 5  ;;  %v1463_v14 = vrot.slane %v1461_v0, 4  ;;  %13987 = vmatprep.mubr.msk.bf16.mxu0 %vm1755_vm7, %v12745_v16 }
  0x5a   : > { %v1655_v40 = vmul.bf16 %v15318_v50, %v15253_v7  ;;  %v382_v15 = vadd.s32 160, %v14927_v3  ;;  %v12746_v32 = vcombine.low %v15310_v17, %v15312_v21  ;;  %v2098_v34 = vshrl.u32 %v15285_v46, 16 }
  0x5b   : > { %v1192_v30 = vrot.slane %v851_v25, %v14970_v20  ;;  %v1455_v51 = vrot.slane %v1454_v26, 4  ;;  %v1464_v52 = vor.u32 %v1463_v14, %v1459_v29  ;;  %v1199_v9 = vrot.slane %v851_v25, %v14975_v24 }
  0x5c   : > { %v538_v55 = vand.u32 15, %v382_v15  ;;  %13988 = vmatmul.mubr.msk.bf16.gmra.mxu0 %vm1755_vm7, %v12746_v32  ;;  %v2100_v35 = vrot.slane %v2098_v34, 3  ;;  %v2101_v61 = vshll.u32 %v15285_v46, 16  ;;  %v2107_v7 = vshrl.u32 %v15289_v56, 16 }
  0x5d   : > { %v15338_v8 = vsel %vm15043_vm11, %v1455_v51, %v1459_v29  ;;  %v1465_v54 = vrot.slane %v1464_v52, 4  ;;  %v1467_v41 = vshll.u32 %v1192_v30, 16  ;;  %v1471_v44 = vshrl.u32 %v1192_v30, 16  ;;  %v15354_v51 = vld [vmem:[#allocation2 + $0x58] sm:$0xf] }
  0x5e   : > { %20419 = vst [vmem:[#allocation22_spill] sm:$0xff] %v15338_v8  ;;  %v1656_v59 = vmul.bf16 %v15338_v8, %v1028_v47  ;;  %vm798_vm5 = vcmp.ne.s32.totalorder %v538_v55, 0  ;;  %v1477_v57 = vshll.u32 %v1199_v9, 16  ;;  %v1481_v4 = vshrl.u32 %v1199_v9, 16 }
  0x5f   : > { %v1469_v5 = vrot.slane %v1467_v41, 5  ;;  %v830_v12 = vsel %vm798_vm5, 1.0, %v20193_v22  ;;  %v1473_v13 = vrot.slane %v1471_v44, 4  ;;  %v2103_v0 = vrot.slane %v2101_v61, 4 }
  0x60   : > { %v12776_v46 = vcombine.low %v1653_v23, %v1654_v10  ;;  %v852_v6 = vpack.c.bf16 %v20191_v28, %v830_v12  ;;  %v1479_v16 = vrot.slane %v1477_v57, 5  ;;  %v1483_v49 = vrot.slane %v1481_v4, 4  ;;  %v15366_v4 = vld [vmem:[#allocation2 + $0x60] sm:$0xf] }
  0x61   : > { %v15345_v25 = vsel %vm15043_vm11, %v1465_v54, %v1469_v5  ;;  %v15347_v26 = vcombine.low %v1655_v40, %v1656_v59  ;;  %v1474_v47 = vor.u32 %v1473_v13, %v1469_v5  ;;  %v2104_v29 = vor.u32 %v2103_v0, %v2100_v35  ;;  %v15358_v35 = vld [vmem:[#allocation2 + $0x5c] sm:$0xf]  ;;  %v15370_v0 = vld [vmem:[#allocation2 + $0x64] sm:$0xf] }
  0x62   : > { %20420 = vst [vmem:[#allocation23_spill] sm:$0xff] %v15345_v25  ;;  %v1206_v14 = vrot.slane %v852_v6, %v14970_v20  ;;  %v1484_v15 = vor.u32 %v1483_v49, %v1479_v16  ;;  %v2109_v32 = vrot.slane %v2107_v7, 3  ;;  %v2110_v34 = vshll.u32 %v15289_v56, 16 }
  0x63   : > { %v1475_v30 = vrot.slane %v1474_v47, 4  ;;  %v2105_v23 = vsel %vm2052_vm14, %v15297_v19, %v2104_v29  ;;  %v384_v10 = vadd.s32 176, %v14927_v3  ;;  %v1213_v52 = vrot.slane %v852_v6, %v14975_v24 }
  0x64   : > { %v1485_v40 = vrot.slane %v1484_v15, 4  ;;  %v1487_v9 = vshll.u32 %v1206_v14, 16  ;;  %14013 = vmatprep.mubr.msk.bf16.mxu1 %vm1755_vm7, %v2105_v23  ;;  %v2112_v55 = vrot.slane %v2110_v34, 4  ;;  %v1491_v61 = vshrl.u32 %v1206_v14, 16 }
  0x65   : > { %v15362_v56 = vsel %vm15043_vm11, %v1475_v30, %v1479_v16  ;;  %v552_v7 = vand.u32 15, %v384_v10  ;;  %v1497_v19 = vshll.u32 %v1213_v52, 16  ;;  %v1501_v54 = vshrl.u32 %v1213_v52, 16 }
  0x66   : > { %20421 = vst [vmem:[#allocation24_spill] sm:$0xff] %v15362_v56  ;;  %v1657_v41 = vmul.bf16 %v15345_v25, %v15299_v37  ;;  %v1489_v44 = vrot.slane %v1487_v9, 5  ;;  %v2113_v59 = vor.u32 %v2112_v55, %v2109_v32  ;;  %v1493_v57 = vrot.slane %v1491_v61, 4 }
  0x67   : > { %vm800_vm6 = vcmp.ne.s32.totalorder %v552_v7, 0  ;;  %v1499_v5 = vrot.slane %v1497_v19, 5  ;;  %v1503_v12 = vrot.slane %v1501_v54, 4  ;;  %v12747_v13 = vcombine.low %v15354_v51, %v15358_v35 }
  0x68   : > { %v15374_v6 = vsel %vm15043_vm11, %v1485_v40, %v1489_v44  ;;  %v1658_v37 = vmul.bf16 %v15362_v56, %v15310_v17  ;;  %v2114_v16 = vsel %vm2052_vm14, %v2104_v29, %v2113_v59  ;;  %v832_v49 = vsel %vm800_vm6, 1.0, %v20193_v22 }
  0x69   : > { %20422 = vst [vmem:[#allocation25_spill] sm:$0xff] %v15374_v6  ;;  %v1659_v47 = vmul.bf16 %v15374_v6, %v15312_v21  ;;  %14014 = vmatmul.mubr.msk.bf16.gmra.mxu1 %vm1755_vm7, %v2114_v16  ;;  %v853_v14 = vpack.c.bf16 %v20191_v28, %v832_v49  ;;  %v1494_v15 = vor.u32 %v1493_v57, %v1489_v44  ;;  %v386_v34 = vadd.s32 192, %v14927_v3 }
  0x6a   : > { %v1504_v32 = vor.u32 %v1503_v12, %v1499_v5  ;;  %13991 = vmatprep.mubr.msk.bf16.mxu0 %vm1755_vm7, %v12747_v13  ;;  %v12748_v17 = vcombine.low %v15366_v4, %v15370_v0  ;;  %v2116_v30 = vshrl.u32 %v12776_v46, 16  ;;  %v2119_v29 = vshll.u32 %v12776_v46, 16 }
  0x6b   : > { %v1220_v23 = vrot.slane %v853_v14, %v14970_v20  ;;  %v1495_v10 = vrot.slane %v1494_v15, 4  ;;  %v1227_v21 = vrot.slane %v853_v14, %v14975_v24  ;;  %v566_v40 = vand.u32 15, %v386_v34 }
  0x6c   : > { %v1505_v52 = vrot.slane %v1504_v32, 4  ;;  %13992 = vmatmul.mubr.msk.bf16.gmra.mxu0 %vm1755_vm7, %v12748_v17  ;;  %v2118_v9 = vrot.slane %v2116_v30, 3  ;;  %v2121_v55 = vrot.slane %v2119_v29, 4  ;;  %v2125_v61 = vshrl.u32 %v15347_v26, 16  ;;  %v15403_v17 = vld [vmem:[#allocation2 + $0x68] sm:$0xf] }
  0x6d   : > { %v15394_v7 = vsel %vm15043_vm11, %v1495_v10, %v1499_v5  ;;  %v1507_v19 = vshll.u32 %v1220_v23, 16  ;;  %v1511_v54 = vshrl.u32 %v1220_v23, 16  ;;  %v1517_v46 = vshll.u32 %v1227_v21, 16  ;;  %v15405_v30 = vld [vmem:[#allocation2 + $0x6c] sm:$0xf] }
  0x6e   : > { %20423 = vst [vmem:[#allocation26_spill] sm:$0xff] %v15394_v7  ;;  %v1660_v44 = vmul.bf16 %v15394_v7, %v15354_v51  ;;  %vm802_vm8 = vcmp.ne.s32.totalorder %v566_v40, 0  ;;  %v1521_v57 = vshrl.u32 %v1227_v21, 16  ;;  %v2122_v12 = vor.u32 %v2121_v55, %v2118_v9 }
  0x6f   : > { %v1509_v13 = vrot.slane %v1507_v19, 5  ;;  %v834_v16 = vsel %vm802_vm8, 1.0, %v20193_v22  ;;  %v1513_v49 = vrot.slane %v1511_v54, 4  ;;  %v1519_v14 = vrot.slane %v1517_v46, 5 }
  0x70   : > { %v15399_v15 = vcombine.low %v1657_v41, %v1658_v37  ;;  %v854_v32 = vpack.c.bf16 %v20191_v28, %v834_v16  ;;  %v1523_v5 = vrot.slane %v1521_v57, 4  ;;  %v2123_v34 = vsel %vm2052_vm14, %v2113_v59, %v2122_v12 }
  0x71   : > { %v15407_v51 = vcombine.low %v1659_v47, %v1660_v44  ;;  %v1514_v29 = vor.u32 %v1513_v49, %v1509_v13  ;;  %14017 = vmatprep.mubr.msk.bf16.mxu1 %vm1755_vm7, %v2123_v34  ;;  %v2127_v23 = vrot.slane %v2125_v61, 3  ;;  %v2128_v10 = vshll.u32 %v15347_v26, 16 }
  0x72   : > { %v15413_v41 = vsel %vm15043_vm11, %v1505_v52, %v1509_v13  ;;  %v1234_v37 = vrot.slane %v854_v32, %v14970_v20  ;;  %v1524_v21 = vor.u32 %v1523_v5, %v1519_v14  ;;  %v388_v59 = vadd.s32 208, %v14927_v3  ;;  %v15427_v13 = vld [vmem:[#allocation2 + $0x70] sm:$0xf]  ;;  %v15431_v5 = vld [vmem:[#allocation2 + $0x74] sm:$0xf] }
  0x73   : > { %20424 = vst [vmem:[#allocation27_spill] sm:$0xff] %v15413_v41  ;;  %v1515_v40 = vrot.slane %v1514_v29, 4  ;;  %v2130_v9 = vrot.slane %v2128_v10, 4  ;;  %v1241_v47 = vrot.slane %v854_v32, %v14975_v24  ;;  %v12749_v55 = vcombine.low %v15403_v17, %v15405_v30 }
  0x74   : > { %v1525_v19 = vrot.slane %v1524_v21, 4  ;;  %v1527_v61 = vshll.u32 %v1234_v37, 16  ;;  %v580_v54 = vand.u32 15, %v388_v59  ;;  %v1531_v26 = vshrl.u32 %v1234_v37, 16 }
  0x75   : > { %v15422_v52 = vsel %vm15043_vm11, %v1515_v40, %v1519_v14  ;;  %v15424_v46 = vor.u32 %v2130_v9, %v2127_v23  ;;  %v1537_v44 = vshll.u32 %v1241_v47, 16  ;;  %v1541_v57 = vshrl.u32 %v1241_v47, 16  ;;  %13995 = vmatprep.mubr.msk.bf16.mxu0 %vm1755_vm7, %v12749_v55 }
  0x76   : > { %20425 = vst [vmem:[#allocation28_spill] sm:$0xff] %v15422_v52  ;;  %v1661_v16 = vmul.bf16 %v15413_v41, %v15358_v35  ;;  %v1529_v49 = vrot.slane %v1527_v61, 5  ;;  %vm804_vm9 = vcmp.ne.s32.totalorder %v580_v54, 0  ;;  %v1533_v32 = vrot.slane %v1531_v26, 4 }
  0x77   : > { %v2132_v14 = vsel %vm2052_vm14, %v2122_v12, %v15424_v46  ;;  %v836_v34 = vsel %vm804_vm9, 1.0, %v20193_v22  ;;  %v1539_v29 = vrot.slane %v1537_v44, 5  ;;  %v1543_v23 = vrot.slane %v1541_v57, 4 }
  0x78   : > { %v15438_v10 = vsel %vm15043_vm11, %v1525_v19, %v1529_v49  ;;  %v1662_v37 = vmul.bf16 %v15422_v52, %v15366_v4  ;;  %14018 = vmatmul.mubr.msk.bf16.gmra.mxu1 %vm1755_vm7, %v2132_v14  ;;  %v855_v35 = vpack.c.bf16 %v20191_v28, %v836_v34  ;;  %v1534_v21 = vor.u32 %v1533_v32, %v1529_v49 }
  0x79   : > { %20426 = vst [vmem:[#allocation29_spill] sm:$0xff] %v15438_v10  ;;  %v1663_v59 = vmul.bf16 %v15438_v10, %v15370_v0  ;;  %v1544_v12 = vor.u32 %v1543_v23, %v1539_v29  ;;  %v390_v40 = vadd.s32 224, %v14927_v3  ;;  %v12750_v9 = vcombine.low %v15427_v13, %v15431_v5 }
  0x7a   : > { %v1248_v47 = vrot.slane %v855_v35, %v14970_v20  ;;  %v1535_v55 = vrot.slane %v1534_v21, 4  ;;  %v1255_v19 = vrot.slane %v855_v35, %v14975_v24  ;;  %v2134_v4 = vshrl.u32 %v15399_v15, 16 }
  0x7b   : > { %v1545_v61 = vrot.slane %v1544_v12, 4  ;;  %v594_v54 = vand.u32 15, %v390_v40  ;;  %13996 = vmatmul.mubr.msk.bf16.gmra.mxu0 %vm1755_vm7, %v12750_v9  ;;  %v2137_v26 = vshll.u32 %v15399_v15, 16  ;;  %v2143_v0 = vshrl.u32 %v15407_v51, 16 }
  0x7c   : > { %v15457_v44 = vsel %vm15043_vm11, %v1535_v55, %v1539_v29  ;;  %v1547_v57 = vshll.u32 %v1248_v47, 16  ;;  %v1551_v49 = vshrl.u32 %v1248_v47, 16  ;;  %v1557_v32 = vshll.u32 %v1255_v19, 16 }
  0x7d   : > { %20427 = vst [vmem:[#allocation30_spill] sm:$0xff] %v15457_v44  ;;  %v1664_v14 = vmul.bf16 %v15457_v44, %v15403_v17  ;;  %vm806_vm10 = vcmp.ne.s32.totalorder %v594_v54, 0  ;;  %v1561_v34 = vshrl.u32 %v1255_v19, 16  ;;  %v2136_v23 = vrot.slane %v2134_v4, 3 }
  0x7e   : > { %v1549_v35 = vrot.slane %v1547_v57, 5  ;;  %v838_v21 = vsel %vm806_vm10, 1.0, %v20193_v22  ;;  %v1553_v12 = vrot.slane %v1551_v49, 4  ;;  %v1559_v15 = vrot.slane %v1557_v32, 5  ;;  %v15472_v49 = vld [vmem:[#allocation2 + $0x78] sm:$0xf] }
  0x7f   : > { %v12780_v40 = vcombine.low %v1661_v16, %v1662_v37  ;;  %v856_v9 = vpack.c.bf16 %v20191_v28, %v838_v21  ;;  %v1563_v10 = vrot.slane %v1561_v34, 4  ;;  %v2139_v29 = vrot.slane %v2137_v26, 4  ;;  %v15477_v32 = vld [vmem:[#allocation2 + $0x7c] sm:$0xf] }
  0x80   : > { %v15463_v55 = vcombine.low %v1663_v59, %v1664_v14  ;;  %v1554_v47 = vor.u32 %v1553_v12, %v1549_v35  ;;  %v2145_v52 = vrot.slane %v2143_v0, 3  ;;  %v2146_v41 = vshll.u32 %v15407_v51, 16 }
  0x81   : > { %v15468_v17 = vsel %vm15043_vm11, %v1545_v61, %v1549_v35  ;;  %v1262_v19 = vrot.slane %v856_v9, %v14970_v20  ;;  %v1564_v4 = vor.u32 %v1563_v10, %v1559_v15  ;;  %v2140_v54 = vor.u32 %v2139_v29, %v2136_v23  ;;  %v15484_v23 = vld [vmem:[#allocation2 + $0x80] sm:$0xf] }
  0x82   : > { %20428 = vst [vmem:[#allocation31_spill] sm:$0xff] %v15468_v17  ;;  %v1555_v57 = vrot.slane %v1554_v47, 4  ;;  %v2148_v16 = vrot.slane %v2146_v41, 4  ;;  %v392_v37 = vadd.s32 240, %v14927_v3  ;;  %v1269_v59 = vrot.slane %v856_v9, %v14975_v24  ;;  %v15488_v9 = vld [vmem:[#allocation2 + $0x84] sm:$0xf] }
  0x83   : > { %v1565_v26 = vrot.slane %v1564_v4, 4  ;;  %v1567_v0 = vshll.u32 %v1262_v19, 16  ;;  %v2141_v51 = vsel %vm2052_vm14, %v15424_v46, %v2140_v54  ;;  %v1571_v61 = vshrl.u32 %v1262_v19, 16 }
  0x84   : > { %v15481_v10 = vsel %vm15043_vm11, %v1555_v57, %v1559_v15  ;;  %14021 = vmatprep.mubr.msk.bf16.mxu1 %vm1755_vm7, %v2141_v51  ;;  %v2149_v41 = vor.u32 %v2148_v16, %v2145_v52  ;;  %v608_v14 = vand.u32 15, %v392_v37  ;;  %v1577_v34 = vshll.u32 %v1269_v59, 16 }
  0x85   : > { %20429 = vst [vmem:[#allocation32_spill] sm:$0xff] %v15481_v10  ;;  %v1665_v35 = vmul.bf16 %v15468_v17, %v15405_v30  ;;  %v1569_v21 = vrot.slane %v1567_v0, 5  ;;  %v1573_v12 = vrot.slane %v1571_v61, 4  ;;  %v1581_v46 = vshrl.u32 %v1269_v59, 16 }
  0x86   : > { %v1666_v29 = vmul.bf16 %v15481_v10, %v15427_v13  ;;  %v2150_v15 = vsel %vm2052_vm14, %v2140_v54, %v2149_v41  ;;  %vm808_vm12 = vcmp.ne.s32.totalorder %v608_v14, 0  ;;  %v12751_v52 = vcombine.low %v15472_v49, %v15477_v32 }
  0x87   : > { %v15497_v47 = vsel %vm15043_vm11, %v1565_v26, %v1569_v21  ;;  %14022 = vmatmul.mubr.msk.bf16.gmra.mxu1 %vm1755_vm7, %v2150_v15  ;;  %v840_v30 = vsel %vm808_vm12, 1.0, %v20193_v22  ;;  %v1574_v19 = vor.u32 %v1573_v12, %v1569_v21  ;;  %v1579_v4 = vrot.slane %v1577_v34, 5 }
  0x88   : > { %20430 = vst [vmem:[#allocation33_spill] sm:$0xff] %v15497_v47  ;;  %v1667_v57 = vmul.bf16 %v15497_v47, %v15431_v5  ;;  %v857_v13 = vpack.c.bf16 %v20191_v28, %v840_v30  ;;  %v1583_v54 = vrot.slane %v1581_v46, 4  ;;  %13999 = vmatprep.mubr.msk.bf16.mxu0 %vm1755_vm7, %v12751_v52  ;;  %v12752_v16 = vcombine.low %v15484_v23, %v15488_v9 }
  0x89   : > { %v1575_v37 = vrot.slane %v1574_v19, 4  ;;  %v2152_v59 = vshrl.u32 %v12780_v40, 16  ;;  %v2155_v26 = vshll.u32 %v12780_v40, 16  ;;  %v2161_v0 = vshrl.u32 %v15463_v55, 16 }
  0x8a   : > { %v1276_v51 = vrot.slane %v857_v13, %v14970_v20  ;;  %v1584_v61 = vor.u32 %v1583_v54, %v1579_v4  ;;  %v1283_v14 = vrot.slane %v857_v13, %v14975_v24  ;;  %14000 = vmatmul.mubr.msk.bf16.gmra.mxu0 %vm1755_vm7, %v12752_v16  ;;  %v2164_v5 = vshll.u32 %v15463_v55, 16 }
  0x8b   : > { %v15514_v34 = vsel %vm15043_vm11, %v1575_v37, %v1579_v4  ;;  %v2154_v21 = vrot.slane %v2152_v59, 3  ;;  %v2157_v12 = vrot.slane %v2155_v26, 4  ;;  %v2163_v46 = vrot.slane %v2161_v0, 3 }
  0x8c   : > { %20431 = vst [vmem:[#allocation34_spill] sm:$0xff] %v15514_v34  ;;  %v1585_v15 = vrot.slane %v1584_v61, 4  ;;  %v1587_v40 = vshll.u32 %v1276_v51, 16  ;;  %v1668_v52 = vmul.bf16 %v15514_v34, %v15472_v49  ;;  %v1591_v30 = vshrl.u32 %v1276_v51, 16 }
  0x8d   : > { %v1597_v19 = vshll.u32 %v1283_v14, 16  ;;  %v1601_v54 = vshrl.u32 %v1283_v14, 16  ;;  %v2158_v13 = vor.u32 %v2157_v12, %v2154_v21  ;;  %v2166_v28 = vrot.slane %v2164_v5, 4 }
  0x8e   : > { %v12782_v16 = vcombine.low %v1665_v35, %v1666_v29  ;;  %v1589_v22 = vrot.slane %v1587_v40, 5  ;;  %v1593_v55 = vrot.slane %v1591_v30, 4  ;;  %v3860_v4 = vsel %vm1804_vm0, %v15155_v42, 0 }
  0x8f   : > { %v1599_v37 = vrot.slane %v1597_v19, 5  ;;  %v1603_v59 = vrot.slane %v1601_v54, 4  ;;  %v2159_v26 = vsel %vm2052_vm14, %v2149_v41, %v2158_v13  ;;  %v15521_v0 = vor.u32 %v2166_v28, %v2163_v46  ;;  %14072 = vmatpush3.bf16.msra.mxu1 %v3860_v4 }
  0x90   : > { %v15525_v49 = vsel %vm15043_vm11, %v1585_v15, %v1589_v22  ;;  %v1594_v51 = vor.u32 %v1593_v55, %v1589_v22  ;;  %14025 = vmatprep.mubr.msk.bf16.mxu1 %vm1755_vm7, %v2159_v26  ;;  %v363_v35 = vadd.s32 8, %v14927_v3  ;;  %v365_v29 = vadd.s32 24, %v14927_v3 }
  0x91   : > { %20432 = vst [vmem:[#allocation35_spill] sm:$0xff] %v15525_v49  ;;  %v12783_v61 = vcombine.low %v1667_v57, %v1668_v52  ;;  %v1604_v42 = vor.u32 %v1603_v59, %v1599_v37  ;;  %v2168_v14 = vsel %vm2052_vm14, %v2158_v13, %v15521_v0  ;;  %v1669_v28 = vmul.bf16 %v15525_v49, %v15477_v32 }
  0x92   : > { %v1595_v41 = vrot.slane %v1594_v51, 4  ;;  %14026 = vmatmul.mubr.msk.bf16.gmra.mxu1 %vm1755_vm7, %v2168_v14  ;;  %v405_v5 = vand.u32 15, %v363_v35  ;;  %v419_v21 = vand.u32 15, %v365_v29  ;;  %vm2690_vm13 = vsmask.f32 256 }
  0x93   : > { %v15535_v22 = vrot.slane %v1604_v42, 4  ;;  %vm2691_vm15 = vsmask.f32 4368  ;;  %v367_v12 = vadd.s32 40, %v14927_v3  ;;  %v2170_v46 = vshrl.u32 %v12782_v16, 16 }
  0x94   : > { %v15540_v57 = vsel %vm15043_vm11, %v1595_v41, %v1599_v37  ;;  %vm859_vm3 = vcmp.ne.s32.totalorder %v405_v5, 15  ;;  %vm861_vm4 = vcmp.ne.s32.totalorder %v419_v21, 15  ;;  %v20435_v15 = vmov 0.0   ;;  %vm15567_vm5 = vmor %vm2690_vm13, %vm2691_vm15 }
  0x95   : > { %20433 = vst [vmem:[#allocation36_spill] sm:$0xff] %v15535_v22  ;;  %20434 = vst [vmem:[#allocation37_spill] sm:$0xff] %v15540_v57  ;;  %v1670_v32 = vmul.bf16 %v15540_v57, %v15484_v23  ;;  %v891_v40 = vsel %vm859_vm3, 1.0, %v20435_v15  ;;  %v893_v52 = vsel %vm861_vm4, 1.0, %v20435_v15  ;;  %v15548_v30 = vsel %vm1804_vm0, %v15222_v58, 0 }
  0x96   : > { %v15552_v19 = vmul.bf16 %v15535_v22, %v15488_v9  ;;  %v922_v54 = vpack.c.bf16 %v891_v40, %v20436_v11  ;;  %v923_v13 = vpack.c.bf16 %v893_v52, %v20436_v11  ;;  %v433_v55 = vand.u32 15, %v367_v12 }
  0x97   : > { %v15556_v4 = vcombine.low %v1669_v28, %v1670_v32  ;;  %v2172_v23 = vrot.slane %v2170_v46, 3  ;;  %v2173_v37 = vshll.u32 %v12782_v16, 16  ;;  %v2179_v59 = vshrl.u32 %v12783_v61, 16  ;;  %v977_v32 = vld [vmem:[%s14960_s24 + $0x78] sm:$0xf] }
  0x98   : > { %v2472_v26 = vrot.slane %v922_v54, %v14970_v20  ;;  %v2479_v58 = vrot.slane %v922_v54, %v14975_v24  ;;  %v2486_v51 = vrot.slane %v923_v13, %v14970_v20  ;;  %v2493_v9 = vrot.slane %v923_v13, %v14975_v24  ;;  %1009 = vst.msk [vmem:[#allocation2 + $0x88] sm:$0xf] %vm938_vm1, %v977_v32  ;;  %v2417_v13 = vld [vmem:[#allocation2 + $0x8] sm:$0xf] }
  0x99   : > { %vm863_vm11 = vcmp.ne.s32.totalorder %v433_v55, 15  ;;  %v2175_v35 = vrot.slane %v2173_v37, 4  ;;  %v2181_v29 = vrot.slane %v2179_v59, 3  ;;  %v2182_v42 = vshll.u32 %v12783_v61, 16 }
  0x9a   : > { %v2694_v14 = vshrl.u32 %v2472_v26, 16  ;;  %v2697_v41 = vshll.u32 %v2472_v26, 16  ;;  %v2702_v28 = vshrl.u32 %v2479_v58, 16  ;;  %v2705_v5 = vshll.u32 %v2479_v58, 16  ;;  %v2418_v58 = vld [vmem:[#allocation2 + $0xc] sm:$0xf] }
  0x9b   : > { %v2711_v21 = vshrl.u32 %v2486_v51, 16  ;;  %v2714_v16 = vshll.u32 %v2486_v51, 16  ;;  %v2720_v12 = vshrl.u32 %v2493_v9, 16  ;;  %v2723_v46 = vshll.u32 %v2493_v9, 16 }
  0x9c   : > { %v2696_v40 = vrot.slane %v2694_v14, 7  ;;  %v2704_v52 = vrot.slane %v2702_v28, 7  ;;  %v895_v54 = vsel %vm863_vm11, 1.0, %v20435_v15  ;;  %v2176_v22 = vor.u32 %v2175_v35, %v2172_v23  ;;  %v2419_v35 = vld [vmem:[#allocation2 + $0x10] sm:$0xf] }
  0x9d   : > { %v2713_v55 = vrot.slane %v2711_v21, 7  ;;  %v2722_v37 = vrot.slane %v2720_v12, 7  ;;  %v924_v59 = vpack.c.bf16 %v895_v54, %v20436_v11  ;;  %v2184_v26 = vrot.slane %v2182_v42, 4  ;;  %v2420_v28 = vld [vmem:[#allocation2 + $0x14] sm:$0xf] }
  0x9e   : > { %v15572_v51 = vor.u32 %v2697_v41, %v2696_v40  ;;  %v2700_v9 = vrot.slane %v2696_v40, 4  ;;  %v2707_v14 = vor.u32 %v2705_v5, %v2704_v52  ;;  %v2709_v23 = vrot.slane %v2704_v52, 4 }
  0x9f   : > { %v2716_v32 = vor.u32 %v2714_v16, %v2713_v55  ;;  %v2718_v57 = vrot.slane %v2713_v55, 4  ;;  %v2725_v49 = vor.u32 %v2723_v46, %v2722_v37  ;;  %v2727_v34 = vrot.slane %v2722_v37, 4 }
  0xa0   : > { %20439 = vst [vmem:[#allocation38_spill] sm:$0xff] %v15572_v51  ;;  %v15576_v47 = vsel %vm15567_vm5, %v2700_v9, %v2707_v14  ;;  %v3013_v21 = vmul.bf16 %v15572_v51, %v2417_v13  ;;  %vm3131_vm6 = vsmask.f32 7424  ;;  %v2500_v42 = vrot.slane %v924_v59, %v14970_v20 }
  0xa1   : > { %20440 = vst [vmem:[#allocation39_spill] sm:$0xff] %v15576_v47  ;;  %v2507_v41 = vrot.slane %v924_v59, %v14975_v24  ;;  %v15583_v5 = vsel %vm15567_vm5, %v2709_v23, %v2716_v32  ;;  %v15587_v16 = vsel %vm15567_vm5, %v2718_v57, %v2725_v49  ;;  %v3014_v12 = vmul.bf16 %v15576_v47, %v2418_v58 }
  0xa2   : > { %20441 = vst [vmem:[#allocation40_spill] sm:$0xff] %v15583_v5  ;;  %20442 = vst [vmem:[#allocation41_spill] sm:$0xff] %v15587_v16  ;;  %v2177_v46 = vsel %vm2052_vm14, %v15521_v0, %v2176_v22  ;;  %v3015_v40 = vmul.bf16 %v15583_v5, %v2419_v35  ;;  %v3016_v52 = vmul.bf16 %v15587_v16, %v2420_v28  ;;  %v2729_v54 = vshrl.u32 %v2500_v42, 16 }
  0xa3   : > { %v2732_v13 = vshll.u32 %v2500_v42, 16  ;;  %14029 = vmatprep.mubr.msk.bf16.mxu1 %vm1755_vm7, %v2177_v46  ;;  %v12803_v55 = vcombine.low %v3013_v21, %v3014_v12  ;;  %v2738_v37 = vshrl.u32 %v2507_v41, 16  ;;  %v2741_v59 = vshll.u32 %v2507_v41, 16  ;;  %v2422_v46 = vld [vmem:[#allocation2 + $0x1c] sm:$0xf] }
  0xa4   : > { %v15595_v9 = vor.u32 %v2184_v26, %v2181_v29  ;;  %v12804_v49 = vcombine.low %v3015_v40, %v3016_v52  ;;  %v2731_v57 = vrot.slane %v2729_v54, 7  ;;  %v369_v58 = vadd.s32 56, %v14927_v3  ;;  %v2421_v29 = vld [vmem:[#allocation2 + $0x18] sm:$0xf] }
  0xa5   : > { %v371_v14 = vadd.s32 72, %v14927_v3  ;;  %v3133_v0 = vshrl.u32 %v12803_v55, 16  ;;  %v3135_v23 = vshll.u32 %v12803_v55, 16  ;;  %v15599_v35 = vrot.slane %v2738_v37, 7 }
  0xa6   : > { %v2186_v28 = vsel %vm2052_vm14, %v2176_v22, %v15595_v9  ;;  %v15605_v32 = vcombine.low %v15552_v19, %v15552_v19  ;;  %v3140_v21 = vshll.u32 %v12804_v49, 16  ;;  %v2734_v26 = vor.u32 %v2732_v13, %v2731_v57 }
  0xa7   : > { %v2736_v42 = vrot.slane %v2731_v57, 4  ;;  %14030 = vmatmul.mubr.msk.bf16.gmra.mxu1 %vm1755_vm7, %v2186_v28  ;;  %v3137_v41 = vrot.slane %v3135_v23, 1  ;;  %v3144_v12 = vshrl.u32 %v12804_v49, 16  ;;  %v2743_v40 = vor.u32 %v2741_v59, %v15599_v35 }
  0xa8   : > { %v447_v52 = vand.u32 15, %v369_v58  ;;  %v3142_v54 = vrot.slane %v3140_v21, 1  ;;  %v15611_v22 = vsel %vm15567_vm5, %v2727_v34, %v2734_v26  ;;  %v461_v55 = vand.u32 15, %v371_v14 }
  0xa9   : > { %20443 = vst [vmem:[#allocation42_spill] sm:$0xff] %v15611_v22  ;;  %v2188_v19 = vshrl.u32 %v15556_v4, 16  ;;  %v3138_v37 = vor.u32 %v3137_v41, %v3133_v0  ;;  %v15616_v13 = vsel %vm15567_vm5, %v2736_v42, %v2743_v40  ;;  %v3017_v49 = vmul.bf16 %v15611_v22, %v2421_v29  ;;  %v978_v42 = vld [vmem:[%s14960_s24 + $0x7c] sm:$0xf]  ;;  %v12903_v40 = vld [vmem:[%s20175_s1 + $0xa] sm:$0x3] }
  0xaa   : > { %20444 = vst [vmem:[#allocation43_spill] sm:$0xff] %v15616_v13  ;;  %vm865_vm8 = vcmp.ne.s32.totalorder %v447_v52, 15  ;;  %v3018_v59 = vmul.bf16 %v15616_v13, %v2422_v46  ;;  %v2745_v58 = vrot.slane %v15599_v35, 4  ;;  %vm867_vm9 = vcmp.ne.s32.totalorder %v461_v55, 15  ;;  %1010 = vst.msk [vmem:[#allocation2 + $0x8c] sm:$0xf] %vm938_vm1, %v978_v42  ;;  %14722 = vmatprep.subr.msk.bf16.mxu1 %vm1804_vm0, %v12903_v40 }
  0xab   : > { %v897_v57 = vsel %vm865_vm8, 1.0, %v20435_v15  ;;  %v3143_v34 = vsel %vm3131_vm6, %v3138_v37, %v3142_v54  ;;  %v3146_v14 = vor.u32 %v3144_v12, %v3142_v54  ;;  %v899_v23 = vsel %vm867_vm9, 1.0, %v20435_v15  ;;  %v2424_v40 = vld [vmem:[#allocation2 + $0x24] sm:$0xf] }
  0xac   : > { %v925_v0 = vpack.c.bf16 %v897_v57, %v20436_v11  ;;  %14039 = vmatprep.mubr.msk.bf16.mxu0 %vm1755_vm7, %v3143_v34  ;;  %v15626_v28 = vcombine.low %v3017_v49, %v3018_v59  ;;  %v926_v21 = vpack.c.bf16 %v899_v23, %v20436_v11  ;;  %v2190_v29 = vrot.slane %v2188_v19, 3 }
  0xad   : > { %v2191_v26 = vshll.u32 %v15556_v4, 16  ;;  %v2197_v12 = vshrl.u32 %v15605_v32, 16  ;;  %v2200_v46 = vshll.u32 %v15605_v32, 16  ;;  %v373_v55 = vadd.s32 88, %v14927_v3 }
  0xae   : > { %v2514_v35 = vrot.slane %v925_v0, %v14970_v20  ;;  %v2521_v41 = vrot.slane %v925_v0, %v14975_v24  ;;  %v3148_v52 = vshll.u32 %v15626_v28, 16  ;;  %v2528_v54 = vrot.slane %v926_v21, %v14970_v20 }
  0xaf   : > { %v2535_v4 = vrot.slane %v926_v21, %v14975_v24  ;;  %v2193_v22 = vrot.slane %v2191_v26, 4  ;;  %v3152_v21 = vshrl.u32 %v15626_v28, 16  ;;  %v2426_v26 = vld [vmem:[#allocation2 + $0x2c] sm:$0xf] }
  0xb0   : > { %v2747_v19 = vshrl.u32 %v2514_v35, 16  ;;  %v2750_v37 = vshll.u32 %v2514_v35, 16  ;;  %v2756_v49 = vshrl.u32 %v2521_v41, 16  ;;  %v2759_v32 = vshll.u32 %v2521_v41, 16  ;;  %v12937_v35 = vld [vmem:[%s20175_s1 + $0xc] sm:$0x3] }
  0xb1   : > { %v3150_v59 = vrot.slane %v3148_v52, 1  ;;  %v2765_v57 = vshrl.u32 %v2528_v54, 16  ;;  %v2768_v34 = vshll.u32 %v2528_v54, 16  ;;  %v2774_v0 = vshrl.u32 %v2535_v4, 16  ;;  %v2423_v41 = vld [vmem:[#allocation2 + $0x20] sm:$0xf] }
  0xb2   : > { %v2749_v23 = vrot.slane %v2747_v19, 7  ;;  %v2758_v42 = vrot.slane %v2756_v49, 7  ;;  %v2777_v13 = vshll.u32 %v2535_v4, 16 }
  0xb3   : > { %v3151_v16 = vsel %vm3131_vm6, %v3146_v14, %v3150_v59  ;;  %v2767_v5 = vrot.slane %v2765_v57, 7  ;;  %v15646_v47 = vrot.slane %v2774_v0, 7  ;;  %v2425_v14 = vld [vmem:[#allocation2 + $0x28] sm:$0xf]  ;;  %v2194_v0 = vor.u32 %v2193_v22, %v2190_v29 }
  0xb4   : > { %14040 = vmatmul.mubr.msk.bf16.vlgmr.msra.gmra.mxu0 %vm1755_vm7, %v3151_v16  ;;  %v2752_v52 = vor.u32 %v2750_v37, %v2749_v23  ;;  %v2754_v54 = vrot.slane %v2749_v23, 4  ;;  %v2761_v19 = vor.u32 %v2759_v32, %v2758_v42  ;;  %v2763_v4 = vrot.slane %v2758_v42, 4 }
  0xb5   : > { %14106 = vmatpush3.bf16.msra.mxu0 %v15548_v30  ;;  %v2770_v28 = vor.u32 %v2768_v34, %v2767_v5  ;;  %v2772_v49 = vrot.slane %v2767_v5, 4  ;;  %v2779_v57 = vor.u32 %v2777_v13, %v15646_v47  ;;  %v2199_v37 = vrot.slane %v2197_v12, 3  ;;  %v3508_v13 = vld [vmem:[#allocation2 + $0xc] sm:$0x8] }
  0xb6   : > { %v15656_v51 = vsel %vm15567_vm5, %v2745_v58, %v2752_v52  ;;  %v15660_v16 = vsel %vm15567_vm5, %v2754_v54, %v2761_v19  ;;  %v2202_v32 = vrot.slane %v2200_v46, 4  ;;  %14723 = vmatprep.subr.msk.bf16.mxu0 %vm1804_vm0, %v12937_v35  ;;  %v3509_v58 = vld [vmem:[#allocation2 + $0x10] sm:$0xf]  ;;  %v2195_v46 = vsel %vm2052_vm14, %v15595_v9, %v2194_v0  ;;  %v3510_v52 = vld [vmem:[#allocation2 + $0x14] sm:$0xf] }
  0xb7   : > { %20445 = vst [vmem:[#allocation44_spill] sm:$0xff] %v15656_v51  ;;  %20446 = vst [vmem:[#allocation45_spill] sm:$0xff] %v15660_v16  ;;  %v3019_v30 = vmul.bf16 %v15656_v51, %v2423_v41  ;;  %v3020_v34 = vmul.bf16 %v15660_v16, %v2424_v40  ;;  %v15667_v5 = vsel %vm15567_vm5, %v2763_v4, %v2770_v28  ;;  %14033 = vmatprep.mubr.msk.bf16.mxu1 %vm1755_vm7, %v2195_v46  ;;  %v15682_v4 = vld [vmem:[#allocation2 + $0x18] sm:$0xf] }
  0xb8   : > { %20447 = vst [vmem:[#allocation46_spill] sm:$0xff] %v15667_v5  ;;  %v15671_v22 = vsel %vm15567_vm5, %v2772_v49, %v2779_v57  ;;  %v3021_v29 = vmul.bf16 %v15667_v5, %v2425_v14  ;;  %v2203_v23 = vor.u32 %v2202_v32, %v2199_v37  ;;  %v3154_v35 = vor.u32 %v3152_v21, %v3150_v59  ;;  %v15692_v32 = vld [vmem:[#allocation2 + $0x1c] sm:$0xf] }
  0xb9   : > { %20448 = vst [vmem:[#allocation47_spill] sm:$0xff] %v15671_v22  ;;  %v3022_v12 = vmul.bf16 %v15671_v22, %v2426_v26  ;;  %v12806_v42 = vcombine.low %v3019_v30, %v3020_v34  ;;  %v475_v41 = vand.u32 15, %v373_v55  ;;  %v375_v40 = vadd.s32 104, %v14927_v3 }
  0xba   : > { %v2204_v19 = vsel %vm2052_vm14, %v2194_v0, %v2203_v23  ;;  %v3541_v14 = vmul.bf16 %v3508_v13, %v15029_v60  ;;  %v3542_v26 = vmul.bf16 %v3509_v58, %v15056_v31  ;;  %v2781_v49 = vrot.slane %v15646_v47, 4 }
  0xbb   : > { %v15679_v54 = vcombine.low %v3021_v29, %v3022_v12  ;;  %v3156_v9 = vshll.u32 %v12806_v42, 16  ;;  %v3160_v28 = vshrl.u32 %v12806_v42, 16  ;;  %14034 = vmatmul.mubr.msk.bf16.gmra.mxu1 %vm1755_vm7, %v2204_v19  ;;  %vm869_vm1 = vcmp.ne.s32.totalorder %v475_v41, 15 }
  0xbc   : > { %v489_v59 = vand.u32 15, %v375_v40  ;;  %v901_v21 = vsel %vm869_vm1, 1.0, %v20435_v15  ;;  %v3543_v57 = vmul.bf16 %v3510_v52, %v15065_v39  ;;  %v3544_v30 = vmul.bf16 %v15682_v4, %v15075_v45 }
  0xbd   : > { %v3164_v55 = vshll.u32 %v15679_v54, 16  ;;  %v3158_v0 = vrot.slane %v3156_v9, 1  ;;  %v927_v37 = vpack.c.bf16 %v901_v21, %v20436_v11  ;;  %v3168_v13 = vshrl.u32 %v15679_v54, 16 }
  0xbe   : > { %vm871_vm10 = vcmp.ne.s32.totalorder %v489_v59, 15  ;;  %v12837_v29 = vcombine.low %v3541_v14, %v3542_v26  ;;  %v3545_v41 = vmul.bf16 %v15692_v32, %v15090_v53  ;;  %v12838_v40 = vcombine.low %v3543_v57, %v3544_v30  ;;  %v2428_v53 = vld [vmem:[#allocation2 + $0x34] sm:$0xf] }
  0xbf   : > { %v3166_v34 = vrot.slane %v3164_v55, 1  ;;  %v903_v58 = vsel %vm871_vm10, 1.0, %v20435_v15  ;;  %v3159_v12 = vsel %vm3131_vm6, %v3154_v35, %v3158_v0  ;;  %v3162_v47 = vor.u32 %v3160_v28, %v3158_v0 }
  0xc0   : > { %v2542_v46 = vrot.slane %v927_v37, %v14970_v20  ;;  %v2549_v23 = vrot.slane %v927_v37, %v14975_v24  ;;  %14043 = vmatprep.mubr.msk.bf16.mxu0 %vm1755_vm7, %v3159_v12  ;;  %v928_v42 = vpack.c.bf16 %v903_v58, %v20436_v11  ;;  %v3660_v52 = vshrl.u32 %v12837_v29, 16 }
  0xc1   : > { %v3167_v54 = vsel %vm3131_vm6, %v3162_v47, %v3166_v34  ;;  %v3663_v0 = vshll.u32 %v12837_v29, 16  ;;  %v3668_v37 = vshrl.u32 %v12838_v40, 16  ;;  %v2427_v47 = vld [vmem:[#allocation2 + $0x30] sm:$0xf] }
  0xc2   : > { %v2783_v19 = vshrl.u32 %v2542_v46, 16  ;;  %v2786_v14 = vshll.u32 %v2542_v46, 16  ;;  %v2792_v26 = vshrl.u32 %v2549_v23, 16  ;;  %14044 = vmatmul.mubr.msk.bf16.gmra.mxu0 %vm1755_vm7, %v3167_v54  ;;  %v2795_v35 = vshll.u32 %v2549_v23, 16 }
  0xc3   : > { %v2556_v9 = vrot.slane %v928_v42, %v14970_v20  ;;  %v2563_v28 = vrot.slane %v928_v42, %v14975_v24  ;;  %v3662_v59 = vrot.slane %v3660_v52, 3  ;;  %v3665_v60 = vrot.slane %v3663_v0, 4  ;;  %v3513_v52 = vld [vmem:[#allocation2 + $0x20] sm:$0xf]  ;;  %v2430_v0 = vld [vmem:[#allocation2 + $0x3c] sm:$0xf] }
  0xc4   : > { %v2785_v55 = vrot.slane %v2783_v19, 7  ;;  %v2794_v21 = vrot.slane %v2792_v26, 7  ;;  %v3670_v42 = vrot.slane %v3668_v37, 3  ;;  %v3671_v26 = vshll.u32 %v12838_v40, 16 }
  0xc5   : > { %v2801_v58 = vshrl.u32 %v2556_v9, 16  ;;  %v2804_v57 = vshll.u32 %v2556_v9, 16  ;;  %v2810_v30 = vshrl.u32 %v2563_v28, 16  ;;  %v2813_v12 = vshll.u32 %v2563_v28, 16  ;;  %v2429_v28 = vld [vmem:[#allocation2 + $0x38] sm:$0xf] }
  0xc6   : > { %v2788_v46 = vor.u32 %v2786_v14, %v2785_v55  ;;  %v2790_v45 = vrot.slane %v2785_v55, 4  ;;  %v2797_v39 = vor.u32 %v2795_v35, %v2794_v21  ;;  %v2799_v54 = vrot.slane %v2794_v21, 4 }
  0xc7   : > { %v2803_v23 = vrot.slane %v2801_v58, 7  ;;  %v15709_v31 = vrot.slane %v2810_v30, 7  ;;  %v3673_v58 = vrot.slane %v3671_v26, 4  ;;  %v3546_v30 = vmul.bf16 %v3513_v52, %v15124_v18 }
  0xc8   : > { %v15713_v29 = vsel %vm15567_vm5, %v2781_v49, %v2788_v46  ;;  %v15717_v19 = vsel %vm15567_vm5, %v2790_v45, %v2797_v39  ;;  %v3666_v49 = vor.u32 %v3665_v60, %v3662_v59  ;;  %v3170_v45 = vor.u32 %v3168_v13, %v3166_v34  ;;  %v3514_v60 = vld [vmem:[#allocation2 + $0x24] sm:$0xf] }
  0xc9   : > { %20449 = vst [vmem:[#allocation48_spill] sm:$0xff] %v15713_v29  ;;  %20450 = vst [vmem:[#allocation49_spill] sm:$0xff] %v15717_v19  ;;  %v3023_v35 = vmul.bf16 %v15713_v29, %v2427_v47  ;;  %v3024_v9 = vmul.bf16 %v15717_v19, %v2428_v53  ;;  %v2806_v55 = vor.u32 %v2804_v57, %v2803_v23  ;;  %v2808_v21 = vrot.slane %v2803_v23, 4 }
  0xca   : > { %v2815_v37 = vor.u32 %v2813_v12, %v15709_v31  ;;  %v377_v47 = vadd.s32 120, %v14927_v3  ;;  %v3674_v46 = vor.u32 %v3673_v58, %v3670_v42  ;;  %v12839_v12 = vcombine.low %v3545_v41, %v3546_v30  ;;  %v3515_v42 = vld [vmem:[#allocation2 + $0x28] sm:$0xf] }
  0xcb   : > { %v12808_v39 = vcombine.low %v3023_v35, %v3024_v9  ;;  %v15727_v40 = vsel %vm15567_vm5, %v2799_v54, %v2806_v55  ;;  %v379_v35 = vadd.s32 136, %v14927_v3  ;;  %v3547_v41 = vmul.bf16 %v3514_v60, %v15137_v36 }
  0xcc   : > { %20451 = vst [vmem:[#allocation50_spill] sm:$0xff] %v15727_v40  ;;  %v15732_v53 = vsel %vm15567_vm5, %v2808_v21, %v2815_v37  ;;  %v3025_v57 = vmul.bf16 %v15727_v40, %v2429_v28  ;;  %v503_v34 = vand.u32 15, %v377_v47  ;;  %v3675_v13 = vsel %vm2052_vm14, %v3666_v49, %v3674_v46 }
  0xcd   : > { %20452 = vst [vmem:[#allocation51_spill] sm:$0xff] %v15732_v53  ;;  %v3172_v59 = vshll.u32 %v12808_v39, 16  ;;  %v3026_v23 = vmul.bf16 %v15732_v53, %v2430_v0  ;;  %v3176_v52 = vshrl.u32 %v12808_v39, 16  ;;  %v3677_v54 = vshrl.u32 %v12839_v12, 16  ;;  %14073 = vmatprep.mubr.msk.bf16.mxu1 %vm1755_vm7, %v3675_v13 }
  0xce   : > { %v3680_v26 = vshll.u32 %v12839_v12, 16  ;;  %vm873_vm12 = vcmp.ne.s32.totalorder %v503_v34, 15  ;;  %v517_v37 = vand.u32 15, %v379_v35  ;;  %v3548_v12 = vmul.bf16 %v3515_v42, %v15163_v1 }
  0xcf   : > { %v3174_v9 = vrot.slane %v3172_v59, 1  ;;  %v15738_v55 = vcombine.low %v3025_v57, %v3026_v23  ;;  %v3679_v28 = vrot.slane %v3677_v54, 3  ;;  %v905_v0 = vsel %vm873_vm12, 1.0, %v20435_v15 }
  0xd0   : > { %v3682_v21 = vrot.slane %v3680_v26, 4  ;;  %v929_v39 = vpack.c.bf16 %v905_v0, %v20436_v11  ;;  %v2817_v57 = vrot.slane %v15709_v31, 4  ;;  %vm875_vm13 = vcmp.ne.s32.totalorder %v517_v37, 15 }
  0xd1   : > { %v3175_v49 = vsel %vm3131_vm6, %v3170_v45, %v3174_v9  ;;  %v3178_v58 = vor.u32 %v3176_v52, %v3174_v9  ;;  %v3180_v30 = vshll.u32 %v15738_v55, 16  ;;  %v907_v45 = vsel %vm875_vm13, 1.0, %v20435_v15  ;;  %v3516_v52 = vld [vmem:[#allocation2 + $0x2c] sm:$0xf] }
  0xd2   : > { %14047 = vmatprep.mubr.msk.bf16.mxu0 %vm1755_vm7, %v3175_v49  ;;  %v15747_v47 = vor.u32 %v3682_v21, %v3679_v28  ;;  %v2570_v59 = vrot.slane %v929_v39, %v14970_v20  ;;  %v2577_v23 = vrot.slane %v929_v39, %v14975_v24  ;;  %v3184_v13 = vshrl.u32 %v15738_v55, 16 }
  0xd3   : > { %v3182_v60 = vrot.slane %v3180_v30, 1  ;;  %v930_v54 = vpack.c.bf16 %v907_v45, %v20436_v11  ;;  %v12840_v26 = vcombine.low %v3547_v41, %v3548_v12  ;;  %v15764_v45 = vld [vmem:[#allocation2 + $0x30] sm:$0xf] }
  0xd4   : > { %v3684_v34 = vsel %vm2052_vm14, %v3674_v46, %v15747_v47  ;;  %v2819_v35 = vshrl.u32 %v2570_v59, 16  ;;  %v2822_v9 = vshll.u32 %v2570_v59, 16  ;;  %v2828_v42 = vshrl.u32 %v2577_v23, 16  ;;  %v2431_v59 = vld [vmem:[#allocation2 + $0x40] sm:$0xf] }
  0xd5   : > { %v3183_v31 = vsel %vm3131_vm6, %v3178_v58, %v3182_v60  ;;  %14074 = vmatmul.mubr.msk.bf16.vlgmr.msra.gmra.mxu1 %vm1755_vm7, %v3684_v34  ;;  %v2831_v28 = vshll.u32 %v2577_v23, 16  ;;  %v2584_v21 = vrot.slane %v930_v54, %v14970_v20  ;;  %v2591_v0 = vrot.slane %v930_v54, %v14975_v24  ;;  %v2432_v34 = vld [vmem:[#allocation2 + $0x44] sm:$0xf] }
  0xd6   : > { %14048 = vmatmul.mubr.msk.bf16.gmra.mxu0 %vm1755_vm7, %v3183_v31  ;;  %v3549_v46 = vmul.bf16 %v3516_v52, %v15167_v2  ;;  %v2821_v55 = vrot.slane %v2819_v35, 7  ;;  %v2830_v37 = vrot.slane %v2828_v42, 7  ;;  %v3686_v49 = vshrl.u32 %v12840_v26, 16 }
  0xd7   : > { %v3689_v41 = vshll.u32 %v12840_v26, 16  ;;  %v2837_v30 = vshrl.u32 %v2584_v21, 16  ;;  %v2840_v58 = vshll.u32 %v2584_v21, 16  ;;  %v2846_v39 = vshrl.u32 %v2591_v0, 16 }
  0xd8   : > { %v2849_v12 = vshll.u32 %v2591_v0, 16  ;;  %v2824_v31 = vor.u32 %v2822_v9, %v2821_v55  ;;  %v2826_v23 = vrot.slane %v2821_v55, 4  ;;  %v2833_v14 = vor.u32 %v2831_v28, %v2830_v37  ;;  %v2433_v55 = vld [vmem:[#allocation2 + $0x48] sm:$0xf] }
  0xd9   : > { %v2835_v1 = vrot.slane %v2830_v37, 4  ;;  %v2839_v36 = vrot.slane %v2837_v30, 7  ;;  %v15766_v54 = vrot.slane %v2846_v39, 7  ;;  %v3688_v52 = vrot.slane %v3686_v49, 3 }
  0xda   : > { %v3691_v35 = vrot.slane %v3689_v41, 4  ;;  %v15770_v26 = vsel %vm15567_vm5, %v2817_v57, %v2824_v31  ;;  %v15774_v42 = vsel %vm15567_vm5, %v2826_v23, %v2833_v14  ;;  %v3550_v21 = vmul.bf16 %v15764_v45, %v15202_v38  ;;  %v2434_v41 = vld [vmem:[#allocation2 + $0x4c] sm:$0xf] }
  0xdb   : > { %20453 = vst [vmem:[#allocation52_spill] sm:$0xff] %v15770_v26  ;;  %20454 = vst [vmem:[#allocation53_spill] sm:$0xff] %v15774_v42  ;;  %v381_v9 = vadd.s32 152, %v14927_v3  ;;  %v3027_v28 = vmul.bf16 %v15770_v26, %v2431_v59  ;;  %v3028_v0 = vmul.bf16 %v15774_v42, %v2432_v34  ;;  %v2842_v37 = vor.u32 %v2840_v58, %v2839_v36  ;;  %v15787_v59 = vld [vmem:[#allocation2 + $0x34] sm:$0xf] }
  0xdc   : > { %v2844_v49 = vrot.slane %v2839_v36, 4  ;;  %v2851_v57 = vor.u32 %v2849_v12, %v15766_v54  ;;  %v3692_v30 = vor.u32 %v3691_v35, %v3688_v52  ;;  %v12841_v39 = vcombine.low %v3549_v46, %v3550_v21  ;;  %v15798_v52 = vld [vmem:[#allocation2 + $0x38] sm:$0xf] }
  0xdd   : > { %v531_v31 = vand.u32 15, %v381_v9  ;;  %v12810_v14 = vcombine.low %v3027_v28, %v3028_v0  ;;  %v3186_v23 = vor.u32 %v3184_v13, %v3182_v60  ;;  %v15784_v38 = vsel %vm15567_vm5, %v2835_v1, %v2842_v37  ;;  %v15805_v37 = vld [vmem:[#allocation2 + $0x3c] sm:$0xf] }
  0xde   : > { %20455 = vst [vmem:[#allocation54_spill] sm:$0xff] %v15784_v38  ;;  %v383_v2 = vadd.s32 168, %v14927_v3  ;;  %v15791_v58 = vsel %vm15567_vm5, %v2844_v49, %v2851_v57  ;;  %v3029_v36 = vmul.bf16 %v15784_v38, %v2433_v55  ;;  %v3693_v46 = vsel %vm2052_vm14, %v15747_v47, %v3692_v30 }
  0xdf   : > { %20456 = vst [vmem:[#allocation55_spill] sm:$0xff] %v15791_v58  ;;  %v3695_v12 = vshrl.u32 %v12841_v39, 16  ;;  %v3188_v34 = vshll.u32 %v12810_v14, 16  ;;  %v3030_v60 = vmul.bf16 %v15791_v58, %v2434_v41  ;;  %v3192_v13 = vshrl.u32 %v12810_v14, 16  ;;  %14077 = vmatprep.mubr.msk.bf16.mxu1 %vm1755_vm7, %v3693_v46 }
  0xe0   : > { %v3698_v1 = vshll.u32 %v12841_v39, 16  ;;  %vm877_vm15 = vcmp.ne.s32.totalorder %v531_v31, 15  ;;  %v545_v21 = vand.u32 15, %v383_v2  ;;  %v3551_v9 = vmul.bf16 %v15787_v59, %v15208_v43 }
  0xe1   : > { %v3697_v35 = vrot.slane %v3695_v12, 3  ;;  %v3190_v28 = vrot.slane %v3188_v34, 1  ;;  %v15802_v0 = vcombine.low %v3029_v36, %v3030_v60  ;;  %v909_v55 = vsel %vm877_vm15, 1.0, %v20435_v15 }
  0xe2   : > { %v3700_v47 = vrot.slane %v3698_v1, 4  ;;  %v931_v49 = vpack.c.bf16 %v909_v55, %v20436_v11  ;;  %v2853_v41 = vrot.slane %v15766_v54, 4  ;;  %vm879_vm3 = vcmp.ne.s32.totalorder %v545_v21, 15 }
  0xe3   : > { %v3552_v57 = vmul.bf16 %v15798_v52, %v15231_v62  ;;  %v3191_v2 = vsel %vm3131_vm6, %v3186_v23, %v3190_v28  ;;  %v3194_v39 = vor.u32 %v3192_v13, %v3190_v28  ;;  %v3196_v31 = vshll.u32 %v15802_v0, 16  ;;  %v15827_v62 = vld [vmem:[#allocation2 + $0x40] sm:$0xf] }
  0xe4   : > { %v3701_v14 = vor.u32 %v3700_v47, %v3697_v35  ;;  %14051 = vmatprep.mubr.msk.bf16.mxu0 %vm1755_vm7, %v3191_v2  ;;  %v2598_v36 = vrot.slane %v931_v49, %v14970_v20  ;;  %v2605_v46 = vrot.slane %v931_v49, %v14975_v24  ;;  %v911_v12 = vsel %vm879_vm3, 1.0, %v20435_v15  ;;  %20457 = vst [vmem:[#allocation56_spill] sm:$0xff] %v15827_v62 }
  0xe5   : > { %v3553_v54 = vmul.bf16 %v15805_v37, %v15251_v33  ;;  %v3198_v34 = vrot.slane %v3196_v31, 1  ;;  %v932_v23 = vpack.c.bf16 %v911_v12, %v20436_v11  ;;  %v12842_v13 = vcombine.low %v3551_v9, %v3552_v57 }
  0xe6   : > { %v3702_v60 = vsel %vm2052_vm14, %v3692_v30, %v3701_v14  ;;  %v2855_v1 = vshrl.u32 %v2598_v36, 16  ;;  %v2858_v35 = vshll.u32 %v2598_v36, 16  ;;  %v2864_v21 = vshrl.u32 %v2605_v46, 16 }
  0xe7   : > { %14078 = vmatmul.mubr.msk.bf16.gmra.mxu1 %vm1755_vm7, %v3702_v60  ;;  %v2867_v28 = vshll.u32 %v2605_v46, 16  ;;  %v3199_v47 = vsel %vm3131_vm6, %v3194_v39, %v3198_v34  ;;  %v3200_v55 = vshrl.u32 %v15802_v0, 16  ;;  %v2612_v49 = vrot.slane %v932_v23, %v14970_v20  ;;  %v2435_v46 = vld [vmem:[#allocation2 + $0x50] sm:$0xf]  ;;  %v2436_v39 = vld [vmem:[#allocation2 + $0x54] sm:$0xf] }
  0xe8   : > { %v2619_v2 = vrot.slane %v932_v23, %v14975_v24  ;;  %14052 = vmatmul.mubr.msk.bf16.gmra.mxu0 %vm1755_vm7, %v3199_v47  ;;  %v2857_v30 = vrot.slane %v2855_v1, 7  ;;  %v2866_v31 = vrot.slane %v2864_v21, 7  ;;  %v3704_v12 = vshrl.u32 %v12842_v13, 16 }
  0xe9   : > { %v3707_v9 = vshll.u32 %v12842_v13, 16  ;;  %v2873_v57 = vshrl.u32 %v2612_v49, 16  ;;  %v2876_v60 = vshll.u32 %v2612_v49, 16  ;;  %v3554_v49 = vmul.bf16 %v15827_v62, %v15276_v63 }
  0xea   : > { %v2882_v33 = vshrl.u32 %v2619_v2, 16  ;;  %v2885_v36 = vshll.u32 %v2619_v2, 16  ;;  %v2860_v43 = vor.u32 %v2858_v35, %v2857_v30  ;;  %v2862_v0 = vrot.slane %v2857_v30, 4  ;;  %v2437_v2 = vld [vmem:[#allocation2 + $0x58] sm:$0xf] }
  0xeb   : > { %v2869_v18 = vor.u32 %v2867_v28, %v2866_v31  ;;  %v2871_v58 = vrot.slane %v2866_v31, 4  ;;  %v2875_v38 = vrot.slane %v2873_v57, 7  ;;  %v3706_v47 = vrot.slane %v3704_v12, 3  ;;  %v2438_v12 = vld [vmem:[#allocation2 + $0x5c] sm:$0xf] }
  0xec   : > { %v15829_v23 = vrot.slane %v2882_v33, 7  ;;  %v3709_v1 = vrot.slane %v3707_v9, 4  ;;  %v15833_v13 = vsel %vm15567_vm5, %v2853_v41, %v2860_v43  ;;  %v385_v35 = vadd.s32 184, %v14927_v3 }
  0xed   : > { %20458 = vst [vmem:[#allocation57_spill] sm:$0xff] %v15833_v13  ;;  %v15837_v21 = vsel %vm15567_vm5, %v2862_v0, %v2869_v18  ;;  %v3031_v28 = vmul.bf16 %v15833_v13, %v2435_v46  ;;  %v2878_v30 = vor.u32 %v2876_v60, %v2875_v38  ;;  %v2880_v31 = vrot.slane %v2875_v38, 4  ;;  %v15850_v46 = vld [vmem:[#allocation2 + $0x44] sm:$0xf] }
  0xee   : > { %20459 = vst [vmem:[#allocation58_spill] sm:$0xff] %v15837_v21  ;;  %v3032_v33 = vmul.bf16 %v15837_v21, %v2436_v39  ;;  %v2887_v43 = vor.u32 %v2885_v36, %v15829_v23  ;;  %v3710_v41 = vor.u32 %v3709_v1, %v3706_v47  ;;  %v12843_v9 = vcombine.low %v3553_v54, %v3554_v49  ;;  %v15860_v47 = vld [vmem:[#allocation2 + $0x48] sm:$0xf] }
  0xef   : > { %v559_v57 = vand.u32 15, %v385_v35  ;;  %v3202_v0 = vor.u32 %v3200_v55, %v3198_v34  ;;  %v15847_v63 = vsel %vm15567_vm5, %v2871_v58, %v2878_v30  ;;  %v387_v62 = vadd.s32 200, %v14927_v3  ;;  %v15867_v30 = vld [vmem:[#allocation2 + $0x4c] sm:$0xf] }
  0xf0   : > { %v12812_v18 = vcombine.low %v3031_v28, %v3032_v33  ;;  %20460 = vst [vmem:[#allocation59_spill] sm:$0xff] %v15847_v63  ;;  %v15854_v60 = vsel %vm15567_vm5, %v2880_v31, %v2887_v43  ;;  %v3033_v38 = vmul.bf16 %v15847_v63, %v2437_v2  ;;  %v3711_v36 = vsel %vm2052_vm14, %v3701_v14, %v3710_v41 }
  0xf1   : > { %20461 = vst [vmem:[#allocation60_spill] sm:$0xff] %v15854_v60  ;;  %v3713_v54 = vshrl.u32 %v12843_v9, 16  ;;  %v3034_v34 = vmul.bf16 %v15854_v60, %v2438_v12  ;;  %14081 = vmatprep.mubr.msk.bf16.mxu1 %vm1755_vm7, %v3711_v36  ;;  %v3716_v58 = vshll.u32 %v12843_v9, 16  ;;  %vm881_vm4 = vcmp.ne.s32.totalorder %v559_v57, 15 }
  0xf2   : > { %v3204_v39 = vshll.u32 %v12812_v18, 16  ;;  %v3208_v55 = vshrl.u32 %v12812_v18, 16  ;;  %v573_v49 = vand.u32 15, %v387_v62  ;;  %v3555_v35 = vmul.bf16 %v15850_v46, %v15295_v48 }
  0xf3   : > { %v3715_v1 = vrot.slane %v3713_v54, 3  ;;  %v15864_v33 = vcombine.low %v3033_v38, %v3034_v34  ;;  %v3718_v14 = vrot.slane %v3716_v58, 4  ;;  %v913_v2 = vsel %vm881_vm4, 1.0, %v20435_v15  ;;  %v15877_v38 = vpop.f32.mrf.mxu0 }
  0xf4   : > { %v3206_v28 = vrot.slane %v3204_v39, 1  ;;  %v933_v31 = vpack.c.bf16 %v913_v2, %v20436_v11  ;;  %v2889_v12 = vrot.slane %v15829_v23, 4  ;;  %vm883_vm11 = vcmp.ne.s32.totalorder %v573_v49, 15  ;;  %20462 = vst [vmem:[#allocation61_spill] sm:$0xff] %v15877_v38 }
  0xf5   : > { %v3556_v43 = vmul.bf16 %v15860_v47, %v15306_v27  ;;  %v3212_v57 = vshll.u32 %v15864_v33, 16  ;;  %v15875_v18 = vor.u32 %v3718_v14, %v3715_v1  ;;  %v915_v23 = vsel %vm883_vm11, 1.0, %v20435_v15  ;;  %v15893_v38 = vpop.f32.mrf.mxu0  ;;  %v15896_v27 = vld [vmem:[#allocation2 + $0x50] sm:$0xf] }
  0xf6   : > { %v3207_v62 = vsel %vm3131_vm6, %v3202_v0, %v3206_v28  ;;  %v3210_v9 = vor.u32 %v3208_v55, %v3206_v28  ;;  %v2626_v36 = vrot.slane %v933_v31, %v14970_v20  ;;  %v2633_v54 = vrot.slane %v933_v31, %v14975_v24  ;;  %20463 = vst [vmem:[#allocation62_spill] sm:$0xff] %v15893_v38 }
  0xf7   : > { %14055 = vmatprep.mubr.msk.bf16.mxu0 %vm1755_vm7, %v3207_v62  ;;  %v3557_v39 = vmul.bf16 %v15867_v30, %v15318_v50  ;;  %v3214_v34 = vrot.slane %v3212_v57, 1  ;;  %v3720_v0 = vsel %vm2052_vm14, %v3710_v41, %v15875_v18  ;;  %v934_v55 = vpack.c.bf16 %v915_v23, %v20436_v11 }
  0xf8   : > { %v12844_v58 = vcombine.low %v3555_v35, %v3556_v43  ;;  %14082 = vmatmul.mubr.msk.bf16.gmra.mxu1 %vm1755_vm7, %v3720_v0  ;;  %v2891_v1 = vshrl.u32 %v2626_v36, 16  ;;  %v2894_v49 = vshll.u32 %v2626_v36, 16  ;;  %v2900_v28 = vshrl.u32 %v2633_v54, 16 }
  0xf9   : > { %v2903_v14 = vshll.u32 %v2633_v54, 16  ;;  %v3215_v2 = vsel %vm3131_vm6, %v3210_v9, %v3214_v34  ;;  %v3216_v31 = vshrl.u32 %v15864_v33, 16  ;;  %v2640_v62 = vrot.slane %v934_v55, %v14970_v20  ;;  %v2439_v9 = vld [vmem:[#allocation2 + $0x60] sm:$0xf]  ;;  %v2440_v33 = vld [vmem:[#allocation2 + $0x64] sm:$0xf] }
  0xfa   : > { %v2647_v57 = vrot.slane %v934_v55, %v14975_v24  ;;  %14056 = vmatmul.mubr.msk.bf16.gmra.mxu0 %vm1755_vm7, %v3215_v2  ;;  %v2893_v41 = vrot.slane %v2891_v1, 7  ;;  %v2902_v35 = vrot.slane %v2900_v28, 7  ;;  %v3722_v43 = vshrl.u32 %v12844_v58, 16  ;;  %v15900_v28 = vpop.f32.mrf.mxu0 }
  0xfb   : > { %v3725_v23 = vshll.u32 %v12844_v58, 16  ;;  %v2909_v0 = vshrl.u32 %v2640_v62, 16  ;;  %v2912_v36 = vshll.u32 %v2640_v62, 16  ;;  %20464 = vst [vmem:[#allocation63_spill] sm:$0xff] %v15900_v28  ;;  %v391_v13 = vadd.s32 232, %v14927_v3 }
  0xfc   : > { %v2918_v50 = vshrl.u32 %v2647_v57, 16  ;;  %v2921_v54 = vshll.u32 %v2647_v57, 16  ;;  %v2896_v48 = vor.u32 %v2894_v49, %v2893_v41  ;;  %v2898_v60 = vrot.slane %v2893_v41, 4  ;;  %v2441_v41 = vld [vmem:[#allocation2 + $0x68] sm:$0xf] }
  0xfd   : > { %v2905_v63 = vor.u32 %v2903_v14, %v2902_v35  ;;  %v2907_v55 = vrot.slane %v2902_v35, 4  ;;  %v2911_v21 = vrot.slane %v2909_v0, 7  ;;  %v3724_v2 = vrot.slane %v3722_v43, 3 }
  0xfe   : > { %v15898_v38 = vrot.slane %v2918_v50, 7  ;;  %v3727_v1 = vrot.slane %v3725_v23, 4  ;;  %v15904_v58 = vsel %vm15567_vm5, %v2889_v12, %v2896_v48  ;;  %v3558_v49 = vmul.bf16 %v15896_v27, %v15338_v8  ;;  %v2442_v23 = vld [vmem:[#allocation2 + $0x6c] sm:$0xf] }
  0xff   : > { %20465 = vst [vmem:[#allocation64_spill] sm:$0xff] %v15904_v58  ;;  %v15908_v62 = vsel %vm15567_vm5, %v2898_v60, %v2905_v63  ;;  %v389_v14 = vadd.s32 216, %v14927_v3  ;;  %v3035_v50 = vmul.bf16 %v15904_v58, %v2439_v9  ;;  %v2914_v35 = vor.u32 %v2912_v36, %v2911_v21  ;;  %v15921_v9 = vld [vmem:[#allocation2 + $0x54] sm:$0xf] }
 0x100   : > { %20466 = vst [vmem:[#allocation65_spill] sm:$0xff] %v15908_v62  ;;  %v3036_v57 = vmul.bf16 %v15908_v62, %v2440_v33  ;;  %v2916_v43 = vrot.slane %v2911_v21, 4  ;;  %v2923_v48 = vor.u32 %v2921_v54, %v15898_v38  ;;  %v3728_v12 = vor.u32 %v3727_v1, %v3724_v2  ;;  %v15923_v33 = vpop.f32.mrf.mxu0  ;;  %v15934_v1 = vld [vmem:[#allocation2 + $0x58] sm:$0xf] }
 0x101   : > { %v12845_v0 = vcombine.low %v3557_v39, %v3558_v49  ;;  %v587_v28 = vand.u32 15, %v389_v14  ;;  %v3218_v60 = vor.u32 %v3216_v31, %v3214_v34  ;;  %v15918_v8 = vsel %vm15567_vm5, %v2907_v55, %v2914_v35  ;;  %20468 = vst [vmem:[#allocation67_spill] sm:$0xff] %v15923_v33 }
 0x102   : > { %v12814_v63 = vcombine.low %v3035_v50, %v3036_v57  ;;  %20467 = vst [vmem:[#allocation66_spill] sm:$0xff] %v15918_v8  ;;  %v15927_v21 = vsel %vm15567_vm5, %v2916_v43, %v2923_v48  ;;  %v3037_v36 = vmul.bf16 %v15918_v8, %v2441_v41  ;;  %v3729_v39 = vsel %vm2052_vm14, %v15875_v18, %v3728_v12  ;;  %v15941_v43 = vld [vmem:[#allocation2 + $0x5c] sm:$0xf] }
 0x103   : > { %20469 = vst [vmem:[#allocation68_spill] sm:$0xff] %v15927_v21  ;;  %v3731_v34 = vshrl.u32 %v12845_v0, 16  ;;  %v3038_v54 = vmul.bf16 %v15927_v21, %v2442_v23  ;;  %14085 = vmatprep.mubr.msk.bf16.mxu1 %vm1755_vm7, %v3729_v39  ;;  %v3734_v2 = vshll.u32 %v12845_v0, 16  ;;  %vm885_vm8 = vcmp.ne.s32.totalorder %v587_v28, 15  ;;  %v15943_v23 = vpop.f32.mrf.mxu0 }
 0x104   : > { %v3220_v31 = vshll.u32 %v12814_v63, 16  ;;  %v3224_v55 = vshrl.u32 %v12814_v63, 16  ;;  %v601_v14 = vand.u32 15, %v391_v13  ;;  %v3559_v50 = vmul.bf16 %v15921_v9, %v15345_v25  ;;  %20470 = vst [vmem:[#allocation69_spill] sm:$0xff] %v15943_v23 }
 0x105   : > { %v3733_v49 = vrot.slane %v3731_v34, 3  ;;  %v15938_v41 = vcombine.low %v3037_v36, %v3038_v54  ;;  %v3736_v18 = vrot.slane %v3734_v2, 4  ;;  %v917_v35 = vsel %vm885_vm8, 1.0, %v20435_v15 }
 0x106   : > { %v3222_v57 = vrot.slane %v3220_v31, 1  ;;  %v935_v48 = vpack.c.bf16 %v917_v35, %v20436_v11  ;;  %v2925_v0 = vrot.slane %v15898_v38, 4  ;;  %vm887_vm9 = vcmp.ne.s32.totalorder %v601_v14, 15 }
 0x107   : > { %v3560_v13 = vmul.bf16 %v15934_v1, %v15362_v56  ;;  %v3228_v36 = vshll.u32 %v15938_v41, 16  ;;  %v15951_v39 = vor.u32 %v3736_v18, %v3733_v49  ;;  %v919_v54 = vsel %vm887_vm9, 1.0, %v20435_v15  ;;  %v15962_v49 = vpop.f32.mrf.mxu0  ;;  %v15970_v56 = vld [vmem:[#allocation2 + $0x60] sm:$0xf] }
 0x108   : > { %v3223_v28 = vsel %vm3131_vm6, %v3218_v60, %v3222_v57  ;;  %v3226_v63 = vor.u32 %v3224_v55, %v3222_v57  ;;  %v2654_v34 = vrot.slane %v935_v48, %v14970_v20  ;;  %v2661_v31 = vrot.slane %v935_v48, %v14975_v24  ;;  %20471 = vst [vmem:[#allocation70_spill] sm:$0xff] %v15962_v49 }
 0x109   : > { %14059 = vmatprep.mubr.msk.bf16.mxu0 %vm1755_vm7, %v3223_v28  ;;  %v3561_v38 = vmul.bf16 %v15941_v43, %v15374_v6  ;;  %v3230_v2 = vrot.slane %v3228_v36, 1  ;;  %v3738_v60 = vsel %vm2052_vm14, %v3728_v12, %v15951_v39  ;;  %v936_v55 = vpack.c.bf16 %v919_v54, %v20436_v11  ;;  %20472 = vst [vmem:[#allocation71_spill] sm:$0xff] %v15970_v56 }
 0x10a   : > { %v12846_v14 = vcombine.low %v3559_v50, %v3560_v13  ;;  %14086 = vmatmul.mubr.msk.bf16.gmra.mxu1 %vm1755_vm7, %v3738_v60  ;;  %v2927_v57 = vshrl.u32 %v2654_v34, 16  ;;  %v2930_v18 = vshll.u32 %v2654_v34, 16  ;;  %v2936_v35 = vshrl.u32 %v2661_v31, 16 }
 0x10b   : > { %v2939_v48 = vshll.u32 %v2661_v31, 16  ;;  %v3231_v28 = vsel %vm3131_vm6, %v3226_v63, %v3230_v2  ;;  %v3232_v33 = vshrl.u32 %v15938_v41, 16  ;;  %v2668_v36 = vrot.slane %v936_v55, %v14970_v20  ;;  %v15972_v31 = vpop.f32.mrf.mxu0  ;;  %v2443_v63 = vld [vmem:[#allocation2 + $0x70] sm:$0xf]  ;;  %v2444_v41 = vld [vmem:[#allocation2 + $0x74] sm:$0xf] }
 0x10c   : > { %v2675_v23 = vrot.slane %v936_v55, %v14975_v24  ;;  %14060 = vmatmul.mubr.msk.bf16.gmra.mxu0 %vm1755_vm7, %v3231_v28  ;;  %v2929_v12 = vrot.slane %v2927_v57, 7  ;;  %v2938_v50 = vrot.slane %v2936_v35, 7  ;;  %v3740_v13 = vshrl.u32 %v12846_v14, 16  ;;  %20473 = vst [vmem:[#allocation72_spill] sm:$0xff] %v15972_v31 }
 0x10d   : > { %v3743_v54 = vshll.u32 %v12846_v14, 16  ;;  %v2945_v49 = vshrl.u32 %v2668_v36, 16  ;;  %v2948_v60 = vshll.u32 %v2668_v36, 16  ;;  %v3562_v36 = vmul.bf16 %v15970_v56, %v15394_v7 }
 0x10e   : > { %v2954_v6 = vshrl.u32 %v2675_v23, 16  ;;  %v2957_v34 = vshll.u32 %v2675_v23, 16  ;;  %v2932_v25 = vor.u32 %v2930_v18, %v2929_v12  ;;  %v2934_v21 = vrot.slane %v2929_v12, 4  ;;  %v2445_v12 = vld [vmem:[#allocation2 + $0x78] sm:$0xf] }
 0x10f   : > { %v2941_v8 = vor.u32 %v2939_v48, %v2938_v50  ;;  %v2943_v55 = vrot.slane %v2938_v50, 4  ;;  %v2947_v62 = vrot.slane %v2945_v49, 7  ;;  %v3742_v57 = vrot.slane %v3740_v13, 3  ;;  %v15987_v48 = vld [vmem:[#allocation2 + $0x64] sm:$0xf] }
 0x110   : > { %v15974_v28 = vrot.slane %v2954_v6, 7  ;;  %v3745_v35 = vrot.slane %v3743_v54, 4  ;;  %v15978_v14 = vsel %vm15567_vm5, %v2925_v0, %v2932_v25  ;;  %v393_v18 = vadd.s32 248, %v14927_v3  ;;  %v15991_v25 = vpop.f32.mrf.mxu0  ;;  %v2446_v0 = vld [vmem:[#allocation2 + $0x7c] sm:$0xf] }
 0x111   : > { %20474 = vst [vmem:[#allocation73_spill] sm:$0xff] %v15978_v14  ;;  %v15982_v23 = vsel %vm15567_vm5, %v2934_v21, %v2941_v8  ;;  %v3039_v6 = vmul.bf16 %v15978_v14, %v2443_v63  ;;  %v2950_v50 = vor.u32 %v2948_v60, %v2947_v62  ;;  %v2952_v13 = vrot.slane %v2947_v62, 4  ;;  %20476 = vst [vmem:[#allocation75_spill] sm:$0xff] %v15991_v25  ;;  %v15998_v63 = vld [vmem:[#allocation2 + $0x68] sm:$0xf]  ;;  %v16004_v25 = vpop.f32.mrf.mxu1 }
 0x112   : > { %20475 = vst [vmem:[#allocation74_spill] sm:$0xff] %v15982_v23  ;;  %v3040_v49 = vmul.bf16 %v15982_v23, %v2444_v41  ;;  %v2959_v8 = vor.u32 %v2957_v34, %v15974_v28  ;;  %v3746_v21 = vor.u32 %v3745_v35, %v3742_v57  ;;  %v12847_v54 = vcombine.low %v3561_v38, %v3562_v36  ;;  %v20478_v41 = vld [vmem:[#allocation27_spill] sm:$0xff]  ;;  %v16002_v62 = vld [vmem:[#allocation2 + $0x6c] sm:$0xf] }
 0x113   : > { %v615_v31 = vand.u32 15, %v393_v18  ;;  %v3234_v56 = vor.u32 %v3232_v33, %v3230_v2  ;;  %v15996_v3 = vsel %vm15567_vm5, %v2943_v55, %v2950_v50  ;;  %v3563_v60 = vmul.bf16 %v15987_v48, %v20478_v41  ;;  %20479 = vst [vmem:[#allocation77_spill] sm:$0xff] %v16004_v25  ;;  %v16015_v18 = vld [vmem:[#allocation2 + $0x70] sm:$0xf]  ;;  %v20482_v50 = vld [vmem:[#allocation28_spill] sm:$0xff] }
 0x114   : > { %v12816_v7 = vcombine.low %v3039_v6, %v3040_v49  ;;  %20477 = vst [vmem:[#allocation76_spill] sm:$0xff] %v15996_v3  ;;  %v16008_v34 = vsel %vm15567_vm5, %v2952_v13, %v2959_v8  ;;  %v3041_v38 = vmul.bf16 %v15996_v3, %v2445_v12  ;;  %v3747_v33 = vsel %vm2052_vm14, %v15951_v39, %v3746_v21  ;;  %v16017_v6 = vpop.f32.mrf.mxu0  ;;  %v20483_v13 = vld [vmem:[#allocation29_spill] sm:$0xff] }
 0x115   : > { %20480 = vst [vmem:[#allocation78_spill] sm:$0xff] %v16008_v34  ;;  %v3749_v2 = vshrl.u32 %v12847_v54, 16  ;;  %v3042_v57 = vmul.bf16 %v16008_v34, %v2446_v0  ;;  %14089 = vmatprep.mubr.msk.bf16.mxu1 %vm1755_vm7, %v3747_v33  ;;  %v3752_v36 = vshll.u32 %v12847_v54, 16  ;;  %20481 = vst [vmem:[#allocation79_spill] sm:$0xff] %v16017_v6  ;;  %vm889_vm1 = vcmp.ne.s32.totalorder %v615_v31, 15  ;;  %v16031_v33 = vpop.f32.mrf.mxu1 }
 0x116   : > { %v3236_v55 = vshll.u32 %v12816_v7, 16  ;;  %v3240_v35 = vshrl.u32 %v12816_v7, 16  ;;  %v3564_v12 = vmul.bf16 %v15998_v63, %v20482_v50  ;;  %v3565_v39 = vmul.bf16 %v16002_v62, %v20483_v13  ;;  %v16029_v54 = vld [vmem:[%s20175_s1 + $0xe] sm:$0x3]  ;;  %20484 = vst [vmem:[#allocation80_spill] sm:$0xff] %v16031_v33  ;;  %v16042_v33 = vpop.f32.mrf.mxu0 }
 0x117   : > { %v3751_v49 = vrot.slane %v3749_v2, 3  ;;  %v16023_v25 = vcombine.low %v3041_v38, %v3042_v57  ;;  %v3754_v0 = vrot.slane %v3752_v36, 4  ;;  %v921_v7 = vsel %vm889_vm1, 1.0, %v20435_v15  ;;  %v14836_v38 = vld [vmem:[%s20175_s1 + $0xa] sm:$0x3]  ;;  %20485 = vst [vmem:[#allocation81_spill] sm:$0xff] %v16042_v33 }
 0x118   : > { %v3238_v8 = vrot.slane %v3236_v55, 1  ;;  %v937_v31 = vpack.c.bf16 %v921_v7, %v20436_v11  ;;  %v12848_v2 = vcombine.low %v3563_v60, %v3564_v12  ;;  %v3566_v6 = vmul.bf16 %v16015_v18, %v15457_v44  ;;  %v16057_v44 = vpop.f32.mrf.mxu0  ;;  %v4381_v34 = vld [vmem:[#allocation2 + $0x10] sm:$0xf] }
 0x119   : > { %v4713_v55 = vsel %vm1804_vm0, %v14836_v38, 0  ;;  %v3244_v36 = vshll.u32 %v16023_v25, 16  ;;  %v3755_v13 = vor.u32 %v3754_v0, %v3751_v49  ;;  %v16050_v38 = vpop.f32.mrf.mxu1  ;;  %20487 = vst [vmem:[#allocation83_spill] sm:$0xff] %v16057_v44  ;;  %v2448_v44 = vld [vmem:[#allocation2 + $0x84] sm:$0xf] }
 0x11a   : > { %v3239_v15 = vsel %vm3131_vm6, %v3234_v56, %v3238_v8  ;;  %v3242_v57 = vor.u32 %v3240_v35, %v3238_v8  ;;  %14140 = vmatpush3.bf16.msra.mxu1 %v4713_v55  ;;  %v2682_v11 = vrot.slane %v937_v31, %v14970_v20  ;;  %v2689_v60 = vrot.slane %v937_v31, %v14975_v24  ;;  %v16053_v20 = vld [vmem:[#allocation2 + $0x74] sm:$0xf] }
 0x11b   : > { %14063 = vmatprep.mubr.msk.bf16.mxu0 %vm1755_vm7, %v3239_v15  ;;  %v3758_v12 = vshrl.u32 %v12848_v2, 16  ;;  %14724 = vmatprep.subr.msk.bf16.mxu1 %vm1804_vm0, %v16029_v54  ;;  %v3246_v7 = vrot.slane %v3244_v36, 1  ;;  %v3756_v56 = vsel %vm2052_vm14, %v3746_v21, %v3755_v13  ;;  %v3761_v35 = vshll.u32 %v12848_v2, 16  ;;  %20486 = vst [vmem:[#allocation82_spill] sm:$0xff] %v16050_v38 }
 0x11c   : > { %v12849_v8 = vcombine.low %v3565_v39, %v3566_v6  ;;  %14090 = vmatmul.mubr.msk.bf16.gmra.mxu1 %vm1755_vm7, %v3756_v56  ;;  %v2963_v49 = vshrl.u32 %v2682_v11, 16  ;;  %v2966_v0 = vshll.u32 %v2682_v11, 16  ;;  %v2972_v55 = vshrl.u32 %v2689_v60, 16  ;;  %v16060_v56 = vld [vmem:[#allocation2 + $0x78] sm:$0xf] }
 0x11d   : > { %v2975_v15 = vshll.u32 %v2689_v60, 16  ;;  %v3247_v24 = vsel %vm3131_vm6, %v3242_v57, %v3246_v7  ;;  %v2961_v31 = vrot.slane %v15974_v28, 4  ;;  %v3760_v33 = vrot.slane %v3758_v12, 3  ;;  %v2449_v60 = vld [vmem:[#allocation2 + $0x88] sm:$0x1]  ;;  %v16067_v12 = vpop.f32.mrf.mxu1 }
 0x11e   : > { %v3763_v36 = vrot.slane %v3761_v35, 4  ;;  %14064 = vmatmul.mubr.msk.bf16.gmra.mxu0 %vm1755_vm7, %v3247_v24  ;;  %v2965_v21 = vrot.slane %v2963_v49, 7  ;;  %v2974_v6 = vrot.slane %v2972_v55, 7  ;;  %v3767_v39 = vshrl.u32 %v12849_v8, 16  ;;  %v16065_v28 = vld [vmem:[#allocation2 + $0x7c] sm:$0xf] }
 0x11f   : > { %v3770_v2 = vshll.u32 %v12849_v8, 16  ;;  %v3248_v11 = vshrl.u32 %v16023_v25, 16  ;;  %v3567_v57 = vmul.bf16 %v16053_v20, %v15468_v17  ;;  %20488 = vst [vmem:[#allocation84_spill] sm:$0xff] %v16067_v12  ;;  %v2447_v35 = vld [vmem:[#allocation2 + $0x80] sm:$0xf]  ;;  %v16076_v17 = vpop.f32.mrf.mxu0  ;;  %v16096_v61 = vpop.f32.mrf.mxu1 }
 0x120   : > { %v3764_v38 = vor.u32 %v3763_v36, %v3760_v33  ;;  %v2968_v24 = vor.u32 %v2966_v0, %v2965_v21  ;;  %v2970_v49 = vrot.slane %v2965_v21, 4  ;;  %v2977_v55 = vor.u32 %v2975_v15, %v2974_v6  ;;  %v16074_v36 = vld [vmem:[#allocation2 + $0x80] sm:$0xf]  ;;  %20491 = vst [vmem:[#allocation87_spill] sm:$0xff] %v16076_v17  ;;  %20497 = vst [vmem:[#allocation92_spill] sm:$0xff] %v16096_v61 }
 0x121   : > { %v16069_v50 = vrot.slane %v2974_v6, 4  ;;  %v3769_v41 = vrot.slane %v3767_v39, 3  ;;  %v3772_v25 = vrot.slane %v3770_v2, 4  ;;  %v3568_v33 = vmul.bf16 %v16060_v56, %v15481_v10  ;;  %20490 = vst [vmem:[#allocation86_spill] sm:$0xff] %v16074_v36  ;;  %v16092_v10 = vld [vmem:[#allocation2 + $0x84] sm:$0xf]  ;;  %v16110_v61 = vpop.f32.mrf.mxu1 }
 0x122   : > { %v3765_v8 = vsel %vm2052_vm14, %v3755_v13, %v3764_v38  ;;  %v16080_v12 = vsel %vm15567_vm5, %v2961_v31, %v2968_v24  ;;  %v16084_v0 = vsel %vm15567_vm5, %v2970_v49, %v2977_v55  ;;  %v20494_v13 = vld [vmem:[#allocation33_spill] sm:$0xff]  ;;  %20495 = vst [vmem:[#allocation90_spill] sm:$0xff] %v16092_v10  ;;  %v16094_v31 = vld [vmem:[#allocation2 + $0x88] sm:$0xf]  ;;  %v3250_v24 = vor.u32 %v3248_v11, %v3246_v7  ;;  %v16108_v11 = vld [vmem:[#allocation2 + $0x8c] sm:$0xf] }
 0x123   : > { %20489 = vst [vmem:[#allocation85_spill] sm:$0xff] %v16069_v50  ;;  %20492 = vst [vmem:[#allocation88_spill] sm:$0xff] %v16080_v12  ;;  %v3045_v15 = vmul.bf16 %v16069_v50, %v2449_v60  ;;  %14093 = vmatprep.mubr.msk.bf16.mxu1 %vm1755_vm7, %v3765_v8  ;;  %v3569_v21 = vmul.bf16 %v16065_v28, %v20494_v13  ;;  %v3043_v6 = vmul.bf16 %v16080_v12, %v2447_v35  ;;  %v20498_v60 = vld [vmem:[#allocation34_spill] sm:$0xff]  ;;  %v16101_v12 = vpop.f32.mrf.mxu0 }
 0x124   : > { %20493 = vst [vmem:[#allocation89_spill] sm:$0xff] %v16084_v0  ;;  %v3044_v39 = vmul.bf16 %v16084_v0, %v2448_v44  ;;  %v3773_v2 = vor.u32 %v3772_v25, %v3769_v41  ;;  %v12850_v17 = vcombine.low %v3567_v57, %v3568_v33  ;;  %20496 = vst [vmem:[#allocation91_spill] sm:$0xff] %v16094_v31  ;;  %v20500_v57 = vld [vmem:[#allocation35_spill] sm:$0xff]  ;;  %v20501_v33 = vld [vmem:[#allocation37_spill] sm:$0xff] }
 0x125   : > { %v12819_v49 = vcombine.low %v3045_v15, %v3045_v15  ;;  %v3570_v55 = vmul.bf16 %v16074_v36, %v20498_v60  ;;  %20499 = vst [vmem:[#allocation93_spill] sm:$0xff] %v16101_v12  ;;  %v3571_v25 = vmul.bf16 %v16092_v10, %v20500_v57  ;;  %v3572_v7 = vmul.bf16 %v16094_v31, %v20501_v33  ;;  %v14838_v12 = vld [vmem:[#allocation2 + $0x14] sm:$0xf]  ;;  %v20503_v10 = vld [vmem:[#allocation36_spill] sm:$0xff]  ;;  %v16114_v31 = vpop.f32.mrf.mxu0 }
 0x126   : > { %v12818_v8 = vcombine.low %v3043_v6, %v3044_v39  ;;  %v3774_v13 = vsel %vm2052_vm14, %v3764_v38, %v3773_v2  ;;  %v3776_v50 = vshrl.u32 %v12850_v17, 16  ;;  %v3779_v35 = vshll.u32 %v12850_v17, 16  ;;  %20502 = vst [vmem:[#allocation94_spill] sm:$0xff] %v16110_v61  ;;  %v14837_v17 = vld [vmem:[#allocation2 + $0x10] sm:$0xf]  ;;  %20504 = vst [vmem:[#allocation95_spill] sm:$0xff] %v16114_v31 }
 0x127   : > { %v3260_v44 = vshll.u32 %v12819_v49, 16  ;;  %14094 = vmatmul.mubr.msk.bf16.gmra.mxu1 %vm1755_vm7, %v3774_v13  ;;  %v12851_v41 = vcombine.low %v3569_v21, %v3570_v55  ;;  %v12871_v49 = vcombine.low %v14837_v17, %v14838_v12  ;;  %v12852_v21 = vcombine.low %v3571_v25, %v3572_v7  ;;  %v4382_v25 = vld [vmem:[#allocation2 + $0x14] sm:$0xf]  ;;  %v4383_v7 = vld [vmem:[#allocation2 + $0x18] sm:$0xf] }
 0x128   : > { %v3252_v15 = vshll.u32 %v12818_v8, 16  ;;  %v3256_v6 = vshrl.u32 %v12818_v8, 16  ;;  %v3778_v39 = vrot.slane %v3776_v50, 3  ;;  %v3781_v38 = vrot.slane %v3779_v35, 4  ;;  %v4385_v17 = vld [vmem:[#allocation2 + $0x20] sm:$0xf] }
 0x129   : > { %v3785_v60 = vshrl.u32 %v12851_v41, 16  ;;  %v3788_v13 = vshll.u32 %v12851_v41, 16  ;;  %v3262_v36 = vrot.slane %v3260_v44, 1  ;;  %v3573_v33 = vmul.bf16 %v16108_v11, %v20503_v10  ;;  %v16118_v44 = vpop.f32.mrf.mxu1 }
 0x12a   : > { %v3254_v55 = vrot.slane %v3252_v15, 1  ;;  %v3782_v57 = vor.u32 %v3781_v38, %v3778_v39  ;;  %v3794_v50 = vshrl.u32 %v12852_v21, 16  ;;  %v3797_v35 = vshll.u32 %v12852_v21, 16  ;;  %20505 = vst [vmem:[#allocation96_spill] sm:$0xff] %v16118_v44  ;;  %v4384_v38 = vld [vmem:[#allocation2 + $0x1c] sm:$0xf] }
 0x12b   : > { %v3787_v0 = vrot.slane %v3785_v60, 3  ;;  %v3790_v8 = vrot.slane %v3788_v13, 4  ;;  %v12853_v41 = vcombine.low %v3573_v33, %v3573_v33  ;;  %v20506_v21 = vld [vmem:[#allocation38_spill] sm:$0xff]  ;;  %v4386_v33 = vld [vmem:[#allocation2 + $0x24] sm:$0xf] }
 0x12c   : > { %v3255_v61 = vsel %vm3131_vm6, %v3250_v24, %v3254_v55  ;;  %v3258_v3 = vor.u32 %v3256_v6, %v3254_v55  ;;  %v3783_v12 = vsel %vm2052_vm14, %v3773_v2, %v3782_v57  ;;  %v3796_v60 = vrot.slane %v3794_v50, 3  ;;  %v16124_v55 = vpop.f32.mrf.mxu0  ;;  %v20511_v44 = vld [vmem:[#allocation42_spill] sm:$0xff] }
 0x12d   : > { %14067 = vmatprep.mubr.msk.bf16.mxu0 %vm1755_vm7, %v3255_v61  ;;  %14097 = vmatprep.mubr.msk.bf16.mxu1 %vm1755_vm7, %v3783_v12  ;;  %v3791_v15 = vor.u32 %v3790_v8, %v3787_v0  ;;  %v3799_v39 = vrot.slane %v3797_v35, 4  ;;  %v3803_v24 = vshrl.u32 %v12853_v41, 16  ;;  %v3806_v6 = vshll.u32 %v12853_v41, 16  ;;  %20507 = vst [vmem:[#allocation97_spill] sm:$0xff] %v16124_v55  ;;  %v20508_v12 = vld [vmem:[#allocation39_spill] sm:$0xff]  ;;  %v20509_v8 = vld [vmem:[#allocation40_spill] sm:$0xff] }
 0x12e   : > { %v3263_v13 = vsel %vm3131_vm6, %v3258_v3, %v3262_v36  ;;  %v4414_v2 = vmul.bf16 %v4381_v34, %v20506_v21  ;;  %v4415_v0 = vmul.bf16 %v4382_v25, %v20508_v12  ;;  %v4416_v50 = vmul.bf16 %v4383_v7, %v20509_v8  ;;  %v4387_v35 = vld [vmem:[#allocation2 + $0x28] sm:$0xf]  ;;  %v20510_v34 = vld [vmem:[#allocation41_spill] sm:$0xff]  ;;  %v4388_v21 = vld [vmem:[#allocation2 + $0x2c] sm:$0xf] }
 0x12f   : > { %14068 = vmatmul.mubr.msk.bf16.gmra.mxu0 %vm1755_vm7, %v3263_v13  ;;  %v3792_v61 = vsel %vm2052_vm14, %v3782_v57, %v3791_v15  ;;  %v3800_v31 = vor.u32 %v3799_v39, %v3796_v60  ;;  %v3805_v3 = vrot.slane %v3803_v24, 3  ;;  %v3808_v36 = vrot.slane %v3806_v6, 4  ;;  %v16134_v13 = vpop.f32.mrf.mxu1  ;;  %v14839_v57 = vld [vmem:[%s20175_s1 + $0xc] sm:$0x3]  ;;  %v20513_v60 = vld [vmem:[#allocation43_spill] sm:$0xff] }
 0x130   : > { %14107 = vmatprep.mubr.msk.bf16.mxu0 %vm1755_vm7, %v12871_v49  ;;  %14098 = vmatmul.mubr.msk.bf16.gmra.mxu1 %vm1755_vm7, %v3792_v61  ;;  %v4417_v41 = vmul.bf16 %v4384_v38, %v20510_v34  ;;  %v4418_v55 = vmul.bf16 %v4385_v17, %v20511_v44  ;;  %20512 = vst [vmem:[#allocation98_spill] sm:$0xff] %v16134_v13  ;;  %v5260_v25 = vsel %vm1804_vm0, %v14839_v57, 0  ;;  %v4389_v61 = vld [vmem:[#allocation2 + $0x30] sm:$0xf]  ;;  %v16146_v13 = vpop.f32.mrf.mxu0 }
 0x131   : > { %v3801_v7 = vsel %vm2052_vm14, %v3791_v15, %v3800_v31  ;;  %v12904_v49 = vcombine.low %v4414_v2, %v4415_v0  ;;  %v4419_v39 = vmul.bf16 %v4386_v33, %v20513_v60  ;;  %v3809_v24 = vor.u32 %v3808_v36, %v3805_v3  ;;  %20514 = vst [vmem:[#allocation99_spill] sm:$0xff] %v16146_v13  ;;  %v4390_v2 = vld [vmem:[#allocation2 + $0x34] sm:$0xf]  ;;  %v14840_v0 = vld [vmem:[#allocation2 + $0x20] sm:$0xf] }
 0x132   : > { %14101 = vmatprep.mubr.msk.bf16.mxu1 %vm1755_vm7, %v3801_v7  ;;  %v12905_v38 = vcombine.low %v4416_v50, %v4417_v41  ;;  %v4420_v6 = vmul.bf16 %v4387_v35, %v15656_v51  ;;  %v4421_v15 = vmul.bf16 %v4388_v21, %v15660_v16  ;;  %v14841_v33 = vld [vmem:[#allocation2 + $0x24] sm:$0xf]  ;;  %v16150_v41 = vpop.f32.mrf.mxu1  ;;  %v4422_v13 = vmul.bf16 %v4389_v61, %v15667_v5  ;;  %v4391_v51 = vld [vmem:[#allocation2 + $0x38] sm:$0xf] }
 0x133   : > { %v4533_v44 = vshrl.u32 %v12904_v49, 16  ;;  %v4535_v34 = vshll.u32 %v12904_v49, 16  ;;  %v12906_v57 = vcombine.low %v4418_v55, %v4419_v39  ;;  %v12873_v60 = vcombine.low %v14840_v0, %v14841_v33 }
 0x134   : > { %v3810_v3 = vsel %vm2052_vm14, %v3800_v31, %v3809_v24  ;;  %v4540_v50 = vshll.u32 %v12905_v38, 16  ;;  %v4544_v36 = vshrl.u32 %v12905_v38, 16  ;;  %v12907_v17 = vcombine.low %v4420_v6, %v4421_v15  ;;  %v4392_v31 = vld [vmem:[#allocation2 + $0x3c] sm:$0xf]  ;;  %v16161_v24 = vld [vmem:[%s20175_s1 + $0x10] sm:$0x3]  ;;  %v16171_v0 = vpop.f32.mrf.mxu1 }
 0x135   : > { %v4537_v7 = vrot.slane %v4535_v34, 1  ;;  %v4548_v35 = vshll.u32 %v12906_v57, 16  ;;  %v4423_v55 = vmul.bf16 %v4390_v2, %v15671_v22  ;;  %v16163_v34 = vpop.f32.mrf.mxu0  ;;  %v20516_v38 = vcombine.low %v15682_v4, %v15692_v32 }
 0x136   : > { %v4542_v49 = vrot.slane %v4540_v50, 1  ;;  %20515 = vst [vmem:[#allocation100_spill] sm:$0xff] %v16163_v34  ;;  %v4552_v61 = vshrl.u32 %v12906_v57, 16  ;;  %v4556_v15 = vshll.u32 %v12907_v17, 16  ;;  %v4424_v2 = vmul.bf16 %v4391_v51, %v15713_v29  ;;  %v14842_v51 = vld [vmem:[#allocation2 + $0x28] sm:$0xf] }
 0x137   : > { %14108 = vmatmul.mubr.msk.bf16.vlgmr.msra.gmra.mxu0 %vm1755_vm7, %v20516_v38  ;;  %v4538_v6 = vor.u32 %v4537_v7, %v4533_v44  ;;  %v4550_v50 = vrot.slane %v4548_v35, 1  ;;  %v12908_v39 = vcombine.low %v4422_v13, %v4423_v55  ;;  %v4425_v4 = vmul.bf16 %v4392_v31, %v15717_v19  ;;  %v4393_v44 = vld [vmem:[#allocation2 + $0x40] sm:$0xf]  ;;  %v14843_v57 = vld [vmem:[#allocation2 + $0x2c] sm:$0xf]  ;;  %v20521_v35 = vld [vmem:[#allocation56_spill] sm:$0xff] }
 0x138   : > { %14174 = vmatpush3.bf16.msra.mxu0 %v5260_v25  ;;  %14111 = vmatprep.mubr.msk.bf16.mxu0 %vm1755_vm7, %v12873_v60  ;;  %v4546_v32 = vor.u32 %v4544_v36, %v4542_v49  ;;  %v4394_v25 = vld [vmem:[#allocation2 + $0x44] sm:$0xf]  ;;  %v16179_v60 = vpop.f32.mrf.mxu0  ;;  %v12874_v7 = vcombine.low %v14842_v51, %v14843_v57  ;;  %v4558_v38 = vrot.slane %v4556_v15, 1  ;;  %v12875_v13 = vcombine.low %v15764_v45, %v15787_v59  ;;  %v4395_v55 = vld [vmem:[#allocation2 + $0x48] sm:$0xf] }
 0x139   : > { %14102 = vmatmul.mubr.msk.bf16.gmra.mxu1 %vm1755_vm7, %v3810_v3  ;;  %v4543_v33 = vsel %vm3131_vm6, %v4538_v6, %v4542_v49  ;;  %14725 = vmatprep.subr.msk.bf16.mxu0 %vm1804_vm0, %v16161_v24  ;;  %20517 = vst [vmem:[#allocation101_spill] sm:$0xff] %v16179_v60  ;;  %v4554_v3 = vor.u32 %v4552_v61, %v4550_v50  ;;  %v4396_v36 = vld [vmem:[#allocation2 + $0x4c] sm:$0xf]  ;;  %v16185_v49 = vpop.f32.mrf.mxu1  ;;  %v4564_v31 = vshll.u32 %v12908_v39, 16  ;;  %v4560_v61 = vshrl.u32 %v12907_v17, 16 }
 0x13a   : > { %14141 = vmatprep.mubr.msk.bf16.mxu1 %vm1755_vm7, %v4543_v33  ;;  %v12909_v6 = vcombine.low %v4424_v2, %v4425_v4  ;;  %v4426_v33 = vmul.bf16 %v4393_v44, %v15727_v40  ;;  %v4427_v21 = vmul.bf16 %v4394_v25, %v15732_v53  ;;  %v4551_v51 = vsel %vm3131_vm6, %v4546_v32, %v4550_v50  ;;  %v16192_v45 = vpop.f32.mrf.mxu0  ;;  %v4397_v25 = vld [vmem:[#allocation2 + $0x50] sm:$0xf] }
 0x13b   : > { %v4568_v15 = vshrl.u32 %v12908_v39, 16  ;;  %v5586_v2 = vsel %vm1804_vm0, %v16029_v54, 0  ;;  %20518 = vst [vmem:[#allocation102_spill] sm:$0xff] %v16192_v45  ;;  %v4559_v59 = vsel %vm3131_vm6, %v4554_v3, %v4558_v38  ;;  %v4428_v57 = vmul.bf16 %v4395_v55, %v15770_v26  ;;  %v16201_v39 = vpop.f32.mrf.mxu1  ;;  %v20593_v26 = vld [vmem:[#allocation30_spill] sm:$0xff] }
 0x13c   : > { %v4572_v4 = vshll.u32 %v12909_v6, 16  ;;  %v4429_v44 = vmul.bf16 %v4396_v36, %v15774_v42  ;;  %20519 = vst [vmem:[#allocation103_spill] sm:$0xff] %v16201_v39  ;;  %v4566_v54 = vrot.slane %v4564_v31, 1  ;;  %v12910_v50 = vcombine.low %v4426_v33, %v4427_v21  ;;  %v16205_v3 = vpop.f32.mrf.mxu0  ;;  %v4400_v31 = vld [vmem:[#allocation2 + $0x5c] sm:$0xf] }
 0x13d   : > { %v4562_v32 = vor.u32 %v4560_v61, %v4558_v38  ;;  %20520 = vst [vmem:[#allocation104_spill] sm:$0xff] %v16205_v3  ;;  %v12877_v39 = vcombine.low %v20521_v35, %v15850_v46  ;;  %v16211_v21 = vpop.f32.mrf.mxu1  ;;  %v20522_v38 = vld [vmem:[#allocation54_spill] sm:$0xff]  ;;  %v4576_v45 = vshrl.u32 %v12909_v6, 16  ;;  %v20525_v35 = vld [vmem:[#allocation57_spill] sm:$0xff] }
 0x13e   : > { %v4570_v55 = vor.u32 %v4568_v15, %v4566_v54  ;;  %v4574_v36 = vrot.slane %v4572_v4, 1  ;;  %v12911_v17 = vcombine.low %v4428_v57, %v4429_v44  ;;  %v4580_v33 = vshll.u32 %v12910_v50, 16  ;;  %v20526_v4 = vld [vmem:[#allocation58_spill] sm:$0xff] }
 0x13f   : > { %14112 = vmatmul.mubr.msk.bf16.gmra.mxu0 %vm1755_vm7, %v12874_v7  ;;  %v4398_v7 = vld [vmem:[#allocation2 + $0x54] sm:$0xf]  ;;  %v4430_v61 = vmul.bf16 %v4397_v25, %v20522_v38  ;;  %v4567_v3 = vsel %vm3131_vm6, %v4562_v32, %v4566_v54  ;;  %v4584_v60 = vshrl.u32 %v12910_v50, 16  ;;  %v4433_v57 = vmul.bf16 %v4400_v31, %v20526_v4  ;;  %v16223_v44 = vpop.f32.mrf.mxu1  ;;  %v4401_v50 = vld [vmem:[#allocation2 + $0x60] sm:$0xf] }
 0x140   : > { %14115 = vmatprep.mubr.msk.bf16.mxu0 %vm1755_vm7, %v12875_v13  ;;  %v12876_v13 = vcombine.low %v15798_v52, %v15805_v37  ;;  %v16216_v52 = vpop.f32.mrf.mxu0  ;;  %v4575_v37 = vsel %vm3131_vm6, %v4570_v55, %v4574_v36  ;;  %v4588_v46 = vshll.u32 %v12911_v17, 16  ;;  %v4582_v54 = vrot.slane %v4580_v33, 1  ;;  %v4402_v32 = vld [vmem:[#allocation2 + $0x64] sm:$0xf]  ;;  %v4404_v31 = vld [vmem:[#allocation2 + $0x6c] sm:$0xf] }
 0x141   : > { %14142 = vmatmul.mubr.msk.bf16.vlgmr.msra.gmra.mxu1 %vm1755_vm7, %v4551_v51  ;;  %v4399_v51 = vld [vmem:[#allocation2 + $0x58] sm:$0xf]  ;;  %20524 = vst [vmem:[#allocation56_spill] sm:$0xff] %v16216_v52  ;;  %v4578_v25 = vor.u32 %v4576_v45, %v4574_v36  ;;  %v4403_v52 = vld [vmem:[#allocation2 + $0x68] sm:$0xf]  ;;  %v20528_v4 = vld [vmem:[#allocation59_spill] sm:$0xff]  ;;  %v16231_v38 = vpop.f32.mrf.mxu1 }
 0x142   : > { %14145 = vmatprep.mubr.msk.bf16.mxu1 %vm1755_vm7, %v4559_v59  ;;  %14208 = vmatpush3.bf16.msra.mxu1 %v5586_v2  ;;  %v20523_v59 = vld [vmem:[#allocation55_spill] sm:$0xff]  ;;  %v4432_v15 = vmul.bf16 %v4399_v51, %v20525_v35  ;;  %v4590_v55 = vrot.slane %v4588_v46, 1  ;;  %v20529_v35 = vld [vmem:[#allocation60_spill] sm:$0xff]  ;;  %v20530_v45 = vld [vmem:[#allocation65_spill] sm:$0xff] }
 0x143   : > { %v4431_v2 = vmul.bf16 %v4398_v7, %v20523_v59  ;;  %v16227_v7 = vpop.f32.mrf.mxu0  ;;  %v4435_v59 = vmul.bf16 %v4402_v32, %v20529_v35  ;;  %v4437_v36 = vmul.bf16 %v4404_v31, %v20530_v45  ;;  %v16308_v45 = vld [vmem:[#allocation2 + $0x2c] sm:$0xf]  ;;  %v16379_v42 = vld [vmem:[#allocation2 + $0x48] sm:$0xf] }
 0x144   : > { %20527 = vst [vmem:[#allocation105_spill] sm:$0xff] %v16227_v7  ;;  %v12913_v51 = vcombine.low %v4432_v15, %v4433_v57  ;;  %v20541_v7 = vld [vmem:[#allocation6_spill] sm:$0xff] }
 0x145   : > { %v12912_v6 = vcombine.low %v4430_v61, %v4431_v2  ;;  %v4583_v61 = vsel %vm3131_vm6, %v4578_v25, %v4582_v54  ;;  %v4436_v2 = vmul.bf16 %v4403_v52, %v15904_v58  ;;  %v16247_v52 = vpop.f32.mrf.mxu1  ;;  %v4405_v25 = vld [vmem:[#allocation2 + $0x70] sm:$0xf] }
 0x146   : > { %v4604_v57 = vshll.u32 %v12913_v51, 16  ;;  %20534 = vst [vmem:[#allocation107_spill] sm:$0xff] %v16247_v52  ;;  %v4408_v52 = vld [vmem:[#allocation2 + $0x7c] sm:$0xf] }
 0x147   : > { %14116 = vmatmul.mubr.msk.bf16.gmra.mxu0 %vm1755_vm7, %v12876_v13  ;;  %v4586_v13 = vor.u32 %v4584_v60, %v4582_v54  ;;  %v4596_v33 = vshll.u32 %v12912_v6, 16  ;;  %v20532_v60 = vcombine.low %v15860_v47, %v15867_v30  ;;  %v4600_v15 = vshrl.u32 %v12912_v6, 16  ;;  %v4406_v47 = vld [vmem:[#allocation2 + $0x74] sm:$0xf] }
 0x148   : > { %14119 = vmatprep.mubr.msk.bf16.mxu0 %vm1755_vm7, %v12877_v39  ;;  %v4434_v39 = vmul.bf16 %v4401_v50, %v20528_v4  ;;  %v16251_v30 = vcombine.low %v4436_v2, %v4437_v36  ;;  %v4606_v31 = vrot.slane %v4604_v57, 1  ;;  %v4608_v36 = vshrl.u32 %v12913_v51, 16 }
 0x149   : > { %14146 = vmatmul.mubr.msk.bf16.gmra.mxu1 %vm1755_vm7, %v4567_v3  ;;  %v4592_v3 = vshrl.u32 %v12911_v17, 16  ;;  %v4591_v46 = vsel %vm3131_vm6, %v4586_v13, %v4590_v55  ;;  %v20533_v17 = vcombine.low %v15896_v27, %v15921_v9  ;;  %v4598_v32 = vrot.slane %v4596_v33, 1  ;;  %v4908_v27 = vld [vmem:[#allocation2 + $0x14] sm:$0x8]  ;;  %v16255_v9 = vld [vmem:[#allocation2 + $0x18] sm:$0xf] }
 0x14a   : > { %14149 = vmatprep.mubr.msk.bf16.mxu1 %vm1755_vm7, %v4575_v37  ;;  %v16236_v37 = vpop.f32.mrf.mxu0  ;;  %v12914_v54 = vcombine.low %v4434_v39, %v4435_v59  ;;  %v20536_v59 = vld [vmem:[#allocation71_spill] sm:$0xff]  ;;  %v4620_v57 = vshll.u32 %v16251_v30, 16 }
 0x14b   : > { %20531 = vst [vmem:[#allocation106_spill] sm:$0xff] %v16236_v37  ;;  %v4594_v50 = vor.u32 %v4592_v3, %v4590_v55  ;;  %v4602_v13 = vor.u32 %v4600_v15, %v4598_v32  ;;  %v12881_v39 = vcombine.low %v20536_v59, %v15987_v48  ;;  %v20538_v3 = vld [vmem:[#allocation68_spill] sm:$0xff]  ;;  %v16267_v37 = vld [vmem:[#allocation2 + $0x20] sm:$0xf] }
 0x14c   : > { %v16253_v6 = vpop.f32.mrf.mxu0  ;;  %v4439_v33 = vmul.bf16 %v4406_v47, %v20538_v3  ;;  %v4616_v15 = vshrl.u32 %v12914_v54, 16  ;;  %v20540_v48 = vld [vmem:[#allocation5_spill] sm:$0xff]  ;;  %v20543_v3 = vcombine.low %v15934_v1, %v15941_v43  ;;  %v20545_v1 = vld [vmem:[#allocation7_spill] sm:$0xff] }
 0x14d   : > { %20535 = vst [vmem:[#allocation108_spill] sm:$0xff] %v16253_v6  ;;  %v4599_v2 = vsel %vm3131_vm6, %v4594_v50, %v4598_v32  ;;  %v16265_v6 = vld [vmem:[#allocation2 + $0x1c] sm:$0xf]  ;;  %v4941_v59 = vmul.bf16 %v4908_v27, %v20540_v48  ;;  %v4607_v51 = vsel %vm3131_vm6, %v4602_v13, %v4606_v31  ;;  %v4441_v50 = vmul.bf16 %v4408_v52, %v15982_v23  ;;  %v16294_v23 = vld [vmem:[#allocation2 + $0x28] sm:$0xf] }
 0x14e   : > { %v16272_v47 = vpop.f32.mrf.mxu0  ;;  %v4943_v43 = vmul.bf16 %v16265_v6, %v20545_v1 }
 0x14f   : > { %14120 = vmatmul.mubr.msk.bf16.gmra.mxu0 %vm1755_vm7, %v20532_v60  ;;  %v4612_v60 = vshll.u32 %v12914_v54, 16  ;;  %20542 = vst [vmem:[#allocation109_spill] sm:$0xff] %v16272_v47  ;;  %v16285_v47 = vld [vmem:[#allocation2 + $0x24] sm:$0xf] }
 0x150   : > { %14123 = vmatprep.mubr.msk.bf16.mxu0 %vm1755_vm7, %v20533_v17  ;;  %v4407_v17 = vld [vmem:[#allocation2 + $0x78] sm:$0xf] }
 0x151   : > { %14150 = vmatmul.mubr.msk.bf16.gmra.mxu1 %vm1755_vm7, %v4583_v61  ;;  %v20537_v61 = vld [vmem:[#allocation66_spill] sm:$0xff]  ;;  %v4440_v54 = vmul.bf16 %v4407_v17, %v15978_v14  ;;  %v4614_v32 = vrot.slane %v4612_v60, 1  ;;  %v4622_v17 = vrot.slane %v4620_v57, 1  ;;  %v4409_v60 = vld [vmem:[#allocation2 + $0x80] sm:$0xf]  ;;  %v20550_v14 = vld [vmem:[#allocation76_spill] sm:$0xff] }
 0x152   : > { %14153 = vmatprep.mubr.msk.bf16.mxu1 %vm1755_vm7, %v4591_v46  ;;  %v4438_v55 = vmul.bf16 %v4405_v25, %v20537_v61  ;;  %v16261_v46 = vpop.f32.mrf.mxu1  ;;  %v4942_v25 = vmul.bf16 %v16255_v9, %v20541_v7  ;;  %v4610_v7 = vor.u32 %v4608_v36, %v4606_v31  ;;  %v4624_v36 = vshrl.u32 %v16251_v30, 16  ;;  %v4412_v57 = vld [vmem:[#allocation2 + $0x8c] sm:$0xf] }
 0x153   : > { %20539 = vst [vmem:[#allocation71_spill] sm:$0xff] %v16261_v46  ;;  %v4618_v52 = vor.u32 %v4616_v15, %v4614_v32  ;;  %v16296_v31 = vcombine.low %v4440_v54, %v4441_v50  ;;  %v4411_v15 = vld [vmem:[#allocation2 + $0x88] sm:$0xf]  ;;  %v4442_v61 = vmul.bf16 %v4409_v60, %v20550_v14  ;;  %v20558_v14 = vld [vmem:[#allocation12_spill] sm:$0xff] }
 0x154   : > { %v12916_v27 = vcombine.low %v4438_v55, %v4439_v33  ;;  %v16282_v48 = vpop.f32.mrf.mxu1  ;;  %v4410_v55 = vld [vmem:[#allocation2 + $0x84] sm:$0xf]  ;;  %v16292_v33 = vpop.f32.mrf.mxu0  ;;  %v20551_v54 = vld [vmem:[#allocation78_spill] sm:$0xff] }
 0x155   : > { %20544 = vst [vmem:[#allocation110_spill] sm:$0xff] %v16282_v48  ;;  %20547 = vst [vmem:[#allocation111_spill] sm:$0xff] %v16292_v33  ;;  %v4443_v50 = vmul.bf16 %v4410_v55, %v20551_v54  ;;  %v20556_v55 = vld [vmem:[#allocation89_spill] sm:$0xff]  ;;  %v20561_v48 = vld [vmem:[#allocation90_spill] sm:$0xff] }
 0x156   : > { %v4628_v1 = vshll.u32 %v12916_v27, 16  ;;  %v16315_v4 = vpop.f32.mrf.mxu0  ;;  %v4445_v54 = vmul.bf16 %v4412_v57, %v20556_v55 }
 0x157   : > { %14124 = vmatmul.mubr.msk.bf16.gmra.mxu0 %vm1755_vm7, %v20543_v3  ;;  %v20546_v3 = vld [vmem:[#allocation8_spill] sm:$0xff]  ;;  %20553 = vst [vmem:[#allocation113_spill] sm:$0xff] %v16315_v4 }
 0x158   : > { %14127 = vmatprep.mubr.msk.bf16.mxu0 %vm1755_vm7, %v12881_v39  ;;  %v4944_v13 = vmul.bf16 %v16267_v37, %v20546_v3  ;;  %v12938_v39 = vcombine.low %v4941_v59, %v4942_v25  ;;  %v20548_v3 = vld [vmem:[#allocation9_spill] sm:$0xff]  ;;  %v16303_v59 = vpop.f32.mrf.mxu1  ;;  %v4615_v25 = vsel %vm3131_vm6, %v4610_v7, %v4614_v32  ;;  %v20554_v7 = vcombine.low %v15998_v63, %v16002_v62 }
 0x159   : > { %14154 = vmatmul.mubr.msk.bf16.gmra.mxu1 %vm1755_vm7, %v4599_v2  ;;  %v12883_v2 = vcombine.low %v16015_v18, %v16053_v20  ;;  %20549 = vst [vmem:[#allocation112_spill] sm:$0xff] %v16303_v59  ;;  %v16310_v18 = vld [vmem:[#allocation2 + $0x30] sm:$0xf]  ;;  %v4623_v20 = vsel %vm3131_vm6, %v4618_v52, %v4622_v17  ;;  %v4632_v32 = vshrl.u32 %v12916_v27, 16  ;;  %v4630_v52 = vrot.slane %v4628_v1, 1 }
 0x15a   : > { %14157 = vmatprep.mubr.msk.bf16.mxu1 %vm1755_vm7, %v4607_v51  ;;  %v4945_v51 = vmul.bf16 %v16285_v47, %v20548_v3  ;;  %v12939_v33 = vcombine.low %v4943_v43, %v4944_v13  ;;  %v5060_v30 = vshrl.u32 %v12938_v39, 16  ;;  %v5063_v58 = vshll.u32 %v12938_v39, 16  ;;  %v20552_v3 = vld [vmem:[#allocation10_spill] sm:$0xff]  ;;  %v20555_v13 = vld [vmem:[#allocation88_spill] sm:$0xff]  ;;  %v20557_v39 = vld [vmem:[#allocation11_spill] sm:$0xff]  ;;  %v16329_v59 = vpop.f32.mrf.mxu1 }
 0x15b   : > { %v4946_v35 = vmul.bf16 %v16294_v23, %v20552_v3  ;;  %v4636_v43 = vshll.u32 %v16296_v31, 16  ;;  %v4444_v60 = vmul.bf16 %v4411_v15, %v20555_v13  ;;  %v4947_v3 = vmul.bf16 %v16308_v45, %v20557_v39  ;;  %20559 = vst [vmem:[#allocation114_spill] sm:$0xff] %v16329_v59  ;;  %v20562_v59 = vld [vmem:[#allocation86_spill] sm:$0xff] }
 0x15c   : > { %v4948_v4 = vmul.bf16 %v16310_v18, %v20558_v14  ;;  %v4626_v63 = vor.u32 %v4624_v36, %v4622_v17  ;;  %v5068_v62 = vshrl.u32 %v12939_v33, 16  ;;  %v5071_v27 = vshll.u32 %v12939_v33, 16  ;;  %v4413_v14 = vld [vmem:[#allocation2 + $0x90] sm:$0x1]  ;;  %v16339_v17 = vld [vmem:[#allocation2 + $0x34] sm:$0xf] }
 0x15d   : > { %v5062_v15 = vrot.slane %v5060_v30, 3  ;;  %v12940_v57 = vcombine.low %v4945_v51, %v4946_v35  ;;  %v5065_v1 = vrot.slane %v5063_v58, 4  ;;  %v4634_v55 = vor.u32 %v4632_v32, %v4630_v52  ;;  %v16341_v33 = vld [vmem:[#allocation2 + $0x38] sm:$0xf]  ;;  %v20564_v32 = vld [vmem:[#allocation85_spill] sm:$0xff] }
 0x15e   : > { %v4638_v39 = vrot.slane %v4636_v43, 1  ;;  %v16335_v13 = vcombine.low %v4444_v60, %v4445_v54  ;;  %v12885_v46 = vcombine.low %v20562_v59, %v20561_v48  ;;  %v4631_v35 = vsel %vm3131_vm6, %v4626_v63, %v4630_v52 }
 0x15f   : > { %14128 = vmatmul.mubr.msk.bf16.gmra.mxu0 %vm1755_vm7, %v20554_v7  ;;  %v12918_v7 = vcombine.low %v4442_v61, %v4443_v50  ;;  %v16343_v61 = vpop.f32.mrf.mxu1  ;;  %v5070_v36 = vrot.slane %v5068_v62, 3  ;;  %v5073_v51 = vrot.slane %v5071_v27, 4  ;;  %v16346_v50 = vld [vmem:[#allocation2 + $0x3c] sm:$0xf]  ;;  %v5077_v54 = vshrl.u32 %v12940_v57, 16 }
 0x160   : > { %14131 = vmatprep.mubr.msk.bf16.mxu0 %vm1755_vm7, %v12883_v2  ;;  %v16333_v2 = vpop.f32.mrf.mxu0  ;;  %20563 = vst [vmem:[#allocation90_spill] sm:$0xff] %v16343_v61  ;;  %v4640_v30 = vshrl.u32 %v16296_v31, 16  ;;  %v4446_v48 = vmul.bf16 %v4413_v14, %v20564_v32  ;;  %v20565_v59 = vcombine.low %v16060_v56, %v16065_v28  ;;  %v5066_v43 = vor.u32 %v5065_v1, %v5062_v15  ;;  %v20566_v14 = vld [vmem:[#allocation13_spill] sm:$0xff]  ;;  %v20570_v15 = vld [vmem:[#allocation16_spill] sm:$0xff] }
 0x161   : > { %14158 = vmatmul.mubr.msk.bf16.gmra.mxu1 %vm1755_vm7, %v4615_v25  ;;  %20560 = vst [vmem:[#allocation115_spill] sm:$0xff] %v16333_v2  ;;  %v12941_v25 = vcombine.low %v4947_v3, %v4948_v4  ;;  %v4644_v58 = vshll.u32 %v12918_v7, 16  ;;  %v16350_v4 = vld [vmem:[#allocation2 + $0x40] sm:$0xf]  ;;  %v4639_v60 = vsel %vm3131_vm6, %v4634_v55, %v4638_v39  ;;  %v4648_v52 = vshrl.u32 %v12918_v7, 16  ;;  %v16365_v32 = vpop.f32.mrf.mxu1  ;;  %v20569_v55 = vld [vmem:[#allocation15_spill] sm:$0xff] }
 0x162   : > { %14161 = vmatprep.mubr.msk.bf16.mxu1 %vm1755_vm7, %v4623_v20  ;;  %v5080_v20 = vshll.u32 %v12940_v57, 16  ;;  %v16352_v3 = vpop.f32.mrf.mxu0  ;;  %v4652_v63 = vshll.u32 %v16335_v13, 16  ;;  %v4949_v27 = vmul.bf16 %v16339_v17, %v20566_v14  ;;  %v20567_v57 = vld [vmem:[#allocation14_spill] sm:$0xff]  ;;  %20568 = vst [vmem:[#allocation86_spill] sm:$0xff] %v16365_v32  ;;  %v5074_v56 = vor.u32 %v5073_v51, %v5070_v36  ;;  %v16377_v36 = vld [vmem:[#allocation2 + $0x44] sm:$0xf] }
 0x163   : > { %v5086_v31 = vshrl.u32 %v12941_v25, 16  ;;  %v5089_v62 = vshll.u32 %v12941_v25, 16  ;;  %v4950_v2 = vmul.bf16 %v16341_v33, %v20567_v57  ;;  %v4646_v28 = vrot.slane %v4644_v58, 1  ;;  %v20571_v57 = vld [vmem:[#allocation91_spill] sm:$0xff] }
 0x164   : > { %v4951_v7 = vmul.bf16 %v16346_v50, %v20569_v55  ;;  %v4642_v1 = vor.u32 %v4640_v30, %v4638_v39  ;;  %v12920_v25 = vcombine.low %v4446_v48, %v4446_v48  ;;  %v12886_v14 = vcombine.low %v20571_v57, %v16108_v11 }
 0x165   : > { %v5079_v32 = vrot.slane %v5077_v54, 3  ;;  %v4650_v61 = vor.u32 %v4648_v52, %v4646_v28  ;;  %v5082_v51 = vrot.slane %v5080_v20, 4  ;;  %v5088_v58 = vrot.slane %v5086_v31, 3  ;;  %v16388_v52 = vld [vmem:[#allocation2 + $0x50] sm:$0xf] }
 0x166   : > { %v5091_v55 = vrot.slane %v5089_v62, 4  ;;  %v12942_v34 = vcombine.low %v4949_v27, %v4950_v2  ;;  %v5075_v39 = vsel %vm2052_vm14, %v5066_v43, %v5074_v56  ;;  %v4647_v48 = vsel %vm3131_vm6, %v4642_v1, %v4646_v28  ;;  %v20574_v43 = vld [vmem:[#allocation18_spill] sm:$0xff]  ;;  %v20576_v1 = vld [vmem:[#allocation19_spill] sm:$0xff] }
 0x167   : > { %14132 = vmatmul.mubr.msk.bf16.gmra.mxu0 %vm1755_vm7, %v20565_v59  ;;  %v16373_v59 = vpop.f32.mrf.mxu0  ;;  %v4656_v11 = vshrl.u32 %v16335_v13, 16  ;;  %v4660_v54 = vshll.u32 %v12920_v25, 16  ;;  %v4954_v62 = vmul.bf16 %v16379_v42, %v20574_v43  ;;  %v5083_v13 = vor.u32 %v5082_v51, %v5079_v32  ;;  %v20577_v25 = vld [vmem:[#allocation20_spill] sm:$0xff] }
 0x168   : > { %14135 = vmatprep.mubr.msk.bf16.mxu0 %vm1755_vm7, %v12885_v46  ;;  %v4952_v46 = vmul.bf16 %v16350_v4, %v20570_v15  ;;  %v16381_v15 = vpop.f32.mrf.mxu1  ;;  %v5092_v27 = vor.u32 %v5091_v55, %v5088_v58  ;;  %v5095_v57 = vshrl.u32 %v12942_v34, 16  ;;  %v5098_v28 = vshll.u32 %v12942_v34, 16  ;;  %v16409_v34 = vld [vmem:[#allocation2 + $0x54] sm:$0xf] }
 0x169   : > { %14162 = vmatmul.mubr.msk.bf16.gmra.mxu1 %vm1755_vm7, %v4631_v35  ;;  %v4654_v35 = vrot.slane %v4652_v63, 1  ;;  %20572 = vst [vmem:[#allocation91_spill] sm:$0xff] %v16381_v15  ;;  %v16390_v20 = vpop.f32.mrf.mxu0  ;;  %v20573_v63 = vld [vmem:[#allocation17_spill] sm:$0xff]  ;;  %v5084_v51 = vsel %vm2052_vm14, %v5074_v56, %v5083_v13  ;;  %v6113_v58 = vsel %vm1804_vm0, %v16161_v24, 0  ;;  %v12972_v24 = vcombine.low %v16255_v9, %v16265_v6  ;;  %v20583_v6 = vld [vmem:[#allocation24_spill] sm:$0xff] }
 0x16a   : > { %14165 = vmatprep.mubr.msk.bf16.mxu1 %vm1755_vm7, %v4639_v60  ;;  %v12943_v30 = vcombine.low %v4951_v7, %v4952_v46  ;;  %v16386_v60 = vld [vmem:[#allocation2 + $0x4c] sm:$0xf]  ;;  %v4953_v31 = vmul.bf16 %v16377_v36, %v20573_v63  ;;  %v16399_v7 = vpop.f32.mrf.mxu1  ;;  %v4956_v63 = vmul.bf16 %v16388_v52, %v20577_v25  ;;  %v16419_v25 = vld [vmem:[#allocation2 + $0x5c] sm:$0xf]  ;;  %vm6785_vm0 = vcmask 1043456  }
 0x16b   : > { %v4655_v2 = vsel %vm3131_vm6, %v4650_v61, %v4654_v35  ;;  %20575 = vst [vmem:[#allocation116_spill] sm:$0xff] %v16399_v7  ;;  %v4955_v61 = vmul.bf16 %v16386_v60, %v20576_v1  ;;  %v4658_v43 = vor.u32 %v4656_v11, %v4654_v35  ;;  %v16407_v32 = vpop.f32.mrf.mxu0  ;;  %v16414_v1 = vld [vmem:[#allocation2 + $0x58] sm:$0xf] }
 0x16c   : > { %v5104_v46 = vshrl.u32 %v12943_v30, 16  ;;  %20578 = vst [vmem:[#allocation117_spill] sm:$0xff] %v16407_v32  ;;  %v12944_v55 = vcombine.low %v4953_v31, %v4954_v62  ;;  %v16416_v7 = vpop.f32.mrf.mxu1  ;;  %v16421_v31 = vld [vmem:[#allocation2 + $0x60] sm:$0xf] }
 0x16d   : > { %20579 = vst [vmem:[#allocation118_spill] sm:$0xff] %v16416_v7  ;;  %v20580_v32 = vld [vmem:[#allocation21_spill] sm:$0xff]  ;;  %v4960_v9 = vmul.bf16 %v16421_v31, %v20583_v6  ;;  %v12973_v6 = vcombine.low %v16267_v37, %v16285_v47 }
 0x16e   : > { %v5106_v35 = vrot.slane %v5104_v46, 3  ;;  %v20581_v46 = vld [vmem:[#allocation22_spill] sm:$0xff] }
 0x16f   : > { %14136 = vmatmul.mubr.msk.bf16.gmra.mxu0 %vm1755_vm7, %v12886_v14  ;;  %v5107_v14 = vshll.u32 %v12943_v30, 16  ;;  %v5097_v30 = vrot.slane %v5095_v57, 3  ;;  %v5113_v57 = vshrl.u32 %v12944_v55, 16 }
 0x170   : > { %14175 = vmatprep.mubr.msk.bf16.mxu0 %vm1755_vm7, %v5075_v39  ;;  %v4662_v39 = vrot.slane %v4660_v54, 1  ;;  %v12945_v54 = vcombine.low %v4955_v61, %v4956_v63  ;;  %v4958_v63 = vmul.bf16 %v16414_v1, %v20581_v46 }
 0x171   : > { %14166 = vmatmul.mubr.msk.bf16.gmra.mxu1 %vm1755_vm7, %v4647_v48  ;;  %v5100_v48 = vrot.slane %v5098_v28, 4  ;;  %v5109_v11 = vrot.slane %v5107_v14, 4  ;;  %v5116_v28 = vshll.u32 %v12944_v55, 16 }
 0x172   : > { %14169 = vmatprep.mubr.msk.bf16.mxu1 %vm1755_vm7, %v4655_v2  ;;  %v5093_v2 = vsel %vm2052_vm14, %v5083_v13, %v5092_v27  ;;  %v4663_v56 = vsel %vm3131_vm6, %v4658_v43, %v4662_v39  ;;  %v4957_v13 = vmul.bf16 %v16409_v34, %v20580_v32  ;;  %v20582_v43 = vld [vmem:[#allocation23_spill] sm:$0xff]  ;;  %v16438_v39 = vpop.f32.mrf.mxu1  ;;  %v5125_v32 = vshll.u32 %v12945_v54, 16 }
 0x173   : > { %v5101_v14 = vor.u32 %v5100_v48, %v5097_v30  ;;  %v4959_v61 = vmul.bf16 %v16419_v25, %v20582_v43  ;;  %20584 = vst [vmem:[#allocation119_spill] sm:$0xff] %v16438_v39  ;;  %v5110_v55 = vor.u32 %v5109_v11, %v5106_v35  ;;  %v20589_v39 = vld [vmem:[#allocation27_spill] sm:$0xff] }
 0x174   : > { %v16426_v62 = vpop.f32.mrf.mxu0  ;;  %v12946_v30 = vcombine.low %v4957_v13, %v4958_v63  ;;  %v16445_v7 = vpop.f32.mrf.mxu1  ;;  %v5127_v11 = vrot.slane %v5125_v32, 4 }
 0x175   : > { %v5102_v48 = vsel %vm2052_vm14, %v5092_v27, %v5101_v14  ;;  %v12947_v43 = vcombine.low %v4959_v61, %v4960_v9  ;;  %20585 = vst [vmem:[#allocation120_spill] sm:$0xff] %v16445_v7  ;;  %v16458_v27 = vld [vmem:[#allocation2 + $0x70] sm:$0xf]  ;;  %v20586_v61 = vld [vmem:[#allocation25_spill] sm:$0xff] }
 0x176   : > { %v16442_v46 = vpop.f32.mrf.mxu0  ;;  %v5131_v47 = vshrl.u32 %v12946_v30, 16  ;;  %v5134_v63 = vshll.u32 %v12946_v30, 16 }
 0x177   : > { %14176 = vmatmul.mubr.msk.bf16.vlgmr.msra.gmra.mxu0 %vm1755_vm7, %v5084_v51  ;;  %v5122_v51 = vshrl.u32 %v12945_v54, 16  ;;  %v16450_v54 = vld [vmem:[#allocation2 + $0x64] sm:$0xf]  ;;  %v5140_v32 = vshrl.u32 %v12947_v43, 16 }
 0x178   : > { %14242 = vmatpush3.bf16.msra.mxu0 %v6113_v58  ;;  %14179 = vmatprep.mubr.msk.bf16.mxu0 %vm1755_vm7, %v5093_v2  ;;  %v5115_v58 = vrot.slane %v5113_v57, 3  ;;  %v5118_v2 = vrot.slane %v5116_v28, 4  ;;  %v12974_v57 = vcombine.low %v16294_v23, %v16308_v45  ;;  %v16456_v28 = vld [vmem:[#allocation2 + $0x6c] sm:$0xf]  ;;  %v16460_v13 = vpop.f32.mrf.mxu0  ;;  %v4961_v9 = vmul.bf16 %v16450_v54, %v20586_v61  ;;  %v16468_v45 = vpop.f32.mrf.mxu1  ;;  %v16479_v61 = vld [vmem:[#allocation2 + $0x74] sm:$0xf] }
 0x179   : > { %14170 = vmatmul.mubr.msk.bf16.gmra.mxu1 %vm1755_vm7, %v4663_v56  ;;  %v5111_v56 = vsel %vm2052_vm14, %v5101_v14, %v5110_v55  ;;  %v5124_v35 = vrot.slane %v5122_v51, 3  ;;  %v5143_v14 = vshll.u32 %v12947_v43, 16  ;;  %v20587_v51 = vld [vmem:[#allocation26_spill] sm:$0xff]  ;;  %20588 = vst [vmem:[#allocation121_spill] sm:$0xff] %v16468_v45  ;;  %v5136_v45 = vrot.slane %v5134_v63, 4 }
 0x17a   : > { %14209 = vmatprep.mubr.msk.bf16.mxu1 %vm1755_vm7, %v12972_v24  ;;  %v16452_v24 = vld [vmem:[#allocation2 + $0x68] sm:$0xf]  ;;  %v5119_v37 = vor.u32 %v5118_v2, %v5115_v58  ;;  %v4963_v58 = vmul.bf16 %v16456_v28, %v20589_v39  ;;  %v20590_v2 = vld [vmem:[#allocation28_spill] sm:$0xff]  ;;  %v16476_v43 = vpop.f32.mrf.mxu0 }
 0x17b   : > { %v4962_v23 = vmul.bf16 %v16452_v24, %v20587_v51  ;;  %v5128_v7 = vor.u32 %v5127_v11, %v5124_v35  ;;  %v4964_v30 = vmul.bf16 %v16458_v27, %v20590_v2  ;;  %20591 = vst [vmem:[#allocation122_spill] sm:$0xff] %v16476_v43  ;;  %v16481_v51 = vld [vmem:[#allocation2 + $0x78] sm:$0xf]  ;;  %v5145_v35 = vrot.slane %v5143_v14, 4  ;;  %v14035_v15 = vpop.f32.mrf.mxu1  ;;  %v16492_v63 = vld [vmem:[#allocation2 + $0x7c] sm:$0xf] }
 0x17c   : > { %v12975_v2 = vcombine.low %v16310_v18, %v16339_v17  ;;  %v12976_v43 = vcombine.low %v16341_v33, %v16346_v50  ;;  %v4966_v53 = vmul.bf16 %v16481_v51, %v20593_v26  ;;  %v20595_v26 = vld [vmem:[#allocation32_spill] sm:$0xff] }
 0x17d   : > { %v12948_v11 = vcombine.low %v4961_v9, %v4962_v23  ;;  %v5129_v39 = vsel %vm2052_vm14, %v5119_v37, %v5128_v7  ;;  %v2402_v50 = vpop.f32.mrf.mxu1 }
 0x17f   : > { %14180 = vmatmul.mubr.msk.bf16.gmra.mxu0 %vm1755_vm7, %v5102_v48  ;;  %v5120_v48 = vsel %vm2052_vm14, %v5110_v55, %v5119_v37  ;;  %v20592_v55 = vld [vmem:[#allocation29_spill] sm:$0xff]  ;;  %v5149_v37 = vshrl.u32 %v12948_v11, 16  ;;  %v5152_v33 = vshll.u32 %v12948_v11, 16  ;;  %v16514_v11 = vld [vmem:[#allocation2 + $0x88] sm:$0xf] }
 0x180   : > { %14183 = vmatprep.mubr.msk.bf16.mxu0 %vm1755_vm7, %v5111_v56  ;;  %v5133_v56 = vrot.slane %v5131_v47, 3  ;;  %v4965_v47 = vmul.bf16 %v16479_v61, %v20592_v55  ;;  %20596 = vst [vmem:[#allocation123_spill] sm:$0xff] %v16514_v11 }
 0x181   : > { %14210 = vmatmul.mubr.msk.bf16.vlgmr.msra.gmra.mxu1 %vm1755_vm7, %v12973_v6  ;;  %v5142_v6 = vrot.slane %v5140_v32, 3  ;;  %v16494_v32 = vld [vmem:[#allocation2 + $0x80] sm:$0xf] }
 0x182   : > { %14213 = vmatprep.mubr.msk.bf16.mxu1 %vm1755_vm7, %v12974_v57  ;;  %v12949_v57 = vcombine.low %v4963_v58, %v4964_v30  ;;  %v16496_v14 = vpop.f32.mrf.mxu0  ;;  %v5137_v18 = vor.u32 %v5136_v45, %v5133_v56  ;;  %v20594_v58 = vld [vmem:[#allocation31_spill] sm:$0xff]  ;;  %v4968_v55 = vmul.bf16 %v16494_v32, %v20595_v26  ;;  %v5151_v56 = vrot.slane %v5149_v37, 3 }
 0x183   : > { %v5146_v17 = vor.u32 %v5145_v35, %v5142_v6  ;;  %v4967_v30 = vmul.bf16 %v16492_v63, %v20594_v58  ;;  %v5154_v6 = vrot.slane %v5152_v33, 4  ;;  %v16512_v35 = vld [vmem:[#allocation2 + $0x84] sm:$0xf] }
 0x184   : > { %v5158_v9 = vshrl.u32 %v12949_v57, 16  ;;  %v5161_v23 = vshll.u32 %v12949_v57, 16  ;;  %v16506_v40 = vpop.f32.mrf.mxu0  ;;  %v5138_v45 = vsel %vm2052_vm14, %v5128_v7, %v5137_v18  ;;  %v14036_v57 = vpop.f32.mrf.mxu1  ;;  %v20599_v33 = vld [vmem:[#allocation33_spill] sm:$0xff] }
 0x186   : > { %v5160_v26 = vrot.slane %v5158_v9, 3  ;;  %v5163_v58 = vrot.slane %v5161_v23, 4  ;;  %v16525_v37 = vpop.f32.mrf.mxu0  ;;  %v4969_v9 = vmul.bf16 %v16512_v35, %v20599_v33 }
 0x187   : > { %14184 = vmatmul.mubr.msk.bf16.gmra.mxu0 %vm1755_vm7, %v5120_v48  ;;  %v12950_v48 = vcombine.low %v4965_v47, %v4966_v53  ;;  %v16516_v53 = vld [vmem:[#allocation2 + $0x8c] sm:$0xf]  ;;  %v16518_v47 = vld [vmem:[#allocation2 + $0x90] sm:$0xf] }
 0x188   : > { %14187 = vmatprep.mubr.msk.bf16.mxu0 %vm1755_vm7, %v5129_v39  ;;  %v12977_v39 = vcombine.low %v16350_v4, %v16377_v36  ;;  %20597 = vst [vmem:[#allocation124_spill] sm:$0xff] %v16516_v53  ;;  %v16521_v4 = vadd.f32 %v14035_v15, %v16352_v3  ;;  %v16536_v3 = vadd.f32 %v14036_v57, %v16390_v20  ;;  %v20608_v57 = vld [vmem:[#allocation62_spill] sm:$0xff] }
 0x189   : > { %14214 = vmatmul.mubr.msk.bf16.gmra.mxu1 %vm1755_vm7, %v12975_v2  ;;  %v5147_v2 = vsel %vm2052_vm14, %v5137_v18, %v5146_v17  ;;  %v5167_v36 = vshrl.u32 %v12950_v48, 16  ;;  %v5170_v7 = vshll.u32 %v12950_v48, 16  ;;  %v12978_v18 = vcombine.low %v16379_v42, %v16386_v60  ;;  %v20603_v42 = vld [vmem:[#allocation35_spill] sm:$0xff]  ;;  %v20604_v48 = vld [vmem:[#allocation37_spill] sm:$0xff] }
 0x18a   : > { %14217 = vmatprep.mubr.msk.bf16.mxu1 %vm1755_vm7, %v12976_v43  ;;  %v12951_v43 = vcombine.low %v4967_v30, %v4968_v55  ;;  %20598 = vst [vmem:[#allocation125_spill] sm:$0xff] %v16521_v4  ;;  %v20600_v55 = vld [vmem:[#allocation34_spill] sm:$0xff]  ;;  %v16533_v30 = vadd.f32 %v2402_v50, %v16373_v59  ;;  %20602 = vst [vmem:[#allocation127_spill] sm:$0xff] %v16536_v3  ;;  %v5155_v15 = vor.u32 %v5154_v6, %v5151_v56  ;;  %v20606_v59 = vld [vmem:[#allocation61_spill] sm:$0xff] }
 0x18b   : > { %v4970_v23 = vmul.bf16 %v16514_v11, %v20600_v55  ;;  %v4971_v60 = vmul.bf16 %v16516_v53, %v20603_v42  ;;  %v5164_v33 = vor.u32 %v5163_v58, %v5160_v26  ;;  %v16544_v11 = vpop.f32.mrf.mxu1  ;;  %v20607_v50 = vld [vmem:[#allocation77_spill] sm:$0xff]  ;;  %v20609_v3 = vld [vmem:[#allocation80_spill] sm:$0xff]  ;;  %v20610_v56 = vld [vmem:[#allocation63_spill] sm:$0xff] }
 0x18c   : > { %20601 = vst [vmem:[#allocation126_spill] sm:$0xff] %v16533_v30  ;;  %v5176_v4 = vshrl.u32 %v12951_v43, 16  ;;  %v5179_v55 = vshll.u32 %v12951_v43, 16  ;;  %20605 = vst [vmem:[#allocation128_spill] sm:$0xff] %v16544_v11  ;;  %v2299_v20 = vadd.f32 %v20607_v50, %v20606_v59  ;;  %v20611_v6 = vld [vmem:[#allocation82_spill] sm:$0xff]  ;;  %v20612_v42 = vld [vmem:[#allocation79_spill] sm:$0xff] }
 0x18d   : > { %v2302_v30 = vadd.f32 %v20611_v6, %v20610_v56  ;;  %v2331_v53 = vadd.f32 %v16150_v41, %v20612_v42  ;;  %v20613_v26 = vld [vmem:[#allocation81_spill] sm:$0xff]  ;;  %v5169_v43 = vrot.slane %v5167_v36, 3  ;;  %v12952_v11 = vcombine.low %v4969_v9, %v4970_v23  ;;  %v16559_v59 = vld [vmem:[#allocation2 + $0x94] sm:$0xf]  ;;  %v5781_v9 = vld [vmem:[#allocation2 + $0x18] sm:$0xf] }
 0x18e   : > { %v2323_v58 = vadd.f32 %v16171_v0, %v20613_v26  ;;  %v20614_v50 = vld [vmem:[#allocation83_spill] sm:$0xff]  ;;  %v3478_v41 = vadd.f32 %v16426_v62, %v2299_v20  ;;  %v12979_v42 = vcombine.low %v16388_v52, %v16409_v34  ;;  %v5178_v6 = vrot.slane %v5176_v4, 3  ;;  %v5782_v23 = vld [vmem:[#allocation2 + $0x1c] sm:$0xf] }
 0x18f   : > { %14188 = vmatmul.mubr.msk.bf16.gmra.mxu0 %vm1755_vm7, %v5138_v45  ;;  %v4972_v45 = vmul.bf16 %v16518_v47, %v20604_v48  ;;  %v5172_v48 = vrot.slane %v5170_v7, 4  ;;  %v5181_v0 = vrot.slane %v5179_v55, 4  ;;  %v12980_v7 = vcombine.low %v16414_v1, %v16419_v25 }
 0x190   : > { %14191 = vmatprep.mubr.msk.bf16.mxu0 %vm1755_vm7, %v5147_v2  ;;  %v2291_v2 = vadd.f32 %v20609_v3, %v20608_v57  ;;  %v5156_v3 = vsel %vm2052_vm14, %v5146_v17, %v5155_v15  ;;  %v2334_v57 = vadd.f32 %v16185_v49, %v20614_v50  ;;  %v4973_v17 = vmul.bf16 %v16559_v59, %v20503_v10  ;;  %v5783_v50 = vld [vmem:[#allocation2 + $0x20] sm:$0xf] }
 0x191   : > { %14218 = vmatmul.mubr.msk.bf16.gmra.mxu1 %vm1755_vm7, %v12977_v39  ;;  %v16555_v39 = vpop.f32.mrf.mxu0  ;;  %v12953_v56 = vcombine.low %v4971_v60, %v4972_v45  ;;  %v5185_v52 = vshrl.u32 %v12952_v11, 16  ;;  %v5188_v34 = vshll.u32 %v12952_v11, 16  ;;  %v3479_v45 = vadd.f32 %v16460_v13, %v2302_v30 }
 0x192   : > { %14221 = vmatprep.mubr.msk.bf16.mxu1 %vm1755_vm7, %v12978_v18  ;;  %v5165_v18 = vsel %vm2052_vm14, %v5155_v15, %v5164_v33  ;;  %v3476_v49 = vadd.f32 %v16442_v46, %v2291_v2  ;;  %v5173_v15 = vor.u32 %v5172_v48, %v5169_v43  ;;  %v5182_v46 = vor.u32 %v5181_v0, %v5178_v6  ;;  %v20615_v2 = vld [vmem:[#allocation38_spill] sm:$0xff] }
 0x193   : > { %v5194_v1 = vshrl.u32 %v12953_v56, 16  ;;  %v5197_v25 = vshll.u32 %v12953_v56, 16  ;;  %v5815_v48 = vmul.bf16 %v5782_v23, %v20508_v12  ;;  %v12954_v43 = vcombine.low %v4973_v17, %v4973_v17  ;;  %v5784_v56 = vld [vmem:[#allocation2 + $0x24] sm:$0xf] }
 0x194   : > { %v5174_v30 = vsel %vm2052_vm14, %v5164_v33, %v5173_v15  ;;  %v5187_v6 = vrot.slane %v5185_v52, 3  ;;  %v5190_v0 = vrot.slane %v5188_v34, 4  ;;  %v20616_v17 = vld [vmem:[#allocation41_spill] sm:$0xff]  ;;  %v12982_v33 = vcombine.low %v16452_v24, %v16456_v28  ;;  %v5786_v52 = vld [vmem:[#allocation2 + $0x2c] sm:$0xf]  ;;  %v20618_v28 = vld [vmem:[#allocation92_spill] sm:$0xff] }
 0x195   : > { %v14075_v36 = vpop.f32.mrf.mxu1  ;;  %v5817_v23 = vmul.bf16 %v5784_v56, %v20616_v17  ;;  %v20617_v24 = vld [vmem:[#allocation69_spill] sm:$0xff] }
 0x196   : > { %v14049_v60 = vpop.f32.mrf.mxu0  ;;  %v16573_v62 = vadd.f32 %v14075_v36, %v3478_v41  ;;  %v5199_v36 = vrot.slane %v5197_v25, 4 }
 0x197   : > { %14192 = vmatmul.mubr.msk.bf16.gmra.mxu0 %vm1755_vm7, %v5156_v3  ;;  %v16576_v4 = vadd.f32 %v14049_v60, %v2331_v53  ;;  %v3896_v55 = vpop.f32.mrf.mxu1  ;;  %v5814_v3 = vmul.bf16 %v5781_v9, %v20615_v2  ;;  %v5183_v9 = vsel %vm2052_vm14, %v5173_v15, %v5182_v46  ;;  %v5203_v60 = vshrl.u32 %v12954_v43, 16 }
 0x198   : > { %14195 = vmatprep.mubr.msk.bf16.mxu0 %vm1755_vm7, %v5165_v18  ;;  %v3381_v20 = vpop.f32.mrf.mxu0  ;;  %v16580_v26 = vadd.f32 %v3896_v55, %v3476_v49  ;;  %v12981_v18 = vcombine.low %v16421_v31, %v16450_v54  ;;  %v5206_v55 = vshll.u32 %v12954_v43, 16  ;;  %v5191_v31 = vor.u32 %v5190_v0, %v5187_v6  ;;  %v20620_v43 = vld [vmem:[#allocation43_spill] sm:$0xff] }
 0x199   : > { %14222 = vmatmul.mubr.msk.bf16.gmra.mxu1 %vm1755_vm7, %v12979_v42  ;;  %v16585_v11 = vadd.f32 %v3381_v20, %v2323_v58  ;;  %v14076_v53 = vpop.f32.mrf.mxu1  ;;  %v5196_v58 = vrot.slane %v5194_v1, 3  ;;  %v13005_v49 = vcombine.low %v5814_v3, %v5815_v48  ;;  %v5205_v1 = vrot.slane %v5203_v60, 3  ;;  %v5788_v20 = vld [vmem:[#allocation2 + $0x34] sm:$0xf]  ;;  %v20619_v48 = vld [vmem:[#allocation42_spill] sm:$0xff] }
 0x19a   : > { %14225 = vmatprep.mubr.msk.bf16.mxu1 %vm1755_vm7, %v12980_v7  ;;  %v14050_v41 = vpop.f32.mrf.mxu0  ;;  %v16588_v13 = vadd.f32 %v14076_v53, %v3479_v45  ;;  %v5816_v7 = vmul.bf16 %v5783_v50, %v20509_v8  ;;  %v5208_v25 = vrot.slane %v5206_v55, 4  ;;  %v5787_v45 = vld [vmem:[#allocation2 + $0x30] sm:$0xf]  ;;  %v2315_v3 = vadd.f32 %v20618_v28, %v20617_v24  ;;  %v20622_v60 = vld [vmem:[#allocation70_spill] sm:$0xff] }
 0x19b   : > { %v16593_v42 = vadd.f32 %v14050_v41, %v2334_v57  ;;  %v5200_v54 = vor.u32 %v5199_v36, %v5196_v58  ;;  %v5785_v57 = vld [vmem:[#allocation2 + $0x28] sm:$0xf]  ;;  %v5935_v34 = vshll.u32 %v13005_v49, 16  ;;  %v5819_v50 = vmul.bf16 %v5786_v52, %v20620_v43  ;;  %v16610_v56 = vpop.f32.mrf.mxu1  ;;  %v20621_v36 = vld [vmem:[#allocation44_spill] sm:$0xff]  ;;  %v20627_v24 = vld [vmem:[#allocation95_spill] sm:$0xff] }
 0x19c   : > { %v16603_v15 = vcombine.low %v5816_v7, %v5817_v23  ;;  %v5818_v53 = vmul.bf16 %v5785_v57, %v20619_v48  ;;  %v5192_v41 = vsel %vm2052_vm14, %v5182_v46, %v5191_v31  ;;  %v5933_v6 = vshrl.u32 %v13005_v49, 16  ;;  %v16619_v23 = vpop.f32.mrf.mxu0  ;;  %v20623_v55 = vld [vmem:[#allocation94_spill] sm:$0xff] }
 0x19d   : > { %v5937_v0 = vrot.slane %v5935_v34, 1  ;;  %v5821_v7 = vmul.bf16 %v5788_v20, %v15660_v16  ;;  %v5209_v57 = vor.u32 %v5208_v25, %v5205_v1  ;;  %v12984_v46 = vcombine.low %v16481_v51, %v16492_v63  ;;  %v5789_v1 = vld [vmem:[#allocation2 + $0x38] sm:$0xf]  ;;  %v5790_v25 = vld [vmem:[#allocation2 + $0x3c] sm:$0xf] }
 0x19e   : > { %v5940_v58 = vshll.u32 %v16603_v15, 16  ;;  %v13007_v52 = vcombine.low %v5818_v53, %v5819_v50  ;;  %v2339_v28 = vadd.f32 %v16223_v44, %v20627_v24 }
 0x19f   : > { %14196 = vmatmul.mubr.msk.bf16.gmra.mxu0 %vm1755_vm7, %v5174_v30  ;;  %v5201_v30 = vsel %vm2052_vm14, %v5191_v31, %v5200_v54  ;;  %v3482_v31 = vadd.f32 %v16496_v14, %v2315_v3  ;;  %v20628_v14 = vld [vmem:[#allocation97_spill] sm:$0xff]  ;;  %v5938_v53 = vor.u32 %v5937_v0, %v5933_v6  ;;  %v5210_v44 = vsel %vm2052_vm14, %v5200_v54, %v5209_v57 }
 0x1a0   : > { %14199 = vmatprep.mubr.msk.bf16.mxu0 %vm1755_vm7, %v5183_v9  ;;  %v5820_v9 = vmul.bf16 %v5787_v45, %v20621_v36  ;;  %v20626_v45 = vld [vmem:[#allocation93_spill] sm:$0xff]  ;;  %v2350_v3 = vadd.f32 %v16231_v38, %v20628_v14  ;;  %v5942_v50 = vrot.slane %v5940_v58, 1  ;;  %v5944_v38 = vshrl.u32 %v16603_v15, 16 }
 0x1a1   : > { %14226 = vmatmul.mubr.msk.bf16.gmra.mxu1 %vm1755_vm7, %v12981_v18  ;;  %v12983_v18 = vcombine.low %v16458_v27, %v16479_v61  ;;  %v20624_v27 = vld [vmem:[#allocation72_spill] sm:$0xff]  ;;  %v2347_v20 = vadd.f32 %v16211_v21, %v20626_v45  ;;  %v5822_v6 = vmul.bf16 %v5789_v1, %v15667_v5  ;;  %v5823_v0 = vmul.bf16 %v5790_v25, %v15671_v22  ;;  %v20630_v45 = vld [vmem:[#allocation123_spill] sm:$0xff]  ;;  %v5794_v1 = vld [vmem:[#allocation2 + $0x4c] sm:$0xf] }
 0x1a2   : > { %14229 = vmatprep.mubr.msk.bf16.mxu1 %vm1755_vm7, %v12982_v33  ;;  %v2307_v33 = vadd.f32 %v20623_v55, %v20622_v60  ;;  %v20625_v61 = vld [vmem:[#allocation96_spill] sm:$0xff]  ;;  %v5791_v55 = vld [vmem:[#allocation2 + $0x40] sm:$0xf]  ;;  %v12985_v54 = vcombine.low %v16494_v32, %v16512_v35 }
 0x1a3   : > { %v2318_v49 = vadd.f32 %v20625_v61, %v20624_v27  ;;  %v5824_v15 = vmul.bf16 %v5791_v55, %v15713_v29  ;;  %v13009_v35 = vcombine.low %v5822_v6, %v5823_v0  ;;  %v20632_v55 = vld [vmem:[#allocation51_spill] sm:$0xff]  ;;  %v20669_v29 = vld [vmem:[#allocation120_spill] sm:$0xff] }
 0x1a4   : > { %v3480_v51 = vadd.f32 %v16506_v40, %v2307_v33  ;;  %v5792_v40 = vld [vmem:[#allocation2 + $0x44] sm:$0xf] }
 0x1a5   : > { %v5825_v61 = vmul.bf16 %v5792_v40, %v15717_v19  ;;  %v5827_v40 = vmul.bf16 %v5794_v1, %v20632_v55  ;;  %v20638_v1 = vld [vmem:[#allocation110_spill] sm:$0xff] }
 0x1a7   : > { %14200 = vmatmul.mubr.msk.bf16.gmra.mxu0 %vm1755_vm7, %v5192_v41  ;;  %v14079_v34 = vpop.f32.mrf.mxu1  ;;  %v13008_v41 = vcombine.low %v5820_v9, %v5821_v7  ;;  %v5952_v7 = vshrl.u32 %v13007_v52, 16  ;;  %v13010_v14 = vcombine.low %v5824_v15, %v5825_v61 }
 0x1a8   : > { %14203 = vmatprep.mubr.msk.bf16.mxu0 %vm1755_vm7, %v5201_v30  ;;  %v16635_v63 = vadd.f32 %v14079_v34, %v3482_v31  ;;  %v14053_v21 = vpop.f32.mrf.mxu0  ;;  %v3483_v30 = vadd.f32 %v16525_v37, %v2318_v49  ;;  %v20629_v34 = vld [vmem:[#allocation124_spill] sm:$0xff] }
 0x1a9   : > { %14230 = vmatmul.mubr.msk.bf16.gmra.mxu1 %vm1755_vm7, %v12983_v18  ;;  %v3912_v60 = vpop.f32.mrf.mxu1  ;;  %v16643_v33 = vadd.f32 %v14053_v21, %v2347_v20  ;;  %v5948_v18 = vshll.u32 %v13007_v52, 16  ;;  %v5956_v27 = vshll.u32 %v13008_v41, 16  ;;  %v12986_v20 = vcombine.low %v20630_v45, %v20629_v34  ;;  %v5796_v21 = vld [vmem:[#allocation2 + $0x54] sm:$0xf] }
 0x1aa   : > { %14233 = vmatprep.mubr.msk.bf16.mxu1 %vm1755_vm7, %v12984_v46  ;;  %v16645_v31 = vadd.f32 %v3912_v60, %v3480_v51  ;;  %v3397_v58 = vpop.f32.mrf.mxu0  ;;  %v5943_v46 = vsel %vm3131_vm6, %v5938_v53, %v5942_v50  ;;  %v5946_v52 = vor.u32 %v5944_v38, %v5942_v50  ;;  %v5795_v53 = vld [vmem:[#allocation2 + $0x50] sm:$0xf]  ;;  %v5964_v60 = vshll.u32 %v13009_v35, 16 }
 0x1ab   : > { %v14080_v9 = vpop.f32.mrf.mxu1  ;;  %v16652_v37 = vadd.f32 %v3397_v58, %v2339_v28  ;;  %v5950_v32 = vrot.slane %v5948_v18, 1  ;;  %v5793_v28 = vld [vmem:[#allocation2 + $0x48] sm:$0xf]  ;;  %v5958_v51 = vrot.slane %v5956_v27, 1  ;;  %v12987_v38 = vcombine.low %v16518_v47, %v16559_v59  ;;  %v20633_v58 = vld [vmem:[#allocation52_spill] sm:$0xff] }
 0x1ac   : > { %v16654_v57 = vadd.f32 %v14080_v9, %v3483_v30  ;;  %v14054_v49 = vpop.f32.mrf.mxu0  ;;  %v20631_v30 = vld [vmem:[#allocation50_spill] sm:$0xff]  ;;  %v5968_v18 = vshrl.u32 %v13009_v35, 16  ;;  %v5972_v0 = vshll.u32 %v13010_v14, 16  ;;  %v5828_v9 = vmul.bf16 %v5795_v53, %v20633_v58  ;;  %v5797_v47 = vld [vmem:[#allocation2 + $0x58] sm:$0xf]  ;;  %v20636_v35 = vld [vmem:[#allocation71_spill] sm:$0xff] }
 0x1ad   : > { %v16661_v24 = vadd.f32 %v14054_v49, %v2350_v3  ;;  %v5954_v25 = vor.u32 %v5952_v7, %v5950_v32  ;;  %v5960_v3 = vshrl.u32 %v13008_v41, 16  ;;  %v5951_v50 = vsel %vm3131_vm6, %v5946_v52, %v5950_v32  ;;  %v5798_v59 = vld [vmem:[#allocation2 + $0x5c] sm:$0xf]  ;;  %v5800_v53 = vld [vmem:[#allocation2 + $0x64] sm:$0xf] }
 0x1ae   : > { %v5966_v27 = vrot.slane %v5964_v60, 1  ;;  %v16678_v61 = vpop.f32.mrf.mxu0  ;;  %v5974_v34 = vrot.slane %v5972_v0, 1  ;;  %v20635_v32 = vld [vmem:[#allocation100_spill] sm:$0xff]  ;;  %v5976_v0 = vshrl.u32 %v13010_v14, 16 }
 0x1af   : > { %14204 = vmatmul.mubr.msk.bf16.gmra.mxu0 %vm1755_vm7, %v5210_v44  ;;  %v5826_v44 = vmul.bf16 %v5793_v28, %v20631_v30  ;;  %v5959_v6 = vsel %vm3131_vm6, %v5954_v25, %v5958_v51  ;;  %v5962_v41 = vor.u32 %v5960_v3, %v5958_v51  ;;  %v2363_v52 = vadd.f32 %v20636_v35, %v20635_v32  ;;  %v20637_v28 = vld [vmem:[#allocation101_spill] sm:$0xff] }
 0x1b0   : > { %14243 = vmatprep.mubr.msk.bf16.mxu0 %vm1755_vm7, %v5943_v46  ;;  %v16675_v46 = vpop.f32.mrf.mxu1  ;;  %v5970_v49 = vor.u32 %v5968_v18, %v5966_v27  ;;  %v2355_v25 = vadd.f32 %v20638_v1, %v20637_v28  ;;  %v5799_v51 = vld [vmem:[#allocation2 + $0x60] sm:$0xf] }
 0x1b1   : > { %14234 = vmatmul.mubr.msk.bf16.gmra.mxu1 %vm1755_vm7, %v12985_v54  ;;  %v20634_v54 = vld [vmem:[#allocation53_spill] sm:$0xff]  ;;  %v13011_v15 = vcombine.low %v5826_v44, %v5827_v40  ;;  %v5967_v3 = vsel %vm3131_vm6, %v5962_v41, %v5966_v27  ;;  %v20639_v44 = vld [vmem:[#allocation54_spill] sm:$0xff] }
 0x1b2   : > { %14237 = vmatprep.mubr.msk.bf16.mxu1 %vm1755_vm7, %v12986_v20  ;;  %v5829_v7 = vmul.bf16 %v5796_v21, %v20634_v54  ;;  %v5830_v40 = vmul.bf16 %v5797_v47, %v20639_v44  ;;  %v5975_v35 = vsel %vm3131_vm6, %v5970_v49, %v5974_v34  ;;  %v20642_v41 = vld [vmem:[#allocation58_spill] sm:$0xff] }
 0x1b3   : > { %v5980_v60 = vshll.u32 %v13011_v15, 16  ;;  %v5833_v27 = vmul.bf16 %v5800_v53, %v20642_v41  ;;  %v20643_v44 = vld [vmem:[#allocation102_spill] sm:$0xff] }
 0x1b4   : > { %v13012_v45 = vcombine.low %v5828_v9, %v5829_v7  ;;  %v5984_v9 = vshrl.u32 %v13011_v15, 16  ;;  %v5802_v53 = vld [vmem:[#allocation2 + $0x6c] sm:$0xf] }
 0x1b7   : > { %14244 = vmatmul.mubr.msk.bf16.vlgmr.msra.gmra.mxu0 %vm1755_vm7, %v5951_v50  ;;  %v20640_v50 = vld [vmem:[#allocation55_spill] sm:$0xff] }
 0x1b8   : > { %14247 = vmatprep.mubr.msk.bf16.mxu0 %vm1755_vm7, %v5959_v6  ;;  %v14083_v20 = vpop.f32.mrf.mxu1 }
 0x1b9   : > { %14238 = vmatmul.mubr.msk.bf16.gmra.mxu1 %vm1755_vm7, %v12987_v38  ;;  %v16687_v21 = vadd.f32 %v14083_v20, %v16576_v4  ;;  %v5831_v38 = vmul.bf16 %v5798_v59, %v20640_v50  ;;  %v5988_v4 = vshll.u32 %v13012_v45, 16  ;;  %v20641_v20 = vld [vmem:[#allocation57_spill] sm:$0xff]  ;;  %v20644_v59 = vld [vmem:[#allocation112_spill] sm:$0xff] }
 0x1ba   : > { %v14057_v18 = vpop.f32.mrf.mxu0  ;;  %v3928_v6 = vpop.f32.mrf.mxu1  ;;  %v5832_v28 = vmul.bf16 %v5799_v51, %v20641_v20  ;;  %v2366_v50 = vadd.f32 %v20644_v59, %v20643_v44  ;;  %v5801_v51 = vld [vmem:[#allocation2 + $0x68] sm:$0xf]  ;;  %v20646_v20 = vld [vmem:[#allocation60_spill] sm:$0xff] }
 0x1bb   : > { %v16692_v7 = vadd.f32 %v14057_v18, %v2363_v52  ;;  %v16695_v32 = vadd.f32 %v3928_v6, %v16585_v11  ;;  %v5982_v11 = vrot.slane %v5980_v60, 1  ;;  %v13013_v15 = vcombine.low %v5830_v40, %v5831_v38 }
 0x1bc   : > { %v3413_v1 = vpop.f32.mrf.mxu0  ;;  %v14084_v47 = vpop.f32.mrf.mxu1  ;;  %v5978_v52 = vor.u32 %v5976_v0, %v5974_v34  ;;  %v5990_v41 = vrot.slane %v5988_v4, 1  ;;  %v13014_v44 = vcombine.low %v5832_v28, %v5833_v27  ;;  %v5992_v40 = vshrl.u32 %v13012_v45, 16 }
 0x1bd   : > { %v16702_v54 = vadd.f32 %v3413_v1, %v2355_v25  ;;  %v16705_v14 = vadd.f32 %v14084_v47, %v16593_v42  ;;  %v5986_v6 = vor.u32 %v5984_v9, %v5982_v11  ;;  %v5803_v25 = vld [vmem:[#allocation2 + $0x70] sm:$0xf]  ;;  %v5804_v1 = vld [vmem:[#allocation2 + $0x74] sm:$0xf]  ;;  %v5996_v59 = vshll.u32 %v13013_v15, 16 }
 0x1be   : > { %v14058_v49 = vpop.f32.mrf.mxu0  ;;  %v20645_v42 = vld [vmem:[#allocation59_spill] sm:$0xff]  ;;  %v5983_v60 = vsel %vm3131_vm6, %v5978_v52, %v5982_v11  ;;  %v6000_v34 = vshrl.u32 %v13013_v15, 16  ;;  %v6004_v0 = vshll.u32 %v13014_v44, 16  ;;  %v16718_v27 = vpop.f32.mrf.mxu1  ;;  %v5806_v11 = vld [vmem:[#allocation2 + $0x7c] sm:$0xf] }
 0x1bf   : > { %14248 = vmatmul.mubr.msk.bf16.gmra.mxu0 %vm1755_vm7, %v5967_v3  ;;  %v16709_v18 = vadd.f32 %v14058_v49, %v2366_v50  ;;  %v5834_v47 = vmul.bf16 %v5801_v51, %v20645_v42  ;;  %v5835_v3 = vmul.bf16 %v5802_v53, %v20646_v20  ;;  %v5991_v38 = vsel %vm3131_vm6, %v5986_v6, %v5990_v41  ;;  %v20648_v49 = vld [vmem:[#allocation65_spill] sm:$0xff]  ;;  %v5805_v53 = vld [vmem:[#allocation2 + $0x78] sm:$0xf] }
 0x1c0   : > { %14251 = vmatprep.mubr.msk.bf16.mxu0 %vm1755_vm7, %v5975_v35  ;;  %v20647_v35 = vld [vmem:[#allocation64_spill] sm:$0xff]  ;;  %v5837_v9 = vmul.bf16 %v5804_v1, %v20648_v49  ;;  %v5998_v4 = vrot.slane %v5996_v59, 1  ;;  %v5994_v51 = vor.u32 %v5992_v40, %v5990_v41  ;;  %v6006_v15 = vrot.slane %v6004_v0, 1  ;;  %v16721_v52 = vpop.f32.mrf.mxu0  ;;  %v5807_v20 = vld [vmem:[#allocation2 + $0x80] sm:$0xf]  ;;  %v20650_v1 = vld [vmem:[#allocation90_spill] sm:$0xff] }
 0x1c1   : > { %v5836_v50 = vmul.bf16 %v5803_v25, %v20647_v35  ;;  %v13015_v28 = vcombine.low %v5834_v47, %v5835_v3  ;;  %v5808_v25 = vld [vmem:[#allocation2 + $0x84] sm:$0xf]  ;;  %v20649_v35 = vld [vmem:[#allocation56_spill] sm:$0xff]  ;;  %v20651_v59 = vld [vmem:[#allocation66_spill] sm:$0xff] }
 0x1c2   : > { %v6002_v45 = vor.u32 %v6000_v34, %v5998_v4  ;;  %v2379_v49 = vadd.f32 %v20650_v1, %v20649_v35  ;;  %v5838_v47 = vmul.bf16 %v5805_v53, %v20651_v59  ;;  %v20652_v3 = vld [vmem:[#allocation68_spill] sm:$0xff]  ;;  %v5999_v40 = vsel %vm3131_vm6, %v5994_v51, %v5998_v4  ;;  %v20653_v0 = vld [vmem:[#allocation73_spill] sm:$0xff]  ;;  %v20654_v1 = vld [vmem:[#allocation74_spill] sm:$0xff] }
 0x1c3   : > { %v13016_v6 = vcombine.low %v5836_v50, %v5837_v9  ;;  %v5839_v42 = vmul.bf16 %v5806_v11, %v20652_v3  ;;  %v5840_v58 = vmul.bf16 %v5807_v20, %v20653_v0  ;;  %v6016_v9 = vshrl.u32 %v13015_v28, 16  ;;  %v20655_v53 = vld [vmem:[#allocation105_spill] sm:$0xff]  ;;  %v20656_v59 = vld [vmem:[#allocation86_spill] sm:$0xff] }
 0x1c4   : > { %v6007_v50 = vsel %vm3131_vm6, %v6002_v45, %v6006_v15  ;;  %v5841_v19 = vmul.bf16 %v5808_v25, %v20654_v1  ;;  %v2371_v11 = vadd.f32 %v20656_v59, %v20655_v53  ;;  %v20658_v45 = vld [vmem:[#allocation91_spill] sm:$0xff] }
 0x1c5   : > { %v6020_v55 = vshll.u32 %v13016_v6, 16  ;;  %v13017_v20 = vcombine.low %v5838_v47, %v5839_v42  ;;  %v5811_v42 = vld [vmem:[#allocation2 + $0x90] sm:$0xf]  ;;  %v5812_v53 = vld [vmem:[#allocation2 + $0x94] sm:$0xf] }
 0x1c7   : > { %14252 = vmatmul.mubr.msk.bf16.gmra.mxu0 %vm1755_vm7, %v5983_v60  ;;  %v6012_v60 = vshll.u32 %v13015_v28, 16  ;;  %v20657_v28 = vld [vmem:[#allocation106_spill] sm:$0xff] }
 0x1c8   : > { %14255 = vmatprep.mubr.msk.bf16.mxu0 %vm1755_vm7, %v5991_v38  ;;  %v6008_v38 = vshrl.u32 %v13014_v44, 16 }
 0x1ca   : > { %v14087_v41 = vpop.f32.mrf.mxu1  ;;  %v6010_v0 = vor.u32 %v6008_v38, %v6006_v15  ;;  %v13072_v15 = vld [vmem:[%s20178_s4 + $0x4] sm:$0xf]  ;;  %v6028_v38 = vshll.u32 %v13017_v20, 16 }
 0x1cb   : > { %v16729_v34 = vadd.f32 %v14087_v41, %v16643_v33  ;;  %v6014_v33 = vrot.slane %v6012_v60, 1  ;;  %v2382_v41 = vadd.f32 %v20658_v45, %v20657_v28  ;;  %v13018_v60 = vcombine.low %v5840_v58, %v5841_v19  ;;  %14726 = vmatprep.subr.msk.bf16.mxu1 %vm6785_vm0, %v13072_v15 }
 0x1cc   : > { %v14061_v30 = vpop.f32.mrf.mxu0  ;;  %v3944_v35 = vpop.f32.mrf.mxu1  ;;  %v6024_v58 = vshrl.u32 %v13016_v6, 16  ;;  %v6032_v45 = vshrl.u32 %v13017_v20, 16 }
 0x1cd   : > { %v16736_v3 = vadd.f32 %v14061_v30, %v2379_v49  ;;  %v16739_v44 = vadd.f32 %v3944_v35, %v16652_v37  ;;  %v5809_v49 = vld [vmem:[#allocation2 + $0x88] sm:$0xf]  ;;  %v5810_v37 = vld [vmem:[#allocation2 + $0x8c] sm:$0xf]  ;;  %v6018_v59 = vor.u32 %v6016_v9, %v6014_v33  ;;  %v6022_v35 = vrot.slane %v6020_v55, 1  ;;  %v20661_v9 = vld [vmem:[#allocation88_spill] sm:$0xff] }
 0x1ce   : > { %v3429_v4 = vpop.f32.mrf.mxu0  ;;  %v14088_v51 = vpop.f32.mrf.mxu1  ;;  %v6787_v55 = vsel %vm6785_vm0, %v13072_v15, 0  ;;  %v6015_v19 = vsel %vm3131_vm6, %v6010_v0, %v6014_v33  ;;  %v5813_v33 = vld [vmem:[#allocation2 + $0x98] sm:$0x1] }
 0x1cf   : > { %14256 = vmatmul.mubr.msk.bf16.gmra.mxu0 %vm1755_vm7, %v5999_v40  ;;  %v16745_v25 = vadd.f32 %v3429_v4, %v2371_v11  ;;  %v16748_v30 = vadd.f32 %v14088_v51, %v16661_v24  ;;  %v20660_v24 = vld [vmem:[#allocation78_spill] sm:$0xff]  ;;  %v5844_v51 = vmul.bf16 %v5811_v42, %v20661_v9  ;;  %14276 = vmatpush3.bf16.msra.mxu1 %v6787_v55  ;;  %v6040_v55 = vshrl.u32 %v13018_v60, 16  ;;  %v20668_v9 = vld [vmem:[#allocation113_spill] sm:$0xff] }
 0x1d0   : > { %14259 = vmatprep.mubr.msk.bf16.mxu0 %vm1755_vm7, %v6007_v50  ;;  %v14062_v40 = vpop.f32.mrf.mxu0  ;;  %v20659_v50 = vld [vmem:[#allocation76_spill] sm:$0xff]  ;;  %v5843_v4 = vmul.bf16 %v5810_v37, %v20660_v24  ;;  %v6023_v28 = vsel %vm3131_vm6, %v6018_v59, %v6022_v35  ;;  %v6026_v24 = vor.u32 %v6024_v58, %v6022_v35  ;;  %v16765_v0 = vpop.f32.mrf.mxu1  ;;  %v20665_v58 = vld [vmem:[#allocation118_spill] sm:$0xff] }
 0x1d1   : > { %v16750_v47 = vadd.f32 %v14062_v40, %v2382_v41  ;;  %v5842_v11 = vmul.bf16 %v5809_v49, %v20659_v50  ;;  %v6036_v41 = vshll.u32 %v13018_v60, 16  ;;  %v20662_v40 = vld [vmem:[#allocation89_spill] sm:$0xff]  ;;  %v6030_v49 = vrot.slane %v6028_v38, 1 }
 0x1d2   : > { %v5845_v1 = vmul.bf16 %v5812_v53, %v20662_v40  ;;  %v16767_v42 = vpop.f32.mrf.mxu0  ;;  %v20663_v53 = vld [vmem:[#allocation85_spill] sm:$0xff] }
 0x1d3   : > { %v13019_v37 = vcombine.low %v5842_v11, %v5843_v4  ;;  %v6034_v15 = vor.u32 %v6032_v45, %v6030_v49  ;;  %v6038_v50 = vrot.slane %v6036_v41, 1  ;;  %v6031_v20 = vsel %vm3131_vm6, %v6026_v24, %v6030_v49 }
 0x1d4   : > { %v13020_v6 = vcombine.low %v5844_v51, %v5845_v1  ;;  %v5846_v40 = vmul.bf16 %v5813_v33, %v20663_v53  ;;  %v20666_v1 = vld [vmem:[#allocation111_spill] sm:$0xff] }
 0x1d5   : > { %v6044_v59 = vshll.u32 %v13019_v37, 16  ;;  %v6039_v38 = vsel %vm3131_vm6, %v6034_v15, %v6038_v50  ;;  %v6048_v35 = vshrl.u32 %v13019_v37, 16  ;;  %v20667_v51 = vld [vmem:[#allocation119_spill] sm:$0xff]  ;;  %v6042_v33 = vor.u32 %v6040_v55, %v6038_v50 }
 0x1d6   : > { %v6052_v4 = vshll.u32 %v13020_v6, 16  ;;  %v2387_v41 = vadd.f32 %v20667_v51, %v20666_v1  ;;  %v13021_v53 = vcombine.low %v5846_v40, %v5846_v40  ;;  %v2398_v1 = vadd.f32 %v20669_v29, %v20668_v9 }
 0x1d7   : > { %14260 = vmatmul.mubr.msk.bf16.gmra.mxu0 %vm1755_vm7, %v6015_v19  ;;  %v20664_v19 = vld [vmem:[#allocation109_spill] sm:$0xff]  ;;  %v6046_v60 = vrot.slane %v6044_v59, 1 }
 0x1d8   : > { %14263 = vmatprep.mubr.msk.bf16.mxu0 %vm1755_vm7, %v6023_v28  ;;  %v2395_v28 = vadd.f32 %v20665_v58, %v20664_v19 }
 0x1d9   : > { %v6047_v55 = vsel %vm3131_vm6, %v6042_v33, %v6046_v60 }
 0x1dc   : > { %v14091_v11 = vpop.f32.mrf.mxu1 }
 0x1dd   : > { %v16775_v45 = vadd.f32 %v14091_v11, %v16692_v7  ;;  %v6050_v7 = vor.u32 %v6048_v35, %v6046_v60  ;;  %v6054_v11 = vrot.slane %v6052_v4, 1 }
 0x1de   : > { %v14065_v24 = vpop.f32.mrf.mxu0  ;;  %v3960_v49 = vpop.f32.mrf.mxu1 }
 0x1df   : > { %14264 = vmatmul.mubr.msk.bf16.gmra.mxu0 %vm1755_vm7, %v6031_v20  ;;  %v3502_v15 = vadd.f32 %v14065_v24, %v2395_v28  ;;  %v16782_v37 = vadd.f32 %v3960_v49, %v16702_v54  ;;  %v6056_v54 = vshrl.u32 %v13020_v6, 16  ;;  %v6060_v28 = vshll.u32 %v13021_v53, 16 }
 0x1e0   : > { %14267 = vmatprep.mubr.msk.bf16.mxu0 %vm1755_vm7, %v6039_v38  ;;  %v3445_v19 = vpop.f32.mrf.mxu0  ;;  %v14092_v58 = vpop.f32.mrf.mxu1  ;;  %v6055_v40 = vsel %vm3131_vm6, %v6050_v7, %v6054_v11 }
 0x1e1   : > { %v3500_v51 = vadd.f32 %v3445_v19, %v2387_v41  ;;  %v16787_v20 = vadd.f32 %v14092_v58, %v16709_v18  ;;  %v6058_v4 = vor.u32 %v6056_v54, %v6054_v11  ;;  %v6062_v29 = vrot.slane %v6060_v28, 1  ;;  %v20670_v19 = vld [vmem:[#allocation125_spill] sm:$0xff]  ;;  %v20672_v28 = vld [vmem:[#allocation127_spill] sm:$0xff] }
 0x1e2   : > { %v14066_v59 = vpop.f32.mrf.mxu0  ;;  %v16789_v50 = vpop.f32.mrf.mxu1 }
 0x1e3   : > { %v3503_v38 = vadd.f32 %v14066_v59, %v2398_v1  ;;  %v6063_v53 = vsel %vm3131_vm6, %v6058_v4, %v6062_v29 }
 0x1e4   : > { %v16801_v24 = vpop.f32.mrf.mxu0 }
 0x1e7   : > { %14268 = vmatmul.mubr.msk.bf16.gmra.mxu0 %vm1755_vm7, %v6047_v55  ;;  %v14095_v35 = vpop.f32.mrf.mxu1 }
 0x1e8   : > { %14271 = vmatprep.mubr.msk.bf16.mxu0 %vm1755_vm7, %v6055_v40  ;;  %v16796_v18 = vadd.f32 %v14095_v35, %v16736_v3 }
 0x1e9   : > { %v3976_v9 = vpop.f32.mrf.mxu1 }
 0x1ea   : > { %v16799_v41 = vadd.f32 %v3976_v9, %v16745_v25  ;;  %v20671_v25 = vld [vmem:[#allocation126_spill] sm:$0xff] }
 0x1eb   : > { %v14096_v6 = vpop.f32.mrf.mxu1 }
 0x1ec   : > { %v16805_v60 = vadd.f32 %v14096_v6, %v16750_v47 }
 0x1ed   : > { %v16807_v49 = vpop.f32.mrf.mxu1 }
 0x1ef   : > { %v14069_v33 = vpop.f32.mrf.mxu0  ;;  %14272 = vmatmul.mubr.msk.bf16.gmra.mxu0 %vm1755_vm7, %v6063_v53  ;;  %vm6736_vm7 = vcmask 64512  }
 0x1f0   : > { %v3506_v3 = vadd.f32 %v14069_v33, %v20670_v19  ;;  %v14099_v58 = vpop.f32.mrf.mxu1 }
 0x1f1   : > { %v3461_v7 = vpop.f32.mrf.mxu0  ;;  %v16811_v11 = vadd.f32 %v14099_v58, %v3502_v15 }
 0x1f2   : > { %v3504_v1 = vadd.f32 %v3461_v7, %v20671_v25  ;;  %v3992_v59 = vpop.f32.mrf.mxu1 }
 0x1f3   : > { %v14070_v55 = vpop.f32.mrf.mxu0  ;;  %v16814_v54 = vadd.f32 %v3992_v59, %v3500_v51 }
 0x1f4   : > { %v3507_v47 = vadd.f32 %v14070_v55, %v20672_v28  ;;  %v14100_v40 = vpop.f32.mrf.mxu1 }
 0x1f5   : > { %v16817_v35 = vpop.f32.mrf.mxu0  ;;  %v16819_v4 = vadd.f32 %v14100_v40, %v3503_v38 }
 0x1f6   : > { %v16821_v29 = vpop.f32.mrf.mxu1 }
 0x1f7   : > { %v14109_v9 = vpop.f32.mrf.mxu0 }
 0x1f8   : > { %v16824_v6 = vadd.f32 %v14109_v9, %v16573_v62 }
 0x1f9   : > { %v4222_v15 = vpop.f32.mrf.mxu0  ;;  %v14103_v53 = vpop.f32.mrf.mxu1 }
 0x1fa   : > { %v16827_v33 = vadd.f32 %v4222_v15, %v16580_v26  ;;  %v16829_v51 = vadd.f32 %v14103_v53, %v3506_v3 }
 0x1fb   : > { %v14110_v19 = vpop.f32.mrf.mxu0  ;;  %v4008_v58 = vpop.f32.mrf.mxu1 }
 0x1fc   : > { %v16832_v7 = vadd.f32 %v14110_v19, %v16588_v13  ;;  %v16834_v38 = vadd.f32 %v4008_v58, %v3504_v1 }
 0x1fd   : > { %v16836_v25 = vpop.f32.mrf.mxu0  ;;  %v14104_v59 = vpop.f32.mrf.mxu1 }
 0x1fe   : > { %v16838_v55 = vadd.f32 %v14104_v59, %v3507_v47 }
 0x1ff   : > { %v14113_v62 = vpop.f32.mrf.mxu0  ;;  %v16840_v28 = vpop.f32.mrf.mxu1 }
 0x200   : > { %v16843_v26 = vadd.f32 %v14113_v62, %v16635_v63 }
 0x201   : > { %v4238_v3 = vpop.f32.mrf.mxu0  ;;  %v16845_v40 = vpop.f32.mrf.mxu1 }
 0x202   : > { %v16848_v9 = vadd.f32 %v4238_v3, %v16645_v31 }
 0x203   : > { %v14114_v13 = vpop.f32.mrf.mxu0  ;;  %v16850_v1 = vpop.f32.mrf.mxu1 }
 0x204   : > { %v16853_v15 = vadd.f32 %v14114_v13, %v16654_v57 }
 0x205   : > { %v16855_v47 = vpop.f32.mrf.mxu0  ;;  %v16857_v53 = vpop.f32.mrf.mxu1 }
 0x207   : > { %v14117_v19 = vpop.f32.mrf.mxu0  ;;  %v16859_v58 = vpop.f32.mrf.mxu1 }
 0x208   : > { %v16862_v63 = vadd.f32 %v14117_v19, %v16687_v21  ;;  %v16880_v21 = vld [vmem:[#allocation3 + $0x8] sm:$0xf]  ;;  %v16882_v19 = vld [vmem:[#allocation3 + $0xc] sm:$0xf] }
 0x209   : > { %v4254_v59 = vpop.f32.mrf.mxu0  ;;  %v16864_v62 = vpop.f32.mrf.mxu1  ;;  %20673 = vst [vmem:[#allocation61_spill] sm:$0xff] %v16882_v19 }
 0x20a   : > { %v16867_v31 = vadd.f32 %v4254_v59, %v16695_v32  ;;  %v13073_v59 = vcombine.low %v16880_v21, %v16882_v19 }
 0x20b   : > { %v14118_v3 = vpop.f32.mrf.mxu0  ;;  %v16869_v22 = vpop.f32.mrf.mxu1 }
 0x20c   : > { %v16872_v57 = vadd.f32 %v14118_v3, %v16705_v14  ;;  %14277 = vmatprep.mubr.msk.bf16.mxu1 %vm6736_vm7, %v13073_v59 }
 0x20d   : > { %v16874_v13 = vpop.f32.mrf.mxu0  ;;  %v16876_v5 = vpop.f32.mrf.mxu1 }
 0x20f   : > { %v14121_v16 = vpop.f32.mrf.mxu0  ;;  %v16878_v36 = vpop.f32.mrf.mxu1 }
 0x210   : > { %v16885_v32 = vadd.f32 %v14121_v16, %v16729_v34 }
 0x211   : > { %v4270_v10 = vpop.f32.mrf.mxu0  ;;  %v16889_v14 = vpop.f32.mrf.mxu1 }
 0x212   : > { %20674 = vst [vmem:[#allocation77_spill] sm:$0xff] %v16885_v32  ;;  %v16892_v3 = vadd.f32 %v4270_v10, %v16739_v44  ;;  %v6653_v10 = vld [vmem:[%s20178_s4] sm:$0xf] }
 0x213   : > { %v14122_v43 = vpop.f32.mrf.mxu0  ;;  %v16895_v17 = vpop.f32.mrf.mxu1  ;;  %14727 = vmatprep.subr.msk.bf16.mxu0 %vm6785_vm0, %v6653_v10  ;;  %v7234_v59 = vsel %vm6785_vm0, %v6653_v10, 0 }
 0x214   : > { %20675 = vst [vmem:[#allocation62_spill] sm:$0xff] %v16892_v3  ;;  %v16898_v48 = vadd.f32 %v14122_v43, %v16748_v30  ;;  %14310 = vmatpush3.bf16.msra.mxu0 %v7234_v59 }
 0x215   : > { %v16900_v16 = vpop.f32.mrf.mxu0  ;;  %v16902_v34 = vpop.f32.mrf.mxu1 }
 0x216   : > { %20676 = vst [vmem:[#allocation80_spill] sm:$0xff] %v16898_v48  ;;  %20677 = vst [vmem:[#allocation63_spill] sm:$0xff] %v16902_v34 }
 0x217   : > { %v14125_v8 = vpop.f32.mrf.mxu0  ;;  %v16904_v32 = vpop.f32.mrf.mxu1 }
 0x218   : > { %20678 = vst [vmem:[#allocation82_spill] sm:$0xff] %v16904_v32  ;;  %v16910_v44 = vadd.f32 %v14125_v8, %v16775_v45  ;;  %v16927_v8 = vld [vmem:[%s20178_s4 + $0x8] sm:$0xf] }
 0x219   : > { %v4286_v43 = vpop.f32.mrf.mxu0  ;;  %v16914_v30 = vpop.f32.mrf.mxu1  ;;  %20684 = vst [vmem:[#allocation70_spill] sm:$0xff] %v16927_v8  ;;  %14728 = vmatprep.subr.msk.bf16.mxu1 %vm6785_vm0, %v16927_v8 }
 0x21a   : > { %20679 = vst [vmem:[#allocation79_spill] sm:$0xff] %v16910_v44  ;;  %20680 = vst [vmem:[#allocation81_spill] sm:$0xff] %v16914_v30  ;;  %v16917_v48 = vadd.f32 %v4286_v43, %v16782_v37  ;;  %v20768_v30 = vld [vmem:[#allocation128_spill] sm:$0xff] }
 0x21b   : > { %v14126_v3 = vpop.f32.mrf.mxu0  ;;  %v16919_v32 = vpop.f32.mrf.mxu1 }
 0x21c   : > { %20681 = vst [vmem:[#allocation83_spill] sm:$0xff] %v16917_v48  ;;  %20682 = vst [vmem:[#allocation69_spill] sm:$0xff] %v16919_v32  ;;  %v16922_v34 = vadd.f32 %v14126_v3, %v16787_v20 }
 0x21d   : > { %v16929_v45 = vpop.f32.mrf.mxu0  ;;  %v16931_v10 = vpop.f32.mrf.mxu1 }
 0x21e   : > { %20683 = vst [vmem:[#allocation92_spill] sm:$0xff] %v16922_v34  ;;  %20685 = vst [vmem:[#allocation94_spill] sm:$0xff] %v16929_v45 }
 0x21f   : > { %20686 = vst [vmem:[#allocation72_spill] sm:$0xff] %v16931_v10  ;;  %v14129_v37 = vpop.f32.mrf.mxu0  ;;  %v16935_v59 = vpop.f32.mrf.mxu1 }
 0x220   : > { %20687 = vst [vmem:[#allocation96_spill] sm:$0xff] %v16935_v59  ;;  %v16938_v43 = vadd.f32 %v14129_v37, %v16796_v18 }
 0x221   : > { %v4302_v20 = vpop.f32.mrf.mxu0  ;;  %v16940_v3 = vpop.f32.mrf.mxu1 }
 0x222   : > { %20688 = vst [vmem:[#allocation93_spill] sm:$0xff] %v16938_v43  ;;  %20689 = vst [vmem:[#allocation95_spill] sm:$0xff] %v16940_v3  ;;  %v16943_v34 = vadd.f32 %v4302_v20, %v16799_v41 }
 0x223   : > { %v14130_v48 = vpop.f32.mrf.mxu0  ;;  %v16945_v44 = vpop.f32.mrf.mxu1 }
 0x224   : > { %20690 = vst [vmem:[#allocation97_spill] sm:$0xff] %v16943_v34  ;;  %20691 = vst [vmem:[#allocation124_spill] sm:$0xff] %v16945_v44  ;;  %v16948_v10 = vadd.f32 %v14130_v48, %v16805_v60 }
 0x225   : > { %v16950_v45 = vpop.f32.mrf.mxu0  ;;  %v16952_v8 = vpop.f32.mrf.mxu1 }
 0x226   : > { %20692 = vst [vmem:[#allocation123_spill] sm:$0xff] %v16948_v10  ;;  %20693 = vst [vmem:[#allocation100_spill] sm:$0xff] %v16950_v45  ;;  %v20767_v45 = vld [vmem:[#allocation117_spill] sm:$0xff] }
 0x227   : > { %20694 = vst [vmem:[#allocation71_spill] sm:$0xff] %v16952_v8  ;;  %v14133_v59 = vpop.f32.mrf.mxu0  ;;  %v16954_v32 = vpop.f32.mrf.mxu1 }
 0x228   : > { %20695 = vst [vmem:[#allocation101_spill] sm:$0xff] %v16954_v32  ;;  %v16957_v18 = vadd.f32 %v14133_v59, %v16811_v11 }
 0x229   : > { %v4318_v37 = vpop.f32.mrf.mxu0  ;;  %v16959_v43 = vpop.f32.mrf.mxu1 }
 0x22a   : > { %20696 = vst [vmem:[#allocation110_spill] sm:$0xff] %v16957_v18  ;;  %20697 = vst [vmem:[#allocation102_spill] sm:$0xff] %v16959_v43  ;;  %v16962_v41 = vadd.f32 %v4318_v37, %v16814_v54 }
 0x22b   : > { %v14134_v20 = vpop.f32.mrf.mxu0  ;;  %v16964_v34 = vpop.f32.mrf.mxu1 }
 0x22c   : > { %20698 = vst [vmem:[#allocation112_spill] sm:$0xff] %v16962_v41  ;;  %20699 = vst [vmem:[#allocation56_spill] sm:$0xff] %v16964_v34  ;;  %v16967_v48 = vadd.f32 %v14134_v20, %v16819_v4 }
 0x22d   : > { %v16969_v60 = vpop.f32.mrf.mxu0  ;;  %v16971_v10 = vpop.f32.mrf.mxu1 }
 0x22e   : > { %20700 = vst [vmem:[#allocation90_spill] sm:$0xff] %v16967_v48  ;;  %20701 = vst [vmem:[#allocation105_spill] sm:$0xff] %v16969_v60  ;;  %v20763_v60 = vld [vmem:[#allocation122_spill] sm:$0xff] }
 0x22f   : > { %20702 = vst [vmem:[#allocation86_spill] sm:$0xff] %v16971_v10  ;;  %v14137_v32 = vpop.f32.mrf.mxu0  ;;  %v16973_v8 = vpop.f32.mrf.mxu1 }
 0x230   : > { %20703 = vst [vmem:[#allocation106_spill] sm:$0xff] %v16973_v8  ;;  %v4379_v11 = vadd.f32 %v14137_v32, %v16829_v51 }
 0x231   : > { %v4334_v59 = vpop.f32.mrf.mxu0  ;;  %v16976_v18 = vpop.f32.mrf.mxu1 }
 0x232   : > { %20704 = vst [vmem:[#allocation91_spill] sm:$0xff] %v16976_v18  ;;  %v4377_v54 = vadd.f32 %v4334_v59, %v16834_v38 }
 0x233   : > { %v14138_v37 = vpop.f32.mrf.mxu0  ;;  %v16979_v41 = vpop.f32.mrf.mxu1 }
 0x234   : > { %20705 = vst [vmem:[#allocation109_spill] sm:$0xff] %v16979_v41  ;;  %v4380_v4 = vadd.f32 %v14138_v37, %v16838_v55 }
 0x235   : > { %v16982_v20 = vpop.f32.mrf.mxu0  ;;  %v16984_v48 = vpop.f32.mrf.mxu1 }
 0x236   : > { %20706 = vst [vmem:[#allocation118_spill] sm:$0xff] %v16982_v20  ;;  %20707 = vst [vmem:[#allocation111_spill] sm:$0xff] %v16984_v48  ;;  %v20762_v20 = vld [vmem:[#allocation116_spill] sm:$0xff] }
 0x237   : > { %v16986_v10 = vpop.f32.mrf.mxu0  ;;  %v16988_v34 = vpop.f32.mrf.mxu1 }
 0x238   : > { %20708 = vst [vmem:[#allocation119_spill] sm:$0xff] %v16986_v10  ;;  %20709 = vst [vmem:[#allocation113_spill] sm:$0xff] %v16988_v34 }
 0x239   : > { %v16990_v8 = vpop.f32.mrf.mxu0  ;;  %v14171_v51 = vpop.f32.mrf.mxu1 }
 0x23a   : > { %20710 = vst [vmem:[#allocation120_spill] sm:$0xff] %v16990_v8  ;;  %v16992_v32 = vadd.f32 %v14171_v51, %v4379_v11 }
 0x23b   : > { %v16994_v18 = vpop.f32.mrf.mxu0  ;;  %v4861_v38 = vpop.f32.mrf.mxu1 }
 0x23c   : > { %20711 = vst [vmem:[#allocation125_spill] sm:$0xff] %v16992_v32  ;;  %20712 = vst [vmem:[#allocation126_spill] sm:$0xff] %v16994_v18  ;;  %v16996_v59 = vadd.f32 %v4861_v38, %v4377_v54 }
 0x23d   : > { %v16998_v41 = vpop.f32.mrf.mxu0  ;;  %v14172_v55 = vpop.f32.mrf.mxu1 }
 0x23e   : > { %20713 = vst [vmem:[#allocation127_spill] sm:$0xff] %v16996_v59  ;;  %20714 = vst [vmem:[#allocation129_spill] sm:$0xff] %v16998_v41  ;;  %v17000_v37 = vadd.f32 %v14172_v55, %v4380_v4 }
 0x23f   : > { %v17002_v48 = vpop.f32.mrf.mxu0  ;;  %v17004_v10 = vpop.f32.mrf.mxu1 }
 0x240   : > { %20715 = vst [vmem:[#allocation130_spill] sm:$0xff] %v17000_v37  ;;  %20716 = vst [vmem:[#allocation131_spill] sm:$0xff] %v17002_v48 }
 0x241   : > { %20717 = vst [vmem:[#allocation132_spill] sm:$0xff] %v17004_v10  ;;  %v17006_v34 = vpop.f32.mrf.mxu0  ;;  %v17008_v8 = vpop.f32.mrf.mxu1 }
 0x242   : > { %20718 = vst [vmem:[#allocation133_spill] sm:$0xff] %v17006_v34  ;;  %20719 = vst [vmem:[#allocation134_spill] sm:$0xff] %v17008_v8 }
 0x243   : > { %v17010_v11 = vpop.f32.mrf.mxu0  ;;  %v17012_v51 = vpop.f32.mrf.mxu1 }
 0x244   : > { %20720 = vst [vmem:[#allocation135_spill] sm:$0xff] %v17010_v11  ;;  %20721 = vst [vmem:[#allocation136_spill] sm:$0xff] %v17012_v51 }
 0x245   : > { %v17014_v32 = vpop.f32.mrf.mxu0  ;;  %v17016_v54 = vpop.f32.mrf.mxu1 }
 0x246   : > { %20722 = vst [vmem:[#allocation137_spill] sm:$0xff] %v17014_v32  ;;  %20723 = vst [vmem:[#allocation138_spill] sm:$0xff] %v17016_v54 }
 0x247   : > { %v17018_v38 = vpop.f32.mrf.mxu0  ;;  %v17020_v4 = vpop.f32.mrf.mxu1 }
 0x248   : > { %20724 = vst [vmem:[#allocation139_spill] sm:$0xff] %v17018_v38  ;;  %20725 = vst [vmem:[#allocation140_spill] sm:$0xff] %v17020_v4 }
 0x249   : > { %v17022_v55 = vpop.f32.mrf.mxu0  ;;  %v17024_v37 = vpop.f32.mrf.mxu1 }
 0x24a   : > { %20726 = vst [vmem:[#allocation141_spill] sm:$0xff] %v17022_v55  ;;  %20727 = vst [vmem:[#allocation142_spill] sm:$0xff] %v17024_v37 }
 0x24b   : > { %v17026_v59 = vpop.f32.mrf.mxu0  ;;  %v17028_v10 = vpop.f32.mrf.mxu1 }
 0x24c   : > { %20728 = vst [vmem:[#allocation143_spill] sm:$0xff] %v17026_v59  ;;  %20729 = vst [vmem:[#allocation144_spill] sm:$0xff] %v17028_v10  ;;  %v6587_v10 = vld [vmem:[#allocation3 + $0x4] sm:$0x8] }
 0x24d   : > { %v17030_v8 = vpop.f32.mrf.mxu0  ;;  %v17032_v11 = vpop.f32.mrf.mxu1 }
 0x24e   : > { %20730 = vst [vmem:[#allocation145_spill] sm:$0xff] %v17030_v8  ;;  %20731 = vst [vmem:[#allocation146_spill] sm:$0xff] %v17032_v11 }
 0x24f   : > { %v17034_v51 = vpop.f32.mrf.mxu0  ;;  %v17036_v32 = vpop.f32.mrf.mxu1 }
 0x250   : > { %20732 = vst [vmem:[#allocation147_spill] sm:$0xff] %v17034_v51  ;;  %20733 = vst [vmem:[#allocation148_spill] sm:$0xff] %v17036_v32 }
 0x251   : > { %v17038_v54 = vpop.f32.mrf.mxu0  ;;  %v17040_v38 = vpop.f32.mrf.mxu1 }
 0x252   : > { %20734 = vst [vmem:[#allocation149_spill] sm:$0xff] %v17038_v54  ;;  %20735 = vst [vmem:[#allocation150_spill] sm:$0xff] %v17040_v38  ;;  %v20744_v54 = vld [vmem:[#allocation5_spill] sm:$0xff]  ;;  %v20745_v38 = vld [vmem:[#allocation6_spill] sm:$0xff] }
 0x253   : > { %v17042_v4 = vpop.f32.mrf.mxu0  ;;  %v17044_v55 = vpop.f32.mrf.mxu1  ;;  %v6620_v34 = vmul.bf16 %v6587_v10, %v20744_v54  ;;  %v20753_v10 = vld [vmem:[#allocation75_spill] sm:$0xff] }
 0x254   : > { %20736 = vst [vmem:[#allocation151_spill] sm:$0xff] %v17042_v4  ;;  %20737 = vst [vmem:[#allocation152_spill] sm:$0xff] %v17044_v55  ;;  %v6621_v4 = vmul.bf16 %v16880_v21, %v20745_v38  ;;  %v20755_v38 = vld [vmem:[#allocation87_spill] sm:$0xff] }
 0x255   : > { %v17046_v37 = vpop.f32.mrf.mxu0  ;;  %v17048_v59 = vpop.f32.mrf.mxu1 }
 0x256   : > { %20738 = vst [vmem:[#allocation153_spill] sm:$0xff] %v17046_v37  ;;  %20739 = vst [vmem:[#allocation154_spill] sm:$0xff] %v17048_v59  ;;  %v20748_v37 = vld [vmem:[#allocation67_spill] sm:$0xff]  ;;  %v20749_v59 = vld [vmem:[#allocation84_spill] sm:$0xff] }
 0x257   : > { %v17050_v8 = vpop.f32.mrf.mxu0  ;;  %v17052_v11 = vpop.f32.mrf.mxu1  ;;  %v2294_v41 = vadd.f32 %v20749_v59, %v20748_v37  ;;  %v20757_v59 = vld [vmem:[#allocation99_spill] sm:$0xff] }
 0x258   : > { %20740 = vst [vmem:[#allocation155_spill] sm:$0xff] %v17050_v8  ;;  %20741 = vst [vmem:[#allocation156_spill] sm:$0xff] %v17052_v11  ;;  %v13105_v11 = vcombine.low %v6620_v34, %v6621_v4  ;;  %v20758_v37 = vld [vmem:[#allocation107_spill] sm:$0xff]  ;;  %v20761_v4 = vld [vmem:[#allocation108_spill] sm:$0xff] }
 0x259   : > { %v17054_v51 = vpop.f32.mrf.mxu0  ;;  %v17056_v32 = vpop.f32.mrf.mxu1  ;;  %v2374_v43 = vadd.f32 %v20762_v20, %v20761_v4  ;;  %v3477_v44 = vadd.f32 %v20763_v60, %v2294_v41 }
 0x25a   : > { %20742 = vst [vmem:[#allocation157_spill] sm:$0xff] %v17054_v51  ;;  %20743 = vst [vmem:[#allocation158_spill] sm:$0xff] %v17056_v32  ;;  %v17074_v32 = vld [vmem:[%s20178_s4 + $0xc] sm:$0xf]  ;;  %v7034_v60 = vshrl.u32 %v13105_v11, 16  ;;  %v7037_v4 = vshll.u32 %v13105_v11, 16 }
 0x25b   : > { %v17061_v48 = vpop.f32.mrf.mxu0  ;;  %v17063_v55 = vpop.f32.mrf.mxu1  ;;  %20752 = vst [vmem:[#allocation161_spill] sm:$0xff] %v17074_v32  ;;  %v20754_v51 = vld [vmem:[#allocation98_spill] sm:$0xff]  ;;  %14729 = vmatprep.subr.msk.bf16.mxu0 %vm6785_vm0, %v17074_v32  ;;  %v20818_v11 = vld [vmem:[#allocation132_spill] sm:$0xff] }
 0x25c   : > { %20746 = vst [vmem:[#allocation159_spill] sm:$0xff] %v17061_v48  ;;  %20747 = vst [vmem:[#allocation160_spill] sm:$0xff] %v17063_v55  ;;  %v2310_v21 = vadd.f32 %v20754_v51, %v20753_v10  ;;  %v20756_v48 = vld [vmem:[#allocation103_spill] sm:$0xff]  ;;  %v20759_v55 = vld [vmem:[#allocation104_spill] sm:$0xff] }
 0x25d   : > { %v17067_v18 = vpop.f32.mrf.mxu0  ;;  %v17069_v8 = vpop.f32.mrf.mxu1  ;;  %v2326_v54 = vadd.f32 %v20756_v48, %v20755_v38  ;;  %v20765_v10 = vld [vmem:[#allocation115_spill] sm:$0xff]  ;;  %v20766_v48 = vld [vmem:[#allocation121_spill] sm:$0xff] }
 0x25e   : > { %20750 = vst [vmem:[#allocation67_spill] sm:$0xff] %v17067_v18  ;;  %20751 = vst [vmem:[#allocation84_spill] sm:$0xff] %v17069_v8  ;;  %v2342_v18 = vadd.f32 %v20758_v37, %v20757_v59  ;;  %v20760_v8 = vld [vmem:[#allocation114_spill] sm:$0xff]  ;;  %v2390_v38 = vadd.f32 %v20766_v48, %v20765_v10  ;;  %v3481_v32 = vadd.f32 %v16555_v39, %v2310_v21 }
 0x25f   : > { %v2358_v34 = vadd.f32 %v20760_v8, %v20759_v55  ;;  %v17089_v3 = vpop.f32.mrf.mxu0  ;;  %v17091_v51 = vpop.f32.mrf.mxu1  ;;  %v2406_v59 = vadd.f32 %v20768_v30, %v20767_v45  ;;  %v3485_v37 = vadd.f32 %v16619_v23, %v2326_v54  ;;  %v3497_v10 = vadd.f32 %v16767_v42, %v2374_v43  ;;  %v20807_v21 = vld [vmem:[#allocation90_spill] sm:$0xff] }
 0x260   : > { %20764 = vst [vmem:[#allocation75_spill] sm:$0xff] %v17091_v51  ;;  %v3489_v8 = vadd.f32 %v16678_v61, %v2342_v18  ;;  %v4024_v51 = vadd.f32 %v16610_v56, %v3477_v44  ;;  %v3501_v39 = vadd.f32 %v16801_v24, %v2390_v38  ;;  %v4028_v23 = vadd.f32 %v16675_v46, %v3481_v32  ;;  %v7397_v44 = vld [vmem:[#allocation3 + $0x8] sm:$0xf]  ;;  %v7398_v46 = vld [vmem:[#allocation3 + $0xc] sm:$0xf] }
 0x261   : > { %v3493_v20 = vadd.f32 %v16721_v52, %v2358_v34  ;;  %v17101_v55 = vpop.f32.mrf.mxu0  ;;  %v17103_v41 = vpop.f32.mrf.mxu1  ;;  %v3505_v30 = vadd.f32 %v16817_v35, %v2406_v59  ;;  %v4032_v61 = vadd.f32 %v16718_v27, %v3485_v37  ;;  %v4044_v56 = vadd.f32 %v16807_v49, %v3497_v10  ;;  %v20775_v59 = vld [vmem:[#allocation81_spill] sm:$0xff]  ;;  %v20783_v10 = vld [vmem:[#allocation96_spill] sm:$0xff] }
 0x262   : > { %v4036_v52 = vadd.f32 %v16765_v0, %v3489_v8  ;;  %v4350_v42 = vadd.f32 %v16836_v25, %v4024_v51  ;;  %v4048_v24 = vadd.f32 %v16821_v29, %v3501_v39  ;;  %v4878_v27 = vadd.f32 %v16845_v40, %v16824_v6 }
 0x263   : > { %v4040_v45 = vadd.f32 %v16789_v50, %v3493_v20  ;;  %v17113_v18 = vpop.f32.mrf.mxu0  ;;  %v17115_v54 = vpop.f32.mrf.mxu1  ;;  %v4052_v35 = vadd.f32 %v16840_v28, %v3505_v30  ;;  %v4876_v0 = vadd.f32 %v16850_v1, %v16827_v33  ;;  %v17129_v32 = vrot.slane %v7034_v60, 3  ;;  %v20781_v20 = vld [vmem:[#allocation80_spill] sm:$0xff] }
 0x264   : > { %v17131_v49 = vrot.slane %v7037_v4, 4  ;;  %v4354_v29 = vadd.f32 %v16855_v47, %v4028_v23  ;;  %v4879_v25 = vadd.f32 %v16857_v53, %v16832_v7  ;;  %v4877_v28 = vadd.f32 %v16859_v58, %v4350_v42  ;;  %v20782_v60 = vld [vmem:[#allocation72_spill] sm:$0xff] }
 0x265   : > { %v17125_v50 = vpop.f32.mrf.mxu0  ;;  %v17127_v43 = vpop.f32.mrf.mxu1  ;;  %20769 = vst [vmem:[#allocation98_spill] sm:$0xff] %v17129_v32  ;;  %v4882_v6 = vadd.f32 %v16864_v62, %v16843_v26  ;;  %v4880_v33 = vadd.f32 %v16869_v22, %v16848_v9  ;;  %v7430_v47 = vmul.bf16 %v7397_v44, %v20615_v2  ;;  %v7431_v34 = vmul.bf16 %v7398_v46, %v20508_v12  ;;  %v20772_v62 = vld [vmem:[#allocation63_spill] sm:$0xff] }
 0x266   : > { %20770 = vst [vmem:[#allocation87_spill] sm:$0xff] %v17131_v49  ;;  %v4358_v7 = vadd.f32 %v16874_v13, %v4032_v61  ;;  %v4883_v53 = vadd.f32 %v16876_v5, %v16853_v15  ;;  %v4881_v26 = vadd.f32 %v16878_v36, %v4354_v29  ;;  %v4886_v22 = vadd.f32 %v16889_v14, %v16862_v63  ;;  %v20773_v15 = vld [vmem:[#allocation82_spill] sm:$0xff]  ;;  %v20774_v13 = vld [vmem:[#allocation77_spill] sm:$0xff]  ;;  %v20785_v44 = vld [vmem:[#allocation79_spill] sm:$0xff] }
 0x267   : > { %v17141_v40 = vpop.f32.mrf.mxu0  ;;  %v17143_v1 = vpop.f32.mrf.mxu1  ;;  %v4362_v9 = vadd.f32 %v16900_v16, %v4036_v52  ;;  %v4884_v58 = vadd.f32 %v16895_v17, %v16867_v31  ;;  %v4887_v51 = vadd.f32 %v20772_v62, %v16872_v57  ;;  %v4890_v63 = vadd.f32 %v20775_v59, %v20774_v13  ;;  %v20776_v14 = vld [vmem:[#allocation62_spill] sm:$0xff]  ;;  %v20777_v16 = vld [vmem:[#allocation69_spill] sm:$0xff]  ;;  %v20784_v52 = vld [vmem:[#allocation100_spill] sm:$0xff] }
 0x268   : > { %v4885_v36 = vadd.f32 %v20773_v15, %v4358_v7  ;;  %v17171_v37 = vadd.f32 %v20777_v16, %v20776_v14  ;;  %v20778_v17 = vld [vmem:[#allocation70_spill] sm:$0xff]  ;;  %v4891_v4 = vadd.f32 %v20782_v60, %v20781_v20  ;;  %v13139_v61 = vcombine.low %v7430_v47, %v7431_v34  ;;  %v20786_v46 = vld [vmem:[#allocation95_spill] sm:$0xff]  ;;  %v20788_v62 = vld [vmem:[#allocation124_spill] sm:$0xff] }
 0x269   : > { %v17160_v48 = vpop.f32.mrf.mxu0  ;;  %v17162_v38 = vpop.f32.mrf.mxu1  ;;  %v17175_v31 = vsel %vm6785_vm0, %v20778_v17, 0  ;;  %v20780_v57 = vld [vmem:[#allocation94_spill] sm:$0xff]  ;;  %v17181_v39 = vadd.f32 %v20783_v10, %v4362_v9  ;;  %v4370_v42 = vadd.f32 %v20784_v52, %v4044_v56  ;;  %v17190_v29 = vadd.f32 %v20786_v46, %v20785_v44  ;;  %v20787_v7 = vld [vmem:[#allocation83_spill] sm:$0xff]  ;;  %v20789_v15 = vld [vmem:[#allocation92_spill] sm:$0xff] }
 0x26a   : > { %20779 = vst [vmem:[#allocation103_spill] sm:$0xff] %v17175_v31  ;;  %v4366_v8 = vadd.f32 %v20780_v57, %v4040_v45  ;;  %v17194_v45 = vadd.f32 %v20788_v62, %v20787_v7  ;;  %v20790_v13 = vld [vmem:[#allocation71_spill] sm:$0xff]  ;;  %v20791_v9 = vld [vmem:[#allocation105_spill] sm:$0xff]  ;;  %v20794_v34 = vld [vmem:[#allocation102_spill] sm:$0xff] }
 0x26b   : > { %v17183_v30 = vpop.f32.mrf.mxu0  ;;  %v17185_v23 = vpop.f32.mrf.mxu1  ;;  %v17198_v59 = vadd.f32 %v20790_v13, %v20789_v15  ;;  %v4374_v14 = vadd.f32 %v20791_v9, %v4048_v24  ;;  %v20792_v16 = vld [vmem:[#allocation101_spill] sm:$0xff]  ;;  %v20796_v20 = vld [vmem:[#allocation56_spill] sm:$0xff]  ;;  %v20798_v44 = vld [vmem:[#allocation123_spill] sm:$0xff] }
 0x26c   : > { %v17202_v17 = vadd.f32 %v20792_v16, %v4366_v8  ;;  %v20793_v47 = vld [vmem:[#allocation93_spill] sm:$0xff]  ;;  %v20799_v46 = vld [vmem:[#allocation86_spill] sm:$0xff]  ;;  %v20802_v15 = vld [vmem:[#allocation91_spill] sm:$0xff] }
 0x26d   : > { %v17206_v56 = vadd.f32 %v20794_v34, %v20793_v47  ;;  %v20795_v57 = vld [vmem:[#allocation97_spill] sm:$0xff]  ;;  %v17212_v10 = vpop.f32.mrf.mxu0  ;;  %v17214_v52 = vpop.f32.mrf.mxu1  ;;  %v17218_v7 = vadd.f32 %v20799_v46, %v20798_v44  ;;  %v20800_v24 = vld [vmem:[#allocation106_spill] sm:$0xff]  ;;  %v20803_v9 = vld [vmem:[#allocation112_spill] sm:$0xff] }
 0x26e   : > { %v17210_v60 = vadd.f32 %v20796_v20, %v20795_v57  ;;  %20797 = vst [vmem:[#allocation99_spill] sm:$0xff] %v17214_v52  ;;  %v17221_v62 = vadd.f32 %v20800_v24, %v4370_v42  ;;  %v20801_v8 = vld [vmem:[#allocation110_spill] sm:$0xff]  ;;  %v20804_v16 = vld [vmem:[#allocation109_spill] sm:$0xff]  ;;  %v20806_v20 = vld [vmem:[#allocation119_spill] sm:$0xff]  ;;  %v7551_v42 = vshll.u32 %v13139_v61, 16 }
 0x26f   : > { %v17225_v13 = vadd.f32 %v20802_v15, %v20801_v8  ;;  %v17229_v47 = vadd.f32 %v20804_v16, %v20803_v9  ;;  %v20805_v34 = vld [vmem:[#allocation118_spill] sm:$0xff]  ;;  %v5425_v5 = vadd.f32 %v20806_v20, %v4878_v27  ;;  %v20808_v12 = vld [vmem:[#allocation111_spill] sm:$0xff]  ;;  %v14205_v44 = vpop.f32.mrf.mxu0  ;;  %v17237_v46 = vpop.f32.mrf.mxu1  ;;  %v20810_v24 = vld [vmem:[#allocation120_spill] sm:$0xff] }
 0x270   : > { %v4378_v57 = vadd.f32 %v20805_v34, %v4052_v35  ;;  %v17235_v2 = vadd.f32 %v20808_v12, %v20807_v21  ;;  %20809 = vst [vmem:[#allocation107_spill] sm:$0xff] %v17237_v46  ;;  %v5423_v32 = vadd.f32 %v20810_v24, %v4876_v0  ;;  %v20811_v8 = vld [vmem:[#allocation126_spill] sm:$0xff]  ;;  %v20812_v49 = vld [vmem:[#allocation113_spill] sm:$0xff]  ;;  %v20816_v34 = vld [vmem:[#allocation131_spill] sm:$0xff] }
 0x271   : > { %v5426_v15 = vadd.f32 %v20811_v8, %v4879_v25  ;;  %v17242_v31 = vadd.f32 %v20812_v49, %v4374_v14  ;;  %v20813_v9 = vld [vmem:[#allocation125_spill] sm:$0xff]  ;;  %v5429_v20 = vadd.f32 %v20816_v34, %v4882_v6  ;;  %v5408_v46 = vpop.f32.mrf.mxu0  ;;  %v17253_v52 = vpop.f32.mrf.mxu1  ;;  %v20821_v0 = vld [vmem:[#allocation135_spill] sm:$0xff]  ;;  %v20822_v24 = vld [vmem:[#allocation134_spill] sm:$0xff] }
 0x272   : > { %v17245_v16 = vadd.f32 %v14205_v44, %v20813_v9  ;;  %v20815_v35 = vld [vmem:[#allocation129_spill] sm:$0xff]  ;;  %v17251_v19 = vadd.f32 %v20818_v11, %v4378_v57  ;;  %20820 = vst [vmem:[#allocation108_spill] sm:$0xff] %v17253_v52  ;;  %v5430_v25 = vadd.f32 %v20821_v0, %v4883_v53  ;;  %v5751_v49 = vadd.f32 %v20822_v24, %v5425_v5  ;;  %v20823_v14 = vld [vmem:[#allocation136_spill] sm:$0xff]  ;;  %v20824_v44 = vld [vmem:[#allocation127_spill] sm:$0xff] }
 0x273   : > { %v5424_v27 = vadd.f32 %v20815_v35, %v4877_v28  ;;  %v20817_v12 = vld [vmem:[#allocation133_spill] sm:$0xff]  ;;  %v5749_v8 = vadd.f32 %v20823_v14, %v5423_v32  ;;  %v17259_v9 = vadd.f32 %v5408_v46, %v20824_v44  ;;  %v17261_v28 = vld [vmem:[#allocation3 + $0xc] sm:$0x8]  ;;  %v14206_v11 = vpop.f32.mrf.mxu0  ;;  %v17265_v57 = vpop.f32.mrf.mxu1  ;;  %v20830_v24 = vld [vmem:[#allocation140_spill] sm:$0xff] }
 0x274   : > { %20814 = vst [vmem:[#allocation104_spill] sm:$0xff] %v17245_v16  ;;  %v5427_v21 = vadd.f32 %v20817_v12, %v4880_v33  ;;  %20819 = vst [vmem:[#allocation114_spill] sm:$0xff] %v17251_v19  ;;  %v20826_v6 = vld [vmem:[#allocation137_spill] sm:$0xff]  ;;  %v20827_v33 = vld [vmem:[#allocation138_spill] sm:$0xff]  ;;  %v7549_v12 = vshrl.u32 %v13139_v61, 16  ;;  %v7553_v16 = vrot.slane %v7551_v42, 1 }
 0x275   : > { %20825 = vst [vmem:[#allocation116_spill] sm:$0xff] %v17259_v9  ;;  %v5428_v35 = vadd.f32 %v20826_v6, %v4881_v26  ;;  %v5752_v34 = vadd.f32 %v20827_v33, %v5426_v15  ;;  %v20828_v19 = vld [vmem:[#allocation139_spill] sm:$0xff]  ;;  %v20829_v0 = vld [vmem:[#allocation141_spill] sm:$0xff]  ;;  %v5750_v32 = vadd.f32 %v20830_v24, %v5424_v27  ;;  %v20831_v14 = vld [vmem:[#allocation130_spill] sm:$0xff]  ;;  %v17280_v33 = vpop.f32.mrf.mxu0  ;;  %v17282_v61 = vpop.f32.mrf.mxu1 }
 0x276   : > { %v5433_v53 = vadd.f32 %v20828_v19, %v4886_v22  ;;  %v5431_v5 = vadd.f32 %v20829_v0, %v4884_v58  ;;  %v17271_v46 = vadd.f32 %v14206_v11, %v20831_v14  ;;  %v20833_v44 = vld [vmem:[#allocation143_spill] sm:$0xff]  ;;  %v20834_v52 = vld [vmem:[#allocation142_spill] sm:$0xff]  ;;  %v20835_v15 = vld [vmem:[#allocation144_spill] sm:$0xff]  ;;  %20836 = vst [vmem:[#allocation115_spill] sm:$0xff] %v17282_v61 }
 0x277   : > { %v5434_v9 = vadd.f32 %v20833_v44, %v4887_v51  ;;  %v17275_v26 = vadd.f32 %v20834_v52, %v5429_v20  ;;  %v17278_v6 = vadd.f32 %v20835_v15, %v5427_v21  ;;  %v20838_v58 = vld [vmem:[#allocation145_spill] sm:$0xff]  ;;  %v20839_v27 = vld [vmem:[#allocation147_spill] sm:$0xff]  ;;  %v20840_v0 = vld [vmem:[#allocation146_spill] sm:$0xff]  ;;  %v14245_v61 = vpop.f32.mrf.mxu0 }
 0x278   : > { %20832 = vst [vmem:[#allocation122_spill] sm:$0xff] %v17271_v46  ;;  %v5432_v42 = vadd.f32 %v20838_v58, %v4885_v36  ;;  %v5437_v11 = vadd.f32 %v20839_v27, %v4890_v63  ;;  %v17289_v24 = vadd.f32 %v20840_v0, %v5430_v25  ;;  %v20841_v51 = vld [vmem:[#allocation148_spill] sm:$0xff]  ;;  %v20842_v20 = vld [vmem:[#allocation149_spill] sm:$0xff]  ;;  %v20843_v14 = vld [vmem:[#allocation151_spill] sm:$0xff]  ;;  %v17305_v63 = vor.u32 %v7553_v16, %v7549_v12 }
 0x279   : > { %v17292_v52 = vadd.f32 %v20841_v51, %v5428_v35  ;;  %v5435_v21 = vadd.f32 %v20842_v20, %v17171_v37  ;;  %v5438_v44 = vadd.f32 %v20843_v14, %v4891_v4  ;;  %v20844_v15 = vld [vmem:[#allocation150_spill] sm:$0xff]  ;;  %v17303_v36 = vld [vmem:[%s20176_s2] ss:$0 sm:$0xff]  ;;  %v20846_v58 = vld [vmem:[#allocation152_spill] sm:$0xff]  ;;  %v6278_v4 = vadd.f32 %v14245_v61, %v5751_v49  ;;  %v6149_v61 = vpop.f32.mrf.mxu0 }
 0x27a   : > { %v17298_v46 = vadd.f32 %v20844_v15, %v5433_v53  ;;  %v20845_v25 = vld [vmem:[#allocation153_spill] sm:$0xff]  ;;  %v17310_v27 = vadd.f32 %v20846_v58, %v5431_v5  ;;  %v20847_v37 = vld [vmem:[#allocation154_spill] sm:$0xff]  ;;  %v17315_v53 = vpop.f32.mrf.mxu1  ;;  %v17320_v51 = vld [vmem:[%s20178_s4 + $0x10] sm:$0xf] }
 0x27b   : > { %v5436_v35 = vadd.f32 %v20845_v25, %v17181_v39  ;;  %v17313_v0 = vadd.f32 %v20847_v37, %v5434_v9  ;;  %v20848_v16 = vld [vmem:[#allocation155_spill] sm:$0xff]  ;;  %v20849_v20 = vld [vmem:[#allocation157_spill] sm:$0xff]  ;;  %v20850_v14 = vld [vmem:[#allocation156_spill] sm:$0xff] }
 0x27c   : > { %v5441_v12 = vadd.f32 %v20848_v16, %v17190_v29  ;;  %v5439_v39 = vadd.f32 %v20849_v20, %v17194_v45  ;;  %v17327_v5 = vadd.f32 %v20850_v14, %v5432_v42  ;;  %v20851_v15 = vld [vmem:[#allocation158_spill] sm:$0xff]  ;;  %v17335_v49 = vld [vmem:[%s20177_s3] ss:$0 sm:$0xff]  ;;  %v20852_v25 = vld [vmem:[#allocation159_spill] sm:$0xff]  ;;  %v6317_v45 = vmul.f32 %v17303_v36, %v6278_v4 }
 0x27d   : > { %v17330_v9 = vadd.f32 %v20851_v15, %v5437_v11  ;;  %v5442_v58 = vadd.f32 %v20852_v25, %v17198_v59  ;;  %v20853_v37 = vld [vmem:[#allocation160_spill] sm:$0xff]  ;;  %v6276_v16 = vadd.f32 %v6149_v61, %v5749_v8  ;;  %v20854_v42 = vld [vmem:[#allocation67_spill] sm:$0xff]  ;;  %v14246_v15 = vpop.f32.mrf.mxu0  ;;  %v20856_v22 = vld [vmem:[#allocation161_spill] sm:$0xff]  ;;  %v17354_v59 = vsel %vm6785_vm0, %v17320_v51, 0  ;;  %v17360_v61 = vpop.f32.mrf.mxu1 }
 0x27e   : > { %v17340_v29 = vadd.f32 %v20853_v37, %v5435_v21  ;;  %v5440_v20 = vadd.f32 %v20854_v42, %v17202_v17  ;;  %v20855_v11 = vld [vmem:[#allocation84_spill] sm:$0xff]  ;;  %v17350_v19 = vsel %vm6785_vm0, %v20856_v22, 0  ;;  %v5445_v21 = vadd.f32 %v17089_v3, %v17206_v56  ;;  %v20857_v25 = vld [vmem:[#allocation75_spill] sm:$0xff] }
 0x27f   : > { %v17346_v14 = vadd.f32 %v20855_v11, %v5438_v44  ;;  %v6356_v8 = vadd.f32 %v17335_v49, %v6317_v45  ;;  %v6315_v4 = vmul.f32 %v17303_v36, %v6276_v16  ;;  %v6279_v17 = vadd.f32 %v14246_v15, %v5752_v34  ;;  %v6152_v3 = vpop.f32.mrf.mxu0 }
 0x280   : > { %v5443_v44 = vadd.f32 %v17101_v55, %v17210_v60  ;;  %v5446_v22 = vadd.f32 %v17113_v18, %v17218_v7  ;;  %v17367_v37 = vadd.f32 %v20857_v25, %v5436_v35  ;;  %v17370_v42 = vadd.f32 %v17103_v41, %v5441_v12  ;;  %v20858_v25 = vld [vmem:[#allocation99_spill] sm:$0xff] }
 0x281   : > { %v6388_v56 = vmax.f32 %v6356_v8, 0.0  ;;  %v6354_v45 = vadd.f32 %v17335_v49, %v6315_v4  ;;  %v6318_v34 = vmul.f32 %v17303_v36, %v6279_v17  ;;  %v6277_v16 = vadd.f32 %v6152_v3, %v5750_v32  ;;  %v14249_v41 = vpop.f32.mrf.mxu0  ;;  %v5734_v32 = vpop.f32.mrf.mxu1 }
 0x282   : > { %v5444_v11 = vadd.f32 %v17125_v50, %v17221_v62  ;;  %v5449_v55 = vadd.f32 %v17141_v40, %v17225_v13  ;;  %v17379_v18 = vadd.f32 %v17115_v54, %v5439_v39  ;;  %v17382_v60 = vadd.f32 %v17127_v43, %v5442_v58 }
 0x283   : > { %v13533_v7 = vpack.c.bf16 %v6388_v56, %v6388_v56  ;;  %v6386_v35 = vmax.f32 %v6354_v45, 0.0  ;;  %v6357_v12 = vadd.f32 %v17335_v49, %v6318_v34  ;;  %v6316_v15 = vmul.f32 %v17303_v36, %v6277_v16  ;;  %v6165_v40 = vpop.f32.mrf.mxu0  ;;  %v14240_v17 = vpop.f32.mrf.mxu1 }
 0x284   : > { %v5447_v50 = vadd.f32 %v17160_v48, %v17229_v47  ;;  %v17389_v62 = vadd.f32 %v17143_v1, %v5440_v20  ;;  %v17392_v54 = vadd.f32 %v17162_v38, %v5445_v21  ;;  %v6282_v43 = vadd.f32 %v14249_v41, %v17275_v26 }
 0x285   : > { %6557 = vst.msk [vmem:[#allocation3 + $0x18] sm:$0xf] %vm6418_vm2, %v13533_v7  ;;  %v13531_v13 = vpack.c.bf16 %v6386_v35, %v6386_v35  ;;  %v6389_v39 = vmax.f32 %v6357_v12, 0.0  ;;  %v6355_v58 = vadd.f32 %v17335_v49, %v6316_v15  ;;  %v6280_v8 = vadd.f32 %v6165_v40, %v17278_v6  ;;  %v14250_v26 = vpop.f32.mrf.mxu0  ;;  %v5737_v40 = vpop.f32.mrf.mxu1 }
 0x286   : > { %v5450_v48 = vadd.f32 %v17183_v30, %v17235_v2  ;;  %v5448_v1 = vadd.f32 %v17212_v10, %v17242_v31  ;;  %v17403_v38 = vadd.f32 %v17185_v23, %v5443_v44  ;;  %v6321_v47 = vmul.f32 %v17303_v36, %v6282_v43  ;;  %v20859_v30 = vld [vmem:[#allocation107_spill] sm:$0xff]  ;;  %v20860_v23 = vld [vmem:[#allocation108_spill] sm:$0xff] }
 0x287   : > { %6555 = vst.msk [vmem:[#allocation3 + $0x10] sm:$0xf] %vm6418_vm2, %v13531_v13  ;;  %v13534_v20 = vpack.c.bf16 %v6389_v39, %v6389_v39  ;;  %v6387_v21 = vmax.f32 %v6355_v58, 0.0  ;;  %v6319_v4 = vmul.f32 %v17303_v36, %v6280_v8  ;;  %v6283_v6 = vadd.f32 %v14250_v26, %v17289_v24  ;;  %v6168_v3 = vpop.f32.mrf.mxu0  ;;  %v20864_v39 = vld [vmem:[#allocation116_spill] sm:$0xff] }
 0x288   : > { %v17410_v2 = vadd.f32 %v20858_v25, %v5446_v22  ;;  %v17413_v31 = vadd.f32 %v20859_v30, %v5444_v11  ;;  %v17416_v10 = vadd.f32 %v20860_v23, %v5449_v55  ;;  %v6360_v44 = vadd.f32 %v17335_v49, %v6321_v47  ;;  %v20861_v22 = vld [vmem:[#allocation114_spill] sm:$0xff]  ;;  %v20862_v55 = vld [vmem:[#allocation115_spill] sm:$0xff] }
 0x289   : > { %6558 = vst.msk [vmem:[#allocation3 + $0x1c] sm:$0xf] %vm6418_vm2, %v13534_v20  ;;  %v13532_v56 = vpack.c.bf16 %v6387_v21, %v6387_v21  ;;  %v6358_v45 = vadd.f32 %v17335_v49, %v6319_v4  ;;  %v6322_v24 = vmul.f32 %v17303_v36, %v6283_v6  ;;  %v6281_v34 = vadd.f32 %v6168_v3, %v17292_v52  ;;  %v14253_v35 = vpop.f32.mrf.mxu0  ;;  %v20866_v25 = vld [vmem:[#allocation10_spill] sm:$0xff] }
 0x28a   : > { %v5452_v16 = vadd.f32 %v17280_v33, %v20861_v22  ;;  %v17426_v11 = vadd.f32 %v17265_v57, %v5447_v50  ;;  %v17429_v41 = vadd.f32 %v20862_v55, %v5450_v48  ;;  %v6392_v7 = vmax.f32 %v6360_v44, 0.0  ;;  %v20863_v50 = vld [vmem:[#allocation104_spill] sm:$0xff] }
 0x28b   : > { %6556 = vst.msk [vmem:[#allocation3 + $0x14] sm:$0xf] %vm6418_vm2, %v13532_v56  ;;  %v6390_v12 = vmax.f32 %v6358_v45, 0.0  ;;  %v6361_v15 = vadd.f32 %v17335_v49, %v6322_v24  ;;  %v6320_v43 = vmul.f32 %v17303_v36, %v6281_v34  ;;  %v6286_v52 = vadd.f32 %v14253_v35, %v17298_v46  ;;  %v6181_v8 = vpop.f32.mrf.mxu0  ;;  %v20867_v34 = vld [vmem:[#allocation8_spill] sm:$0xff] }
 0x28c   : > { %v17436_v33 = vadd.f32 %v17315_v53, %v5448_v1  ;;  %v13537_v57 = vpack.c.bf16 %v6392_v7, %v6392_v7  ;;  %v17440_v13 = vadd.f32 %v17360_v61, %v20863_v50  ;;  %v17443_v58 = vadd.f32 %v5734_v32, %v20864_v39  ;;  %v17445_v48 = vld [vmem:[#allocation3 + $0x18] sm:$0xf]  ;;  %v20865_v53 = vld [vmem:[#allocation122_spill] sm:$0xff]  ;;  %v20870_v50 = vld [vmem:[#allocation61_spill] sm:$0xff] }
 0x28d   : > { %v13535_v47 = vpack.c.bf16 %v6390_v12, %v6390_v12  ;;  %v6393_v26 = vmax.f32 %v6361_v15, 0.0  ;;  %v6359_v20 = vadd.f32 %v17335_v49, %v6320_v43  ;;  %v6325_v46 = vmul.f32 %v17303_v36, %v6286_v52  ;;  %v17449_v21 = vld [vmem:[#allocation3 + $0x18] sm:$0xf]  ;;  %v14254_v4 = vpop.f32.mrf.mxu0  ;;  %v20869_v7 = vld [vmem:[#allocation42_spill] sm:$0xff]  ;;  %v20871_v39 = vld [vmem:[#allocation7_spill] sm:$0xff] }
 0x28e   : > { %6561 = vst.msk [vmem:[#allocation3 + $0x28] sm:$0xf] %vm6418_vm2, %v13537_v57  ;;  %v17453_v1 = vadd.f32 %v14240_v17, %v20865_v53  ;;  %v17455_v61 = vadd.f32 %v5737_v40, %v5452_v16  ;;  %v6284_v32 = vadd.f32 %v6181_v8, %v17310_v27  ;;  %v6590_v6 = vld [vmem:[#allocation3 + $0x10] sm:$0xf]  ;;  %v6625_v30 = vmul.bf16 %v17445_v48, %v20866_v25  ;;  %v20868_v16 = vld [vmem:[#allocation40_spill] sm:$0xff] }
 0x28f   : > { %v17460_v23 = vld [vmem:[#allocation3 + $0x10] sm:$0xf]  ;;  %6559 = vst.msk [vmem:[#allocation3 + $0x20] sm:$0xf] %vm6418_vm2, %v13535_v47  ;;  %v13538_v44 = vpack.c.bf16 %v6393_v26, %v6393_v26  ;;  %v6391_v3 = vmax.f32 %v6359_v20, 0.0  ;;  %v6364_v56 = vadd.f32 %v17335_v49, %v6325_v46  ;;  %v6287_v17 = vadd.f32 %v14254_v4, %v17313_v0  ;;  %v6184_v24 = vpop.f32.mrf.mxu0 }
 0x290   : > { %v6323_v45 = vmul.f32 %v17303_v36, %v6284_v32  ;;  %v6623_v27 = vmul.bf16 %v6590_v6, %v20867_v34  ;;  %v6593_v22 = vld [vmem:[#allocation3 + $0x1c] sm:$0xf]  ;;  %v6285_v0 = vadd.f32 %v6184_v24, %v17327_v5  ;;  %v20872_v8 = vmul.bf16 %v20870_v50, %v20871_v39  ;;  %v20873_v26 = vld [vmem:[#allocation11_spill] sm:$0xff] }
 0x291   : > { %6562 = vst.msk [vmem:[#allocation3 + $0x2c] sm:$0xf] %vm6418_vm2, %v13538_v44  ;;  %v13536_v12 = vpack.c.bf16 %v6391_v3, %v6391_v3  ;;  %v6396_v15 = vmax.f32 %v6364_v56, 0.0  ;;  %v6326_v43 = vmul.f32 %v17303_v36, %v6287_v17  ;;  %v14257_v52 = vpop.f32.mrf.mxu0  ;;  %v6626_v20 = vmul.bf16 %v6593_v22, %v20873_v26  ;;  %v20874_v17 = vld [vmem:[#allocation9_spill] sm:$0xff] }
 0x292   : > { %v6362_v40 = vadd.f32 %v17335_v49, %v6323_v45  ;;  %v6591_v57 = vld [vmem:[#allocation3 + $0x14] sm:$0xf]  ;;  %v13106_v47 = vcombine.low %v20872_v8, %v6623_v27  ;;  %v13075_v46 = vcombine.low %v17445_v48, %v6593_v22  ;;  %v6324_v4 = vmul.f32 %v17303_v36, %v6285_v0 }
 0x293   : > { %6560 = vst.msk [vmem:[#allocation3 + $0x24] sm:$0xf] %vm6418_vm2, %v13536_v12  ;;  %v13541_v53 = vpack.c.bf16 %v6396_v15, %v6396_v15  ;;  %v6365_v32 = vadd.f32 %v17335_v49, %v6326_v43  ;;  %v6290_v5 = vadd.f32 %v14257_v52, %v17330_v9  ;;  %v6197_v3 = vpop.f32.mrf.mxu0  ;;  %v13074_v56 = vcombine.low %v6590_v6, %v6591_v57 }
 0x294   : > { %v6394_v44 = vmax.f32 %v6362_v40, 0.0  ;;  %v6624_v45 = vmul.bf16 %v6591_v57, %v20874_v17  ;;  %v7042_v24 = vshrl.u32 %v13106_v47, 16  ;;  %v6363_v48 = vadd.f32 %v17335_v49, %v6324_v4 }
 0x295   : > { %6565 = vst.msk [vmem:[#allocation3 + $0x38] sm:$0xf] %vm6418_vm2, %v13541_v53  ;;  %v6397_v27 = vmax.f32 %v6365_v32, 0.0  ;;  %v6329_v22 = vmul.f32 %v17303_v36, %v6290_v5  ;;  %v6288_v12 = vadd.f32 %v6197_v3, %v17340_v29  ;;  %14278 = vmatmul.mubr.msk.bf16.vlgmr.msra.gmra.mxu1 %vm6736_vm7, %v13074_v56  ;;  %v14258_v43 = vpop.f32.mrf.mxu0  ;;  %v7045_v6 = vshll.u32 %v13106_v47, 16  ;;  %v20875_v53 = vld [vmem:[#allocation103_spill] sm:$0xff]  ;;  %v20876_v32 = vld [vmem:[#allocation12_spill] sm:$0xff] }
 0x296   : > { %v13539_v15 = vpack.c.bf16 %v6394_v44, %v6394_v44  ;;  %v6594_v9 = vld [vmem:[#allocation3 + $0x20] sm:$0xf]  ;;  %v13107_v0 = vcombine.low %v6624_v45, %v6625_v30  ;;  %v7044_v40 = vrot.slane %v7042_v24, 3  ;;  %v6395_v57 = vmax.f32 %v6363_v48, 0.0  ;;  %14344 = vmatpush3.bf16.msra.mxu1 %v20875_v53  ;;  %14281 = vmatprep.mubr.msk.bf16.mxu1 %vm6736_vm7, %v13075_v46 }
 0x297   : > { %v13542_v52 = vpack.c.bf16 %v6397_v27, %v6397_v27  ;;  %v6368_v50 = vadd.f32 %v17335_v49, %v6329_v22  ;;  %v6327_v8 = vmul.f32 %v17303_v36, %v6288_v12  ;;  %v6291_v29 = vadd.f32 %v14258_v43, %v17346_v14  ;;  %v6200_v44 = vpop.f32.mrf.mxu0  ;;  %14730 = vmatprep.subr.msk.bf16.mxu1 %vm6785_vm0, %v17320_v51 }
 0x298   : > { %6563 = vst.msk [vmem:[#allocation3 + $0x30] sm:$0xf] %vm6418_vm2, %v13539_v15  ;;  %v6627_v4 = vmul.bf16 %v6594_v9, %v20876_v32  ;;  %v7051_v5 = vshrl.u32 %v13107_v0, 16  ;;  %v7054_v30 = vshll.u32 %v13107_v0, 16  ;;  %v13540_v47 = vpack.c.bf16 %v6395_v57, %v6395_v57  ;;  %v6596_v0 = vld [vmem:[#allocation3 + $0x28] sm:$0xf] }
 0x299   : > { %6566 = vst.msk [vmem:[#allocation3 + $0x3c] sm:$0xf] %vm6418_vm2, %v13542_v52  ;;  %v6400_v3 = vmax.f32 %v6368_v50, 0.0  ;;  %v6366_v56 = vadd.f32 %v17335_v49, %v6327_v8  ;;  %v6289_v46 = vadd.f32 %v6200_v44, %v17367_v37  ;;  %v6330_v45 = vmul.f32 %v17303_v36, %v6291_v29  ;;  %v14261_v48 = vpop.f32.mrf.mxu0 }
 0x29a   : > { %v17503_v24 = vcombine.low %v6626_v20, %v6627_v4  ;;  %v7053_v14 = vrot.slane %v7051_v5, 3  ;;  %v7056_v27 = vrot.slane %v7054_v30, 4  ;;  %v6595_v22 = vld [vmem:[#allocation3 + $0x24] sm:$0xf]  ;;  %6564 = vst.msk [vmem:[#allocation3 + $0x34] sm:$0xf] %vm6418_vm2, %v13540_v47  ;;  %v6294_v43 = vadd.f32 %v14261_v48, %v17370_v42 }
 0x29b   : > { %v13545_v12 = vpack.c.bf16 %v6400_v3, %v6400_v3  ;;  %v6398_v51 = vmax.f32 %v6366_v56, 0.0  ;;  %v6328_v15 = vmul.f32 %v17303_v36, %v6289_v46  ;;  %v6369_v52 = vadd.f32 %v17335_v49, %v6330_v45  ;;  %v6213_v20 = vpop.f32.mrf.mxu0  ;;  %v6597_v5 = vld [vmem:[#allocation3 + $0x2c] sm:$0xf]  ;;  %v20877_v47 = vld [vmem:[#allocation13_spill] sm:$0xff]  ;;  %v20879_v48 = vld [vmem:[#allocation87_spill] sm:$0xff] }
 0x29c   : > { %v17509_v37 = vor.u32 %v7056_v27, %v7053_v14  ;;  %v7047_v57 = vrot.slane %v7045_v6, 4  ;;  %v13076_v50 = vcombine.low %v6594_v9, %v6595_v22  ;;  %v6333_v29 = vmul.f32 %v17303_v36, %v6294_v43  ;;  %v20878_v6 = vld [vmem:[#allocation14_spill] sm:$0xff]  ;;  %v20883_v43 = vld [vmem:[#allocation16_spill] sm:$0xff] }
 0x29d   : > { %6569 = vst.msk [vmem:[#allocation3 + $0x48] sm:$0xf] %vm6418_vm2, %v13545_v12  ;;  %v13543_v8 = vpack.c.bf16 %v6398_v51, %v6398_v51  ;;  %v6367_v53 = vadd.f32 %v17335_v49, %v6328_v15  ;;  %v6292_v4 = vadd.f32 %v6213_v20, %v17379_v18  ;;  %v6401_v30 = vmax.f32 %v6369_v52, 0.0  ;;  %v14262_v44 = vpop.f32.mrf.mxu0  ;;  %v20882_v15 = vld [vmem:[#allocation15_spill] sm:$0xff] }
 0x29e   : > { %v7048_v42 = vor.u32 %v7047_v57, %v7044_v40  ;;  %14282 = vmatmul.mubr.msk.bf16.gmra.mxu1 %vm6736_vm7, %v13076_v50  ;;  %v6628_v3 = vmul.bf16 %v6595_v22, %v20877_v47  ;;  %v6629_v56 = vmul.bf16 %v6596_v0, %v20878_v6  ;;  %v6372_v46 = vadd.f32 %v17335_v49, %v6333_v29  ;;  %v20880_v40 = vld [vmem:[#allocation98_spill] sm:$0xff] }
 0x29f   : > { %6567 = vst.msk [vmem:[#allocation3 + $0x40] sm:$0xf] %vm6418_vm2, %v13543_v8  ;;  %v6399_v9 = vmax.f32 %v6367_v53, 0.0  ;;  %v6331_v45 = vmul.f32 %v17303_v36, %v6292_v4  ;;  %v6295_v14 = vadd.f32 %v14262_v44, %v17382_v60  ;;  %v6598_v18 = vld [vmem:[#allocation3 + $0x30] sm:$0xf]  ;;  %v13546_v27 = vpack.c.bf16 %v6401_v30, %v6401_v30  ;;  %v6216_v57 = vpop.f32.mrf.mxu0 }
 0x2a0   : > { %v20881_v12 = vor.u32 %v20879_v48, %v20880_v40  ;;  %v6630_v22 = vmul.bf16 %v6597_v5, %v20882_v15  ;;  %v6631_v52 = vmul.bf16 %v6598_v18, %v20883_v43  ;;  %v6404_v50 = vmax.f32 %v6372_v46, 0.0 }
 0x2a1   : > { %v13544_v20 = vpack.c.bf16 %v6399_v9, %v6399_v9  ;;  %v6370_v8 = vadd.f32 %v17335_v49, %v6331_v45  ;;  %v6334_v60 = vmul.f32 %v17303_v36, %v6295_v14  ;;  %6570 = vst.msk [vmem:[#allocation3 + $0x4c] sm:$0xf] %vm6418_vm2, %v13546_v27  ;;  %v13077_v53 = vcombine.low %v6596_v0, %v6597_v5  ;;  %v14265_v44 = vpop.f32.mrf.mxu0  ;;  %v6599_v48 = vld [vmem:[#allocation3 + $0x34] sm:$0xf] }
 0x2a2   : > { %v7049_v51 = vsel %vm2052_vm14, %v20881_v12, %v7048_v42  ;;  %v17532_v29 = vcombine.low %v6628_v3, %v6629_v56  ;;  %v17534_v4 = vcombine.low %v6630_v22, %v6631_v52  ;;  %v7058_v30 = vsel %vm2052_vm14, %v7048_v42, %v17509_v37  ;;  %v17541_v9 = vld [vmem:[%s20178_s4 + $0x14] sm:$0xf]  ;;  %v6600_v22 = vld [vmem:[#allocation3 + $0x38] sm:$0xf]  ;;  %v6601_v52 = vld [vmem:[#allocation3 + $0x3c] sm:$0xf] }
 0x2a3   : > { %14311 = vmatprep.mubr.msk.bf16.mxu0 %vm6736_vm7, %v7049_v51  ;;  %6568 = vst.msk [vmem:[#allocation3 + $0x44] sm:$0xf] %vm6418_vm2, %v13544_v20  ;;  %v13549_v46 = vpack.c.bf16 %v6404_v50, %v6404_v50  ;;  %v6402_v45 = vmax.f32 %v6370_v8, 0.0  ;;  %v6373_v0 = vadd.f32 %v17335_v49, %v6334_v60  ;;  %v6293_v5 = vadd.f32 %v6216_v57, %v17389_v62  ;;  %v6229_v14 = vpop.f32.mrf.mxu0  ;;  %v20884_v20 = vld [vmem:[#allocation17_spill] sm:$0xff] }
 0x2a4   : > { %14312 = vmatmul.mubr.msk.bf16.vlgmr.msra.gmra.mxu0 %vm6736_vm7, %v7058_v30  ;;  %14285 = vmatprep.mubr.msk.bf16.mxu1 %vm6736_vm7, %v13077_v53  ;;  %v6298_v42 = vadd.f32 %v14265_v44, %v17392_v54  ;;  %v7060_v3 = vshrl.u32 %v17503_v24, 16  ;;  %v7063_v56 = vshll.u32 %v17503_v24, 16  ;;  %v13078_v27 = vcombine.low %v6598_v18, %v6599_v48 }
 0x2a5   : > { %14378 = vmatpush3.bf16.msra.mxu0 %v17350_v19  ;;  %6573 = vst.msk [vmem:[#allocation3 + $0x58] sm:$0xf] %vm6418_vm2, %v13549_v46  ;;  %v13547_v40 = vpack.c.bf16 %v6402_v45, %v6402_v45  ;;  %v6405_v12 = vmax.f32 %v6373_v0, 0.0  ;;  %v6332_v51 = vmul.f32 %v17303_v36, %v6293_v5  ;;  %v6296_v62 = vadd.f32 %v6229_v14, %v17403_v38  ;;  %v14266_v19 = vpop.f32.mrf.mxu0  ;;  %v20885_v46 = vld [vmem:[#allocation18_spill] sm:$0xff]  ;;  %v20886_v0 = vld [vmem:[#allocation19_spill] sm:$0xff]  ;;  %v20887_v14 = vld [vmem:[#allocation20_spill] sm:$0xff] }
 0x2a6   : > { %14731 = vmatprep.subr.msk.bf16.mxu0 %vm6785_vm0, %v17541_v9  ;;  %v6337_v54 = vmul.f32 %v17303_v36, %v6298_v42  ;;  %v7062_v24 = vrot.slane %v7060_v3, 3  ;;  %v7065_v57 = vrot.slane %v7063_v56, 4  ;;  %14286 = vmatmul.mubr.msk.bf16.gmra.mxu1 %vm6736_vm7, %v13078_v27  ;;  %v17559_v18 = vld [vmem:[#allocation3 + $0x40] sm:$0xf]  ;;  %v6632_v50 = vmul.bf16 %v6599_v48, %v20884_v20 }
 0x2a7   : > { %6571 = vst.msk [vmem:[#allocation3 + $0x50] sm:$0xf] %vm6418_vm2, %v13547_v40  ;;  %v13550_v8 = vpack.c.bf16 %v6405_v12, %v6405_v12  ;;  %v6371_v38 = vadd.f32 %v17335_v49, %v6332_v51  ;;  %v6335_v60 = vmul.f32 %v17303_v36, %v6296_v62  ;;  %v6299_v53 = vadd.f32 %v14266_v19, %v17410_v2  ;;  %v6232_v42 = vpop.f32.mrf.mxu0 }
 0x2a8   : > { %v6376_v30 = vadd.f32 %v17335_v49, %v6337_v54  ;;  %v7066_v44 = vor.u32 %v7065_v57, %v7062_v24  ;;  %v6633_v45 = vmul.bf16 %v6600_v22, %v20885_v46  ;;  %v6634_v5 = vmul.bf16 %v6601_v52, %v20886_v0 }
 0x2a9   : > { %6574 = vst.msk [vmem:[#allocation3 + $0x5c] sm:$0xf] %vm6418_vm2, %v13550_v8  ;;  %v6403_v48 = vmax.f32 %v6371_v38, 0.0  ;;  %v6374_v3 = vadd.f32 %v17335_v49, %v6335_v60  ;;  %v6338_v56 = vmul.f32 %v17303_v36, %v6299_v53  ;;  %v6635_v27 = vmul.bf16 %v17559_v18, %v20887_v14  ;;  %v14269_v62 = vpop.f32.mrf.mxu0 }
 0x2aa   : > { %v6408_v40 = vmax.f32 %v6376_v30, 0.0  ;;  %v7067_v2 = vsel %vm2052_vm14, %v17509_v37, %v7066_v44  ;;  %v13079_v12 = vcombine.low %v6600_v22, %v6601_v52  ;;  %v17576_v51 = vcombine.low %v6632_v50, %v6633_v45  ;;  %v6603_v45 = vld [vmem:[#allocation3 + $0x44] sm:$0xf] }
 0x2ab   : > { %v13548_v54 = vpack.c.bf16 %v6403_v48, %v6403_v48  ;;  %14315 = vmatprep.mubr.msk.bf16.mxu0 %vm6736_vm7, %v7067_v2  ;;  %v6406_v24 = vmax.f32 %v6374_v3, 0.0  ;;  %v6377_v57 = vadd.f32 %v17335_v49, %v6338_v56  ;;  %v17580_v19 = vcombine.low %v6634_v5, %v6635_v27  ;;  %v6245_v22 = vpop.f32.mrf.mxu0 }
 0x2ac   : > { %v13553_v8 = vpack.c.bf16 %v6408_v40, %v6408_v40  ;;  %14289 = vmatprep.mubr.msk.bf16.mxu1 %vm6736_vm7, %v13079_v12  ;;  %v7069_v38 = vshrl.u32 %v17532_v29, 16  ;;  %v7072_v60 = vshll.u32 %v17532_v29, 16  ;;  %v6297_v37 = vadd.f32 %v6232_v42, %v17413_v31  ;;  %v6604_v40 = vld [vmem:[#allocation3 + $0x48] sm:$0xf] }
 0x2ad   : > { %6572 = vst.msk [vmem:[#allocation3 + $0x54] sm:$0xf] %vm6418_vm2, %v13548_v54  ;;  %v13551_v52 = vpack.c.bf16 %v6406_v24, %v6406_v24  ;;  %v6409_v50 = vmax.f32 %v6377_v57, 0.0  ;;  %v6302_v53 = vadd.f32 %v14269_v62, %v17416_v10  ;;  %v7078_v30 = vshrl.u32 %v17534_v4, 16  ;;  %v14270_v56 = vpop.f32.mrf.mxu0  ;;  %v6605_v24 = vld [vmem:[#allocation3 + $0x4c] sm:$0xf] }
 0x2ae   : > { %6577 = vst.msk [vmem:[#allocation3 + $0x68] sm:$0xf] %vm6418_vm2, %v13553_v8  ;;  %v7071_v5 = vrot.slane %v7069_v38, 3  ;;  %v7074_v48 = vrot.slane %v7072_v60, 4  ;;  %v6336_v3 = vmul.f32 %v17303_v36, %v6297_v37  ;;  %v7081_v29 = vshll.u32 %v17534_v4, 16  ;;  %v20888_v37 = vld [vmem:[#allocation21_spill] sm:$0xff] }
 0x2af   : > { %6575 = vst.msk [vmem:[#allocation3 + $0x60] sm:$0xf] %vm6418_vm2, %v13551_v52  ;;  %v13554_v31 = vpack.c.bf16 %v6409_v50, %v6409_v50  ;;  %v6341_v42 = vmul.f32 %v17303_v36, %v6302_v53  ;;  %v7080_v27 = vrot.slane %v7078_v30, 3  ;;  %v6300_v10 = vadd.f32 %v6245_v22, %v17426_v11  ;;  %v6248_v57 = vpop.f32.mrf.mxu0  ;;  %v6606_v60 = vld [vmem:[#allocation3 + $0x50] sm:$0xf] }
 0x2b0   : > { %v7075_v2 = vor.u32 %v7074_v48, %v7071_v5  ;;  %v6375_v12 = vadd.f32 %v17335_v49, %v6336_v3  ;;  %v7083_v62 = vrot.slane %v7081_v29, 4  ;;  %v13080_v54 = vcombine.low %v17559_v18, %v6603_v45  ;;  %v20889_v18 = vld [vmem:[#allocation22_spill] sm:$0xff] }
 0x2b1   : > { %6578 = vst.msk [vmem:[#allocation3 + $0x6c] sm:$0xf] %vm6418_vm2, %v13554_v31  ;;  %v6380_v4 = vadd.f32 %v17335_v49, %v6341_v42  ;;  %v6339_v8 = vmul.f32 %v17303_v36, %v6300_v10  ;;  %v6303_v38 = vadd.f32 %v14270_v56, %v17429_v41  ;;  %v6636_v11 = vmul.bf16 %v6603_v45, %v20888_v37  ;;  %v14273_v30 = vpop.f32.mrf.mxu0  ;;  %v20890_v41 = vld [vmem:[#allocation23_spill] sm:$0xff] }
 0x2b2   : > { %v7076_v22 = vsel %vm2052_vm14, %v7066_v44, %v7075_v2  ;;  %v6407_v52 = vmax.f32 %v6375_v12, 0.0  ;;  %v7084_v50 = vor.u32 %v7083_v62, %v7080_v27  ;;  %14290 = vmatmul.mubr.msk.bf16.gmra.mxu1 %vm6736_vm7, %v13080_v54  ;;  %v6637_v53 = vmul.bf16 %v6604_v40, %v20889_v18  ;;  %v20891_v44 = vld [vmem:[#allocation24_spill] sm:$0xff] }
 0x2b3   : > { %14316 = vmatmul.mubr.msk.bf16.gmra.mxu0 %vm6736_vm7, %v7076_v22  ;;  %v6412_v5 = vmax.f32 %v6380_v4, 0.0  ;;  %v6378_v48 = vadd.f32 %v17335_v49, %v6339_v8  ;;  %v6342_v3 = vmul.f32 %v17303_v36, %v6303_v38  ;;  %v6638_v29 = vmul.bf16 %v6605_v24, %v20890_v41  ;;  %v6261_v27 = vpop.f32.mrf.mxu0 }
 0x2b4   : > { %v13552_v56 = vpack.c.bf16 %v6407_v52, %v6407_v52  ;;  %v7085_v45 = vsel %vm2052_vm14, %v7075_v2, %v7084_v50  ;;  %v6639_v31 = vmul.bf16 %v6606_v60, %v20891_v44  ;;  %v13081_v42 = vcombine.low %v6604_v40, %v6605_v24  ;;  %v6607_v52 = vld [vmem:[#allocation3 + $0x54] sm:$0xf] }
 0x2b5   : > { %v13557_v10 = vpack.c.bf16 %v6412_v5, %v6412_v5  ;;  %14319 = vmatprep.mubr.msk.bf16.mxu0 %vm6736_vm7, %v7085_v45  ;;  %v6410_v12 = vmax.f32 %v6378_v48, 0.0  ;;  %v6381_v62 = vadd.f32 %v17335_v49, %v6342_v3  ;;  %v17613_v54 = vcombine.low %v6636_v11, %v6637_v53  ;;  %v6608_v45 = vld [vmem:[#allocation3 + $0x58] sm:$0xf] }
 0x2b6   : > { %6576 = vst.msk [vmem:[#allocation3 + $0x64] sm:$0xf] %vm6418_vm2, %v13552_v56  ;;  %14293 = vmatprep.mubr.msk.bf16.mxu1 %vm6736_vm7, %v13081_v42  ;;  %v17617_v4 = vcombine.low %v6638_v29, %v6639_v31  ;;  %v7087_v2 = vshrl.u32 %v17576_v51, 16  ;;  %v7090_v8 = vshll.u32 %v17576_v51, 16  ;;  %v6301_v40 = vadd.f32 %v6248_v57, %v17436_v33  ;;  %v14274_v29 = vpop.f32.mrf.mxu0 }
 0x2b7   : > { %6581 = vst.msk [vmem:[#allocation3 + $0x78] sm:$0xf] %vm6418_vm2, %v13557_v10  ;;  %v13555_v24 = vpack.c.bf16 %v6410_v12, %v6410_v12  ;;  %v6413_v38 = vmax.f32 %v6381_v62, 0.0  ;;  %v6306_v22 = vadd.f32 %v14273_v30, %v17440_v13  ;;  %v7096_v11 = vshrl.u32 %v17580_v19, 16  ;;  %v6609_v10 = vld [vmem:[#allocation3 + $0x5c] sm:$0xf] }
 0x2b8   : > { %v7089_v53 = vrot.slane %v7087_v2, 3  ;;  %v7092_v5 = vrot.slane %v7090_v8, 4  ;;  %v6340_v48 = vmul.f32 %v17303_v36, %v6301_v40  ;;  %v7099_v3 = vshll.u32 %v17580_v19, 16  ;;  %v6610_v2 = vld [vmem:[#allocation3 + $0x60] sm:$0xf] }
 0x2b9   : > { %6579 = vst.msk [vmem:[#allocation3 + $0x70] sm:$0xf] %vm6418_vm2, %v13555_v24  ;;  %v13558_v51 = vpack.c.bf16 %v6413_v38, %v6413_v38  ;;  %v6345_v33 = vmul.f32 %v17303_v36, %v6306_v22  ;;  %v7098_v57 = vrot.slane %v7096_v11, 3  ;;  %v6304_v56 = vadd.f32 %v6261_v27, %v17443_v58  ;;  %v20892_v8 = vld [vmem:[#allocation25_spill] sm:$0xff]  ;;  %v20893_v38 = vld [vmem:[#allocation26_spill] sm:$0xff] }
 0x2ba   : > { %v7093_v13 = vor.u32 %v7092_v5, %v7089_v53  ;;  %v6379_v30 = vadd.f32 %v17335_v49, %v6340_v48  ;;  %v7101_v31 = vrot.slane %v7099_v3, 4  ;;  %v13082_v42 = vcombine.low %v6606_v60, %v6607_v52  ;;  %v20894_v5 = vld [vmem:[#allocation27_spill] sm:$0xff]  ;;  %v6264_v48 = vpop.f32.mrf.mxu0 }
 0x2bb   : > { %6582 = vst.msk [vmem:[#allocation3 + $0x7c] sm:$0xf] %vm6418_vm2, %v13558_v51  ;;  %v6384_v19 = vadd.f32 %v17335_v49, %v6345_v33  ;;  %v6343_v12 = vmul.f32 %v17303_v36, %v6304_v56  ;;  %v6307_v62 = vadd.f32 %v14274_v29, %v17453_v1  ;;  %v6640_v40 = vmul.bf16 %v6607_v52, %v20892_v8 }
 0x2bc   : > { %v7094_v58 = vsel %vm2052_vm14, %v7084_v50, %v7093_v13  ;;  %v6411_v27 = vmax.f32 %v6379_v30, 0.0  ;;  %v7102_v24 = vor.u32 %v7101_v31, %v7098_v57  ;;  %14294 = vmatmul.mubr.msk.bf16.gmra.mxu1 %vm6736_vm7, %v13082_v42  ;;  %v6641_v60 = vmul.bf16 %v6608_v45, %v20893_v38  ;;  %v20895_v50 = vld [vmem:[#allocation28_spill] sm:$0xff] }
 0x2bd   : > { %14320 = vmatmul.mubr.msk.bf16.gmra.mxu0 %vm6736_vm7, %v7094_v58  ;;  %v6416_v22 = vmax.f32 %v6384_v19, 0.0  ;;  %v6382_v11 = vadd.f32 %v17335_v49, %v6343_v12  ;;  %v6346_v53 = vmul.f32 %v17303_v36, %v6307_v62  ;;  %v6642_v1 = vmul.bf16 %v6609_v10, %v20894_v5  ;;  %v6611_v31 = vld [vmem:[#allocation3 + $0x64] sm:$0xf] }
 0x2be   : > { %v13556_v3 = vpack.c.bf16 %v6411_v27, %v6411_v27  ;;  %v7103_v52 = vsel %vm2052_vm14, %v7093_v13, %v7102_v24  ;;  %v6643_v29 = vmul.bf16 %v6610_v2, %v20895_v50  ;;  %v13083_v51 = vcombine.low %v6608_v45, %v6609_v10  ;;  %v6612_v45 = vld [vmem:[#allocation3 + $0x68] sm:$0xf]  ;;  %v6613_v27 = vld [vmem:[#allocation3 + $0x6c] sm:$0xf] }
 0x2bf   : > { %v13561_v33 = vpack.c.bf16 %v6416_v22, %v6416_v22  ;;  %14323 = vmatprep.mubr.msk.bf16.mxu0 %vm6736_vm7, %v7103_v52  ;;  %v6414_v57 = vmax.f32 %v6382_v11, 0.0  ;;  %v6385_v56 = vadd.f32 %v17335_v49, %v6346_v53  ;;  %v13115_v30 = vcombine.low %v6640_v40, %v6641_v60 }
 0x2c0   : > { %6580 = vst.msk [vmem:[#allocation3 + $0x74] sm:$0xf] %vm6418_vm2, %v13556_v3  ;;  %14297 = vmatprep.mubr.msk.bf16.mxu1 %vm6736_vm7, %v13083_v51  ;;  %v13116_v42 = vcombine.low %v6642_v1, %v6643_v29  ;;  %v7105_v19 = vshrl.u32 %v17613_v54, 16  ;;  %v7108_v13 = vshll.u32 %v17613_v54, 16  ;;  %v6305_v12 = vadd.f32 %v6264_v48, %v17455_v61  ;;  %v6614_v1 = vld [vmem:[#allocation3 + $0x70] sm:$0xf] }
 0x2c1   : > { %6585 = vst.msk [vmem:[#allocation3 + $0x88] sm:$0xf] %vm6418_vm2, %v13561_v33  ;;  %v13559_v10 = vpack.c.bf16 %v6414_v57, %v6414_v57  ;;  %v6417_v62 = vmax.f32 %v6385_v56, 0.0  ;;  %v7114_v58 = vshrl.u32 %v17617_v4, 16  ;;  %v7117_v40 = vshll.u32 %v17617_v4, 16  ;;  %v20896_v3 = vld [vmem:[#allocation29_spill] sm:$0xff] }
 0x2c2   : > { %v7107_v60 = vrot.slane %v7105_v19, 3  ;;  %v7110_v22 = vrot.slane %v7108_v13, 4  ;;  %v6344_v11 = vmul.f32 %v17303_v36, %v6305_v12  ;;  %v13084_v53 = vcombine.low %v6610_v2, %v6611_v31  ;;  %v20897_v4 = vld [vmem:[#allocation30_spill] sm:$0xff]  ;;  %v20898_v57 = vld [vmem:[#allocation31_spill] sm:$0xff]  ;;  %v20899_v2 = vld [vmem:[#allocation32_spill] sm:$0xff] }
 0x2c3   : > { %6583 = vst.msk [vmem:[#allocation3 + $0x80] sm:$0xf] %vm6418_vm2, %v13559_v10  ;;  %v13562_v54 = vpack.c.bf16 %v6417_v62, %v6417_v62  ;;  %v7116_v61 = vrot.slane %v7114_v58, 3  ;;  %v7119_v48 = vrot.slane %v7117_v40, 4  ;;  %v6644_v52 = vmul.bf16 %v6611_v31, %v20896_v3  ;;  %v6616_v40 = vld [vmem:[#allocation3 + $0x78] sm:$0xf] }
 0x2c4   : > { %v7111_v29 = vor.u32 %v7110_v22, %v7107_v60  ;;  %v6383_v51 = vadd.f32 %v17335_v49, %v6344_v11  ;;  %14298 = vmatmul.mubr.msk.bf16.gmra.mxu1 %vm6736_vm7, %v13084_v53  ;;  %v6645_v33 = vmul.bf16 %v6612_v45, %v20897_v4  ;;  %v6646_v56 = vmul.bf16 %v6613_v27, %v20898_v57  ;;  %v6617_v49 = vld [vmem:[#allocation3 + $0x7c] sm:$0xf] }
 0x2c5   : > { %6586 = vst.msk [vmem:[#allocation3 + $0x8c] sm:$0xf] %vm6418_vm2, %v13562_v54  ;;  %v7120_v36 = vor.u32 %v7119_v48, %v7116_v61  ;;  %v6647_v19 = vmul.bf16 %v6614_v1, %v20899_v2  ;;  %v13085_v13 = vcombine.low %v6612_v45, %v6613_v27  ;;  %v7123_v12 = vshrl.u32 %v13115_v30, 16 }
 0x2c6   : > { %v7112_v10 = vsel %vm2052_vm14, %v7102_v24, %v7111_v29  ;;  %v6415_v62 = vmax.f32 %v6383_v51, 0.0  ;;  %v13117_v31 = vcombine.low %v6644_v52, %v6645_v33  ;;  %v7126_v58 = vshll.u32 %v13115_v30, 16  ;;  %v20900_v30 = vld [vmem:[#allocation33_spill] sm:$0xff]  ;;  %v20901_v51 = vld [vmem:[#allocation34_spill] sm:$0xff] }
 0x2c7   : > { %14324 = vmatmul.mubr.msk.bf16.gmra.mxu0 %vm6736_vm7, %v7112_v10  ;;  %v7121_v60 = vsel %vm2052_vm14, %v7111_v29, %v7120_v36  ;;  %14301 = vmatprep.mubr.msk.bf16.mxu1 %vm6736_vm7, %v13085_v13  ;;  %v13118_v22 = vcombine.low %v6646_v56, %v6647_v19  ;;  %v7125_v11 = vrot.slane %v7123_v12, 3  ;;  %v7132_v53 = vshrl.u32 %v13116_v42, 16  ;;  %v6615_v54 = vld [vmem:[#allocation3 + $0x74] sm:$0xf] }
 0x2c8   : > { %v13560_v61 = vpack.c.bf16 %v6415_v62, %v6415_v62  ;;  %14327 = vmatprep.mubr.msk.bf16.mxu0 %vm6736_vm7, %v7121_v60  ;;  %v7128_v45 = vrot.slane %v7126_v58, 4  ;;  %v7135_v24 = vshll.u32 %v13116_v42, 16  ;;  %v13086_v27 = vcombine.low %v6614_v1, %v6615_v54  ;;  %v20902_v10 = vld [vmem:[#allocation35_spill] sm:$0xff]  ;;  %v20903_v62 = vld [vmem:[#allocation37_spill] sm:$0xff] }
 0x2c9   : > { %v7134_v48 = vrot.slane %v7132_v53, 3  ;;  %v6648_v52 = vmul.bf16 %v6615_v54, %v20900_v30  ;;  %v6649_v33 = vmul.bf16 %v6616_v40, %v20901_v51  ;;  %v6650_v35 = vmul.bf16 %v6617_v49, %v20902_v10  ;;  %v7400_v1 = vld [vmem:[#allocation3 + $0x14] sm:$0xf]  ;;  %v17679_v30 = vld [vmem:[#allocation3 + $0x10] sm:$0xf] }
 0x2ca   : > { %6584 = vst.msk [vmem:[#allocation3 + $0x84] sm:$0xf] %vm6418_vm2, %v13560_v61  ;;  %v7129_v29 = vor.u32 %v7128_v45, %v7125_v11  ;;  %v7137_v56 = vrot.slane %v7135_v24, 4  ;;  %v6618_v19 = vld [vmem:[#allocation3 + $0x80] sm:$0xf]  ;;  %v13087_v13 = vcombine.low %v6616_v40, %v6617_v49  ;;  %v7141_v12 = vshrl.u32 %v13117_v31, 16 }
 0x2cb   : > { %v6651_v55 = vmul.bf16 %v6618_v19, %v20903_v62  ;;  %v13119_v60 = vcombine.low %v6648_v52, %v6649_v33  ;;  %v7144_v58 = vshll.u32 %v13117_v31, 16  ;;  %v7150_v42 = vshrl.u32 %v13118_v22, 16  ;;  %v7402_v49 = vld [vmem:[#allocation3 + $0x1c] sm:$0xf]  ;;  %v20904_v33 = vld [vmem:[#allocation41_spill] sm:$0xff] }
 0x2cc   : > { %v7130_v53 = vsel %vm2052_vm14, %v7120_v36, %v7129_v29  ;;  %v7138_v54 = vor.u32 %v7137_v56, %v7134_v48  ;;  %14302 = vmatmul.mubr.msk.bf16.gmra.mxu1 %vm6736_vm7, %v13086_v27  ;;  %v7143_v51 = vrot.slane %v7141_v12, 3  ;;  %v7153_v10 = vshll.u32 %v13118_v22, 16  ;;  %v17681_v36 = vld [vmem:[#allocation3 + $0x18] sm:$0xf] }
 0x2cd   : > { %14305 = vmatprep.mubr.msk.bf16.mxu1 %vm6736_vm7, %v13087_v13  ;;  %v13120_v11 = vcombine.low %v6650_v35, %v6651_v55  ;;  %v7146_v61 = vrot.slane %v7144_v58, 4  ;;  %v7152_v45 = vrot.slane %v7150_v42, 3  ;;  %v7159_v40 = vshrl.u32 %v13119_v60, 16  ;;  %20905 = vst [vmem:[#allocation121_spill] sm:$0xff] %v17681_v36  ;;  %v20907_v13 = vld [vmem:[#allocation43_spill] sm:$0xff] }
 0x2ce   : > { %v7139_v24 = vsel %vm2052_vm14, %v7129_v29, %v7138_v54  ;;  %v7155_v52 = vrot.slane %v7153_v10, 4  ;;  %v7162_v31 = vshll.u32 %v13119_v60, 16  ;;  %v7433_v62 = vmul.bf16 %v7400_v1, %v20904_v33  ;;  %v7403_v60 = vld [vmem:[#allocation3 + $0x20] sm:$0xf]  ;;  %v7404_v33 = vld [vmem:[#allocation3 + $0x24] sm:$0xf] }
 0x2cf   : > { %14328 = vmatmul.mubr.msk.bf16.gmra.mxu0 %vm6736_vm7, %v7130_v53  ;;  %v7147_v22 = vor.u32 %v7146_v61, %v7143_v51  ;;  %v7161_v27 = vrot.slane %v7159_v40, 3  ;;  %v7168_v48 = vshrl.u32 %v13120_v11, 16  ;;  %v7171_v55 = vshll.u32 %v13120_v11, 16  ;;  %v20908_v53 = vld [vmem:[#allocation6_spill] sm:$0xff] }
 0x2d0   : > { %14331 = vmatprep.mubr.msk.bf16.mxu0 %vm6736_vm7, %v7139_v24  ;;  %v7156_v35 = vor.u32 %v7155_v52, %v7152_v45  ;;  %v7164_v56 = vrot.slane %v7162_v31, 4  ;;  %v20906_v10 = vmul.bf16 %v17460_v23, %v20868_v16  ;;  %v7435_v12 = vmul.bf16 %v7402_v49, %v20907_v13  ;;  %v20909_v45 = vld [vmem:[#allocation36_spill] sm:$0xff] }
 0x2d1   : > { %v6619_v58 = vld [vmem:[#allocation3 + $0x84] sm:$0xf]  ;;  %v7170_v42 = vrot.slane %v7168_v48, 3  ;;  %v7173_v1 = vrot.slane %v7171_v55, 4  ;;  %v7958_v51 = vmul.bf16 %v17679_v30, %v20908_v53  ;;  %v7960_v11 = vmul.bf16 %v17681_v36, %v20867_v34  ;;  %v20911_v55 = vld [vmem:[#allocation44_spill] sm:$0xff] }
 0x2d2   : > { %v13140_v29 = vcombine.low %v20906_v10, %v7433_v62  ;;  %v7148_v61 = vsel %vm2052_vm14, %v7138_v54, %v7147_v22  ;;  %v6652_v40 = vmul.bf16 %v6619_v58, %v20909_v45  ;;  %v13088_v24 = vcombine.low %v6618_v19, %v6619_v58  ;;  %v17695_v62 = vld [vmem:[#allocation3 + $0x14] sm:$0xf]  ;;  %v20912_v36 = vld [vmem:[#allocation45_spill] sm:$0xff]  ;;  %v17707_v58 = vld [vmem:[#allocation3 + $0x1c] sm:$0xf] }
 0x2d3   : > { %v7165_v23 = vor.u32 %v7164_v56, %v7161_v27  ;;  %v7157_v49 = vsel %vm2052_vm14, %v7147_v22, %v7156_v35  ;;  %v20910_v31 = vmul.bf16 %v17449_v21, %v20869_v7  ;;  %v7436_v10 = vmul.bf16 %v7403_v60, %v20911_v55  ;;  %v17704_v19 = vld [vmem:[#allocation3 + $0x20] sm:$0xf] }
 0x2d4   : > { %v7556_v52 = vshll.u32 %v13140_v29, 16  ;;  %14306 = vmatmul.mubr.msk.bf16.gmra.mxu1 %vm6736_vm7, %v13088_v24  ;;  %v13121_v53 = vcombine.low %v6652_v40, %v6652_v40  ;;  %v7560_v34 = vshrl.u32 %v13140_v29, 16  ;;  %v7174_v54 = vor.u32 %v7173_v1, %v7170_v42  ;;  %20913 = vst [vmem:[#allocation117_spill] sm:$0xff] %v17704_v19 }
 0x2d5   : > { %v13141_v48 = vcombine.low %v20910_v31, %v7435_v12  ;;  %v7437_v13 = vmul.bf16 %v7404_v33, %v20912_v36  ;;  %v7166_v27 = vsel %vm2052_vm14, %v7156_v35, %v7165_v23  ;;  %v7959_v21 = vmul.bf16 %v17695_v62, %v20871_v39  ;;  %v7408_v39 = vld [vmem:[#allocation3 + $0x34] sm:$0xf] }
 0x2d6   : > { %v7558_v56 = vrot.slane %v7556_v52, 1  ;;  %v7177_v12 = vshrl.u32 %v13121_v53, 16  ;;  %v7180_v60 = vshll.u32 %v13121_v53, 16  ;;  %v7962_v35 = vmul.bf16 %v17704_v19, %v20866_v25 }
 0x2d7   : > { %v7564_v22 = vshll.u32 %v13141_v48, 16  ;;  %v13142_v31 = vcombine.low %v7436_v10, %v7437_v13  ;;  %v7568_v24 = vshrl.u32 %v13141_v48, 16  ;;  %14332 = vmatmul.mubr.msk.bf16.gmra.mxu0 %vm6736_vm7, %v7148_v61  ;;  %v7961_v13 = vmul.bf16 %v17707_v58, %v20874_v17 }
 0x2d8   : > { %v7559_v33 = vsel %vm3131_vm6, %v17305_v63, %v7558_v56  ;;  %v7562_v29 = vor.u32 %v7560_v34, %v7558_v56  ;;  %14335 = vmatprep.mubr.msk.bf16.mxu0 %vm6736_vm7, %v7157_v49  ;;  %v7179_v1 = vrot.slane %v7177_v12, 3  ;;  %v7182_v40 = vrot.slane %v7180_v60, 4  ;;  %v20914_v63 = vld [vmem:[#allocation5_spill] sm:$0xff]  ;;  %v7405_v56 = vld [vmem:[#allocation3 + $0x28] sm:$0xf] }
 0x2d9   : > { %v7566_v42 = vrot.slane %v7564_v22, 1  ;;  %14345 = vmatprep.mubr.msk.bf16.mxu1 %vm6736_vm7, %v7559_v33  ;;  %v7572_v52 = vshll.u32 %v13142_v31, 16  ;;  %v7175_v53 = vsel %vm2052_vm14, %v7165_v23, %v7174_v54  ;;  %v20915_v34 = vmul.bf16 %v17261_v28, %v20914_v63  ;;  %v7406_v22 = vld [vmem:[#allocation3 + $0x2c] sm:$0xf]  ;;  %v7407_v60 = vld [vmem:[#allocation3 + $0x30] sm:$0xf] }
 0x2da   : > { %v13174_v10 = vcombine.low %v7959_v21, %v7960_v11  ;;  %v7183_v49 = vor.u32 %v7182_v40, %v7179_v1  ;;  %v13175_v12 = vcombine.low %v7961_v13, %v7962_v35  ;;  %v17728_v23 = vld [vmem:[%s20178_s4 + $0x18] sm:$0xf]  ;;  %v7576_v11 = vshrl.u32 %v13142_v31, 16  ;;  %v20916_v21 = vld [vmem:[#allocation46_spill] sm:$0xff]  ;;  %v20917_v13 = vld [vmem:[#allocation47_spill] sm:$0xff] }
 0x2db   : > { %v7567_v61 = vsel %vm3131_vm6, %v7562_v29, %v7566_v42  ;;  %v13173_v48 = vcombine.low %v20915_v34, %v7958_v51  ;;  %v7570_v25 = vor.u32 %v7568_v24, %v7566_v42  ;;  %v7574_v33 = vrot.slane %v7572_v52, 1  ;;  %v17734_v29 = vld [vmem:[#allocation3 + $0x24] sm:$0xf]  ;;  %v17738_v52 = vld [vmem:[#allocation3 + $0x28] sm:$0xf] }
 0x2dc   : > { %v8084_v17 = vshrl.u32 %v13174_v10, 16  ;;  %v8087_v19 = vshll.u32 %v13174_v10, 16  ;;  %14346 = vmatmul.mubr.msk.bf16.vlgmr.msra.gmra.mxu1 %vm6736_vm7, %v7567_v61  ;;  %v7184_v28 = vsel %vm2052_vm14, %v7174_v54, %v7183_v49  ;;  %v7438_v24 = vmul.bf16 %v7405_v56, %v20916_v21  ;;  %v20918_v54 = vld [vmem:[#allocation48_spill] sm:$0xff]  ;;  %v20920_v63 = vld [vmem:[#allocation50_spill] sm:$0xff]  ;;  %v17758_v21 = vld [vmem:[#allocation3 + $0x30] sm:$0xf] }
 0x2dd   : > { %v8076_v55 = vshrl.u32 %v13173_v48, 16  ;;  %v8079_v36 = vshll.u32 %v13173_v48, 16  ;;  %v7575_v51 = vsel %vm3131_vm6, %v7570_v25, %v7574_v33  ;;  %14412 = vmatpush3.bf16.msra.mxu1 %v17354_v59  ;;  %v7439_v61 = vmul.bf16 %v7406_v22, %v20917_v13  ;;  %v20919_v25 = vld [vmem:[#allocation49_spill] sm:$0xff]  ;;  %v7409_v10 = vld [vmem:[#allocation3 + $0x38] sm:$0xf] }
 0x2de   : > { %14349 = vmatprep.mubr.msk.bf16.mxu1 %vm6736_vm7, %v7575_v51  ;;  %v8086_v1 = vrot.slane %v8084_v17, 3  ;;  %v8089_v40 = vrot.slane %v8087_v19, 4  ;;  %v7440_v34 = vmul.bf16 %v7407_v60, %v20918_v54  ;;  %v7441_v31 = vmul.bf16 %v7408_v39, %v20919_v25  ;;  %v7410_v56 = vld [vmem:[#allocation3 + $0x3c] sm:$0xf]  ;;  %14732 = vmatprep.subr.msk.bf16.mxu1 %vm6785_vm0, %v17728_v23  ;;  %v20921_v25 = vld [vmem:[#allocation51_spill] sm:$0xff] }
 0x2df   : > { %v8078_v42 = vrot.slane %v8076_v55, 3  ;;  %v8081_v35 = vrot.slane %v8079_v36, 4  ;;  %v8093_v48 = vshrl.u32 %v13175_v12, 16  ;;  %14336 = vmatmul.mubr.msk.bf16.gmra.mxu0 %vm6736_vm7, %v7166_v27  ;;  %v7578_v59 = vor.u32 %v7576_v11, %v7574_v33  ;;  %v7411_v33 = vld [vmem:[#allocation3 + $0x40] sm:$0xf] }
 0x2e0   : > { %v8090_v36 = vor.u32 %v8089_v40, %v8086_v1  ;;  %v8096_v17 = vshll.u32 %v13175_v12, 16  ;;  %v7963_v55 = vmul.bf16 %v17734_v29, %v20873_v26  ;;  %14339 = vmatprep.mubr.msk.bf16.mxu0 %vm6736_vm7, %v7175_v53  ;;  %v13143_v22 = vcombine.low %v7438_v24, %v7439_v61  ;;  %v7412_v11 = vld [vmem:[#allocation3 + $0x44] sm:$0xf]  ;;  %v17754_v53 = vld [vmem:[#allocation3 + $0x2c] sm:$0xf] }
 0x2e1   : > { %v8082_v19 = vor.u32 %v8081_v35, %v8078_v42  ;;  %v13144_v49 = vcombine.low %v7440_v34, %v7441_v31  ;;  %v8095_v39 = vrot.slane %v8093_v48, 3  ;;  %v7964_v51 = vmul.bf16 %v17738_v52, %v20876_v32  ;;  %v20922_v48 = vld [vmem:[#allocation52_spill] sm:$0xff] }
 0x2e2   : > { %v8098_v60 = vrot.slane %v8096_v17, 4  ;;  %v7442_v54 = vmul.bf16 %v7409_v10, %v20920_v63  ;;  %v7443_v27 = vmul.bf16 %v7410_v56, %v20921_v25  ;;  %v7580_v1 = vshll.u32 %v13143_v22, 16  ;;  %v20923_v10 = vld [vmem:[#allocation53_spill] sm:$0xff] }
 0x2e3   : > { %v8091_v12 = vsel %vm2052_vm14, %v8082_v19, %v8090_v36  ;;  %v7584_v40 = vshrl.u32 %v13143_v22, 16  ;;  %v7588_v26 = vshll.u32 %v13144_v49, 16  ;;  %v7592_v24 = vshrl.u32 %v13144_v49, 16 }
 0x2e4   : > { %v8099_v42 = vor.u32 %v8098_v60, %v8095_v39  ;;  %v13176_v35 = vcombine.low %v7963_v55, %v7964_v51  ;;  %v13145_v61 = vcombine.low %v7442_v54, %v7443_v27  ;;  %v7582_v34 = vrot.slane %v7580_v1, 1  ;;  %v17763_v54 = vld [vmem:[#allocation3 + $0x34] sm:$0xf]  ;;  %v7413_v60 = vld [vmem:[#allocation3 + $0x48] sm:$0xf] }
 0x2e5   : > { %v7590_v31 = vrot.slane %v7588_v26, 1  ;;  %v7444_v17 = vmul.bf16 %v7411_v33, %v20922_v48  ;;  %v7445_v32 = vmul.bf16 %v7412_v11, %v20923_v10  ;;  %v7965_v19 = vmul.bf16 %v17754_v53, %v20877_v47  ;;  %v17765_v26 = vld [vmem:[#allocation3 + $0x38] sm:$0xf]  ;;  %v7414_v1 = vld [vmem:[#allocation3 + $0x4c] sm:$0xf]  ;;  %v20926_v47 = vld [vmem:[#allocation57_spill] sm:$0xff] }
 0x2e6   : > { %v8102_v56 = vshrl.u32 %v13176_v35, 16  ;;  %v8105_v63 = vshll.u32 %v13176_v35, 16  ;;  %v7596_v25 = vshll.u32 %v13145_v61, 16  ;;  %v7583_v22 = vsel %vm3131_vm6, %v7578_v59, %v7582_v34  ;;  %v7415_v35 = vld [vmem:[#allocation3 + $0x50] sm:$0xf] }
 0x2e7   : > { %v7586_v49 = vor.u32 %v7584_v40, %v7582_v34  ;;  %v7594_v39 = vor.u32 %v7592_v24, %v7590_v31  ;;  %v13146_v55 = vcombine.low %v7444_v17, %v7445_v32  ;;  %14340 = vmatmul.mubr.msk.bf16.gmra.mxu0 %vm6736_vm7, %v7184_v28  ;;  %14350 = vmatmul.mubr.msk.bf16.gmra.mxu1 %vm6736_vm7, %v7583_v22  ;;  %v7600_v32 = vshrl.u32 %v13145_v61, 16  ;;  %v7416_v34 = vld [vmem:[#allocation3 + $0x54] sm:$0xf] }
 0x2e8   : > { %v8100_v51 = vsel %vm2052_vm14, %v8090_v36, %v8099_v42  ;;  %v8104_v27 = vrot.slane %v8102_v56, 3  ;;  %v8107_v33 = vrot.slane %v8105_v63, 4  ;;  %v7598_v11 = vrot.slane %v7596_v25, 1  ;;  %14379 = vmatprep.mubr.msk.bf16.mxu0 %vm6736_vm7, %v8091_v12 }
 0x2e9   : > { %v7591_v59 = vsel %vm3131_vm6, %v7586_v49, %v7590_v31  ;;  %v7604_v40 = vshll.u32 %v13146_v55, 16  ;;  %v7966_v24 = vmul.bf16 %v17758_v21, %v20878_v6  ;;  %v7608_v17 = vshrl.u32 %v13146_v55, 16  ;;  %v20924_v31 = vld [vmem:[#allocation54_spill] sm:$0xff]  ;;  %v20925_v49 = vld [vmem:[#allocation55_spill] sm:$0xff] }
 0x2ea   : > { %14353 = vmatprep.mubr.msk.bf16.mxu1 %vm6736_vm7, %v7591_v59  ;;  %v8108_v28 = vor.u32 %v8107_v33, %v8104_v27  ;;  %v7599_v36 = vsel %vm3131_vm6, %v7594_v39, %v7598_v11  ;;  %v7967_v63 = vmul.bf16 %v17763_v54, %v20882_v15  ;;  %v7602_v25 = vor.u32 %v7600_v32, %v7598_v11  ;;  %v20927_v59 = vld [vmem:[#allocation58_spill] sm:$0xff]  ;;  %v17784_v33 = vld [vmem:[#allocation3 + $0x3c] sm:$0xf]  ;;  %v17786_v39 = vld [vmem:[#allocation3 + $0x40] sm:$0xf] }
 0x2eb   : > { %v7606_v12 = vrot.slane %v7604_v40, 1  ;;  %v13177_v56 = vcombine.low %v7965_v19, %v7966_v24  ;;  %v7968_v61 = vmul.bf16 %v17765_v26, %v20883_v43  ;;  %v7446_v22 = vmul.bf16 %v7413_v60, %v20924_v31  ;;  %v17790_v40 = vld [vmem:[#allocation3 + $0x44] sm:$0xf] }
 0x2ec   : > { %v7447_v6 = vmul.bf16 %v7414_v1, %v20925_v49  ;;  %v7448_v48 = vmul.bf16 %v7415_v35, %v20926_v47  ;;  %v7449_v27 = vmul.bf16 %v7416_v34, %v20927_v59  ;;  %v8109_v55 = vsel %vm2052_vm14, %v8099_v42, %v8108_v28  ;;  %v17796_v59 = vld [vmem:[#allocation3 + $0x48] sm:$0xf] }
 0x2ed   : > { %v7607_v11 = vsel %vm3131_vm6, %v7602_v25, %v7606_v12  ;;  %v8111_v19 = vshrl.u32 %v13177_v56, 16  ;;  %v8114_v32 = vshll.u32 %v13177_v56, 16  ;;  %v7610_v24 = vor.u32 %v7608_v17, %v7606_v12 }
 0x2ee   : > { %v13178_v60 = vcombine.low %v7967_v63, %v7968_v61  ;;  %v13147_v15 = vcombine.low %v7446_v22, %v7447_v6  ;;  %v13148_v1 = vcombine.low %v7448_v48, %v7449_v27  ;;  %v7969_v34 = vmul.bf16 %v17784_v33, %v20884_v20 }
 0x2ef   : > { %v8113_v43 = vrot.slane %v8111_v19, 3  ;;  %v8116_v35 = vrot.slane %v8114_v32, 4  ;;  %v7970_v47 = vmul.bf16 %v17786_v39, %v20885_v46  ;;  %14380 = vmatmul.mubr.msk.bf16.vlgmr.msra.gmra.mxu0 %vm6736_vm7, %v8100_v51  ;;  %14354 = vmatmul.mubr.msk.bf16.gmra.mxu1 %vm6736_vm7, %v7599_v36  ;;  %v7971_v6 = vmul.bf16 %v17790_v40, %v20886_v0  ;;  %v7417_v36 = vld [vmem:[#allocation3 + $0x58] sm:$0xf] }
 0x2f0   : > { %v8120_v42 = vshrl.u32 %v13178_v60, 16  ;;  %v8123_v25 = vshll.u32 %v13178_v60, 16  ;;  %v7612_v17 = vshll.u32 %v13147_v15, 16  ;;  %14383 = vmatprep.mubr.msk.bf16.mxu0 %vm6736_vm7, %v8109_v55  ;;  %14357 = vmatprep.mubr.msk.bf16.mxu1 %vm6736_vm7, %v7607_v11  ;;  %v7616_v63 = vshrl.u32 %v13147_v15, 16  ;;  %v7419_v15 = vld [vmem:[#allocation3 + $0x60] sm:$0xf] }
 0x2f1   : > { %v8117_v48 = vor.u32 %v8116_v35, %v8113_v43  ;;  %v7620_v12 = vshll.u32 %v13148_v1, 16  ;;  %v13179_v56 = vcombine.low %v7969_v34, %v7970_v47  ;;  %v7972_v51 = vmul.bf16 %v17796_v59, %v20887_v14  ;;  %v7418_v43 = vld [vmem:[#allocation3 + $0x5c] sm:$0xf]  ;;  %v7420_v35 = vld [vmem:[#allocation3 + $0x64] sm:$0xf] }
 0x2f2   : > { %v8122_v61 = vrot.slane %v8120_v42, 3  ;;  %v8125_v22 = vrot.slane %v8123_v25, 4  ;;  %v7614_v27 = vrot.slane %v7612_v17, 1  ;;  %v7624_v32 = vshrl.u32 %v13148_v1, 16  ;;  %v20928_v25 = vld [vmem:[#allocation59_spill] sm:$0xff] }
 0x2f3   : > { %v7622_v19 = vrot.slane %v7620_v12, 1  ;;  %v8129_v60 = vshrl.u32 %v13179_v56, 16  ;;  %v8132_v46 = vshll.u32 %v13179_v56, 16  ;;  %v8118_v0 = vsel %vm2052_vm14, %v8108_v28, %v8117_v48  ;;  %v17809_v14 = vld [vmem:[#allocation3 + $0x4c] sm:$0xf] }
 0x2f4   : > { %v8126_v55 = vor.u32 %v8125_v22, %v8122_v61  ;;  %v7618_v20 = vor.u32 %v7616_v63, %v7614_v27  ;;  %v13180_v11 = vcombine.low %v7971_v6, %v7972_v51  ;;  %v7615_v47 = vsel %vm3131_vm6, %v7610_v24, %v7614_v27  ;;  %v17811_v12 = vld [vmem:[#allocation3 + $0x50] sm:$0xf]  ;;  %v20929_v61 = vld [vmem:[#allocation60_spill] sm:$0xff]  ;;  %v20931_v24 = vld [vmem:[#allocation65_spill] sm:$0xff] }
 0x2f5   : > { %v8131_v34 = vrot.slane %v8129_v60, 3  ;;  %v8134_v42 = vrot.slane %v8132_v46, 4  ;;  %v7450_v17 = vmul.bf16 %v7417_v36, %v20928_v25  ;;  %v7451_v22 = vmul.bf16 %v7418_v43, %v20929_v61  ;;  %v20930_v51 = vld [vmem:[#allocation64_spill] sm:$0xff]  ;;  %v17818_v46 = vld [vmem:[#allocation3 + $0x54] sm:$0xf] }
 0x2f6   : > { %v8127_v1 = vsel %vm2052_vm14, %v8117_v48, %v8126_v55  ;;  %v7623_v28 = vsel %vm3131_vm6, %v7618_v20, %v7622_v19  ;;  %v8138_v56 = vshrl.u32 %v13180_v11, 16  ;;  %v8141_v63 = vshll.u32 %v13180_v11, 16  ;;  %v17820_v36 = vld [vmem:[#allocation3 + $0x58] sm:$0xf]  ;;  %v17831_v43 = vld [vmem:[%s20178_s4 + $0x1c] sm:$0xf] }
 0x2f7   : > { %v8135_v6 = vor.u32 %v8134_v42, %v8131_v34  ;;  %v7452_v31 = vmul.bf16 %v7419_v15, %v20930_v51  ;;  %v7453_v27 = vmul.bf16 %v7420_v35, %v20931_v24  ;;  %20932 = vst [vmem:[#allocation128_spill] sm:$0xff] %v17820_v36  ;;  %14384 = vmatmul.mubr.msk.bf16.gmra.mxu0 %vm6736_vm7, %v8118_v0  ;;  %v7423_v51 = vld [vmem:[#allocation3 + $0x70] sm:$0xf] }
 0x2f8   : > { %14358 = vmatmul.mubr.msk.bf16.gmra.mxu1 %vm6736_vm7, %v7615_v47  ;;  %v8140_v48 = vrot.slane %v8138_v56, 3  ;;  %v8143_v60 = vrot.slane %v8141_v63, 4  ;;  %v7973_v20 = vmul.bf16 %v17809_v14, %v20888_v37  ;;  %v7974_v11 = vmul.bf16 %v17811_v12, %v20889_v18  ;;  %14387 = vmatprep.mubr.msk.bf16.mxu0 %vm6736_vm7, %v8127_v1  ;;  %v7421_v18 = vld [vmem:[#allocation3 + $0x68] sm:$0xf]  ;;  %v7422_v37 = vld [vmem:[#allocation3 + $0x6c] sm:$0xf] }
 0x2f9   : > { %v7626_v15 = vor.u32 %v7624_v32, %v7622_v19  ;;  %14361 = vmatprep.mubr.msk.bf16.mxu1 %vm6736_vm7, %v7623_v28  ;;  %v13149_v0 = vcombine.low %v7450_v17, %v7451_v22  ;;  %v13150_v35 = vcombine.low %v7452_v31, %v7453_v27  ;;  %v9129_v47 = vsel %vm6785_vm0, %v17541_v9, 0 }
 0x2fa   : > { %v8136_v34 = vsel %vm2052_vm14, %v8126_v55, %v8135_v6  ;;  %v13181_v42 = vcombine.low %v7973_v20, %v7974_v11  ;;  %v7975_v56 = vmul.bf16 %v17818_v46, %v20890_v41  ;;  %v7976_v63 = vmul.bf16 %v17820_v36, %v20891_v44  ;;  %14446 = vmatpush3.bf16.msra.mxu0 %v9129_v47  ;;  %v20933_v20 = vld [vmem:[#allocation66_spill] sm:$0xff]  ;;  %v20934_v41 = vld [vmem:[#allocation68_spill] sm:$0xff] }
 0x2fb   : > { %v8144_v19 = vor.u32 %v8143_v60, %v8140_v48  ;;  %v7628_v32 = vshll.u32 %v13149_v0, 16  ;;  %v7632_v1 = vshrl.u32 %v13149_v0, 16  ;;  %v7636_v17 = vshll.u32 %v13150_v35, 16  ;;  %14733 = vmatprep.subr.msk.bf16.mxu0 %vm6785_vm0, %v17831_v43  ;;  %v7424_v0 = vld [vmem:[#allocation3 + $0x74] sm:$0xf] }
 0x2fc   : > { %v7640_v9 = vshrl.u32 %v13150_v35, 16  ;;  %v8147_v31 = vshrl.u32 %v13181_v42, 16  ;;  %v8150_v55 = vshll.u32 %v13181_v42, 16  ;;  %v13182_v28 = vcombine.low %v7975_v56, %v7976_v63  ;;  %v17848_v42 = vld [vmem:[#allocation3 + $0x5c] sm:$0xf] }
 0x2fd   : > { %v7630_v22 = vrot.slane %v7628_v32, 1  ;;  %v7638_v27 = vrot.slane %v7636_v17, 1  ;;  %v7454_v11 = vmul.bf16 %v7421_v18, %v20933_v20  ;;  %v7455_v44 = vmul.bf16 %v7422_v37, %v20934_v41  ;;  %v17850_v56 = vld [vmem:[#allocation3 + $0x60] sm:$0xf]  ;;  %v17854_v17 = vld [vmem:[#allocation3 + $0x64] sm:$0xf] }
 0x2fe   : > { %v8149_v24 = vrot.slane %v8147_v31, 3  ;;  %v8152_v47 = vrot.slane %v8150_v55, 4  ;;  %v8156_v48 = vshrl.u32 %v13182_v28, 16  ;;  %v8159_v60 = vshll.u32 %v13182_v28, 16  ;;  %v17856_v31 = vld [vmem:[#allocation3 + $0x68] sm:$0xf] }
 0x2ff   : > { %v8145_v25 = vsel %vm2052_vm14, %v8135_v6, %v8144_v19  ;;  %v7631_v36 = vsel %vm3131_vm6, %v7626_v15, %v7630_v22  ;;  %v7634_v35 = vor.u32 %v7632_v1, %v7630_v22  ;;  %v13151_v61 = vcombine.low %v7454_v11, %v7455_v44  ;;  %14388 = vmatmul.mubr.msk.bf16.gmra.mxu0 %vm6736_vm7, %v8136_v34  ;;  %v20935_v15 = vld [vmem:[#allocation73_spill] sm:$0xff]  ;;  %v20936_v55 = vld [vmem:[#allocation74_spill] sm:$0xff]  ;;  %v7425_v34 = vld [vmem:[#allocation3 + $0x78] sm:$0xf] }
 0x300   : > { %14362 = vmatmul.mubr.msk.bf16.gmra.mxu1 %vm6736_vm7, %v7631_v36  ;;  %v7642_v37 = vor.u32 %v7640_v9, %v7638_v27  ;;  %v8153_v18 = vor.u32 %v8152_v47, %v8149_v24  ;;  %v8158_v63 = vrot.slane %v8156_v48, 3  ;;  %v8161_v32 = vrot.slane %v8159_v60, 4  ;;  %14391 = vmatprep.mubr.msk.bf16.mxu0 %vm6736_vm7, %v8145_v25  ;;  %v7426_v22 = vld [vmem:[#allocation3 + $0x7c] sm:$0xf] }
 0x301   : > { %v7639_v44 = vsel %vm3131_vm6, %v7634_v35, %v7638_v27  ;;  %v7644_v6 = vshll.u32 %v13151_v61, 16  ;;  %v7456_v1 = vmul.bf16 %v7423_v51, %v20935_v15  ;;  %v7457_v28 = vmul.bf16 %v7424_v0, %v20936_v55  ;;  %v20937_v0 = vld [vmem:[#allocation76_spill] sm:$0xff] }
 0x302   : > { %14365 = vmatprep.mubr.msk.bf16.mxu1 %vm6736_vm7, %v7639_v44  ;;  %v8162_v24 = vor.u32 %v8161_v32, %v8158_v63  ;;  %v7648_v36 = vshrl.u32 %v13151_v61, 16  ;;  %v7977_v9 = vmul.bf16 %v17848_v42, %v20892_v8  ;;  %v7978_v11 = vmul.bf16 %v17850_v56, %v20893_v38  ;;  %v20938_v61 = vld [vmem:[#allocation78_spill] sm:$0xff]  ;;  %v7427_v32 = vld [vmem:[#allocation3 + $0x80] sm:$0xf]  ;;  %v7428_v44 = vld [vmem:[#allocation3 + $0x84] sm:$0xf] }
 0x303   : > { %v8154_v25 = vsel %vm2052_vm14, %v8144_v19, %v8153_v18  ;;  %v7646_v27 = vrot.slane %v7644_v6, 1  ;;  %v13152_v47 = vcombine.low %v7456_v1, %v7457_v28  ;;  %v7979_v51 = vmul.bf16 %v17854_v17, %v20894_v5  ;;  %v20939_v55 = vld [vmem:[#allocation88_spill] sm:$0xff] }
 0x304   : > { %v13183_v48 = vcombine.low %v7977_v9, %v7978_v11  ;;  %v7980_v60 = vmul.bf16 %v17856_v31, %v20895_v50  ;;  %v7458_v35 = vmul.bf16 %v7425_v34, %v20937_v0  ;;  %v7459_v63 = vmul.bf16 %v7426_v22, %v20938_v61  ;;  %v17876_v9 = vld [vmem:[#allocation3 + $0x6c] sm:$0xf]  ;;  %v20940_v0 = vld [vmem:[#allocation89_spill] sm:$0xff]  ;;  %v17882_v61 = vld [vmem:[#allocation3 + $0x70] sm:$0xf] }
 0x305   : > { %v8163_v8 = vsel %vm2052_vm14, %v8153_v18, %v8162_v24  ;;  %v7647_v38 = vsel %vm3131_vm6, %v7642_v37, %v7646_v27  ;;  %v7650_v19 = vor.u32 %v7648_v36, %v7646_v27  ;;  %v7652_v6 = vshll.u32 %v13152_v47, 16 }
 0x306   : > { %v8165_v1 = vshrl.u32 %v13183_v48, 16  ;;  %v8168_v28 = vshll.u32 %v13183_v48, 16  ;;  %v13184_v15 = vcombine.low %v7979_v51, %v7980_v60  ;;  %v13153_v5 = vcombine.low %v7458_v35, %v7459_v63  ;;  %v17888_v35 = vld [vmem:[#allocation3 + $0x74] sm:$0xf] }
 0x307   : > { %v7654_v11 = vrot.slane %v7652_v6, 1  ;;  %v7656_v50 = vshrl.u32 %v13152_v47, 16  ;;  %v7460_v34 = vmul.bf16 %v7427_v32, %v20939_v55  ;;  %v7461_v22 = vmul.bf16 %v7428_v44, %v20940_v0  ;;  %14392 = vmatmul.mubr.msk.bf16.gmra.mxu0 %vm6736_vm7, %v8154_v25  ;;  %v17890_v25 = vld [vmem:[#allocation3 + $0x78] sm:$0xf]  ;;  %v20942_v55 = vld [vmem:[#allocation33_spill] sm:$0xff] }
 0x308   : > { %14366 = vmatmul.mubr.msk.bf16.gmra.mxu1 %vm6736_vm7, %v7647_v38  ;;  %v8167_v18 = vrot.slane %v8165_v1, 3  ;;  %v8170_v37 = vrot.slane %v8168_v28, 4  ;;  %v8174_v36 = vshrl.u32 %v13184_v15, 16  ;;  %v8177_v27 = vshll.u32 %v13184_v15, 16  ;;  %14395 = vmatprep.mubr.msk.bf16.mxu0 %vm6736_vm7, %v8163_v8  ;;  %v7429_v1 = vld [vmem:[#allocation3 + $0x88] sm:$0x1] }
 0x309   : > { %v7655_v51 = vsel %vm3131_vm6, %v7650_v19, %v7654_v11  ;;  %v7660_v48 = vshll.u32 %v13153_v5, 16  ;;  %v13154_v47 = vcombine.low %v7460_v34, %v7461_v22  ;;  %v7981_v60 = vmul.bf16 %v17876_v9, %v20896_v3 }
 0x30a   : > { %v7658_v38 = vor.u32 %v7656_v50, %v7654_v11  ;;  %14369 = vmatprep.mubr.msk.bf16.mxu1 %vm6736_vm7, %v7655_v51  ;;  %v8171_v63 = vor.u32 %v8170_v37, %v8167_v18  ;;  %v8176_v15 = vrot.slane %v8174_v36, 3  ;;  %v8179_v32 = vrot.slane %v8177_v27, 4  ;;  %v17899_v11 = vld [vmem:[#allocation3 + $0x7c] sm:$0xf]  ;;  %v17902_v27 = vld [vmem:[#allocation3 + $0x80] sm:$0xf] }
 0x30b   : > { %v7662_v44 = vrot.slane %v7660_v48, 1  ;;  %v7664_v6 = vshrl.u32 %v13153_v5, 16  ;;  %v7668_v8 = vshll.u32 %v13154_v47, 16  ;;  %v7982_v19 = vmul.bf16 %v17882_v61, %v20897_v4 }
 0x30c   : > { %v8180_v28 = vor.u32 %v8179_v32, %v8176_v15  ;;  %v7672_v34 = vshrl.u32 %v13154_v47, 16  ;;  %v7983_v22 = vmul.bf16 %v17888_v35, %v20898_v57  ;;  %v7984_v50 = vmul.bf16 %v17890_v25, %v20899_v2  ;;  %v20941_v15 = vld [vmem:[#allocation85_spill] sm:$0xff] }
 0x30d   : > { %v8172_v18 = vsel %vm2052_vm14, %v8162_v24, %v8171_v63  ;;  %v7666_v37 = vor.u32 %v7664_v6, %v7662_v44  ;;  %v7670_v36 = vrot.slane %v7668_v8, 1  ;;  %v13185_v5 = vcombine.low %v7981_v60, %v7982_v19  ;;  %v17907_v57 = vld [vmem:[#allocation3 + $0x84] sm:$0xf]  ;;  %v17916_v8 = vld [vmem:[#allocation3 + $0x88] sm:$0xf] }
 0x30e   : > { %v8181_v51 = vsel %vm2052_vm14, %v8171_v63, %v8180_v28  ;;  %v7663_v48 = vsel %vm3131_vm6, %v7658_v38, %v7662_v44  ;;  %v13186_v47 = vcombine.low %v7983_v22, %v7984_v50  ;;  %v7462_v32 = vmul.bf16 %v7429_v1, %v20941_v15  ;;  %v20943_v38 = vld [vmem:[#allocation34_spill] sm:$0xff]  ;;  %v20944_v50 = vld [vmem:[#allocation35_spill] sm:$0xff] }
 0x30f   : > { %v7671_v2 = vsel %vm3131_vm6, %v7666_v37, %v7670_v36  ;;  %v8183_v4 = vshrl.u32 %v13185_v5, 16  ;;  %v8186_v3 = vshll.u32 %v13185_v5, 16  ;;  %v7985_v24 = vmul.bf16 %v17899_v11, %v20942_v55  ;;  %14396 = vmatmul.mubr.msk.bf16.gmra.mxu0 %vm6736_vm7, %v8172_v18 }
 0x310   : > { %14370 = vmatmul.mubr.msk.bf16.gmra.mxu1 %vm6736_vm7, %v7663_v48  ;;  %v8192_v60 = vshrl.u32 %v13186_v47, 16  ;;  %v8195_v63 = vshll.u32 %v13186_v47, 16  ;;  %v13155_v6 = vcombine.low %v7462_v32, %v7462_v32  ;;  %v7986_v44 = vmul.bf16 %v17902_v27, %v20943_v38  ;;  %14399 = vmatprep.mubr.msk.bf16.mxu0 %vm6736_vm7, %v8181_v51  ;;  %v17922_v32 = vld [vmem:[#allocation3 + $0x8c] sm:$0xf]  ;;  %v20945_v38 = vld [vmem:[#allocation37_spill] sm:$0xff] }
 0x311   : > { %v7674_v19 = vor.u32 %v7672_v34, %v7670_v36  ;;  %14373 = vmatprep.mubr.msk.bf16.mxu1 %vm6736_vm7, %v7671_v2  ;;  %v8185_v1 = vrot.slane %v8183_v4, 3  ;;  %v8188_v22 = vrot.slane %v8186_v3, 4  ;;  %v7987_v18 = vmul.bf16 %v17907_v57, %v20944_v50  ;;  %v8797_v4 = vld [vmem:[#allocation3 + $0x10] sm:$0xf]  ;;  %v8798_v50 = vld [vmem:[#allocation3 + $0x14] sm:$0xf] }
 0x312   : > { %v8194_v37 = vrot.slane %v8192_v60, 3  ;;  %v8197_v5 = vrot.slane %v8195_v63, 4  ;;  %v7676_v48 = vshll.u32 %v13155_v6, 16  ;;  %v13187_v47 = vcombine.low %v7985_v24, %v7986_v44 }
 0x313   : > { %v8189_v55 = vor.u32 %v8188_v22, %v8185_v1  ;;  %v7988_v15 = vmul.bf16 %v17916_v8, %v20945_v38  ;;  %v7989_v3 = vmul.bf16 %v17922_v32, %v20909_v45  ;;  %v13207_v63 = vcombine.low %v17679_v30, %v17695_v62 }
 0x314   : > { %v8198_v0 = vor.u32 %v8197_v5, %v8194_v37  ;;  %v7678_v51 = vrot.slane %v7676_v48, 1  ;;  %v8201_v34 = vshrl.u32 %v13187_v47, 16  ;;  %v8204_v36 = vshll.u32 %v13187_v47, 16  ;;  %v8800_v37 = vld [vmem:[#allocation3 + $0x1c] sm:$0xf]  ;;  %v20947_v48 = vld [vmem:[#allocation39_spill] sm:$0xff] }
 0x315   : > { %v13188_v2 = vcombine.low %v7987_v18, %v7988_v15  ;;  %v8190_v60 = vsel %vm2052_vm14, %v8180_v28, %v8189_v55  ;;  %v20946_v18 = vld [vmem:[#allocation38_spill] sm:$0xff]  ;;  %v8831_v28 = vmul.bf16 %v8798_v50, %v20947_v48  ;;  %v8799_v47 = vld [vmem:[#allocation3 + $0x18] sm:$0xf]  ;;  %v20949_v48 = vld [vmem:[#allocation43_spill] sm:$0xff] }
 0x316   : > { %v7679_v24 = vsel %vm3131_vm6, %v7674_v19, %v7678_v51  ;;  %v8203_v6 = vrot.slane %v8201_v34, 3  ;;  %v8206_v44 = vrot.slane %v8204_v36, 4  ;;  %v8199_v15 = vsel %vm2052_vm14, %v8189_v55, %v8198_v0  ;;  %v20948_v51 = vld [vmem:[#allocation41_spill] sm:$0xff] }
 0x317   : > { %v8210_v1 = vshrl.u32 %v13188_v2, 16  ;;  %v8213_v22 = vshll.u32 %v13188_v2, 16  ;;  %14400 = vmatmul.mubr.msk.bf16.gmra.mxu0 %vm6736_vm7, %v8190_v60  ;;  %v8830_v5 = vmul.bf16 %v8797_v4, %v20946_v18  ;;  %v13189_v19 = vcombine.low %v7989_v3, %v7989_v3  ;;  %v8802_v2 = vld [vmem:[#allocation3 + $0x24] sm:$0xf]  ;;  %v8801_v55 = vld [vmem:[#allocation3 + $0x20] sm:$0xf] }
 0x318   : > { %14374 = vmatmul.mubr.msk.bf16.gmra.mxu1 %vm6736_vm7, %v7679_v24  ;;  %14403 = vmatprep.mubr.msk.bf16.mxu0 %vm6736_vm7, %v8199_v15  ;;  %v8833_v34 = vmul.bf16 %v8800_v37, %v20948_v51  ;;  %v8207_v60 = vor.u32 %v8206_v44, %v8203_v6  ;;  %v8832_v24 = vmul.bf16 %v8799_v47, %v20868_v16  ;;  %v9676_v3 = vsel %vm6785_vm0, %v17728_v23, 0  ;;  %v8804_v44 = vld [vmem:[#allocation3 + $0x2c] sm:$0xf]  ;;  %v8803_v47 = vld [vmem:[#allocation3 + $0x28] sm:$0xf] }
 0x319   : > { %14413 = vmatprep.mubr.msk.bf16.mxu1 %vm6736_vm7, %v13207_v63  ;;  %v8212_v30 = vrot.slane %v8210_v1, 3  ;;  %v8215_v62 = vrot.slane %v8213_v22, 4  ;;  %v13240_v36 = vcombine.low %v8830_v5, %v8831_v28  ;;  %v8219_v18 = vshrl.u32 %v13189_v19, 16  ;;  %v20950_v63 = vld [vmem:[#allocation121_spill] sm:$0xff] }
 0x31a   : > { %v8222_v50 = vshll.u32 %v13189_v19, 16  ;;  %v8835_v15 = vmul.bf16 %v8802_v2, %v20949_v48  ;;  %v13208_v1 = vcombine.low %v20950_v63, %v17707_v58  ;;  %v13241_v22 = vcombine.low %v8832_v24, %v8833_v34  ;;  %v17951_v5 = vld [vmem:[%s20178_s4 + $0x20] sm:$0xf]  ;;  %v8806_v34 = vld [vmem:[#allocation3 + $0x34] sm:$0xf] }
 0x31b   : > { %v8216_v45 = vor.u32 %v8215_v62, %v8212_v30  ;;  %v8951_v4 = vshll.u32 %v13240_v36, 16  ;;  %v8834_v37 = vmul.bf16 %v8801_v55, %v20869_v7  ;;  %v8208_v6 = vsel %vm2052_vm14, %v8198_v0, %v8207_v60  ;;  %v20951_v58 = vld [vmem:[#allocation117_spill] sm:$0xff]  ;;  %v8805_v63 = vld [vmem:[#allocation3 + $0x30] sm:$0xf] }
 0x31c   : > { %v13209_v23 = vcombine.low %v20951_v58, %v17734_v29  ;;  %v8221_v0 = vrot.slane %v8219_v18, 3  ;;  %v8224_v19 = vrot.slane %v8222_v50, 4  ;;  %v8949_v2 = vshrl.u32 %v13240_v36, 16  ;;  %v20952_v24 = vld [vmem:[#allocation45_spill] sm:$0xff]  ;;  %v20954_v36 = vld [vmem:[#allocation46_spill] sm:$0xff] }
 0x31d   : > { %v8217_v28 = vsel %vm2052_vm14, %v8207_v60, %v8216_v45  ;;  %v8953_v30 = vrot.slane %v8951_v4, 1  ;;  %v13242_v62 = vcombine.low %v8834_v37, %v8835_v15  ;;  %v8956_v55 = vshll.u32 %v13241_v22, 16  ;;  %v20953_v15 = vld [vmem:[#allocation44_spill] sm:$0xff] }
 0x31e   : > { %v8837_v60 = vmul.bf16 %v8804_v44, %v20952_v24  ;;  %v8225_v18 = vor.u32 %v8224_v19, %v8221_v0  ;;  %v13210_v37 = vcombine.low %v17738_v52, %v17754_v53  ;;  %v13211_v58 = vcombine.low %v17758_v21, %v17763_v54  ;;  %v8807_v52 = vld [vmem:[#allocation3 + $0x38] sm:$0xf]  ;;  %v8810_v53 = vld [vmem:[#allocation3 + $0x44] sm:$0xf]  ;;  %v8809_v54 = vld [vmem:[#allocation3 + $0x40] sm:$0xf] }
 0x31f   : > { %14404 = vmatmul.mubr.msk.bf16.gmra.mxu0 %vm6736_vm7, %v8208_v6  ;;  %v8954_v29 = vor.u32 %v8953_v30, %v8949_v2  ;;  %v8964_v4 = vshll.u32 %v13242_v62, 16  ;;  %v8958_v50 = vrot.slane %v8956_v55, 1  ;;  %v8960_v21 = vshrl.u32 %v13241_v22, 16 }
 0x320   : > { %14414 = vmatmul.mubr.msk.bf16.vlgmr.msra.gmra.mxu1 %vm6736_vm7, %v13208_v1  ;;  %14407 = vmatprep.mubr.msk.bf16.mxu0 %vm6736_vm7, %v8217_v28  ;;  %v8836_v1 = vmul.bf16 %v8803_v47, %v20953_v15  ;;  %v8838_v28 = vmul.bf16 %v8805_v63, %v20954_v36  ;;  %v8226_v44 = vsel %vm2052_vm14, %v8216_v45, %v8225_v18  ;;  %v8968_v47 = vshrl.u32 %v13242_v62, 16  ;;  %v20956_v63 = vld [vmem:[#allocation48_spill] sm:$0xff] }
 0x321   : > { %14480 = vmatpush3.bf16.msra.mxu1 %v9676_v3  ;;  %14417 = vmatprep.mubr.msk.bf16.mxu1 %vm6736_vm7, %v13209_v23  ;;  %v8839_v3 = vmul.bf16 %v8806_v34, %v20917_v13  ;;  %v8808_v23 = vld [vmem:[#allocation3 + $0x3c] sm:$0xf]  ;;  %v8959_v30 = vsel %vm3131_vm6, %v8954_v29, %v8958_v50  ;;  %v8966_v0 = vrot.slane %v8964_v4, 1  ;;  %v20955_v34 = vld [vmem:[#allocation49_spill] sm:$0xff]  ;;  %v8840_v29 = vmul.bf16 %v8807_v52, %v20956_v63 }
 0x322   : > { %14734 = vmatprep.subr.msk.bf16.mxu1 %vm6785_vm0, %v17951_v5  ;;  %v13243_v6 = vcombine.low %v8836_v1, %v8837_v60  ;;  %v8841_v2 = vmul.bf16 %v8808_v23, %v20955_v34  ;;  %v20957_v1 = vld [vmem:[#allocation51_spill] sm:$0xff]  ;;  %v8962_v4 = vor.u32 %v8960_v21, %v8958_v50  ;;  %v13213_v22 = vcombine.low %v17786_v39, %v17790_v40  ;;  %v8812_v23 = vld [vmem:[#allocation3 + $0x4c] sm:$0xf]  ;;  %v20959_v21 = vld [vmem:[#allocation52_spill] sm:$0xff] }
 0x323   : > { %v13244_v19 = vcombine.low %v8838_v28, %v8839_v3  ;;  %v8970_v55 = vor.u32 %v8968_v47, %v8966_v0  ;;  %v8843_v18 = vmul.bf16 %v8810_v53, %v20957_v1  ;;  %v8845_v40 = vmul.bf16 %v8812_v23, %v20923_v10  ;;  %v8813_v47 = vld [vmem:[#allocation3 + $0x50] sm:$0xf] }
 0x324   : > { %v8972_v45 = vshll.u32 %v13243_v6, 16  ;;  %v13245_v28 = vcombine.low %v8840_v29, %v8841_v2  ;;  %v8967_v62 = vsel %vm3131_vm6, %v8962_v4, %v8966_v0  ;;  %v8814_v0 = vld [vmem:[#allocation3 + $0x54] sm:$0xf] }
 0x325   : > { %v8980_v60 = vshll.u32 %v13244_v19, 16  ;;  %v8984_v53 = vshrl.u32 %v13244_v19, 16 }
 0x326   : > { %v8974_v3 = vrot.slane %v8972_v45, 1  ;;  %v8988_v39 = vshll.u32 %v13245_v28, 16 }
 0x327   : > { %14408 = vmatmul.mubr.msk.bf16.gmra.mxu0 %vm6736_vm7, %v8226_v44  ;;  %v20958_v44 = vld [vmem:[#allocation50_spill] sm:$0xff]  ;;  %v8982_v52 = vrot.slane %v8980_v60, 1 }
 0x328   : > { %14418 = vmatmul.mubr.msk.bf16.gmra.mxu1 %vm6736_vm7, %v13210_v37  ;;  %14447 = vmatprep.mubr.msk.bf16.mxu0 %vm6736_vm7, %v8959_v30  ;;  %v13212_v37 = vcombine.low %v17765_v26, %v17784_v33  ;;  %v10002_v30 = vsel %vm6785_vm0, %v17831_v43, 0  ;;  %v8975_v50 = vsel %vm3131_vm6, %v8970_v55, %v8974_v3  ;;  %v8811_v33 = vld [vmem:[#allocation3 + $0x48] sm:$0xf]  ;;  %v8976_v43 = vshrl.u32 %v13243_v6, 16 }
 0x329   : > { %14421 = vmatprep.mubr.msk.bf16.mxu1 %vm6736_vm7, %v13211_v58  ;;  %v8842_v58 = vmul.bf16 %v8809_v54, %v20958_v44  ;;  %v8986_v45 = vor.u32 %v8984_v53, %v8982_v52  ;;  %v8844_v54 = vmul.bf16 %v8811_v33, %v20959_v21  ;;  %v8847_v55 = vmul.bf16 %v8814_v0, %v20925_v49  ;;  %v18158_v21 = vld [vmem:[#allocation3 + $0x54] sm:$0xf]  ;;  %v18199_v44 = vld [vmem:[#allocation3 + $0x64] sm:$0xf] }
 0x32a   : > { %v8978_v60 = vor.u32 %v8976_v43, %v8974_v3  ;;  %v8990_v29 = vrot.slane %v8988_v39, 1  ;;  %v13215_v6 = vcombine.low %v17811_v12, %v17818_v46  ;;  %v8992_v12 = vshrl.u32 %v13245_v28, 16  ;;  %v8817_v46 = vld [vmem:[#allocation3 + $0x60] sm:$0xf]  ;;  %v20963_v43 = vld [vmem:[#allocation60_spill] sm:$0xff] }
 0x32b   : > { %v13246_v26 = vcombine.low %v8842_v58, %v8843_v18  ;;  %v13214_v18 = vcombine.low %v17796_v59, %v17809_v14  ;;  %v13247_v4 = vcombine.low %v8844_v54, %v8845_v40  ;;  %v8815_v14 = vld [vmem:[#allocation3 + $0x58] sm:$0xf]  ;;  %v8818_v59 = vld [vmem:[#allocation3 + $0x64] sm:$0xf]  ;;  %v13217_v28 = vcombine.low %v17850_v56, %v17854_v17  ;;  %v8821_v17 = vld [vmem:[#allocation3 + $0x70] sm:$0xf] }
 0x32c   : > { %v8983_v58 = vsel %vm3131_vm6, %v8978_v60, %v8982_v52  ;;  %v20961_v52 = vld [vmem:[#allocation58_spill] sm:$0xff]  ;;  %v20962_v39 = vld [vmem:[#allocation57_spill] sm:$0xff]  ;;  %v20964_v54 = vld [vmem:[#allocation128_spill] sm:$0xff] }
 0x32d   : > { %v8996_v2 = vshll.u32 %v13246_v26, 16  ;;  %v8848_v40 = vmul.bf16 %v8815_v14, %v20962_v39  ;;  %v20966_v14 = vld [vmem:[#allocation65_spill] sm:$0xff] }
 0x32f   : > { %14448 = vmatmul.mubr.msk.bf16.vlgmr.msra.gmra.mxu0 %vm6736_vm7, %v8967_v62  ;;  %v8816_v62 = vld [vmem:[#allocation3 + $0x5c] sm:$0xf]  ;;  %v8998_v3 = vrot.slane %v8996_v2, 1 }
 0x330   : > { %14422 = vmatmul.mubr.msk.bf16.gmra.mxu1 %vm6736_vm7, %v13212_v37  ;;  %14451 = vmatprep.mubr.msk.bf16.mxu0 %vm6736_vm7, %v8975_v50  ;;  %v20960_v37 = vld [vmem:[#allocation54_spill] sm:$0xff]  ;;  %v9004_v50 = vshll.u32 %v13247_v4, 16  ;;  %v8849_v33 = vmul.bf16 %v8816_v62, %v20961_v52 }
 0x331   : > { %14425 = vmatprep.mubr.msk.bf16.mxu1 %vm6736_vm7, %v13213_v22  ;;  %14514 = vmatpush3.bf16.msra.mxu0 %v10002_v30  ;;  %v8846_v19 = vmul.bf16 %v8813_v47, %v20960_v37  ;;  %v8991_v22 = vsel %vm3131_vm6, %v8986_v45, %v8990_v29  ;;  %v9000_v30 = vshrl.u32 %v13246_v26, 16  ;;  %v8851_v47 = vmul.bf16 %v8818_v59, %v20963_v43 }
 0x332   : > { %v8994_v45 = vor.u32 %v8992_v12, %v8990_v29  ;;  %v9006_v2 = vrot.slane %v9004_v50, 1  ;;  %v18011_v60 = vcombine.low %v8848_v40, %v8849_v33  ;;  %v9008_v50 = vshrl.u32 %v13247_v4, 16  ;;  %v20967_v33 = vld [vmem:[#allocation64_spill] sm:$0xff] }
 0x333   : > { %v13248_v23 = vcombine.low %v8846_v19, %v8847_v55  ;;  %v9002_v0 = vor.u32 %v9000_v30, %v8998_v3  ;;  %v13216_v55 = vcombine.low %v20964_v54, %v17848_v42  ;;  %v8820_v19 = vld [vmem:[#allocation3 + $0x6c] sm:$0xf]  ;;  %v8822_v42 = vld [vmem:[#allocation3 + $0x74] sm:$0xf] }
 0x334   : > { %v8853_v59 = vmul.bf16 %v8820_v19, %v20966_v14  ;;  %v9020_v56 = vshll.u32 %v18011_v60, 16  ;;  %v18035_v19 = vld [vmem:[#allocation3 + $0x18] sm:$0xf] }
 0x335   : > { %v9012_v53 = vshll.u32 %v13248_v23, 16  ;;  %v9016_v30 = vshrl.u32 %v13248_v23, 16  ;;  %v8854_v23 = vmul.bf16 %v8821_v17, %v20933_v20 }
 0x336   : > { %v9022_v4 = vrot.slane %v9020_v56, 1  ;;  %v8826_v56 = vld [vmem:[#allocation3 + $0x84] sm:$0xf] }
 0x337   : > { %14452 = vmatmul.mubr.msk.bf16.gmra.mxu0 %vm6736_vm7, %v8983_v58  ;;  %v8999_v58 = vsel %vm3131_vm6, %v8994_v45, %v8998_v3  ;;  %v9014_v29 = vrot.slane %v9012_v53, 1  ;;  %v18023_v3 = vld [vmem:[#allocation3 + $0x20] sm:$0xf]  ;;  %v18028_v53 = vld [vmem:[#allocation3 + $0x1c] sm:$0xf] }
 0x338   : > { %14426 = vmatmul.mubr.msk.bf16.gmra.mxu1 %vm6736_vm7, %v13214_v18  ;;  %14455 = vmatprep.mubr.msk.bf16.mxu0 %vm6736_vm7, %v8991_v22  ;;  %v20965_v18 = vld [vmem:[#allocation59_spill] sm:$0xff]  ;;  %v8819_v22 = vld [vmem:[#allocation3 + $0x68] sm:$0xf]  ;;  %v20968_v45 = vld [vmem:[#allocation8_spill] sm:$0xff] }
 0x339   : > { %14429 = vmatprep.mubr.msk.bf16.mxu1 %vm6736_vm7, %v13215_v6  ;;  %v8850_v26 = vmul.bf16 %v8817_v46, %v20965_v18  ;;  %v9007_v6 = vsel %vm3131_vm6, %v9002_v0, %v9006_v2  ;;  %v8852_v12 = vmul.bf16 %v8819_v22, %v20967_v33  ;;  %v8855_v46 = vmul.bf16 %v8822_v42, %v20934_v41  ;;  %v9324_v0 = vld [vmem:[#allocation3 + $0x14] sm:$0x8]  ;;  %v8829_v33 = vld [vmem:[#allocation3 + $0x90] sm:$0x1]  ;;  %v20984_v18 = vld [vmem:[#allocation14_spill] sm:$0xff] }
 0x33a   : > { %v9018_v40 = vor.u32 %v9016_v30, %v9014_v29  ;;  %v9360_v54 = vmul.bf16 %v18023_v3, %v20968_v45  ;;  %v20970_v42 = vld [vmem:[#allocation7_spill] sm:$0xff] }
 0x33b   : > { %v13250_v62 = vcombine.low %v8850_v26, %v8851_v47  ;;  %v18032_v26 = vcombine.low %v8852_v12, %v8853_v59  ;;  %v9359_v30 = vmul.bf16 %v18028_v53, %v20970_v42  ;;  %v13219_v59 = vcombine.low %v17882_v61, %v17888_v35  ;;  %v18051_v12 = vld [vmem:[#allocation3 + $0x24] sm:$0xf] }
 0x33c   : > { %v18046_v17 = vcombine.low %v8854_v23, %v8855_v46  ;;  %v13221_v35 = vcombine.low %v17902_v27, %v17907_v57  ;;  %v20972_v46 = vld [vmem:[#allocation74_spill] sm:$0xff] }
 0x33d   : > { %v9028_v47 = vshll.u32 %v13250_v62, 16  ;;  %v9036_v61 = vshll.u32 %v18032_v26, 16  ;;  %v9032_v45 = vshrl.u32 %v13250_v62, 16 }
 0x33f   : > { %14456 = vmatmul.mubr.msk.bf16.gmra.mxu0 %vm6736_vm7, %v8999_v58  ;;  %v13218_v58 = vcombine.low %v17856_v31, %v17876_v9  ;;  %v9023_v31 = vsel %vm3131_vm6, %v9018_v40, %v9022_v4  ;;  %v9030_v9 = vrot.slane %v9028_v47, 1  ;;  %v8825_v47 = vld [vmem:[#allocation3 + $0x80] sm:$0xf] }
 0x340   : > { %14430 = vmatmul.mubr.msk.bf16.gmra.mxu1 %vm6736_vm7, %v13216_v55  ;;  %14459 = vmatprep.mubr.msk.bf16.mxu0 %vm6736_vm7, %v9007_v6  ;;  %v9010_v55 = vor.u32 %v9008_v50, %v9006_v2  ;;  %v20969_v6 = vld [vmem:[#allocation5_spill] sm:$0xff]  ;;  %v9024_v2 = vshrl.u32 %v18011_v60, 16  ;;  %v8823_v50 = vld [vmem:[#allocation3 + $0x78] sm:$0xf]  ;;  %v13275_v60 = vcombine.low %v9359_v30, %v9360_v54  ;;  %v18067_v30 = vld [vmem:[#allocation3 + $0x30] sm:$0xf] }
 0x341   : > { %14433 = vmatprep.mubr.msk.bf16.mxu1 %vm6736_vm7, %v13217_v28  ;;  %v8824_v28 = vld [vmem:[#allocation3 + $0x7c] sm:$0xf]  ;;  %v9357_v22 = vmul.bf16 %v9324_v0, %v20969_v6  ;;  %v20971_v0 = vld [vmem:[#allocation6_spill] sm:$0xff]  ;;  %v9034_v27 = vor.u32 %v9032_v45, %v9030_v9 }
 0x342   : > { %v9015_v41 = vsel %vm3131_vm6, %v9010_v55, %v9014_v29  ;;  %v9358_v29 = vmul.bf16 %v18035_v19, %v20971_v0  ;;  %v8857_v40 = vmul.bf16 %v8824_v28, %v20972_v46  ;;  %v20973_v55 = vld [vmem:[#allocation73_spill] sm:$0xff]  ;;  %v18065_v6 = vld [vmem:[#allocation3 + $0x28] sm:$0xf]  ;;  %v20976_v28 = vld [vmem:[#allocation76_spill] sm:$0xff]  ;;  %v9484_v0 = vshrl.u32 %v13275_v60, 16 }
 0x343   : > { %v8856_v23 = vmul.bf16 %v8823_v50, %v20973_v55  ;;  %v8858_v62 = vmul.bf16 %v8825_v47, %v20976_v28  ;;  %v9487_v50 = vshll.u32 %v13275_v60, 16  ;;  %v18074_v55 = vld [vmem:[#allocation3 + $0x2c] sm:$0xf] }
 0x344   : > { %v13274_v42 = vcombine.low %v9357_v22, %v9358_v29  ;;  %v20977_v22 = vld [vmem:[#allocation10_spill] sm:$0xff]  ;;  %v13222_v29 = vcombine.low %v17916_v8, %v17922_v32  ;;  %v9048_v8 = vshrl.u32 %v18046_v17, 16  ;;  %v9486_v32 = vrot.slane %v9484_v0, 3 }
 0x346   : > { %v9476_v45 = vshrl.u32 %v13274_v42, 16  ;;  %v9479_v47 = vshll.u32 %v13274_v42, 16 }
 0x347   : > { %14460 = vmatmul.mubr.msk.bf16.gmra.mxu0 %vm6736_vm7, %v9015_v41  ;;  %v13220_v41 = vcombine.low %v17890_v25, %v17899_v11  ;;  %v9044_v25 = vshll.u32 %v18046_v17, 16  ;;  %v20975_v11 = vld [vmem:[#allocation9_spill] sm:$0xff] }
 0x348   : > { %14434 = vmatmul.mubr.msk.bf16.gmra.mxu1 %vm6736_vm7, %v13218_v58  ;;  %14463 = vmatprep.mubr.msk.bf16.mxu0 %vm6736_vm7, %v9023_v31  ;;  %v20974_v58 = vld [vmem:[#allocation78_spill] sm:$0xff]  ;;  %v9040_v31 = vshrl.u32 %v18032_v26, 16  ;;  %v9361_v57 = vmul.bf16 %v18051_v12, %v20975_v11  ;;  %v9478_v17 = vrot.slane %v9476_v45, 3  ;;  %v9481_v0 = vrot.slane %v9479_v47, 4  ;;  %v20983_v45 = vld [vmem:[#allocation16_spill] sm:$0xff] }
 0x349   : > { %14437 = vmatprep.mubr.msk.bf16.mxu1 %vm6736_vm7, %v13219_v59  ;;  %v8859_v54 = vmul.bf16 %v8826_v56, %v20974_v58  ;;  %v9026_v59 = vor.u32 %v9024_v2, %v9022_v4  ;;  %v9038_v56 = vrot.slane %v9036_v61, 1  ;;  %v18076_v58 = vcombine.low %v8856_v23, %v8857_v40  ;;  %v20978_v2 = vld [vmem:[#allocation12_spill] sm:$0xff]  ;;  %v8828_v61 = vld [vmem:[#allocation3 + $0x8c] sm:$0xf]  ;;  %v20979_v40 = vld [vmem:[#allocation11_spill] sm:$0xff] }
 0x34a   : > { %v9362_v4 = vmul.bf16 %v18065_v6, %v20977_v22  ;;  %v9364_v26 = vmul.bf16 %v18067_v30, %v20978_v2  ;;  %v9046_v28 = vrot.slane %v9044_v25, 1  ;;  %v9363_v23 = vmul.bf16 %v18074_v55, %v20979_v40  ;;  %v8827_v25 = vld [vmem:[#allocation3 + $0x88] sm:$0xf]  ;;  %v18103_v2 = vld [vmem:[#allocation3 + $0x38] sm:$0xf] }
 0x34b   : > { %v18084_v11 = vcombine.low %v8858_v62, %v8859_v54  ;;  %v9031_v60 = vsel %vm3131_vm6, %v9026_v59, %v9030_v9  ;;  %v9039_v22 = vsel %vm3131_vm6, %v9034_v27, %v9038_v56  ;;  %v9489_v54 = vrot.slane %v9487_v50, 4  ;;  %v18093_v62 = vld [vmem:[#allocation3 + $0x34] sm:$0xf]  ;;  %v18099_v27 = vld [vmem:[#allocation3 + $0x40] sm:$0xf] }
 0x34c   : > { %v13276_v46 = vcombine.low %v9361_v57, %v9362_v4  ;;  %v9042_v42 = vor.u32 %v9040_v31, %v9038_v56  ;;  %v9052_v9 = vshll.u32 %v18076_v58, 16  ;;  %v9056_v59 = vshrl.u32 %v18076_v58, 16  ;;  %v20980_v50 = vld [vmem:[#allocation89_spill] sm:$0xff]  ;;  %v18108_v58 = vld [vmem:[#allocation3 + $0x3c] sm:$0xf] }
 0x34d   : > { %v13277_v57 = vcombine.low %v9363_v23, %v9364_v26  ;;  %v8861_v4 = vmul.bf16 %v8828_v61, %v20980_v50  ;;  %v9050_v26 = vor.u32 %v9048_v8, %v9046_v28  ;;  %v9490_v23 = vor.u32 %v9489_v54, %v9486_v32 }
 0x34e   : > { %v9047_v31 = vsel %vm3131_vm6, %v9042_v42, %v9046_v28  ;;  %v9493_v56 = vshrl.u32 %v13276_v46, 16  ;;  %v9368_v47 = vmul.bf16 %v18099_v27, %v20983_v45  ;;  %v9054_v61 = vrot.slane %v9052_v9, 1  ;;  %v18122_v9 = vld [vmem:[#allocation3 + $0x44] sm:$0xf] }
 0x34f   : > { %14464 = vmatmul.mubr.msk.bf16.gmra.mxu0 %vm6736_vm7, %v9031_v60  ;;  %v20981_v60 = vld [vmem:[#allocation13_spill] sm:$0xff]  ;;  %v9502_v50 = vshrl.u32 %v13277_v57, 16  ;;  %v9505_v14 = vshll.u32 %v13277_v57, 16  ;;  %v9366_v42 = vmul.bf16 %v18103_v2, %v20984_v18  ;;  %v9482_v43 = vor.u32 %v9481_v0, %v9478_v17 }
 0x350   : > { %14438 = vmatmul.mubr.msk.bf16.gmra.mxu1 %vm6736_vm7, %v13220_v41  ;;  %14467 = vmatprep.mubr.msk.bf16.mxu0 %vm6736_vm7, %v9039_v22  ;;  %v9060_v41 = vshll.u32 %v18084_v11, 16  ;;  %v9365_v40 = vmul.bf16 %v18093_v62, %v20981_v60  ;;  %v20982_v22 = vld [vmem:[#allocation88_spill] sm:$0xff]  ;;  %v20985_v60 = vld [vmem:[#allocation15_spill] sm:$0xff]  ;;  %v9495_v32 = vrot.slane %v9493_v56, 3  ;;  %v9055_v18 = vsel %vm3131_vm6, %v9050_v26, %v9054_v61 }
 0x351   : > { %14441 = vmatprep.mubr.msk.bf16.mxu1 %vm6736_vm7, %v13221_v35  ;;  %v9496_v35 = vshll.u32 %v13276_v46, 16  ;;  %v8860_v20 = vmul.bf16 %v8827_v25, %v20982_v22  ;;  %v9367_v28 = vmul.bf16 %v18108_v58, %v20985_v60  ;;  %v20986_v25 = vld [vmem:[#allocation85_spill] sm:$0xff]  ;;  %v9064_v57 = vshrl.u32 %v18084_v11, 16 }
 0x352   : > { %v9062_v46 = vrot.slane %v9060_v41, 1  ;;  %v8862_v22 = vmul.bf16 %v8829_v33, %v20986_v25  ;;  %v13278_v45 = vcombine.low %v9365_v40, %v9366_v42  ;;  %v9504_v17 = vrot.slane %v9502_v50, 3  ;;  %v20990_v25 = vld [vmem:[#allocation19_spill] sm:$0xff] }
 0x353   : > { %v18115_v39 = vcombine.low %v8860_v20, %v8861_v4  ;;  %v9498_v54 = vrot.slane %v9496_v35, 4  ;;  %v9491_v20 = vsel %vm2052_vm14, %v9482_v43, %v9490_v23  ;;  %v13279_v41 = vcombine.low %v9367_v28, %v9368_v47  ;;  %v18133_v4 = vld [vmem:[#allocation3 + $0x48] sm:$0xf]  ;;  %v20987_v43 = vld [vmem:[#allocation17_spill] sm:$0xff] }
 0x354   : > { %v9507_v33 = vrot.slane %v9505_v14, 4  ;;  %v9058_v56 = vor.u32 %v9056_v59, %v9054_v61  ;;  %v9066_v35 = vor.u32 %v9064_v57, %v9062_v46  ;;  %v9369_v11 = vmul.bf16 %v18122_v9, %v20987_v43  ;;  %v18142_v14 = vld [vmem:[#allocation3 + $0x4c] sm:$0xf]  ;;  %v20989_v59 = vld [vmem:[#allocation20_spill] sm:$0xff] }
 0x355   : > { %v18119_v8 = vpop.f32.mrf.mxu1  ;;  %v9499_v40 = vor.u32 %v9498_v54, %v9495_v32  ;;  %v13256_v26 = vcombine.low %v8862_v22, %v8862_v22  ;;  %v9511_v42 = vshrl.u32 %v13278_v45, 16  ;;  %v9514_v50 = vshll.u32 %v13278_v45, 16 }
 0x356   : > { %v9520_v60 = vshrl.u32 %v13279_v41, 16  ;;  %v9523_v28 = vshll.u32 %v13279_v41, 16  ;;  %v10529_v57 = vsel %vm6785_vm0, %v17951_v5, 0  ;;  %v9508_v43 = vor.u32 %v9507_v33, %v9504_v17 }
 0x357   : > { %14468 = vmatmul.mubr.msk.bf16.gmra.mxu0 %vm6736_vm7, %v9047_v31  ;;  %v18131_v0 = vpop.f32.mrf.mxu1  ;;  %v18135_v31 = vld [vmem:[#allocation3 + $0x50] sm:$0xf]  ;;  %v9063_v22 = vsel %vm3131_vm6, %v9058_v56, %v9062_v46  ;;  %v9371_v52 = vmul.bf16 %v18142_v14, %v20990_v25  ;;  %v9500_v41 = vsel %vm2052_vm14, %v9490_v23, %v9499_v40  ;;  %v9076_v37 = vshll.u32 %v13256_v26, 16  ;;  %v18163_v56 = vld [vmem:[#allocation3 + $0x60] sm:$0xf] }
 0x358   : > { %14442 = vmatmul.mubr.msk.bf16.gmra.mxu1 %vm6736_vm7, %v13222_v29  ;;  %14471 = vmatprep.mubr.msk.bf16.mxu0 %vm6736_vm7, %v9055_v18  ;;  %v9068_v29 = vshll.u32 %v18115_v39, 16  ;;  %v20988_v18 = vld [vmem:[#allocation18_spill] sm:$0xff]  ;;  %v9372_v61 = vmul.bf16 %v18135_v31, %v20989_v59  ;;  %v9513_v49 = vrot.slane %v9511_v42, 3  ;;  %v9516_v59 = vrot.slane %v9514_v50, 4  ;;  %v20991_v42 = vld [vmem:[#allocation21_spill] sm:$0xff] }
 0x359   : > { %14481 = vmatprep.mubr.msk.bf16.mxu1 %vm6736_vm7, %v9491_v20  ;;  %v18140_v47 = vpop.f32.mrf.mxu1  ;;  %v9370_v20 = vmul.bf16 %v18133_v4, %v20988_v18  ;;  %v9522_v46 = vrot.slane %v9520_v60, 3  ;;  %v9525_v17 = vrot.slane %v9523_v28, 4  ;;  %v9072_v23 = vshrl.u32 %v18115_v39, 16  ;;  %v18175_v50 = vld [vmem:[#allocation3 + $0x5c] sm:$0xf] }
 0x35a   : > { %v9070_v54 = vrot.slane %v9068_v29, 1  ;;  %v13281_v33 = vcombine.low %v9371_v52, %v9372_v61  ;;  %v9509_v25 = vsel %vm2052_vm14, %v9499_v40, %v9508_v43  ;;  %v9373_v52 = vmul.bf16 %v18158_v21, %v20991_v42  ;;  %v20992_v61 = vld [vmem:[#allocation24_spill] sm:$0xff] }
 0x35b   : > { %v18150_v32 = vpop.f32.mrf.mxu1  ;;  %v13280_v45 = vcombine.low %v9369_v11, %v9370_v20  ;;  %v18170_v11 = vld [vmem:[#allocation3 + $0x58] sm:$0xf]  ;;  %v9078_v39 = vrot.slane %v9076_v37, 1  ;;  %v9517_v28 = vor.u32 %v9516_v59, %v9513_v49  ;;  %v9376_v40 = vmul.bf16 %v18163_v56, %v20992_v61 }
 0x35c   : > { %v9071_v5 = vsel %vm3131_vm6, %v9066_v35, %v9070_v54  ;;  %v9074_v60 = vor.u32 %v9072_v23, %v9070_v54  ;;  %v20994_v54 = vld [vmem:[#allocation23_spill] sm:$0xff]  ;;  %v13308_v37 = vcombine.low %v18035_v19, %v18028_v53 }
 0x35d   : > { %v9529_v35 = vshrl.u32 %v13280_v45, 16  ;;  %v9532_v26 = vshll.u32 %v13280_v45, 16  ;;  %v9375_v49 = vmul.bf16 %v18175_v50, %v20994_v54 }
 0x35e   : > { %v18156_v18 = vpop.f32.mrf.mxu1 }
 0x35f   : > { %14472 = vmatmul.mubr.msk.bf16.gmra.mxu0 %vm6736_vm7, %v9063_v22  ;;  %v9526_v22 = vor.u32 %v9525_v17, %v9522_v46  ;;  %v9531_v23 = vrot.slane %v9529_v35, 3  ;;  %v9534_v61 = vrot.slane %v9532_v26, 4  ;;  %v9079_v17 = vsel %vm3131_vm6, %v9074_v60, %v9078_v39 }
 0x360   : > { %14482 = vmatmul.mubr.msk.bf16.vlgmr.msra.gmra.mxu1 %vm6736_vm7, %v9500_v41  ;;  %14475 = vmatprep.mubr.msk.bf16.mxu0 %vm6736_vm7, %v9071_v5  ;;  %v18168_v29 = vpop.f32.mrf.mxu1  ;;  %v9538_v41 = vshrl.u32 %v13281_v33, 16  ;;  %v9541_v5 = vshll.u32 %v13281_v33, 16  ;;  %v9518_v33 = vsel %vm2052_vm14, %v9508_v43, %v9517_v28 }
 0x361   : > { %14548 = vmatpush3.bf16.msra.mxu1 %v10529_v57  ;;  %14485 = vmatprep.mubr.msk.bf16.mxu1 %vm6736_vm7, %v9509_v25  ;;  %v20993_v25 = vld [vmem:[#allocation22_spill] sm:$0xff]  ;;  %v9527_v53 = vsel %vm2052_vm14, %v9517_v28, %v9526_v22  ;;  %v9535_v39 = vor.u32 %v9534_v61, %v9531_v23  ;;  %v20997_v28 = vld [vmem:[#allocation25_spill] sm:$0xff]  ;;  %v13309_v61 = vcombine.low %v18023_v3, %v18051_v12 }
 0x362   : > { %v18177_v20 = vpop.f32.mrf.mxu1  ;;  %v9374_v45 = vmul.bf16 %v18170_v11, %v20993_v25  ;;  %v9540_v35 = vrot.slane %v9538_v41, 3  ;;  %v9543_v26 = vrot.slane %v9541_v5, 4  ;;  %v9377_v41 = vmul.bf16 %v18199_v44, %v20997_v28  ;;  %v21001_v28 = vld [vmem:[#allocation27_spill] sm:$0xff] }
 0x364   : > { %v14313_v57 = vpop.f32.mrf.mxu0  ;;  %v18186_v42 = vpop.f32.mrf.mxu1  ;;  %v13282_v46 = vcombine.low %v9373_v52, %v9374_v45  ;;  %v18211_v52 = vld [vmem:[#allocation3 + $0x70] sm:$0xf]  ;;  %v18213_v45 = vld [vmem:[#allocation3 + $0x68] sm:$0xf] }
 0x365   : > { %v18184_v10 = vadd.f32 %v14313_v57, %v18119_v8  ;;  %v13283_v57 = vcombine.low %v9375_v49, %v9376_v40 }
 0x366   : > { %v7270_v59 = vpop.f32.mrf.mxu0  ;;  %v18197_v8 = vpop.f32.mrf.mxu1  ;;  %v9547_v40 = vshrl.u32 %v13282_v46, 16  ;;  %v9550_v49 = vshll.u32 %v13282_v46, 16 }
 0x367   : > { %v18195_v25 = vadd.f32 %v7270_v59, %v18131_v0  ;;  %14476 = vmatmul.mubr.msk.bf16.gmra.mxu0 %vm6736_vm7, %v9079_v17  ;;  %v18222_v59 = vld [vmem:[#allocation3 + $0x6c] sm:$0xf]  ;;  %v9544_v17 = vor.u32 %v9543_v26, %v9540_v35 }
 0x368   : > { %14486 = vmatmul.mubr.msk.bf16.gmra.mxu1 %vm6736_vm7, %v9518_v33  ;;  %v14314_v19 = vpop.f32.mrf.mxu0  ;;  %14515 = vmatprep.mubr.msk.bf16.mxu0 %vm6736_vm7, %v13308_v37  ;;  %v18209_v43 = vpop.f32.mrf.mxu1  ;;  %v9559_v37 = vshll.u32 %v13283_v57, 16  ;;  %v20999_v33 = vld [vmem:[#allocation28_spill] sm:$0xff]  ;;  %v9549_v46 = vrot.slane %v9547_v40, 3  ;;  %v9552_v35 = vrot.slane %v9550_v49, 4 }
 0x369   : > { %20995 = vst [vmem:[#allocation63_spill] sm:$0xff] %v18195_v25  ;;  %14489 = vmatprep.mubr.msk.bf16.mxu1 %vm6736_vm7, %v9527_v53  ;;  %v18207_v0 = vadd.f32 %v14314_v19, %v18140_v47  ;;  %v9556_v47 = vshrl.u32 %v13283_v57, 16  ;;  %v9380_v23 = vmul.bf16 %v18211_v52, %v20999_v33  ;;  %v21000_v53 = vld [vmem:[#allocation26_spill] sm:$0xff]  ;;  %v9379_v57 = vmul.bf16 %v18222_v59, %v21001_v28  ;;  %v18237_v25 = vld [vmem:[#allocation3 + $0x74] sm:$0xf]  ;;  %v21004_v28 = vld [vmem:[#allocation32_spill] sm:$0xff] }
 0x36a   : > { %v7273_v60 = vpop.f32.mrf.mxu0  ;;  %v18220_v54 = vpop.f32.mrf.mxu1  ;;  %v9378_v19 = vmul.bf16 %v18213_v45, %v21000_v53  ;;  %v9561_v33 = vrot.slane %v9559_v37, 4  ;;  %v9545_v3 = vsel %vm2052_vm14, %v9535_v39, %v9544_v17  ;;  %v9553_v49 = vor.u32 %v9552_v35, %v9549_v46  ;;  %v18252_v53 = vld [vmem:[#allocation3 + $0x7c] sm:$0xf] }
 0x36b   : > { %20996 = vst [vmem:[#allocation82_spill] sm:$0xff] %v18207_v0  ;;  %v18218_v5 = vadd.f32 %v7273_v60, %v18150_v32  ;;  %v13310_v32 = vcombine.low %v18065_v6, %v18074_v55  ;;  %v9536_v60 = vsel %vm2052_vm14, %v9526_v22, %v9535_v39  ;;  %v9558_v26 = vrot.slane %v9556_v47, 3  ;;  %v18244_v55 = vld [vmem:[#allocation3 + $0x78] sm:$0xf]  ;;  %v18246_v6 = vld [vmem:[#allocation3 + $0x80] sm:$0xf] }
 0x36c   : > { %v13284_v0 = vcombine.low %v9377_v41, %v9378_v19  ;;  %v13285_v12 = vcombine.low %v9379_v57, %v9380_v23  ;;  %v21002_v22 = vld [vmem:[#allocation29_spill] sm:$0xff]  ;;  %v9384_v57 = vmul.bf16 %v18246_v6, %v21004_v28  ;;  %v13311_v46 = vcombine.low %v18067_v30, %v18093_v62 }
 0x36d   : > { %20998 = vst [vmem:[#allocation77_spill] sm:$0xff] %v18218_v5  ;;  %v18235_v5 = vpop.f32.mrf.mxu1  ;;  %v9381_v40 = vmul.bf16 %v18237_v25, %v21002_v22  ;;  %v9562_v47 = vor.u32 %v9561_v33, %v9558_v26  ;;  %v21006_v33 = vld [vmem:[#allocation31_spill] sm:$0xff]  ;;  %v9554_v28 = vsel %vm2052_vm14, %v9544_v17, %v9553_v49 }
 0x36e   : > { %v9565_v37 = vshrl.u32 %v13284_v0, 16  ;;  %v9574_v23 = vshrl.u32 %v13285_v12, 16  ;;  %v9577_v19 = vshll.u32 %v13285_v12, 16  ;;  %v9383_v12 = vmul.bf16 %v18252_v53, %v21006_v33 }
 0x36f   : > { %14516 = vmatmul.mubr.msk.bf16.vlgmr.msra.gmra.mxu0 %vm6736_vm7, %v13309_v61  ;;  %v9568_v61 = vshll.u32 %v13284_v0, 16  ;;  %v13312_v0 = vcombine.low %v18103_v2, %v18108_v58  ;;  %v9563_v62 = vsel %vm2052_vm14, %v9553_v49, %v9562_v47 }
 0x370   : > { %14490 = vmatmul.mubr.msk.bf16.gmra.mxu1 %vm6736_vm7, %v9536_v60  ;;  %14519 = vmatprep.mubr.msk.bf16.mxu0 %vm6736_vm7, %v13310_v32  ;;  %v21003_v32 = vld [vmem:[#allocation30_spill] sm:$0xff]  ;;  %v9576_v2 = vrot.slane %v9574_v23, 3  ;;  %v9579_v58 = vrot.slane %v9577_v19, 4  ;;  %v21009_v19 = vld [vmem:[#allocation33_spill] sm:$0xff] }
 0x371   : > { %14493 = vmatprep.mubr.msk.bf16.mxu1 %vm6736_vm7, %v9545_v3  ;;  %v9382_v60 = vmul.bf16 %v18244_v55, %v21003_v32 }
 0x372   : > { %v18250_v41 = vpop.f32.mrf.mxu1  ;;  %v9580_v33 = vor.u32 %v9579_v58, %v9576_v2 }
 0x373   : > { %v14317_v39 = vpop.f32.mrf.mxu0  ;;  %v13286_v26 = vcombine.low %v9381_v40, %v9382_v60  ;;  %v13287_v40 = vcombine.low %v9383_v12, %v9384_v57  ;;  %v18278_v60 = vld [vmem:[#allocation3 + $0x84] sm:$0xf] }
 0x374   : > { %v18259_v3 = vadd.f32 %v14317_v39, %v18156_v18  ;;  %v18261_v22 = vpop.f32.mrf.mxu1  ;;  %v9567_v39 = vrot.slane %v9565_v37, 3  ;;  %v9385_v57 = vmul.bf16 %v18278_v60, %v21009_v19 }
 0x375   : > { %v7286_v35 = vpop.f32.mrf.mxu0  ;;  %v9592_v12 = vshrl.u32 %v13287_v40, 16 }
 0x376   : > { %21005 = vst [vmem:[#allocation81_spill] sm:$0xff] %v18259_v3  ;;  %v18270_v32 = vadd.f32 %v7286_v35, %v18168_v29  ;;  %v18273_v18 = vpop.f32.mrf.mxu1  ;;  %v9570_v3 = vrot.slane %v9568_v61, 4  ;;  %v9583_v61 = vshrl.u32 %v13286_v26, 16  ;;  %v18287_v35 = vld [vmem:[#allocation3 + $0x88] sm:$0xf] }
 0x377   : > { %14520 = vmatmul.mubr.msk.bf16.gmra.mxu0 %vm6736_vm7, %v13311_v46  ;;  %v14318_v30 = vpop.f32.mrf.mxu0  ;;  %v9586_v46 = vshll.u32 %v13286_v26, 16 }
 0x378   : > { %14494 = vmatmul.mubr.msk.bf16.gmra.mxu1 %vm6736_vm7, %v9554_v28  ;;  %14523 = vmatprep.mubr.msk.bf16.mxu0 %vm6736_vm7, %v13312_v0  ;;  %v18282_v29 = vadd.f32 %v14318_v30, %v18177_v20  ;;  %v18285_v17 = vpop.f32.mrf.mxu1  ;;  %v9571_v23 = vor.u32 %v9570_v3, %v9567_v39  ;;  %v18294_v0 = vld [vmem:[#allocation3 + $0x8c] sm:$0xf]  ;;  %v18296_v20 = vld [vmem:[#allocation3 + $0x90] sm:$0xf]  ;;  %v9595_v28 = vshll.u32 %v13287_v40, 16  ;;  %v13313_v30 = vcombine.low %v18099_v27, %v18122_v9 }
 0x379   : > { %14497 = vmatprep.mubr.msk.bf16.mxu1 %vm6736_vm7, %v9563_v62  ;;  %v7289_v37 = vpop.f32.mrf.mxu0  ;;  %v21010_v62 = vld [vmem:[#allocation34_spill] sm:$0xff]  ;;  %v9585_v3 = vrot.slane %v9583_v61, 3  ;;  %v9588_v39 = vrot.slane %v9586_v46, 4  ;;  %v13314_v27 = vcombine.low %v18133_v4, %v18142_v14 }
 0x37a   : > { %21007 = vst [vmem:[#allocation62_spill] sm:$0xff] %v18282_v29  ;;  %v18290_v49 = vadd.f32 %v7289_v37, %v18186_v42  ;;  %v9386_v42 = vmul.bf16 %v18287_v35, %v21010_v62  ;;  %v9388_v29 = vmul.bf16 %v18296_v20, %v20945_v38  ;;  %v9572_v9 = vsel %vm2052_vm14, %v9562_v47, %v9571_v23  ;;  %v18319_v62 = vld [vmem:[#allocation3 + $0x94] sm:$0xf] }
 0x37b   : > { %v9581_v46 = vsel %vm2052_vm14, %v9571_v23, %v9580_v33  ;;  %v9597_v38 = vrot.slane %v9595_v28, 4  ;;  %v9589_v47 = vor.u32 %v9588_v39, %v9585_v3  ;;  %v13315_v3 = vcombine.low %v18135_v31, %v18158_v21  ;;  %v10200_v39 = vld [vmem:[#allocation3 + $0x24] sm:$0xf] }
 0x37c   : > { %21008 = vst [vmem:[#allocation69_spill] sm:$0xff] %v18290_v49  ;;  %v18300_v26 = vpop.f32.mrf.mxu1  ;;  %v21011_v49 = vld [vmem:[#allocation35_spill] sm:$0xff]  ;;  %v13288_v40 = vcombine.low %v9385_v57, %v9386_v42  ;;  %v21013_v42 = vld [vmem:[#allocation36_spill] sm:$0xff] }
 0x37d   : > { %v14321_v37 = vpop.f32.mrf.mxu0  ;;  %v9387_v19 = vmul.bf16 %v18294_v0, %v21011_v49  ;;  %v9594_v49 = vrot.slane %v9592_v12, 3 }
 0x37e   : > { %v18309_v2 = vadd.f32 %v14321_v37, %v18197_v8  ;;  %v18314_v58 = vpop.f32.mrf.mxu1  ;;  %v9601_v12 = vshrl.u32 %v13288_v40, 16  ;;  %v9604_v28 = vshll.u32 %v13288_v40, 16  ;;  %v9389_v37 = vmul.bf16 %v18319_v62, %v21013_v42 }
 0x37f   : > { %14524 = vmatmul.mubr.msk.bf16.gmra.mxu0 %vm6736_vm7, %v13313_v30  ;;  %v7302_v61 = vpop.f32.mrf.mxu0  ;;  %v13289_v57 = vcombine.low %v9387_v19, %v9388_v29  ;;  %v13316_v19 = vcombine.low %v18170_v11, %v18175_v50  ;;  %v21016_v11 = vld [vmem:[#allocation38_spill] sm:$0xff] }
 0x380   : > { %14498 = vmatmul.mubr.msk.bf16.gmra.mxu1 %vm6736_vm7, %v9572_v9  ;;  %14527 = vmatprep.mubr.msk.bf16.mxu0 %vm6736_vm7, %v13314_v27  ;;  %v18323_v4 = vadd.f32 %v7302_v61, %v18209_v43  ;;  %v18326_v14 = vpop.f32.mrf.mxu1  ;;  %v10198_v27 = vld [vmem:[#allocation3 + $0x1c] sm:$0xf]  ;;  %v9598_v9 = vor.u32 %v9597_v38, %v9594_v49  ;;  %v9606_v38 = vrot.slane %v9604_v28, 4 }
 0x381   : > { %14501 = vmatprep.mubr.msk.bf16.mxu1 %vm6736_vm7, %v9581_v46  ;;  %v14322_v8 = vpop.f32.mrf.mxu0  ;;  %v9610_v40 = vshrl.u32 %v13289_v57, 16  ;;  %v9613_v46 = vshll.u32 %v13289_v57, 16  ;;  %v10233_v57 = vmul.bf16 %v10200_v39, %v20948_v51 }
 0x382   : > { %v18329_v30 = vadd.f32 %v14322_v8, %v18220_v54  ;;  %v18331_v23 = vpop.f32.mrf.mxu1  ;;  %v10197_v54 = vld [vmem:[#allocation3 + $0x18] sm:$0xf]  ;;  %v21015_v8 = vld [vmem:[#allocation39_spill] sm:$0xff]  ;;  %v9599_v31 = vsel %vm2052_vm14, %v9589_v47, %v9598_v9 }
 0x383   : > { %21012 = vst [vmem:[#allocation70_spill] sm:$0xff] %v18331_v23  ;;  %v7305_v43 = vpop.f32.mrf.mxu0  ;;  %v10231_v42 = vmul.bf16 %v10198_v27, %v21015_v8  ;;  %v9590_v23 = vsel %vm2052_vm14, %v9580_v33, %v9589_v47  ;;  %v10230_v50 = vmul.bf16 %v10197_v54, %v21016_v11  ;;  %v9612_v28 = vrot.slane %v9610_v40, 3  ;;  %v10202_v8 = vld [vmem:[#allocation3 + $0x2c] sm:$0xf] }
 0x384   : > { %v18336_v61 = vadd.f32 %v7305_v43, %v18235_v5  ;;  %v18340_v29 = vpop.f32.mrf.mxu1  ;;  %v9603_v5 = vrot.slane %v9601_v12, 3  ;;  %v13290_v43 = vcombine.low %v9389_v37, %v9389_v37  ;;  %v9615_v37 = vrot.slane %v9613_v46, 4  ;;  %v10201_v46 = vld [vmem:[#allocation3 + $0x28] sm:$0xf] }
 0x385   : > { %v13317_v40 = vcombine.low %v18163_v56, %v18199_v44 }
 0x386   : > { %21014 = vst [vmem:[#allocation94_spill] sm:$0xff] %v18336_v61  ;;  %v18346_v49 = vpop.f32.mrf.mxu1  ;;  %v10199_v61 = vld [vmem:[#allocation3 + $0x20] sm:$0xf]  ;;  %v9607_v39 = vor.u32 %v9606_v38, %v9603_v5  ;;  %v13318_v5 = vcombine.low %v18213_v45, %v18222_v59  ;;  %v9616_v38 = vor.u32 %v9615_v37, %v9612_v28 }
 0x387   : > { %v14325_v21 = vpop.f32.mrf.mxu0  ;;  %14528 = vmatmul.mubr.msk.bf16.gmra.mxu0 %vm6736_vm7, %v13315_v3  ;;  %v13341_v3 = vcombine.low %v10230_v50, %v10231_v42  ;;  %v10235_v50 = vmul.bf16 %v10202_v8, %v20949_v48  ;;  %v10234_v8 = vmul.bf16 %v10201_v46, %v20869_v7  ;;  %v21039_v7 = vld [vmem:[#allocation73_spill] sm:$0xff] }
 0x388   : > { %14502 = vmatmul.mubr.msk.bf16.gmra.mxu1 %vm6736_vm7, %v9590_v23  ;;  %v18354_v27 = vadd.f32 %v14325_v21, %v18250_v41  ;;  %14531 = vmatprep.mubr.msk.bf16.mxu0 %vm6736_vm7, %v13316_v19  ;;  %v18358_v33 = vpop.f32.mrf.mxu1  ;;  %v10232_v23 = vmul.bf16 %v10199_v61, %v20868_v16  ;;  %v9619_v41 = vshrl.u32 %v13290_v43, 16  ;;  %v9622_v21 = vshll.u32 %v13290_v43, 16 }
 0x389   : > { %14505 = vmatprep.mubr.msk.bf16.mxu1 %vm6736_vm7, %v9599_v31  ;;  %v7318_v12 = vpop.f32.mrf.mxu0  ;;  %v10351_v43 = vshll.u32 %v13341_v3, 16  ;;  %v9617_v45 = vsel %vm2052_vm14, %v9607_v39, %v9616_v38 }
 0x38a   : > { %v18362_v47 = vadd.f32 %v7318_v12, %v18261_v22  ;;  %v18364_v54 = vpop.f32.mrf.mxu1  ;;  %v18366_v51 = vcombine.low %v10232_v23, %v10233_v57  ;;  %v10204_v22 = vld [vmem:[#allocation3 + $0x34] sm:$0xf]  ;;  %v9621_v44 = vrot.slane %v9619_v41, 3  ;;  %v9624_v56 = vrot.slane %v9622_v21, 4  ;;  %v10203_v23 = vld [vmem:[#allocation3 + $0x30] sm:$0xf] }
 0x38b   : > { %v14326_v19 = vpop.f32.mrf.mxu0  ;;  %v10353_v41 = vrot.slane %v10351_v43, 1  ;;  %v13343_v21 = vcombine.low %v10234_v8, %v10235_v50  ;;  %v10205_v43 = vld [vmem:[#allocation3 + $0x38] sm:$0xf]  ;;  %v10208_v50 = vld [vmem:[#allocation3 + $0x44] sm:$0xf] }
 0x38c   : > { %v18369_v31 = vadd.f32 %v14326_v19, %v18273_v18  ;;  %v18373_v61 = vpop.f32.mrf.mxu1  ;;  %v9608_v18 = vsel %vm2052_vm14, %v9598_v9, %v9607_v39  ;;  %v10356_v59 = vshll.u32 %v18366_v51, 16  ;;  %v10236_v39 = vmul.bf16 %v10203_v23, %v20953_v15 }
 0x38d   : > { %v7321_v42 = vpop.f32.mrf.mxu0 }
 0x38e   : > { %v18379_v57 = vadd.f32 %v7321_v42, %v18285_v17  ;;  %v18382_v12 = vpop.f32.mrf.mxu1  ;;  %v10237_v17 = vmul.bf16 %v10204_v22, %v20952_v24  ;;  %v9625_v22 = vor.u32 %v9624_v56, %v9621_v44  ;;  %v10206_v42 = vld [vmem:[#allocation3 + $0x3c] sm:$0xf]  ;;  %v10364_v44 = vshll.u32 %v13343_v21, 16 }
 0x38f   : > { %v14329_v19 = vpop.f32.mrf.mxu0  ;;  %14532 = vmatmul.mubr.msk.bf16.gmra.mxu0 %vm6736_vm7, %v13317_v40  ;;  %v10239_v56 = vmul.bf16 %v10206_v42, %v20917_v13 }
 0x390   : > { %14506 = vmatmul.mubr.msk.bf16.gmra.mxu1 %vm6736_vm7, %v9608_v18  ;;  %v18391_v9 = vadd.f32 %v14329_v19, %v18300_v26  ;;  %14535 = vmatprep.mubr.msk.bf16.mxu0 %vm6736_vm7, %v13318_v5  ;;  %v18395_v28 = vpop.f32.mrf.mxu1  ;;  %v10349_v18 = vshrl.u32 %v13341_v3, 16  ;;  %v10358_v19 = vrot.slane %v10356_v59, 1  ;;  %v18403_v5 = vcombine.low %v10236_v39, %v10237_v17  ;;  %v10207_v17 = vld [vmem:[#allocation3 + $0x40] sm:$0xf] }
 0x391   : > { %14509 = vmatprep.mubr.msk.bf16.mxu1 %vm6736_vm7, %v9617_v45  ;;  %v7334_v37 = vpop.f32.mrf.mxu0  ;;  %v13320_v3 = vcombine.low %v18244_v55, %v18252_v53  ;;  %v9626_v59 = vsel %vm2052_vm14, %v9616_v38, %v9625_v22  ;;  %v10360_v53 = vshrl.u32 %v18366_v51, 16  ;;  %v10366_v42 = vrot.slane %v10364_v44, 1 }
 0x392   : > { %v18399_v40 = vadd.f32 %v7334_v37, %v18314_v58  ;;  %v18401_v46 = vpop.f32.mrf.mxu1  ;;  %v13319_v58 = vcombine.low %v18211_v52, %v18237_v25  ;;  %v10354_v8 = vor.u32 %v10353_v41, %v10349_v18  ;;  %v10372_v25 = vshll.u32 %v18403_v5, 16 }
 0x393   : > { %v14330_v26 = vpop.f32.mrf.mxu0  ;;  %v10238_v52 = vmul.bf16 %v10205_v43, %v20954_v36  ;;  %v10241_v41 = vmul.bf16 %v10208_v50, %v20955_v34  ;;  %v10240_v18 = vmul.bf16 %v10207_v17, %v20956_v63  ;;  %v10362_v50 = vor.u32 %v10360_v53, %v10358_v19  ;;  %v10212_v17 = vld [vmem:[#allocation3 + $0x54] sm:$0xf] }
 0x394   : > { %v18406_v45 = vadd.f32 %v14330_v26, %v18326_v14  ;;  %v18408_v24 = vpop.f32.mrf.mxu1  ;;  %v10359_v39 = vsel %vm3131_vm6, %v10354_v8, %v10358_v19  ;;  %v13321_v44 = vcombine.low %v18246_v6, %v18278_v60  ;;  %v10211_v6 = vld [vmem:[#allocation3 + $0x50] sm:$0xf] }
 0x395   : > { %v18410_v23 = vpop.f32.mrf.mxu0  ;;  %v13345_v26 = vcombine.low %v10238_v52, %v10239_v56  ;;  %v18440_v51 = vcombine.low %v10240_v18, %v10241_v41 }
 0x396   : > { %v18418_v14 = vpop.f32.mrf.mxu1 }
 0x397   : > { %v14333_v37 = vpop.f32.mrf.mxu0  ;;  %14536 = vmatmul.mubr.msk.bf16.gmra.mxu0 %vm6736_vm7, %v13319_v58  ;;  %v10380_v53 = vshll.u32 %v13345_v26, 16  ;;  %v10384_v34 = vshrl.u32 %v13345_v26, 16 }
 0x398   : > { %14510 = vmatmul.mubr.msk.bf16.gmra.mxu1 %vm6736_vm7, %v9626_v59  ;;  %v18427_v55 = vadd.f32 %v14333_v37, %v18340_v29  ;;  %14539 = vmatprep.mubr.msk.bf16.mxu0 %vm6736_vm7, %v13320_v3  ;;  %v18432_v38 = vpop.f32.mrf.mxu1  ;;  %v10210_v29 = vld [vmem:[#allocation3 + $0x4c] sm:$0xf]  ;;  %v10368_v3 = vshrl.u32 %v13343_v21, 16  ;;  %v10374_v59 = vrot.slane %v10372_v25, 1  ;;  %v10209_v37 = vld [vmem:[#allocation3 + $0x48] sm:$0xf]  ;;  %v13322_v25 = vcombine.low %v18287_v35, %v18294_v0 }
 0x399   : > { %14549 = vmatprep.mubr.msk.bf16.mxu1 %vm6736_vm7, %v10359_v39  ;;  %v7350_v22 = vpop.f32.mrf.mxu0  ;;  %v10243_v21 = vmul.bf16 %v10210_v29, %v20957_v1  ;;  %v10388_v29 = vshll.u32 %v18440_v51, 16 }
 0x39a   : > { %v18436_v43 = vadd.f32 %v7350_v22, %v18346_v49  ;;  %v18438_v58 = vpop.f32.mrf.mxu1  ;;  %v10370_v52 = vor.u32 %v10368_v3, %v10366_v42  ;;  %v21017_v22 = vld [vmem:[#allocation50_spill] sm:$0xff] }
 0x39b   : > { %v14334_v8 = vpop.f32.mrf.mxu0  ;;  %v10242_v18 = vmul.bf16 %v10209_v37, %v21017_v22 }
 0x39c   : > { %v18443_v39 = vadd.f32 %v14334_v8, %v18358_v33  ;;  %v14347_v56 = vpop.f32.mrf.mxu1  ;;  %v10367_v33 = vsel %vm3131_vm6, %v10362_v50, %v10366_v42  ;;  %v21018_v8 = vld [vmem:[#allocation63_spill] sm:$0xff]  ;;  %v10376_v42 = vshrl.u32 %v18403_v5, 16  ;;  %v10214_v5 = vld [vmem:[#allocation3 + $0x5c] sm:$0xf] }
 0x39d   : > { %v18447_v49 = vpop.f32.mrf.mxu0  ;;  %v18450_v19 = vadd.f32 %v14347_v56, %v18184_v10  ;;  %v10375_v10 = vsel %vm3131_vm6, %v10370_v52, %v10374_v59  ;;  %v21019_v56 = vld [vmem:[#allocation53_spill] sm:$0xff] }
 0x39e   : > { %v7765_v41 = vpop.f32.mrf.mxu1  ;;  %v10245_v35 = vmul.bf16 %v10212_v17, %v21019_v56 }
 0x39f   : > { %v14337_v60 = vpop.f32.mrf.mxu0  ;;  %14540 = vmatmul.mubr.msk.bf16.gmra.mxu0 %vm6736_vm7, %v13321_v44  ;;  %v18461_v3 = vadd.f32 %v7765_v41, %v21018_v8  ;;  %v21020_v44 = vld [vmem:[#allocation82_spill] sm:$0xff]  ;;  %v13347_v41 = vcombine.low %v10242_v18, %v10243_v21  ;;  %v21021_v8 = vld [vmem:[#allocation52_spill] sm:$0xff] }
 0x3a0   : > { %14550 = vmatmul.mubr.msk.bf16.vlgmr.msra.gmra.mxu1 %vm6736_vm7, %v10367_v33  ;;  %v18466_v0 = vadd.f32 %v14337_v60, %v18373_v61  ;;  %14543 = vmatprep.mubr.msk.bf16.mxu0 %vm6736_vm7, %v13322_v25  ;;  %v14348_v50 = vpop.f32.mrf.mxu1  ;;  %v10382_v33 = vrot.slane %v10380_v53, 1  ;;  %v10244_v1 = vmul.bf16 %v10211_v6, %v21021_v8  ;;  %v13323_v61 = vcombine.low %v18296_v20, %v18319_v62  ;;  %v10213_v21 = vld [vmem:[#allocation3 + $0x58] sm:$0xf]  ;;  %v21023_v62 = vld [vmem:[#allocation55_spill] sm:$0xff]  ;;  %v21027_v8 = vld [vmem:[#allocation57_spill] sm:$0xff] }
 0x3a1   : > { %14553 = vmatprep.mubr.msk.bf16.mxu1 %vm6736_vm7, %v10375_v10  ;;  %v7366_v37 = vpop.f32.mrf.mxu0  ;;  %v18472_v52 = vadd.f32 %v14348_v50, %v21020_v44  ;;  %v10378_v25 = vor.u32 %v10376_v42, %v10374_v59  ;;  %v21022_v10 = vld [vmem:[#allocation77_spill] sm:$0xff]  ;;  %v10390_v50 = vrot.slane %v10388_v29, 1  ;;  %v10396_v20 = vshll.u32 %v13347_v41, 16  ;;  %v21024_v29 = vld [vmem:[#allocation54_spill] sm:$0xff] }
 0x3a2   : > { %v18476_v17 = vadd.f32 %v7366_v37, %v18382_v12  ;;  %v7768_v60 = vpop.f32.mrf.mxu1  ;;  %v18483_v44 = vcombine.low %v10244_v1, %v10245_v35  ;;  %v10216_v12 = vld [vmem:[#allocation3 + $0x64] sm:$0xf]  ;;  %v10386_v6 = vor.u32 %v10384_v34, %v10382_v33  ;;  %v10247_v59 = vmul.bf16 %v10214_v5, %v21023_v62  ;;  %v10215_v37 = vld [vmem:[#allocation3 + $0x60] sm:$0xf]  ;;  %v21025_v35 = vld [vmem:[#allocation58_spill] sm:$0xff] }
 0x3a3   : > { %v14338_v56 = vpop.f32.mrf.mxu0  ;;  %v18481_v22 = vadd.f32 %v7768_v60, %v21022_v10  ;;  %v10383_v42 = vsel %vm3131_vm6, %v10378_v25, %v10382_v33  ;;  %v10249_v34 = vmul.bf16 %v10216_v12, %v21025_v35  ;;  %v21026_v5 = vld [vmem:[#allocation81_spill] sm:$0xff]  ;;  %v10392_v25 = vshrl.u32 %v18440_v51, 16 }
 0x3a4   : > { %v18486_v53 = vadd.f32 %v14338_v56, %v18395_v28  ;;  %v10391_v1 = vsel %vm3131_vm6, %v10386_v6, %v10390_v50  ;;  %v10404_v28 = vshll.u32 %v18483_v44, 16  ;;  %v10246_v56 = vmul.bf16 %v10213_v21, %v21024_v29 }
 0x3a5   : > { %v18488_v18 = vpop.f32.mrf.mxu0  ;;  %v10398_v62 = vrot.slane %v10396_v20, 1  ;;  %v10248_v63 = vmul.bf16 %v10215_v37, %v21027_v8  ;;  %v10394_v12 = vor.u32 %v10392_v25, %v10390_v50  ;;  %v10400_v35 = vshrl.u32 %v13347_v41, 16  ;;  %v21028_v20 = vld [vmem:[#allocation62_spill] sm:$0xff]  ;;  %v21030_v8 = vld [vmem:[#allocation69_spill] sm:$0xff] }
 0x3a6   : > { %v13349_v6 = vcombine.low %v10246_v56, %v10247_v59  ;;  %v10406_v51 = vrot.slane %v10404_v28, 1  ;;  %v10217_v37 = vld [vmem:[#allocation3 + $0x68] sm:$0xf]  ;;  %v10219_v28 = vld [vmem:[#allocation3 + $0x70] sm:$0xf] }
 0x3a7   : > { %v14341_v60 = vpop.f32.mrf.mxu0  ;;  %14544 = vmatmul.mubr.msk.bf16.gmra.mxu0 %vm6736_vm7, %v13323_v61  ;;  %v14351_v26 = vpop.f32.mrf.mxu1  ;;  %v18513_v29 = vcombine.low %v10248_v63, %v10249_v34  ;;  %v10399_v63 = vsel %vm3131_vm6, %v10394_v12, %v10398_v62 }
 0x3a8   : > { %14554 = vmatmul.mubr.msk.bf16.gmra.mxu1 %vm6736_vm7, %v10383_v42  ;;  %v18499_v10 = vadd.f32 %v14341_v60, %v18408_v24  ;;  %v18502_v33 = vadd.f32 %v14351_v26, %v21026_v5  ;;  %v10218_v60 = vld [vmem:[#allocation3 + $0x6c] sm:$0xf]  ;;  %v10412_v25 = vshll.u32 %v13349_v6, 16 }
 0x3a9   : > { %14557 = vmatprep.mubr.msk.bf16.mxu1 %vm6736_vm7, %v10391_v1  ;;  %v7382_v61 = vpop.f32.mrf.mxu0  ;;  %v7781_v42 = vpop.f32.mrf.mxu1 }
 0x3aa   : > { %v18508_v21 = vadd.f32 %v7382_v61, %v18418_v14  ;;  %v18511_v24 = vadd.f32 %v7781_v42, %v18270_v32  ;;  %v10220_v14 = vld [vmem:[#allocation3 + $0x74] sm:$0xf]  ;;  %v10402_v32 = vor.u32 %v10400_v35, %v10398_v62  ;;  %v21029_v61 = vld [vmem:[#allocation60_spill] sm:$0xff]  ;;  %v21032_v35 = vld [vmem:[#allocation65_spill] sm:$0xff]  ;;  %v10408_v62 = vshrl.u32 %v18483_v44, 16 }
 0x3ab   : > { %v14342_v26 = vpop.f32.mrf.mxu0  ;;  %v14352_v5 = vpop.f32.mrf.mxu1  ;;  %v10251_v42 = vmul.bf16 %v10218_v60, %v21029_v61  ;;  %v10253_v36 = vmul.bf16 %v10220_v14, %v21032_v35  ;;  %v21033_v61 = vld [vmem:[#allocation64_spill] sm:$0xff]  ;;  %v10416_v35 = vshrl.u32 %v13349_v6, 16 }
 0x3ac   : > { %v18516_v1 = vadd.f32 %v14342_v26, %v18432_v38  ;;  %v18519_v59 = vadd.f32 %v14352_v5, %v21028_v20  ;;  %v10407_v26 = vsel %vm3131_vm6, %v10402_v32, %v10406_v51  ;;  %v10420_v5 = vshll.u32 %v18513_v29, 16  ;;  %v21031_v20 = vld [vmem:[#allocation59_spill] sm:$0xff] }
 0x3ad   : > { %v18521_v56 = vpop.f32.mrf.mxu0  ;;  %v7784_v50 = vpop.f32.mrf.mxu1  ;;  %v10250_v13 = vmul.bf16 %v10217_v37, %v21031_v20  ;;  %v10252_v15 = vmul.bf16 %v10219_v28, %v21033_v61  ;;  %v10410_v14 = vor.u32 %v10408_v62, %v10406_v51  ;;  %v21034_v62 = vld [vmem:[#allocation68_spill] sm:$0xff] }
 0x3ae   : > { %v18525_v41 = vadd.f32 %v7784_v50, %v21030_v8  ;;  %v10422_v44 = vrot.slane %v10420_v5, 1 }
 0x3af   : > { %v14381_v38 = vpop.f32.mrf.mxu0  ;;  %v14355_v34 = vpop.f32.mrf.mxu1  ;;  %v13351_v32 = vcombine.low %v10250_v13, %v10251_v42  ;;  %v18548_v20 = vcombine.low %v10252_v15, %v10253_v36  ;;  %v10223_v36 = vld [vmem:[#allocation3 + $0x80] sm:$0xf] }
 0x3b0   : > { %14558 = vmatmul.mubr.msk.bf16.gmra.mxu1 %vm6736_vm7, %v10399_v63  ;;  %v18534_v60 = vadd.f32 %v14381_v38, %v18450_v19  ;;  %v18537_v8 = vadd.f32 %v14355_v34, %v18309_v2  ;;  %v10414_v63 = vrot.slane %v10412_v25, 1  ;;  %v10222_v38 = vld [vmem:[#allocation3 + $0x7c] sm:$0xf]  ;;  %v10221_v25 = vld [vmem:[#allocation3 + $0x78] sm:$0xf]  ;;  %v10256_v11 = vmul.bf16 %v10223_v36, %v21039_v7 }
 0x3b1   : > { %14561 = vmatprep.mubr.msk.bf16.mxu1 %vm6736_vm7, %v10407_v26  ;;  %v8312_v12 = vpop.f32.mrf.mxu0  ;;  %v7797_v50 = vpop.f32.mrf.mxu1  ;;  %v10428_v28 = vshll.u32 %v13351_v32, 16 }
 0x3b2   : > { %v18543_v37 = vadd.f32 %v8312_v12, %v18461_v3  ;;  %v18546_v19 = vadd.f32 %v7797_v50, %v18323_v4  ;;  %v10224_v3 = vld [vmem:[#allocation3 + $0x84] sm:$0xf]  ;;  %v10418_v4 = vor.u32 %v10416_v35, %v10414_v63  ;;  %v10255_v12 = vmul.bf16 %v10222_v38, %v21034_v62  ;;  %v21035_v50 = vld [vmem:[#allocation94_spill] sm:$0xff] }
 0x3b3   : > { %v14382_v2 = vpop.f32.mrf.mxu0  ;;  %v14356_v34 = vpop.f32.mrf.mxu1  ;;  %v10415_v15 = vsel %vm3131_vm6, %v10410_v14, %v10414_v63  ;;  %v21038_v35 = vld [vmem:[#allocation74_spill] sm:$0xff]  ;;  %v10424_v63 = vshrl.u32 %v18513_v29, 16  ;;  %v10432_v29 = vshrl.u32 %v13351_v32, 16 }
 0x3b4   : > { %v18551_v26 = vadd.f32 %v14382_v2, %v18472_v52  ;;  %v18554_v13 = vadd.f32 %v14356_v34, %v18329_v30  ;;  %v10423_v30 = vsel %vm3131_vm6, %v10418_v4, %v10422_v44  ;;  %v10436_v2 = vshll.u32 %v18548_v20, 16  ;;  %v21037_v34 = vld [vmem:[#allocation66_spill] sm:$0xff] }
 0x3b5   : > { %v18556_v42 = vpop.f32.mrf.mxu0  ;;  %v7800_v51 = vpop.f32.mrf.mxu1  ;;  %v10254_v61 = vmul.bf16 %v10221_v25, %v21037_v34  ;;  %v10257_v48 = vmul.bf16 %v10224_v3, %v21038_v35  ;;  %v10226_v14 = vld [vmem:[#allocation3 + $0x8c] sm:$0xf]  ;;  %v10430_v4 = vrot.slane %v10428_v28, 1  ;;  %v10426_v3 = vor.u32 %v10424_v63, %v10422_v44  ;;  %v21041_v63 = vld [vmem:[#allocation76_spill] sm:$0xff] }
 0x3b6   : > { %v18560_v6 = vadd.f32 %v7800_v51, %v21035_v50  ;;  %v10438_v35 = vrot.slane %v10436_v2, 1  ;;  %v21040_v34 = vld [vmem:[#allocation78_spill] sm:$0xff] }
 0x3b7   : > { %v14385_v52 = vpop.f32.mrf.mxu0  ;;  %v13353_v62 = vcombine.low %v10254_v61, %v10255_v12  ;;  %v10259_v16 = vmul.bf16 %v10226_v14, %v21040_v34 }
 0x3b8   : > { %21036 = vst [vmem:[#allocation80_spill] sm:$0xff] %v18560_v6  ;;  %v14359_v5 = vpop.f32.mrf.mxu1  ;;  %14562 = vmatmul.mubr.msk.bf16.gmra.mxu1 %vm6736_vm7, %v10415_v15  ;;  %v18569_v38 = vadd.f32 %v14385_v52, %v18502_v33  ;;  %v10227_v6 = vld [vmem:[#allocation3 + $0x90] sm:$0xf] }
 0x3b9   : > { %v18572_v51 = vadd.f32 %v14359_v5, %v18354_v27  ;;  %14565 = vmatprep.mubr.msk.bf16.mxu1 %vm6736_vm7, %v10423_v30  ;;  %v8328_v50 = vpop.f32.mrf.mxu0  ;;  %v10225_v27 = vld [vmem:[#allocation3 + $0x88] sm:$0xf]  ;;  %v13354_v30 = vcombine.low %v10256_v11, %v10257_v48  ;;  %v10444_v36 = vshll.u32 %v13353_v62, 16  ;;  %v10431_v48 = vsel %vm3131_vm6, %v10426_v3, %v10430_v4  ;;  %v21042_v11 = vld [vmem:[#allocation88_spill] sm:$0xff] }
 0x3ba   : > { %v7813_v15 = vpop.f32.mrf.mxu1  ;;  %v18578_v25 = vadd.f32 %v8328_v50, %v18511_v24  ;;  %v10228_v24 = vld [vmem:[#allocation3 + $0x94] sm:$0xf]  ;;  %v10258_v50 = vmul.bf16 %v10225_v27, %v21041_v63  ;;  %v10260_v2 = vmul.bf16 %v10227_v6, %v21042_v11  ;;  %v10440_v27 = vshrl.u32 %v18548_v20, 16 }
 0x3bb   : > { %v18581_v33 = vadd.f32 %v7813_v15, %v18362_v47  ;;  %v14386_v52 = vpop.f32.mrf.mxu0  ;;  %v10434_v47 = vor.u32 %v10432_v29, %v10430_v4  ;;  %v10452_v15 = vshll.u32 %v13354_v30, 16  ;;  %v10446_v3 = vrot.slane %v10444_v36, 1 }
 0x3bc   : > { %v14360_v5 = vpop.f32.mrf.mxu1  ;;  %v18585_v61 = vadd.f32 %v14386_v52, %v18519_v59  ;;  %v13355_v52 = vcombine.low %v10258_v50, %v10259_v16 }
 0x3bd   : > { %v7907_v28 = vadd.f32 %v14360_v5, %v18369_v31  ;;  %v18588_v12 = vpop.f32.mrf.mxu0  ;;  %v10439_v31 = vsel %vm3131_vm6, %v10434_v47, %v10438_v35  ;;  %v21043_v5 = vld [vmem:[#allocation89_spill] sm:$0xff]  ;;  %v10442_v47 = vor.u32 %v10440_v27, %v10438_v35 }
 0x3be   : > { %v7816_v44 = vpop.f32.mrf.mxu1  ;;  %v10261_v29 = vmul.bf16 %v10228_v24, %v21043_v5  ;;  %v10460_v5 = vshll.u32 %v13355_v52, 16 }
 0x3bf   : > { %v18592_v32 = vadd.f32 %v7816_v44, %v18379_v57  ;;  %v14389_v14 = vpop.f32.mrf.mxu0  ;;  %v10229_v44 = vld [vmem:[#allocation3 + $0x98] sm:$0x1] }
 0x3c0   : > { %v14363_v59 = vpop.f32.mrf.mxu1  ;;  %14566 = vmatmul.mubr.msk.bf16.gmra.mxu1 %vm6736_vm7, %v10431_v48  ;;  %v18600_v34 = vadd.f32 %v14389_v14, %v18537_v8  ;;  %v10448_v8 = vshrl.u32 %v13353_v62, 16  ;;  %v10454_v14 = vrot.slane %v10452_v15, 1 }
 0x3c1   : > { %v7910_v57 = vadd.f32 %v14363_v59, %v18391_v9  ;;  %14569 = vmatprep.mubr.msk.bf16.mxu1 %vm6736_vm7, %v10439_v31  ;;  %v8344_v6 = vpop.f32.mrf.mxu0  ;;  %v13356_v9 = vcombine.low %v10260_v2, %v10261_v29  ;;  %v21044_v31 = vld [vmem:[#allocation85_spill] sm:$0xff]  ;;  %v10462_v2 = vrot.slane %v10460_v5, 1  ;;  %v10456_v29 = vshrl.u32 %v13354_v30, 16 }
 0x3c2   : > { %v7829_v4 = vpop.f32.mrf.mxu1  ;;  %v18606_v48 = vadd.f32 %v8344_v6, %v18546_v19  ;;  %v10262_v36 = vmul.bf16 %v10229_v44, %v21044_v31  ;;  %v10450_v35 = vor.u32 %v10448_v8, %v10446_v3 }
 0x3c3   : > { %v7908_v16 = vadd.f32 %v7829_v4, %v18399_v40  ;;  %v14390_v24 = vpop.f32.mrf.mxu0  ;;  %v10447_v40 = vsel %vm3131_vm6, %v10442_v47, %v10446_v3  ;;  %v10464_v3 = vshrl.u32 %v13355_v52, 16  ;;  %v10472_v30 = vshrl.u32 %v13356_v9, 16 }
 0x3c4   : > { %v14364_v50 = vpop.f32.mrf.mxu1  ;;  %v18610_v20 = vadd.f32 %v14390_v24, %v18554_v13  ;;  %v10455_v62 = vsel %vm3131_vm6, %v10450_v35, %v10454_v14  ;;  %v10468_v13 = vshll.u32 %v13356_v9, 16  ;;  %v13357_v4 = vcombine.low %v10262_v36, %v10262_v36  ;;  %v13408_v9 = vld [vmem:[%s20181_s7 + $0x4] sm:$0xf] }
 0x3c5   : > { %v7911_v59 = vadd.f32 %v14364_v50, %v18406_v45  ;;  %v18614_v11 = vpop.f32.mrf.mxu0  ;;  %v10458_v50 = vor.u32 %v10456_v29, %v10454_v14  ;;  %14735 = vmatprep.subr.msk.bf16.mxu0 %vm6785_vm0, %v13408_v9 }
 0x3c6   : > { %v18616_v19 = vpop.f32.mrf.mxu1 }
 0x3c7   : > { %v14393_v27 = vpop.f32.mrf.mxu0 }
 0x3c8   : > { %v14367_v6 = vpop.f32.mrf.mxu1  ;;  %14570 = vmatmul.mubr.msk.bf16.gmra.mxu1 %vm6736_vm7, %v10447_v40  ;;  %v18622_v15 = vadd.f32 %v14393_v27, %v18572_v51  ;;  %v10466_v40 = vor.u32 %v10464_v3, %v10462_v2  ;;  %v10470_v51 = vrot.slane %v10468_v13, 1 }
 0x3c9   : > { %v7914_v45 = vadd.f32 %v14367_v6, %v18427_v55  ;;  %14573 = vmatprep.mubr.msk.bf16.mxu1 %vm6736_vm7, %v10455_v62  ;;  %v8360_v44 = vpop.f32.mrf.mxu0  ;;  %v10476_v6 = vshll.u32 %v13357_v4, 16 }
 0x3ca   : > { %v7845_v24 = vpop.f32.mrf.mxu1  ;;  %v18627_v47 = vadd.f32 %v8360_v44, %v18581_v33  ;;  %v10463_v33 = vsel %vm3131_vm6, %v10458_v50, %v10462_v2  ;;  %v10474_v13 = vor.u32 %v10472_v30, %v10470_v51  ;;  %v11367_v44 = vsel %vm6785_vm0, %v13408_v9, 0 }
 0x3cb   : > { %v7912_v8 = vadd.f32 %v7845_v24, %v18436_v43  ;;  %v14394_v5 = vpop.f32.mrf.mxu0  ;;  %v10471_v43 = vsel %vm3131_vm6, %v10466_v40, %v10470_v51  ;;  %14582 = vmatpush3.bf16.msra.mxu0 %v11367_v44 }
 0x3cc   : > { %v14368_v35 = vpop.f32.mrf.mxu1  ;;  %v18630_v27 = vadd.f32 %v14394_v5, %v7907_v28 }
 0x3cd   : > { %v7915_v55 = vadd.f32 %v14368_v35, %v18443_v39  ;;  %v18633_v36 = vpop.f32.mrf.mxu0  ;;  %v10478_v39 = vrot.slane %v10476_v6, 1 }
 0x3ce   : > { %v18635_v62 = vpop.f32.mrf.mxu1 }
 0x3cf   : > { %v14397_v52 = vpop.f32.mrf.mxu0 }
 0x3d0   : > { %v14371_v14 = vpop.f32.mrf.mxu1  ;;  %14574 = vmatmul.mubr.msk.bf16.gmra.mxu1 %vm6736_vm7, %v10463_v33  ;;  %v18640_v29 = vadd.f32 %v14397_v52, %v7910_v57 }
 0x3d1   : > { %v7918_v28 = vadd.f32 %v14371_v14, %v18466_v0  ;;  %14577 = vmatprep.mubr.msk.bf16.mxu1 %vm6736_vm7, %v10471_v43  ;;  %v8376_v4 = vpop.f32.mrf.mxu0  ;;  %v11100_v0 = vld [vmem:[%s20181_s7] sm:$0xf] }
 0x3d2   : > { %v7861_v2 = vpop.f32.mrf.mxu1  ;;  %v18649_v24 = vadd.f32 %v8376_v4, %v7908_v16  ;;  %14736 = vmatprep.subr.msk.bf16.mxu1 %vm6785_vm0, %v11100_v0  ;;  %v11579_v5 = vsel %vm6785_vm0, %v11100_v0, 0  ;;  %v10479_v16 = vsel %vm3131_vm6, %v10474_v13, %v10478_v39 }
 0x3d3   : > { %v7916_v57 = vadd.f32 %v7861_v2, %v18476_v17  ;;  %v14398_v3 = vpop.f32.mrf.mxu0  ;;  %14616 = vmatpush3.bf16.msra.mxu1 %v11579_v5 }
 0x3d4   : > { %v14372_v50 = vpop.f32.mrf.mxu1  ;;  %v18657_v35 = vadd.f32 %v14398_v3, %v7911_v59 }
 0x3d5   : > { %v7919_v40 = vadd.f32 %v14372_v50, %v18486_v53  ;;  %v18661_v51 = vpop.f32.mrf.mxu0 }
 0x3d6   : > { %v18663_v17 = vpop.f32.mrf.mxu1 }
 0x3d7   : > { %v14401_v30 = vpop.f32.mrf.mxu0 }
 0x3d8   : > { %v14375_v6 = vpop.f32.mrf.mxu1  ;;  %14578 = vmatmul.mubr.msk.bf16.gmra.mxu1 %vm6736_vm7, %v10479_v16  ;;  %v18666_v33 = vadd.f32 %v14401_v30, %v7914_v45 }
 0x3d9   : > { %v7922_v52 = vadd.f32 %v14375_v6, %v18499_v10  ;;  %v8392_v14 = vpop.f32.mrf.mxu0 }
 0x3da   : > { %v7877_v59 = vpop.f32.mrf.mxu1  ;;  %v18669_v43 = vadd.f32 %v8392_v14, %v7912_v8 }
 0x3db   : > { %v7920_v53 = vadd.f32 %v7877_v59, %v18508_v21  ;;  %v14402_v13 = vpop.f32.mrf.mxu0 }
 0x3dc   : > { %v14376_v39 = vpop.f32.mrf.mxu1  ;;  %v18672_v9 = vadd.f32 %v14402_v13, %v7915_v55 }
 0x3dd   : > { %v7923_v4 = vadd.f32 %v14376_v39, %v18516_v1  ;;  %v18675_v2 = vpop.f32.mrf.mxu0 }
 0x3de   : > { %v18677_v44 = vpop.f32.mrf.mxu1 }
 0x3df   : > { %v14405_v45 = vpop.f32.mrf.mxu0 }
 0x3e0   : > { %v14415_v0 = vpop.f32.mrf.mxu1  ;;  %v18679_v3 = vadd.f32 %v14405_v45, %v7918_v28 }
 0x3e1   : > { %v18682_v10 = vadd.f32 %v14415_v0, %v18534_v60  ;;  %v8408_v8 = vpop.f32.mrf.mxu0 }
 0x3e2   : > { %v8638_v50 = vpop.f32.mrf.mxu1  ;;  %v18684_v21 = vadd.f32 %v8408_v8, %v7916_v57 }
 0x3e3   : > { %v18687_v55 = vadd.f32 %v8638_v50, %v18543_v37  ;;  %v14406_v5 = vpop.f32.mrf.mxu0 }
 0x3e4   : > { %v14416_v1 = vpop.f32.mrf.mxu1  ;;  %v18689_v16 = vadd.f32 %v14406_v5, %v7919_v40 }
 0x3e5   : > { %v18692_v30 = vadd.f32 %v14416_v1, %v18551_v26  ;;  %v18694_v6 = vpop.f32.mrf.mxu0 }
 0x3e6   : > { %v18696_v28 = vpop.f32.mrf.mxu1 }
 0x3e7   : > { %v14409_v60 = vpop.f32.mrf.mxu0 }
 0x3e8   : > { %v14419_v14 = vpop.f32.mrf.mxu1  ;;  %v18698_v59 = vadd.f32 %v14409_v60, %v7922_v52 }
 0x3e9   : > { %v18701_v57 = vadd.f32 %v14419_v14, %v18569_v38  ;;  %v8424_v37 = vpop.f32.mrf.mxu0 }
 0x3ea   : > { %v8654_v13 = vpop.f32.mrf.mxu1  ;;  %v18703_v39 = vadd.f32 %v8424_v37, %v7920_v53 }
 0x3eb   : > { %v18706_v40 = vadd.f32 %v8654_v13, %v18578_v25  ;;  %v14410_v26 = vpop.f32.mrf.mxu0 }
 0x3ec   : > { %v14420_v45 = vpop.f32.mrf.mxu1  ;;  %v18708_v0 = vadd.f32 %v14410_v26, %v7923_v4 }
 0x3ed   : > { %v18711_v8 = vadd.f32 %v14420_v45, %v18585_v61  ;;  %v18713_v50 = vpop.f32.mrf.mxu0 }
 0x3ee   : > { %v18715_v52 = vpop.f32.mrf.mxu1 }
 0x3ef   : > { %v18717_v38 = vpop.f32.mrf.mxu0 }
 0x3f0   : > { %v14423_v5 = vpop.f32.mrf.mxu1 }
 0x3f1   : > { %v18720_v53 = vadd.f32 %v14423_v5, %v18600_v34  ;;  %v18722_v1 = vpop.f32.mrf.mxu0 }
 0x3f2   : > { %v8670_v25 = vpop.f32.mrf.mxu1 }
 0x3f3   : > { %v18725_v60 = vadd.f32 %v8670_v25, %v18606_v48  ;;  %v18727_v4 = vpop.f32.mrf.mxu0 }
 0x3f4   : > { %v14424_v61 = vpop.f32.mrf.mxu1 }
 0x3f5   : > { %21045 = vst [vmem:[#allocation72_spill] sm:$0xff] %v18725_v60  ;;  %v18730_v14 = vadd.f32 %v14424_v61, %v18610_v20  ;;  %v18732_v37 = vpop.f32.mrf.mxu0 }
 0x3f6   : > { %v18734_v13 = vpop.f32.mrf.mxu1 }
 0x3f7   : > { %21046 = vst [vmem:[#allocation96_spill] sm:$0xff] %v18730_v14  ;;  %v18736_v26 = vpop.f32.mrf.mxu0 }
 0x3f8   : > { %v14427_v34 = vpop.f32.mrf.mxu1 }
 0x3f9   : > { %v18739_v45 = vadd.f32 %v14427_v34, %v18622_v15  ;;  %v18741_v5 = vpop.f32.mrf.mxu0 }
 0x3fa   : > { %v8686_v48 = vpop.f32.mrf.mxu1 }
 0x3fb   : > { %21047 = vst [vmem:[#allocation100_spill] sm:$0xff] %v18739_v45  ;;  %v18744_v25 = vadd.f32 %v8686_v48, %v18627_v47  ;;  %v18746_v31 = vpop.f32.mrf.mxu0 }
 0x3fc   : > { %v14428_v20 = vpop.f32.mrf.mxu1 }
 0x3fd   : > { %21048 = vst [vmem:[#allocation79_spill] sm:$0xff] %v18744_v25  ;;  %v18749_v61 = vadd.f32 %v14428_v20, %v18630_v27  ;;  %v18751_v63 = vpop.f32.mrf.mxu0 }
 0x3fe   : > { %v18753_v7 = vpop.f32.mrf.mxu1 }
 0x3ff   : > { %21049 = vst [vmem:[#allocation95_spill] sm:$0xff] %v18749_v61  ;;  %21050 = vst [vmem:[#allocation83_spill] sm:$0xff] %v18753_v7  ;;  %v18755_v14 = vpop.f32.mrf.mxu0 }
 0x400   : > { %v14431_v15 = vpop.f32.mrf.mxu1 }
 0x401   : > { %v18758_v34 = vadd.f32 %v14431_v15, %v18640_v29  ;;  %v18760_v45 = vpop.f32.mrf.mxu0 }
 0x402   : > { %v8702_v47 = vpop.f32.mrf.mxu1 }
 0x403   : > { %21051 = vst [vmem:[#allocation124_spill] sm:$0xff] %v18758_v34  ;;  %v18763_v48 = vadd.f32 %v8702_v47, %v18649_v24  ;;  %v18765_v25 = vpop.f32.mrf.mxu0 }
 0x404   : > { %v14432_v27 = vpop.f32.mrf.mxu1 }
 0x405   : > { %21052 = vst [vmem:[#allocation92_spill] sm:$0xff] %v18763_v48  ;;  %v18768_v20 = vadd.f32 %v14432_v27, %v18657_v35  ;;  %v18770_v61 = vpop.f32.mrf.mxu0 }
 0x406   : > { %v18772_v7 = vpop.f32.mrf.mxu1 }
 0x407   : > { %21053 = vst [vmem:[#allocation71_spill] sm:$0xff] %v18768_v20  ;;  %21054 = vst [vmem:[#allocation105_spill] sm:$0xff] %v18772_v7  ;;  %v18774_v60 = vpop.f32.mrf.mxu0 }
 0x408   : > { %21055 = vst [vmem:[#allocation101_spill] sm:$0xff] %v18774_v60  ;;  %v14435_v29 = vpop.f32.mrf.mxu1 }
 0x409   : > { %v18777_v15 = vadd.f32 %v14435_v29, %v18666_v33  ;;  %v18779_v34 = vpop.f32.mrf.mxu0 }
 0x40a   : > { %v8718_v24 = vpop.f32.mrf.mxu1 }
 0x40b   : > { %21056 = vst [vmem:[#allocation93_spill] sm:$0xff] %v18777_v15  ;;  %v18782_v47 = vadd.f32 %v8718_v24, %v18669_v43  ;;  %v18784_v48 = vpop.f32.mrf.mxu0 }
 0x40c   : > { %v14436_v35 = vpop.f32.mrf.mxu1 }
 0x40d   : > { %21057 = vst [vmem:[#allocation102_spill] sm:$0xff] %v18782_v47  ;;  %v18787_v27 = vadd.f32 %v14436_v35, %v18672_v9  ;;  %v18789_v20 = vpop.f32.mrf.mxu0  ;;  %v18806_v9 = vld [vmem:[%s20181_s7 + $0x8] sm:$0xf] }
 0x40e   : > { %v18791_v7 = vpop.f32.mrf.mxu1  ;;  %21061 = vst [vmem:[#allocation86_spill] sm:$0xff] %v18806_v9  ;;  %14737 = vmatprep.subr.msk.bf16.mxu0 %vm6785_vm0, %v18806_v9 }
 0x40f   : > { %21058 = vst [vmem:[#allocation97_spill] sm:$0xff] %v18787_v27  ;;  %v18793_v60 = vpop.f32.mrf.mxu0 }
 0x410   : > { %v14439_v33 = vpop.f32.mrf.mxu1 }
 0x411   : > { %v18796_v29 = vadd.f32 %v14439_v33, %v18679_v3  ;;  %v18798_v15 = vpop.f32.mrf.mxu0  ;;  %v18818_v33 = vld [vmem:[%s20181_s7 + $0xc] sm:$0xf] }
 0x412   : > { %v8734_v43 = vpop.f32.mrf.mxu1  ;;  %21064 = vst [vmem:[#allocation91_spill] sm:$0xff] %v18818_v33  ;;  %14738 = vmatprep.subr.msk.bf16.mxu1 %vm6785_vm0, %v18818_v33 }
 0x413   : > { %21059 = vst [vmem:[#allocation56_spill] sm:$0xff] %v18796_v29  ;;  %v18801_v24 = vadd.f32 %v8734_v43, %v18684_v21  ;;  %v18808_v35 = vpop.f32.mrf.mxu0 }
 0x414   : > { %21062 = vst [vmem:[#allocation106_spill] sm:$0xff] %v18808_v35  ;;  %v14440_v27 = vpop.f32.mrf.mxu1 }
 0x415   : > { %21060 = vst [vmem:[#allocation123_spill] sm:$0xff] %v18801_v24  ;;  %v18813_v3 = vadd.f32 %v14440_v27, %v18689_v16  ;;  %v18820_v21 = vpop.f32.mrf.mxu0 }
 0x416   : > { %21065 = vst [vmem:[#allocation112_spill] sm:$0xff] %v18820_v21  ;;  %v18822_v43 = vpop.f32.mrf.mxu1 }
 0x417   : > { %21063 = vst [vmem:[#allocation110_spill] sm:$0xff] %v18813_v3  ;;  %21066 = vst [vmem:[#allocation109_spill] sm:$0xff] %v18822_v43  ;;  %v18826_v24 = vpop.f32.mrf.mxu0 }
 0x418   : > { %21067 = vst [vmem:[#allocation118_spill] sm:$0xff] %v18826_v24  ;;  %v14443_v29 = vpop.f32.mrf.mxu1 }
 0x419   : > { %v18829_v47 = vadd.f32 %v14443_v29, %v18698_v59  ;;  %v18831_v16 = vpop.f32.mrf.mxu0 }
 0x41a   : > { %v8750_v27 = vpop.f32.mrf.mxu1 }
 0x41b   : > { %21068 = vst [vmem:[#allocation119_spill] sm:$0xff] %v18829_v47  ;;  %v18834_v3 = vadd.f32 %v8750_v27, %v18703_v39  ;;  %v18836_v9 = vpop.f32.mrf.mxu0 }
 0x41c   : > { %v14444_v21 = vpop.f32.mrf.mxu1 }
 0x41d   : > { %21069 = vst [vmem:[#allocation90_spill] sm:$0xff] %v18834_v3  ;;  %v18839_v43 = vadd.f32 %v14444_v21, %v18708_v0  ;;  %v18841_v35 = vpop.f32.mrf.mxu0 }
 0x41e   : > { %v18843_v33 = vpop.f32.mrf.mxu1 }
 0x41f   : > { %21070 = vst [vmem:[#allocation111_spill] sm:$0xff] %v18839_v43  ;;  %21071 = vst [vmem:[#allocation120_spill] sm:$0xff] %v18843_v33  ;;  %v18845_v24 = vpop.f32.mrf.mxu0 }
 0x420   : > { %21072 = vst [vmem:[#allocation126_spill] sm:$0xff] %v18845_v24  ;;  %v18847_v59 = vpop.f32.mrf.mxu1 }
 0x421   : > { %21073 = vst [vmem:[#allocation113_spill] sm:$0xff] %v18847_v59  ;;  %v18849_v29 = vpop.f32.mrf.mxu0 }
 0x422   : > { %21074 = vst [vmem:[#allocation125_spill] sm:$0xff] %v18849_v29  ;;  %v18851_v47 = vpop.f32.mrf.mxu1 }
 0x423   : > { %21075 = vst [vmem:[#allocation129_spill] sm:$0xff] %v18851_v47  ;;  %v18853_v39 = vpop.f32.mrf.mxu0 }
 0x424   : > { %21076 = vst [vmem:[#allocation131_spill] sm:$0xff] %v18853_v39  ;;  %v18855_v27 = vpop.f32.mrf.mxu1 }
 0x425   : > { %21077 = vst [vmem:[#allocation133_spill] sm:$0xff] %v18855_v27  ;;  %v18857_v3 = vpop.f32.mrf.mxu0 }
 0x426   : > { %21078 = vst [vmem:[#allocation132_spill] sm:$0xff] %v18857_v3  ;;  %v18859_v0 = vpop.f32.mrf.mxu1 }
 0x427   : > { %21079 = vst [vmem:[#allocation135_spill] sm:$0xff] %v18859_v0  ;;  %v18861_v21 = vpop.f32.mrf.mxu0 }
 0x428   : > { %21080 = vst [vmem:[#allocation134_spill] sm:$0xff] %v18861_v21  ;;  %v18863_v43 = vpop.f32.mrf.mxu1 }
 0x429   : > { %21081 = vst [vmem:[#allocation136_spill] sm:$0xff] %v18863_v43  ;;  %v18865_v33 = vpop.f32.mrf.mxu0 }
 0x42a   : > { %21082 = vst [vmem:[#allocation127_spill] sm:$0xff] %v18865_v33  ;;  %v18867_v24 = vpop.f32.mrf.mxu1 }
 0x42b   : > { %21083 = vst [vmem:[#allocation137_spill] sm:$0xff] %v18867_v24  ;;  %v18869_v59 = vpop.f32.mrf.mxu0 }
 0x42c   : > { %21084 = vst [vmem:[#allocation138_spill] sm:$0xff] %v18869_v59  ;;  %v18871_v29 = vpop.f32.mrf.mxu1 }
 0x42d   : > { %21085 = vst [vmem:[#allocation139_spill] sm:$0xff] %v18871_v29  ;;  %v18873_v47 = vpop.f32.mrf.mxu0 }
 0x42e   : > { %21086 = vst [vmem:[#allocation141_spill] sm:$0xff] %v18873_v47  ;;  %v18875_v39 = vpop.f32.mrf.mxu1 }
 0x42f   : > { %21087 = vst [vmem:[#allocation140_spill] sm:$0xff] %v18875_v39  ;;  %v18877_v27 = vpop.f32.mrf.mxu0 }
 0x430   : > { %21088 = vst [vmem:[#allocation130_spill] sm:$0xff] %v18877_v27  ;;  %v18879_v3 = vpop.f32.mrf.mxu1 }
 0x431   : > { %21089 = vst [vmem:[#allocation143_spill] sm:$0xff] %v18879_v3  ;;  %v18881_v0 = vpop.f32.mrf.mxu0 }
 0x432   : > { %21090 = vst [vmem:[#allocation142_spill] sm:$0xff] %v18881_v0  ;;  %v18883_v21 = vpop.f32.mrf.mxu1 }
 0x433   : > { %21091 = vst [vmem:[#allocation144_spill] sm:$0xff] %v18883_v21  ;;  %v18885_v43 = vpop.f32.mrf.mxu0 }
 0x434   : > { %21092 = vst [vmem:[#allocation145_spill] sm:$0xff] %v18885_v43  ;;  %v18887_v33 = vpop.f32.mrf.mxu1 }
 0x435   : > { %21093 = vst [vmem:[#allocation147_spill] sm:$0xff] %v18887_v33  ;;  %v18889_v24 = vpop.f32.mrf.mxu0 }
 0x436   : > { %21094 = vst [vmem:[#allocation146_spill] sm:$0xff] %v18889_v24  ;;  %v18891_v59 = vpop.f32.mrf.mxu1 }
 0x437   : > { %21095 = vst [vmem:[#allocation148_spill] sm:$0xff] %v18891_v59  ;;  %v18893_v29 = vpop.f32.mrf.mxu0 }
 0x438   : > { %21096 = vst [vmem:[#allocation149_spill] sm:$0xff] %v18893_v29  ;;  %v18895_v47 = vpop.f32.mrf.mxu1 }
 0x439   : > { %21097 = vst [vmem:[#allocation151_spill] sm:$0xff] %v18895_v47  ;;  %v18897_v39 = vpop.f32.mrf.mxu0 }
 0x43a   : > { %21098 = vst [vmem:[#allocation150_spill] sm:$0xff] %v18897_v39  ;;  %v18899_v27 = vpop.f32.mrf.mxu1 }
 0x43b   : > { %21099 = vst [vmem:[#allocation153_spill] sm:$0xff] %v18899_v27  ;;  %v18901_v3 = vpop.f32.mrf.mxu0 }
 0x43c   : > { %21100 = vst [vmem:[#allocation152_spill] sm:$0xff] %v18901_v3  ;;  %v18903_v0 = vpop.f32.mrf.mxu1 }
 0x43d   : > { %21101 = vst [vmem:[#allocation154_spill] sm:$0xff] %v18903_v0  ;;  %v18905_v21 = vpop.f32.mrf.mxu0 }
 0x43e   : > { %21102 = vst [vmem:[#allocation155_spill] sm:$0xff] %v18905_v21  ;;  %v18907_v43 = vpop.f32.mrf.mxu1 }
 0x43f   : > { %21103 = vst [vmem:[#allocation157_spill] sm:$0xff] %v18907_v43  ;;  %v18909_v33 = vpop.f32.mrf.mxu0 }
 0x440   : > { %21104 = vst [vmem:[#allocation156_spill] sm:$0xff] %v18909_v33  ;;  %v18911_v24 = vpop.f32.mrf.mxu1 }
 0x441   : > { %21105 = vst [vmem:[#allocation158_spill] sm:$0xff] %v18911_v24  ;;  %v18913_v59 = vpop.f32.mrf.mxu0  ;;  %v21114_v24 = vld [vmem:[#allocation70_spill] sm:$0xff] }
 0x442   : > { %21106 = vst [vmem:[#allocation159_spill] sm:$0xff] %v18913_v59  ;;  %v18915_v29 = vpop.f32.mrf.mxu1  ;;  %v7338_v59 = vadd.f32 %v18410_v23, %v21114_v24  ;;  %v8444_v23 = vadd.f32 %v18588_v12, %v18525_v41 }
 0x443   : > { %21107 = vst [vmem:[#allocation160_spill] sm:$0xff] %v18915_v29  ;;  %v18917_v47 = vpop.f32.mrf.mxu0  ;;  %v7354_v29 = vadd.f32 %v18447_v49, %v18364_v54 }
 0x444   : > { %v18919_v39 = vpop.f32.mrf.mxu1 }
 0x445   : > { %21108 = vst [vmem:[#allocation67_spill] sm:$0xff] %v18919_v39  ;;  %v18921_v27 = vpop.f32.mrf.mxu0  ;;  %v7370_v39 = vadd.f32 %v18488_v18, %v18401_v46  ;;  %v7913_v54 = vadd.f32 %v18635_v62, %v7354_v29 }
 0x446   : > { %21109 = vst [vmem:[#allocation84_spill] sm:$0xff] %v18921_v27  ;;  %v18923_v3 = vpop.f32.mrf.mxu1 }
 0x447   : > { %21110 = vst [vmem:[#allocation161_spill] sm:$0xff] %v18923_v3  ;;  %v18925_v0 = vpop.f32.mrf.mxu0  ;;  %v7386_v3 = vadd.f32 %v18521_v56, %v18438_v58  ;;  %v7917_v49 = vadd.f32 %v18663_v17, %v7370_v39  ;;  %v21115_v56 = vld [vmem:[#allocation80_spill] sm:$0xff]  ;;  %v8460_v12 = vadd.f32 %v18675_v2, %v7913_v54  ;;  %v8770_v17 = vadd.f32 %v18715_v52, %v8444_v23 }
 0x448   : > { %21111 = vst [vmem:[#allocation75_spill] sm:$0xff] %v18925_v0  ;;  %v18927_v21 = vpop.f32.mrf.mxu1  ;;  %v8448_v24 = vadd.f32 %v18614_v11, %v21115_v56  ;;  %v9294_v11 = vadd.f32 %v18717_v38, %v18682_v10  ;;  %v9298_v2 = vadd.f32 %v18736_v26, %v18701_v57  ;;  %v21116_v38 = vld [vmem:[#allocation72_spill] sm:$0xff] }
 0x449   : > { %21112 = vst [vmem:[#allocation99_spill] sm:$0xff] %v18927_v21  ;;  %v18929_v43 = vpop.f32.mrf.mxu0  ;;  %v8440_v21 = vadd.f32 %v18556_v42, %v18481_v22  ;;  %v7921_v46 = vadd.f32 %v18677_v44, %v7386_v3  ;;  %v8452_v22 = vadd.f32 %v18633_v36, %v18592_v32  ;;  %v9292_v32 = vadd.f32 %v18722_v1, %v18687_v55  ;;  %v21117_v1 = vld [vmem:[#allocation83_spill] sm:$0xff]  ;;  %v21125_v23 = vld [vmem:[#allocation92_spill] sm:$0xff] }
 0x44a   : > { %v18931_v33 = vpop.f32.mrf.mxu1  ;;  %v9295_v36 = vadd.f32 %v18727_v4, %v18692_v30  ;;  %v9297_v55 = vadd.f32 %v18751_v63, %v8770_v17  ;;  %v9302_v30 = vadd.f32 %v18755_v14, %v18720_v53  ;;  %v9300_v57 = vadd.f32 %v18760_v45, %v21116_v38  ;;  %v21122_v53 = vld [vmem:[#allocation79_spill] sm:$0xff]  ;;  %v21136_v38 = vld [vmem:[#allocation102_spill] sm:$0xff] }
 0x44b   : > { %21113 = vst [vmem:[#allocation107_spill] sm:$0xff] %v18931_v33  ;;  %v18941_v27 = vpop.f32.mrf.mxu0  ;;  %v7909_v33 = vadd.f32 %v18616_v19, %v7338_v59  ;;  %v8766_v41 = vadd.f32 %v18696_v28, %v8440_v21  ;;  %v8464_v19 = vadd.f32 %v18694_v6, %v7917_v49  ;;  %v8468_v62 = vadd.f32 %v18713_v50, %v7921_v46  ;;  %v21123_v45 = vld [vmem:[#allocation95_spill] sm:$0xff]  ;;  %v21127_v46 = vld [vmem:[#allocation106_spill] sm:$0xff] }
 0x44c   : > { %v18943_v0 = vpop.f32.mrf.mxu1  ;;  %v9296_v6 = vadd.f32 %v18741_v5, %v18706_v40  ;;  %v9299_v28 = vadd.f32 %v18746_v31, %v18711_v8  ;;  %v8774_v50 = vadd.f32 %v18734_v13, %v8448_v24  ;;  %v8778_v4 = vadd.f32 %v21117_v1, %v8452_v22  ;;  %v21118_v40 = vld [vmem:[#allocation96_spill] sm:$0xff]  ;;  %v21120_v13 = vld [vmem:[#allocation101_spill] sm:$0xff]  ;;  %v21126_v49 = vld [vmem:[#allocation71_spill] sm:$0xff] }
 0x44d   : > { %v18953_v18 = vpop.f32.mrf.mxu0  ;;  %v8456_v42 = vadd.f32 %v18661_v51, %v7909_v33  ;;  %v9293_v51 = vadd.f32 %v18732_v37, %v8766_v41  ;;  %v9303_v37 = vadd.f32 %v18765_v25, %v21118_v40  ;;  %v21119_v8 = vld [vmem:[#allocation100_spill] sm:$0xff]  ;;  %v21121_v5 = vld [vmem:[#allocation105_spill] sm:$0xff]  ;;  %v9304_v14 = vadd.f32 %v18779_v34, %v21122_v53  ;;  %v21128_v34 = vld [vmem:[#allocation86_spill] sm:$0xff] }
 0x44e   : > { %v18955_v58 = vpop.f32.mrf.mxu1  ;;  %v9301_v31 = vadd.f32 %v18770_v61, %v8774_v50  ;;  %v9306_v26 = vadd.f32 %v21120_v13, %v21119_v8  ;;  %v9307_v29 = vadd.f32 %v18784_v48, %v21123_v45  ;;  %v9305_v39 = vadd.f32 %v18789_v20, %v8778_v4  ;;  %v21124_v61 = vld [vmem:[#allocation124_spill] sm:$0xff]  ;;  %v21132_v41 = vld [vmem:[#allocation118_spill] sm:$0xff]  ;;  %v21134_v17 = vld [vmem:[#allocation91_spill] sm:$0xff] }
 0x44f   : > { %v18967_v44 = vpop.f32.mrf.mxu0  ;;  %v8782_v33 = vadd.f32 %v21121_v5, %v8456_v42  ;;  %v8786_v25 = vadd.f32 %v18791_v7, %v8460_v12  ;;  %v9310_v21 = vadd.f32 %v18793_v60, %v21124_v61  ;;  %v9308_v54 = vadd.f32 %v18798_v15, %v21125_v23  ;;  %v21130_v20 = vld [vmem:[#allocation112_spill] sm:$0xff]  ;;  %v21131_v7 = vld [vmem:[#allocation93_spill] sm:$0xff]  ;;  %v21140_v45 = vld [vmem:[#allocation126_spill] sm:$0xff] }
 0x450   : > { %v18969_v3 = vpop.f32.mrf.mxu1  ;;  %v9311_v56 = vadd.f32 %v21127_v46, %v21126_v49  ;;  %v19023_v48 = vsel %vm6785_vm0, %v21128_v34, 0  ;;  %v19030_v60 = vadd.f32 %v21132_v41, %v21131_v7  ;;  %v21133_v12 = vld [vmem:[#allocation109_spill] sm:$0xff]  ;;  %v19035_v50 = vsel %vm6785_vm0, %v21134_v17, 0  ;;  %v21138_v13 = vld [vmem:[#allocation120_spill] sm:$0xff]  ;;  %v21141_v23 = vld [vmem:[#allocation123_spill] sm:$0xff] }
 0x451   : > { %v18985_v10 = vpop.f32.mrf.mxu0  ;;  %21129 = vst [vmem:[#allocation108_spill] sm:$0xff] %v19023_v48  ;;  %v19026_v42 = vadd.f32 %v21130_v20, %v8782_v33  ;;  %v8790_v15 = vadd.f32 %v21133_v12, %v8464_v19  ;;  %21135 = vst [vmem:[#allocation114_spill] sm:$0xff] %v19035_v50  ;;  %v19039_v1 = vadd.f32 %v18831_v16, %v21136_v38  ;;  %v21137_v4 = vld [vmem:[#allocation97_spill] sm:$0xff]  ;;  %v21139_v53 = vld [vmem:[#allocation56_spill] sm:$0xff] }
 0x452   : > { %v18987_v52 = vpop.f32.mrf.mxu1  ;;  %v19043_v40 = vadd.f32 %v18836_v9, %v21137_v4  ;;  %v19046_v8 = vadd.f32 %v18841_v35, %v8786_v25  ;;  %v8794_v5 = vadd.f32 %v21138_v13, %v8468_v62  ;;  %v19055_v61 = vadd.f32 %v21140_v45, %v21139_v53  ;;  %v21142_v16 = vld [vmem:[#allocation125_spill] sm:$0xff]  ;;  %v21145_v35 = vld [vmem:[#allocation110_spill] sm:$0xff]  ;;  %v21146_v25 = vld [vmem:[#allocation131_spill] sm:$0xff] }
 0x453   : > { %v19001_v59 = vpop.f32.mrf.mxu0  ;;  %v19059_v49 = vadd.f32 %v21142_v16, %v21141_v23  ;;  %v21143_v46 = vld [vmem:[#allocation113_spill] sm:$0xff]  ;;  %v19065_v7 = vadd.f32 %v21146_v25, %v21145_v35  ;;  %v21147_v62 = vld [vmem:[#allocation132_spill] sm:$0xff]  ;;  %v21149_v38 = vld [vmem:[#allocation135_spill] sm:$0xff] }
 0x454   : > { %v19003_v63 = vpop.f32.mrf.mxu1  ;;  %v9841_v9 = vadd.f32 %v21143_v46, %v9294_v11  ;;  %v21144_v34 = vld [vmem:[#allocation129_spill] sm:$0xff]  ;;  %v19068_v41 = vadd.f32 %v21147_v62, %v8790_v15  ;;  %v9840_v4 = vadd.f32 %v21149_v38, %v9293_v51  ;;  %v21152_v45 = vld [vmem:[#allocation119_spill] sm:$0xff]  ;;  %v21153_v23 = vld [vmem:[#allocation134_spill] sm:$0xff] }
 0x455   : > { %v19017_v24 = vpop.f32.mrf.mxu0  ;;  %v9839_v20 = vadd.f32 %v21144_v34, %v9292_v32  ;;  %v21148_v12 = vld [vmem:[#allocation133_spill] sm:$0xff]  ;;  %v19078_v11 = vadd.f32 %v21153_v23, %v21152_v45  ;;  %v21154_v32 = vld [vmem:[#allocation90_spill] sm:$0xff]  ;;  %v21155_v16 = vld [vmem:[#allocation127_spill] sm:$0xff] }
 0x456   : > { %v19019_v22 = vpop.f32.mrf.mxu1  ;;  %v9842_v17 = vadd.f32 %v21148_v12, %v9295_v36  ;;  %v19082_v46 = vadd.f32 %v21155_v16, %v21154_v32  ;;  %v21157_v34 = vld [vmem:[#allocation136_spill] sm:$0xff]  ;;  %v21158_v15 = vld [vmem:[#allocation137_spill] sm:$0xff]  ;;  %v21159_v62 = vld [vmem:[#allocation111_spill] sm:$0xff] }
 0x457   : > { %v19049_v33 = vpop.f32.mrf.mxu0  ;;  %v9845_v35 = vadd.f32 %v21157_v34, %v9298_v2  ;;  %v9843_v25 = vadd.f32 %v21158_v15, %v9296_v6  ;;  %v21160_v36 = vld [vmem:[#allocation138_spill] sm:$0xff]  ;;  %v21162_v51 = vld [vmem:[#allocation141_spill] sm:$0xff]  ;;  %v21164_v48 = vld [vmem:[#allocation139_spill] sm:$0xff] }
 0x458   : > { %v19051_v19 = vpop.f32.mrf.mxu1  ;;  %21156 = vst [vmem:[#allocation116_spill] sm:$0xff] %v19082_v46  ;;  %v19088_v12 = vadd.f32 %v21160_v36, %v21159_v62  ;;  %v19091_v38 = vadd.f32 %v21162_v51, %v8794_v5  ;;  %v9846_v50 = vadd.f32 %v21164_v48, %v9299_v28  ;;  %v21168_v32 = vld [vmem:[#allocation130_spill] sm:$0xff]  ;;  %v21170_v6 = vld [vmem:[#allocation143_spill] sm:$0xff]  ;;  %v21171_v46 = vld [vmem:[#allocation144_spill] sm:$0xff] }
 0x459   : > { %v19072_v13 = vpop.f32.mrf.mxu0  ;;  %v10167_v16 = vadd.f32 %v21168_v32, %v9841_v9  ;;  %v21169_v2 = vld [vmem:[#allocation142_spill] sm:$0xff]  ;;  %v9849_v15 = vadd.f32 %v21170_v6, %v9302_v30  ;;  %v9847_v62 = vadd.f32 %v21171_v46, %v9300_v57  ;;  %v21172_v36 = vld [vmem:[#allocation145_spill] sm:$0xff]  ;;  %v21175_v48 = vld [vmem:[#allocation148_spill] sm:$0xff] }
 0x45a   : > { %21150 = vst [vmem:[#allocation115_spill] sm:$0xff] %v19072_v13  ;;  %v19074_v53 = vpop.f32.mrf.mxu1  ;;  %21161 = vst [vmem:[#allocation122_spill] sm:$0xff] %v19088_v12  ;;  %v10165_v34 = vadd.f32 %v21169_v2, %v9839_v20  ;;  %v10168_v12 = vadd.f32 %v21172_v36, %v9842_v17  ;;  %v21173_v5 = vld [vmem:[#allocation146_spill] sm:$0xff]  ;;  %v21178_v30 = vld [vmem:[#allocation151_spill] sm:$0xff] }
 0x45b   : > { %21151 = vst [vmem:[#allocation104_spill] sm:$0xff] %v19074_v53  ;;  %21163 = vst [vmem:[#allocation61_spill] sm:$0xff] %v19091_v38  ;;  %v21165_v53 = vld [vmem:[#allocation140_spill] sm:$0xff]  ;;  %v19095_v23 = vpop.f32.mrf.mxu0  ;;  %v10166_v51 = vadd.f32 %v21173_v5, %v9840_v4  ;;  %v21174_v38 = vld [vmem:[#allocation147_spill] sm:$0xff]  ;;  %v9853_v2 = vadd.f32 %v21178_v30, %v9306_v26 }
 0x45c   : > { %v9844_v45 = vadd.f32 %v21165_v53, %v9297_v55  ;;  %21166 = vst [vmem:[#allocation103_spill] sm:$0xff] %v19095_v23  ;;  %v19097_v13 = vpop.f32.mrf.mxu1  ;;  %v9850_v28 = vadd.f32 %v21174_v38, %v9303_v37  ;;  %v9848_v55 = vadd.f32 %v21175_v48, %v9301_v31  ;;  %v21177_v32 = vld [vmem:[#allocation150_spill] sm:$0xff]  ;;  %v21179_v57 = vld [vmem:[#allocation153_spill] sm:$0xff]  ;;  %v21180_v17 = vld [vmem:[#allocation152_spill] sm:$0xff] }
 0x45d   : > { %21167 = vst [vmem:[#allocation87_spill] sm:$0xff] %v19097_v13  ;;  %v19107_v53 = vpop.f32.mrf.mxu0  ;;  %v21176_v13 = vld [vmem:[#allocation149_spill] sm:$0xff]  ;;  %v19113_v20 = vadd.f32 %v21177_v32, %v9843_v25  ;;  %v9851_v46 = vadd.f32 %v21179_v57, %v9304_v14  ;;  %v19118_v6 = vadd.f32 %v21180_v17, %v9846_v50  ;;  %v21181_v4 = vld [vmem:[#allocation155_spill] sm:$0xff]  ;;  %v21182_v31 = vld [vmem:[#allocation154_spill] sm:$0xff] }
 0x45e   : > { %v19109_v23 = vpop.f32.mrf.mxu1  ;;  %v10171_v9 = vadd.f32 %v21176_v13, %v9845_v35  ;;  %v19121_v37 = vadd.f32 %v21181_v4, %v9844_v45  ;;  %v9854_v38 = vadd.f32 %v21182_v31, %v9307_v29  ;;  %v21183_v36 = vld [vmem:[#allocation157_spill] sm:$0xff]  ;;  %v21185_v26 = vld [vmem:[#allocation156_spill] sm:$0xff]  ;;  %v21186_v50 = vld [vmem:[#allocation159_spill] sm:$0xff]  ;;  %v19140_v29 = vadd.f32 %v18917_v47, %v9850_v28 }
 0x45f   : > { %v9852_v5 = vadd.f32 %v21183_v36, %v9305_v39  ;;  %v19125_v48 = vpop.f32.mrf.mxu0  ;;  %v19130_v35 = vld [vmem:[%s20179_s5] ss:$0 sm:$0xff]  ;;  %v19133_v14 = vadd.f32 %v21185_v26, %v9849_v15  ;;  %v19136_v25 = vadd.f32 %v21186_v50, %v9847_v62  ;;  %v21187_v45 = vld [vmem:[#allocation158_spill] sm:$0xff]  ;;  %v21188_v39 = vld [vmem:[#allocation84_spill] sm:$0xff] }
 0x460   : > { %21184 = vst [vmem:[#allocation98_spill] sm:$0xff] %v19125_v48  ;;  %v14551_v13 = vpop.f32.mrf.mxu1  ;;  %v9857_v32 = vadd.f32 %v21187_v45, %v9310_v21  ;;  %v19143_v57 = vadd.f32 %v21188_v39, %v9848_v55  ;;  %v21189_v17 = vld [vmem:[#allocation160_spill] sm:$0xff]  ;;  %v21190_v31 = vld [vmem:[#allocation67_spill] sm:$0xff]  ;;  %v19152_v15 = vld [vmem:[%s20180_s6] ss:$0 sm:$0xff] }
 0x461   : > { %v10694_v30 = vadd.f32 %v14551_v13, %v10167_v16  ;;  %v9855_v4 = vadd.f32 %v21189_v17, %v9308_v54  ;;  %v9858_v36 = vadd.f32 %v21190_v31, %v9311_v56  ;;  %v19147_v48 = vpop.f32.mrf.mxu0  ;;  %v21191_v21 = vld [vmem:[#allocation75_spill] sm:$0xff]  ;;  %v21192_v47 = vld [vmem:[#allocation161_spill] sm:$0xff]  ;;  %v19161_v54 = vadd.f32 %v18929_v43, %v9851_v46 }
 0x462   : > { %v10565_v62 = vpop.f32.mrf.mxu1  ;;  %v19155_v16 = vadd.f32 %v21191_v21, %v9853_v2  ;;  %v9856_v28 = vadd.f32 %v21192_v47, %v19026_v42  ;;  %v19164_v56 = vadd.f32 %v18941_v27, %v9854_v38  ;;  %v21193_v26 = vld [vmem:[#allocation99_spill] sm:$0xff]  ;;  %v9862_v42 = vadd.f32 %v18943_v0, %v19043_v40 }
 0x463   : > { %v10733_v55 = vmul.f32 %v19130_v35, %v10694_v30  ;;  %v10692_v13 = vadd.f32 %v10565_v62, %v10165_v34  ;;  %v9861_v50 = vadd.f32 %v21193_v26, %v19030_v60  ;;  %v21194_v45 = vld [vmem:[#allocation107_spill] sm:$0xff]  ;;  %v19170_v2 = vpop.f32.mrf.mxu0  ;;  %v19177_v27 = vadd.f32 %v18953_v18, %v9852_v5 }
 0x464   : > { %v9859_v39 = vadd.f32 %v21194_v45, %v19039_v1  ;;  %v14552_v17 = vpop.f32.mrf.mxu1  ;;  %v19180_v38 = vadd.f32 %v18967_v44, %v9857_v32  ;;  %v9860_v60 = vadd.f32 %v18955_v58, %v19046_v8  ;;  %v9865_v1 = vadd.f32 %v18969_v3, %v19055_v61  ;;  %v21195_v47 = vld [vmem:[#allocation115_spill] sm:$0xff]  ;;  %v21199_v45 = vld [vmem:[#allocation122_spill] sm:$0xff] }
 0x465   : > { %v10772_v34 = vadd.f32 %v19152_v15, %v10733_v55  ;;  %v10731_v43 = vmul.f32 %v19130_v35, %v10692_v13  ;;  %v10695_v46 = vadd.f32 %v14552_v17, %v10168_v12  ;;  %v19187_v0 = vadd.f32 %v18985_v10, %v9855_v4  ;;  %v19189_v40 = vpop.f32.mrf.mxu0  ;;  %v21197_v55 = vld [vmem:[#allocation104_spill] sm:$0xff]  ;;  %v21198_v26 = vld [vmem:[#allocation103_spill] sm:$0xff] }
 0x466   : > { %v10568_v30 = vpop.f32.mrf.mxu1  ;;  %v19196_v44 = vadd.f32 %v19001_v59, %v9858_v36  ;;  %v9863_v58 = vadd.f32 %v18987_v52, %v19059_v49  ;;  %v9866_v3 = vadd.f32 %v19003_v63, %v19065_v7  ;;  %v19203_v61 = vadd.f32 %v19017_v24, %v9856_v28  ;;  %v21196_v28 = vld [vmem:[#allocation116_spill] sm:$0xff] }
 0x467   : > { %v19191_v31 = vmax.f32 %v10772_v34, 0.0  ;;  %v10770_v18 = vadd.f32 %v19152_v15, %v10731_v43  ;;  %v10734_v12 = vmul.f32 %v19130_v35, %v10695_v46  ;;  %v10693_v8 = vadd.f32 %v10568_v30, %v10166_v51  ;;  %v14545_v51 = vpop.f32.mrf.mxu0 }
 0x468   : > { %v14555_v10 = vpop.f32.mrf.mxu1  ;;  %v19209_v59 = vadd.f32 %v19049_v33, %v9861_v50  ;;  %v9864_v52 = vadd.f32 %v19019_v22, %v19068_v41  ;;  %v9869_v24 = vadd.f32 %v19051_v19, %v19078_v11  ;;  %v19219_v33 = vadd.f32 %v21195_v47, %v9859_v39  ;;  %v21200_v39 = vld [vmem:[#allocation87_spill] sm:$0xff] }
 0x469   : > { %v13565_v5 = vpack.c.bf16 %v19191_v31, %v19191_v31  ;;  %v10802_v32 = vmax.f32 %v10770_v18, 0.0  ;;  %v10773_v4 = vadd.f32 %v19152_v15, %v10734_v12  ;;  %v10732_v49 = vmul.f32 %v19130_v35, %v10693_v8 }
 0x46a   : > { %v10698_v63 = vadd.f32 %v14555_v10, %v10171_v9  ;;  %v10581_v7 = vpop.f32.mrf.mxu1  ;;  %v9867_v22 = vadd.f32 %v21197_v55, %v21196_v28  ;;  %v19226_v19 = vadd.f32 %v21198_v26, %v9862_v42  ;;  %v9870_v17 = vadd.f32 %v21200_v39, %v21199_v45  ;;  %v21201_v42 = vld [vmem:[#allocation61_spill] sm:$0xff]  ;;  %v21204_v26 = vld [vmem:[#allocation114_spill] sm:$0xff]  ;;  %v21206_v39 = vld [vmem:[#allocation40_spill] sm:$0xff] }
 0x46b   : > { %10968 = vst.msk [vmem:[#allocation4 + $0x18] sm:$0xf] %vm6418_vm2, %v13565_v5  ;;  %v13563_v36 = vpack.c.bf16 %v10802_v32, %v10802_v32  ;;  %v10805_v62 = vmax.f32 %v10773_v4, 0.0  ;;  %v10696_v21 = vadd.f32 %v10581_v7, %v19113_v20  ;;  %v10771_v41 = vadd.f32 %v19152_v15, %v10732_v49 }
 0x46c   : > { %v10737_v9 = vmul.f32 %v19130_v35, %v10698_v63  ;;  %v14556_v13 = vpop.f32.mrf.mxu1  ;;  %v19236_v18 = vadd.f32 %v19107_v53, %v9860_v60  ;;  %v19240_v12 = vadd.f32 %v19109_v23, %v21201_v42  ;;  %v21202_v53 = vld [vmem:[#allocation98_spill] sm:$0xff]  ;;  %v19273_v55 = vadd.f32 %v14545_v51, %v9869_v24 }
 0x46d   : > { %10966 = vst.msk [vmem:[#allocation4 + $0x10] sm:$0xf] %vm6418_vm2, %v13563_v36  ;;  %v10839_v11 = vpack.c.bf16 %v10805_v62, %v19191_v31  ;;  %v13566_v50 = vpack.c.bf16 %v10805_v62, %v10805_v62  ;;  %v10735_v20 = vmul.f32 %v19130_v35, %v10696_v21  ;;  %v10803_v34 = vmax.f32 %v10771_v41, 0.0  ;;  %v10150_v31 = vpop.f32.mrf.mxu0 }
 0x46e   : > { %v10776_v43 = vadd.f32 %v19152_v15, %v10737_v9  ;;  %v10699_v46 = vadd.f32 %v14556_v13, %v19118_v6  ;;  %v10584_v30 = vpop.f32.mrf.mxu1  ;;  %v19249_v60 = vadd.f32 %v21202_v53, %v9865_v1  ;;  %v19254_v62 = vadd.f32 %v19147_v48, %v9863_v58 }
 0x46f   : > { %10969 = vst.msk [vmem:[#allocation4 + $0x1c] sm:$0xf] %vm6418_vm2, %v13566_v50  ;;  %v10774_v8 = vadd.f32 %v19152_v15, %v10735_v20  ;;  %v10697_v10 = vadd.f32 %v10584_v30, %v19121_v37  ;;  %v10838_v5 = vpack.c.bf16 %v10803_v34, %v10802_v32  ;;  %v13564_v4 = vpack.c.bf16 %v10803_v34, %v10803_v34  ;;  %v14546_v47 = vpop.f32.mrf.mxu0 }
 0x470   : > { %v19245_v49 = vmax.f32 %v10776_v43, 0.0  ;;  %v10738_v6 = vmul.f32 %v19130_v35, %v10699_v46  ;;  %v14559_v63 = vpop.f32.mrf.mxu1  ;;  %v19257_v37 = vadd.f32 %v19170_v2, %v9866_v3  ;;  %v19271_v3 = vadd.f32 %v19189_v40, %v9864_v52 }
 0x471   : > { %v10806_v7 = vmax.f32 %v10774_v8, 0.0  ;;  %v10736_v23 = vmul.f32 %v19130_v35, %v10697_v10  ;;  %v10702_v36 = vadd.f32 %v14559_v63, %v19133_v14  ;;  %10967 = vst.msk [vmem:[#allocation4 + $0x14] sm:$0xf] %vm6418_vm2, %v13564_v4  ;;  %14617 = vmatprep.mubr.msk.bf16.mxu1 %vm6736_vm7, %v10838_v5  ;;  %v19275_v41 = vadd.f32 %v10150_v31, %v9867_v22  ;;  %v10153_v31 = vpop.f32.mrf.mxu0  ;;  %v21207_v10 = vld [vmem:[#allocation38_spill] sm:$0xff]  ;;  %v21208_v4 = vld [vmem:[#allocation41_spill] sm:$0xff] }
 0x472   : > { %v13569_v32 = vpack.c.bf16 %v19245_v49, %v19245_v49  ;;  %v10777_v21 = vadd.f32 %v19152_v15, %v10738_v6  ;;  %v10597_v1 = vpop.f32.mrf.mxu1  ;;  %14618 = vmatmul.mubr.msk.bf16.vlgmr.msra.gmra.mxu1 %vm6736_vm7, %v10839_v11  ;;  %v19268_v2 = vld [vmem:[#allocation4 + $0x18] sm:$0xf]  ;;  %v19283_v24 = vadd.f32 %v14546_v47, %v9870_v17 }
 0x473   : > { %v13567_v28 = vpack.c.bf16 %v10806_v7, %v10806_v7  ;;  %v10775_v14 = vadd.f32 %v19152_v15, %v10736_v23  ;;  %v10741_v48 = vmul.f32 %v19130_v35, %v10702_v36  ;;  %v10700_v58 = vadd.f32 %v10597_v1, %v19136_v25  ;;  %21203 = vst [vmem:[#allocation37_spill] sm:$0xff] %v19268_v2 }
 0x474   : > { %10972 = vst.msk [vmem:[#allocation4 + $0x28] sm:$0xf] %vm6418_vm2, %v13569_v32  ;;  %v10809_v9 = vmax.f32 %v10777_v21, 0.0  ;;  %v14560_v13 = vpop.f32.mrf.mxu1  ;;  %14684 = vmatpush3.bf16.msra.mxu1 %v21204_v26  ;;  %v10998_v52 = vld [vmem:[#allocation4 + $0x10] sm:$0xf]  ;;  %v11033_v34 = vmul.bf16 %v19268_v2, %v21206_v39 }
 0x475   : > { %10970 = vst.msk [vmem:[#allocation4 + $0x20] sm:$0xf] %vm6418_vm2, %v13567_v28  ;;  %v10807_v25 = vmax.f32 %v10775_v14, 0.0  ;;  %v10780_v11 = vadd.f32 %v19152_v15, %v10741_v48  ;;  %v10739_v50 = vmul.f32 %v19130_v35, %v10700_v58  ;;  %v10703_v40 = vadd.f32 %v14560_v13, %v19140_v29  ;;  %v21209_v21 = vld [vmem:[#allocation39_spill] sm:$0xff] }
 0x476   : > { %v10841_v51 = vpack.c.bf16 %v10809_v9, %v19245_v49  ;;  %v13570_v22 = vpack.c.bf16 %v10809_v9, %v10809_v9  ;;  %v10600_v20 = vpop.f32.mrf.mxu1  ;;  %v19286_v45 = vld [vmem:[#allocation4 + $0x1c] sm:$0xf]  ;;  %v11031_v5 = vmul.bf16 %v10998_v52, %v21207_v10  ;;  %v19312_v28 = vadd.f32 %v10153_v31, %v19240_v12 }
 0x477   : > { %21205 = vst [vmem:[#allocation121_spill] sm:$0xff] %v19286_v45  ;;  %v10840_v43 = vpack.c.bf16 %v10807_v25, %v10806_v7  ;;  %v13568_v46 = vpack.c.bf16 %v10807_v25, %v10807_v25  ;;  %v19290_v30 = vmax.f32 %v10780_v11, 0.0  ;;  %v10778_v42 = vadd.f32 %v19152_v15, %v10739_v50 }
 0x478   : > { %10973 = vst.msk [vmem:[#allocation4 + $0x2c] sm:$0xf] %vm6418_vm2, %v13570_v22  ;;  %v10742_v29 = vmul.f32 %v19130_v35, %v10703_v40  ;;  %v10701_v17 = vadd.f32 %v10600_v20, %v19143_v57  ;;  %v14563_v8 = vpop.f32.mrf.mxu1  ;;  %v11034_v49 = vmul.bf16 %v19286_v45, %v21208_v4  ;;  %v10999_v7 = vld [vmem:[#allocation4 + $0x14] sm:$0xf]  ;;  %v11067_v25 = vmul.bf16 %v19268_v2, %v21207_v10  ;;  %v21230_v57 = vld [vmem:[#allocation60_spill] sm:$0xff] }
 0x479   : > { %10971 = vst.msk [vmem:[#allocation4 + $0x24] sm:$0xf] %vm6418_vm2, %v13568_v46  ;;  %v13573_v6 = vpack.c.bf16 %v19290_v30, %v19290_v30  ;;  %v10810_v63 = vmax.f32 %v10778_v42, 0.0  ;;  %v10706_v53 = vadd.f32 %v14563_v8, %v19155_v16  ;;  %14621 = vmatprep.mubr.msk.bf16.mxu1 %vm6736_vm7, %v10840_v43  ;;  %v11032_v1 = vmul.bf16 %v10999_v7, %v21209_v21 }
 0x47a   : > { %v10781_v23 = vadd.f32 %v19152_v15, %v10742_v29  ;;  %v10740_v36 = vmul.f32 %v19130_v35, %v10701_v17  ;;  %v10613_v32 = vpop.f32.mrf.mxu1  ;;  %v19309_v47 = vcombine.low %v11033_v34, %v11034_v49  ;;  %14622 = vmatmul.mubr.msk.bf16.gmra.mxu1 %vm6736_vm7, %v10841_v51 }
 0x47b   : > { %10976 = vst.msk [vmem:[#allocation4 + $0x38] sm:$0xf] %vm6418_vm2, %v13573_v6  ;;  %v13571_v16 = vpack.c.bf16 %v10810_v63, %v10810_v63  ;;  %v10745_v14 = vmul.f32 %v19130_v35, %v10706_v53  ;;  %v10704_v48 = vadd.f32 %v10613_v32, %v19161_v54  ;;  %v13409_v26 = vcombine.low %v11031_v5, %v11032_v1 }
 0x47c   : > { %v10813_v58 = vmax.f32 %v10781_v23, 0.0  ;;  %v10779_v9 = vadd.f32 %v19152_v15, %v10740_v36  ;;  %v14564_v13 = vpop.f32.mrf.mxu1  ;;  %v11068_v54 = vmul.bf16 %v19286_v45, %v21209_v21  ;;  %v11194_v20 = vshll.u32 %v19309_v47, 16  ;;  %v19340_v53 = vld [vmem:[#allocation4 + $0x20] sm:$0xf] }
 0x47d   : > { %10974 = vst.msk [vmem:[#allocation4 + $0x30] sm:$0xf] %vm6418_vm2, %v13571_v16  ;;  %v10784_v12 = vadd.f32 %v19152_v15, %v10745_v14  ;;  %v10743_v11 = vmul.f32 %v19130_v35, %v10704_v48  ;;  %v10707_v50 = vadd.f32 %v14564_v13, %v19164_v56  ;;  %v11189_v17 = vshll.u32 %v13409_v26, 16 }
 0x47e   : > { %v10843_v40 = vpack.c.bf16 %v10813_v58, %v19290_v30  ;;  %v13574_v52 = vpack.c.bf16 %v10813_v58, %v10813_v58  ;;  %v10811_v51 = vmax.f32 %v10779_v9, 0.0  ;;  %v10616_v22 = vpop.f32.mrf.mxu1  ;;  %v11198_v30 = vshrl.u32 %v19309_v47, 16  ;;  %v21210_v9 = vld [vmem:[#allocation42_spill] sm:$0xff] }
 0x47f   : > { %v19329_v34 = vmax.f32 %v10784_v12, 0.0  ;;  %v10782_v43 = vadd.f32 %v19152_v15, %v10743_v11  ;;  %v10746_v46 = vmul.f32 %v19130_v35, %v10707_v50  ;;  %v10705_v42 = vadd.f32 %v10616_v22, %v19177_v27 }
 0x480   : > { %10977 = vst.msk [vmem:[#allocation4 + $0x3c] sm:$0xf] %vm6418_vm2, %v13574_v52  ;;  %v10842_v56 = vpack.c.bf16 %v10811_v51, %v10810_v63  ;;  %v13572_v31 = vpack.c.bf16 %v10811_v51, %v10811_v51  ;;  %v14567_v29 = vpop.f32.mrf.mxu1  ;;  %v19342_v7 = vld [vmem:[#allocation4 + $0x24] sm:$0xf]  ;;  %v11187_v23 = vshrl.u32 %v13409_v26, 16  ;;  %v11191_v36 = vrot.slane %v11189_v17, 1 }
 0x481   : > { %v13577_v8 = vpack.c.bf16 %v19329_v34, %v19329_v34  ;;  %v10814_v5 = vmax.f32 %v10782_v43, 0.0  ;;  %v10785_v49 = vadd.f32 %v19152_v15, %v10746_v46  ;;  %v10744_v6 = vmul.f32 %v19130_v35, %v10705_v42  ;;  %v21211_v26 = vld [vmem:[#allocation43_spill] sm:$0xff]  ;;  %v19359_v51 = vld [vmem:[#allocation4 + $0x2c] sm:$0xf] }
 0x482   : > { %10975 = vst.msk [vmem:[#allocation4 + $0x34] sm:$0xf] %vm6418_vm2, %v13572_v31  ;;  %v10710_v27 = vadd.f32 %v14567_v29, %v19180_v38  ;;  %14625 = vmatprep.mubr.msk.bf16.mxu1 %vm6736_vm7, %v10842_v56  ;;  %v10629_v63 = vpop.f32.mrf.mxu1  ;;  %v11196_v32 = vrot.slane %v11194_v20, 1  ;;  %v11192_v38 = vor.u32 %v11191_v36, %v11187_v23  ;;  %v11035_v13 = vmul.bf16 %v19340_v53, %v21210_v9  ;;  %v19368_v29 = vld [vmem:[#allocation4 + $0x28] sm:$0xf] }
 0x483   : > { %10980 = vst.msk [vmem:[#allocation4 + $0x48] sm:$0xf] %vm6418_vm2, %v13577_v8  ;;  %v13575_v1 = vpack.c.bf16 %v10814_v5, %v10814_v5  ;;  %v10817_v47 = vmax.f32 %v10785_v49, 0.0  ;;  %v10783_v16 = vadd.f32 %v19152_v15, %v10744_v6  ;;  %v10708_v14 = vadd.f32 %v10629_v63, %v19187_v0  ;;  %14626 = vmatmul.mubr.msk.bf16.gmra.mxu1 %vm6736_vm7, %v10843_v40  ;;  %v21214_v6 = vld [vmem:[#allocation45_spill] sm:$0xff] }
 0x484   : > { %v10749_v48 = vmul.f32 %v19130_v35, %v10710_v27  ;;  %v14568_v58 = vpop.f32.mrf.mxu1  ;;  %v11036_v12 = vmul.bf16 %v19342_v7, %v21211_v26  ;;  %21212 = vst [vmem:[#allocation117_spill] sm:$0xff] %v19359_v51  ;;  %v11197_v20 = vsel %vm3131_vm6, %v11192_v38, %v11196_v32  ;;  %21213 = vst [vmem:[#allocation128_spill] sm:$0xff] %v19368_v29 }
 0x485   : > { %10978 = vst.msk [vmem:[#allocation4 + $0x40] sm:$0xf] %vm6418_vm2, %v13575_v1  ;;  %v10845_v11 = vpack.c.bf16 %v10817_v47, %v19329_v34  ;;  %v13578_v50 = vpack.c.bf16 %v10817_v47, %v10817_v47  ;;  %v10815_v52 = vmax.f32 %v10783_v16, 0.0  ;;  %v10747_v0 = vmul.f32 %v19130_v35, %v10708_v14  ;;  %14583 = vmatprep.mubr.msk.bf16.mxu0 %vm6736_vm7, %v11197_v20  ;;  %v21215_v14 = vld [vmem:[#allocation44_spill] sm:$0xff] }
 0x486   : > { %v10788_v40 = vadd.f32 %v19152_v15, %v10749_v48  ;;  %v10711_v22 = vadd.f32 %v14568_v58, %v19196_v44  ;;  %v10632_v43 = vpop.f32.mrf.mxu1  ;;  %v13411_v46 = vcombine.low %v11035_v13, %v11036_v12  ;;  %v11038_v27 = vmul.bf16 %v19359_v51, %v21214_v6 }
 0x487   : > { %10981 = vst.msk [vmem:[#allocation4 + $0x4c] sm:$0xf] %vm6418_vm2, %v13578_v50  ;;  %v10844_v42 = vpack.c.bf16 %v10815_v52, %v10814_v5  ;;  %v13576_v56 = vpack.c.bf16 %v10815_v52, %v10815_v52  ;;  %v10786_v34 = vadd.f32 %v19152_v15, %v10747_v0  ;;  %v10709_v31 = vadd.f32 %v10632_v43, %v19203_v61  ;;  %v21216_v43 = vld [vmem:[#allocation108_spill] sm:$0xff] }
 0x488   : > { %v19370_v17 = vmax.f32 %v10788_v40, 0.0  ;;  %v10750_v44 = vmul.f32 %v19130_v35, %v10711_v22  ;;  %v14571_v8 = vpop.f32.mrf.mxu1  ;;  %v11202_v49 = vshll.u32 %v13411_v46, 16  ;;  %v11200_v63 = vor.u32 %v11198_v30, %v11196_v32 }
 0x489   : > { %10979 = vst.msk [vmem:[#allocation4 + $0x44] sm:$0xf] %vm6418_vm2, %v13576_v56  ;;  %v10818_v5 = vmax.f32 %v10786_v34, 0.0  ;;  %v10748_v23 = vmul.f32 %v19130_v35, %v10709_v31  ;;  %v10714_v36 = vadd.f32 %v14571_v8, %v19209_v59  ;;  %14629 = vmatprep.mubr.msk.bf16.mxu1 %vm6736_vm7, %v10844_v42  ;;  %v11037_v48 = vmul.bf16 %v19368_v29, %v21215_v14 }
 0x48a   : > { %v13581_v61 = vpack.c.bf16 %v19370_v17, %v19370_v17  ;;  %v10789_v1 = vadd.f32 %v19152_v15, %v10750_v44  ;;  %v10645_v47 = vpop.f32.mrf.mxu1  ;;  %v11204_v16 = vrot.slane %v11202_v49, 1  ;;  %v11206_v52 = vshrl.u32 %v13411_v46, 16  ;;  %v19397_v46 = vld [vmem:[#allocation4 + $0x30] sm:$0xf] }
 0x48b   : > { %v13579_v58 = vpack.c.bf16 %v10818_v5, %v10818_v5  ;;  %v10787_v38 = vadd.f32 %v19152_v15, %v10748_v23  ;;  %v10753_v30 = vmul.f32 %v19130_v35, %v10714_v36  ;;  %v10712_v32 = vadd.f32 %v10645_v47, %v19219_v33  ;;  %14630 = vmatmul.mubr.msk.bf16.gmra.mxu1 %vm6736_vm7, %v10845_v11  ;;  %v19405_v36 = vld [vmem:[#allocation4 + $0x34] sm:$0xf]  ;;  %v21217_v47 = vld [vmem:[#allocation46_spill] sm:$0xff] }
 0x48c   : > { %10984 = vst.msk [vmem:[#allocation4 + $0x58] sm:$0xf] %vm6418_vm2, %v13581_v61  ;;  %v10821_v59 = vmax.f32 %v10789_v1, 0.0  ;;  %v11205_v13 = vsel %vm3131_vm6, %v11200_v63, %v11204_v16  ;;  %v14572_v12 = vpop.f32.mrf.mxu1  ;;  %v13412_v50 = vcombine.low %v11037_v48, %v11038_v27  ;;  %v11208_v42 = vor.u32 %v11206_v52, %v11204_v16  ;;  %v19414_v48 = vld [vmem:[#allocation4 + $0x38] sm:$0xf] }
 0x48d   : > { %10982 = vst.msk [vmem:[#allocation4 + $0x50] sm:$0xf] %vm6418_vm2, %v13579_v58  ;;  %v10819_v0 = vmax.f32 %v10787_v38, 0.0  ;;  %v10792_v40 = vadd.f32 %v19152_v15, %v10753_v30  ;;  %v10751_v22 = vmul.f32 %v19130_v35, %v10712_v32  ;;  %14584 = vmatmul.mubr.msk.bf16.vlgmr.msra.gmra.mxu0 %vm6736_vm7, %v11205_v13  ;;  %v10715_v33 = vadd.f32 %v14572_v12, %v19226_v19  ;;  %v19416_v58 = vld [vmem:[#allocation4 + $0x3c] sm:$0xf] }
 0x48e   : > { %v10847_v11 = vpack.c.bf16 %v10821_v59, %v19370_v17  ;;  %v13582_v20 = vpack.c.bf16 %v10821_v59, %v10821_v59  ;;  %14650 = vmatpush3.bf16.msra.mxu0 %v21216_v43  ;;  %v11210_v56 = vshll.u32 %v13412_v50, 16  ;;  %v10648_v34 = vpop.f32.mrf.mxu1  ;;  %v11214_v17 = vshrl.u32 %v13412_v50, 16  ;;  %v21218_v50 = vld [vmem:[#allocation47_spill] sm:$0xff]  ;;  %v21220_v43 = vld [vmem:[#allocation49_spill] sm:$0xff] }
 0x48f   : > { %v10846_v31 = vpack.c.bf16 %v10819_v0, %v10818_v5  ;;  %v13580_v44 = vpack.c.bf16 %v10819_v0, %v10819_v0  ;;  %v19399_v8 = vmax.f32 %v10792_v40, 0.0  ;;  %v10790_v49 = vadd.f32 %v19152_v15, %v10751_v22 }
 0x490   : > { %10985 = vst.msk [vmem:[#allocation4 + $0x5c] sm:$0xf] %vm6418_vm2, %v13582_v20  ;;  %v10754_v19 = vmul.f32 %v19130_v35, %v10715_v33  ;;  %v11212_v27 = vrot.slane %v11210_v56, 1  ;;  %v10713_v63 = vadd.f32 %v10648_v34, %v19236_v18  ;;  %v14575_v23 = vpop.f32.mrf.mxu1  ;;  %v11039_v16 = vmul.bf16 %v19397_v46, %v21217_v47  ;;  %v21219_v33 = vld [vmem:[#allocation48_spill] sm:$0xff] }
 0x491   : > { %10983 = vst.msk [vmem:[#allocation4 + $0x54] sm:$0xf] %vm6418_vm2, %v13580_v44  ;;  %v13585_v5 = vpack.c.bf16 %v19399_v8, %v19399_v8  ;;  %v10822_v61 = vmax.f32 %v10790_v49, 0.0  ;;  %v10718_v1 = vadd.f32 %v14575_v23, %v19249_v60  ;;  %14633 = vmatprep.mubr.msk.bf16.mxu1 %vm6736_vm7, %v10846_v31  ;;  %v11040_v52 = vmul.bf16 %v19405_v36, %v21218_v50 }
 0x492   : > { %v10793_v18 = vadd.f32 %v19152_v15, %v10754_v19  ;;  %v11213_v38 = vsel %vm3131_vm6, %v11208_v42, %v11212_v27  ;;  %v11216_v30 = vor.u32 %v11214_v17, %v11212_v27  ;;  %v10752_v32 = vmul.f32 %v19130_v35, %v10713_v63  ;;  %v10661_v59 = vpop.f32.mrf.mxu1 }
 0x493   : > { %10988 = vst.msk [vmem:[#allocation4 + $0x68] sm:$0xf] %vm6418_vm2, %v13585_v5  ;;  %v13583_v60 = vpack.c.bf16 %v10822_v61, %v10822_v61  ;;  %14587 = vmatprep.mubr.msk.bf16.mxu0 %vm6736_vm7, %v11213_v38  ;;  %v10757_v13 = vmul.f32 %v19130_v35, %v10718_v1  ;;  %v10716_v12 = vadd.f32 %v10661_v59, %v19254_v62 }
 0x494   : > { %v10825_v0 = vmax.f32 %v10793_v18, 0.0  ;;  %v10791_v40 = vadd.f32 %v19152_v15, %v10752_v32  ;;  %14634 = vmatmul.mubr.msk.bf16.gmra.mxu1 %vm6736_vm7, %v10847_v11  ;;  %v14576_v22 = vpop.f32.mrf.mxu1  ;;  %v11041_v20 = vmul.bf16 %v19414_v48, %v21219_v33  ;;  %v11042_v42 = vmul.bf16 %v19416_v58, %v21220_v43 }
 0x495   : > { %10986 = vst.msk [vmem:[#allocation4 + $0x60] sm:$0xf] %vm6418_vm2, %v13583_v60  ;;  %v10796_v56 = vadd.f32 %v19152_v15, %v10757_v13  ;;  %v10755_v62 = vmul.f32 %v19130_v35, %v10716_v12  ;;  %v13413_v34 = vcombine.low %v11039_v16, %v11040_v52  ;;  %v10719_v31 = vadd.f32 %v14576_v22, %v19257_v37 }
 0x496   : > { %v10849_v44 = vpack.c.bf16 %v10825_v0, %v19399_v8  ;;  %v13586_v49 = vpack.c.bf16 %v10825_v0, %v10825_v0  ;;  %v10823_v11 = vmax.f32 %v10791_v40, 0.0  ;;  %v13414_v19 = vcombine.low %v11041_v20, %v11042_v42  ;;  %v10664_v27 = vpop.f32.mrf.mxu1  ;;  %v19452_v0 = vld [vmem:[#allocation4 + $0x40] sm:$0xf]  ;;  %v19466_v42 = vld [vmem:[#allocation4 + $0x44] sm:$0xf] }
 0x497   : > { %v19438_v17 = vmax.f32 %v10796_v56, 0.0  ;;  %v10794_v63 = vadd.f32 %v19152_v15, %v10755_v62  ;;  %v11218_v23 = vshll.u32 %v13413_v34, 16  ;;  %v10758_v5 = vmul.f32 %v19130_v35, %v10719_v31  ;;  %v19472_v62 = vld [vmem:[#allocation4 + $0x48] sm:$0xf] }
 0x498   : > { %10989 = vst.msk [vmem:[#allocation4 + $0x6c] sm:$0xf] %vm6418_vm2, %v13586_v49  ;;  %v10848_v1 = vpack.c.bf16 %v10823_v11, %v10822_v61  ;;  %v13584_v18 = vpack.c.bf16 %v10823_v11, %v10823_v11  ;;  %v11222_v16 = vshrl.u32 %v13413_v34, 16  ;;  %v11226_v38 = vshll.u32 %v13414_v19, 16  ;;  %v14579_v37 = vpop.f32.mrf.mxu1  ;;  %v19474_v34 = vld [vmem:[#allocation4 + $0x4c] sm:$0xf] }
 0x499   : > { %v13589_v8 = vpack.c.bf16 %v19438_v17, %v19438_v17  ;;  %v19445_v32 = vmax.f32 %v10794_v63, 0.0  ;;  %v11220_v59 = vrot.slane %v11218_v23, 1  ;;  %v10797_v60 = vadd.f32 %v19152_v15, %v10758_v5  ;;  %v21221_v11 = vld [vmem:[#allocation50_spill] sm:$0xff]  ;;  %v21222_v23 = vld [vmem:[#allocation51_spill] sm:$0xff] }
 0x49a   : > { %10987 = vst.msk [vmem:[#allocation4 + $0x64] sm:$0xf] %vm6418_vm2, %v13584_v18  ;;  %v11228_v13 = vrot.slane %v11226_v38, 1  ;;  %v10717_v12 = vadd.f32 %v10664_v27, %v19271_v3  ;;  %v10722_v52 = vadd.f32 %v14579_v37, %v19273_v55  ;;  %14637 = vmatprep.mubr.msk.bf16.mxu1 %vm6736_vm7, %v10848_v1  ;;  %v10677_v61 = vpop.f32.mrf.mxu1  ;;  %v19460_v40 = vcombine.low %v11067_v25, %v11068_v54  ;;  %v21223_v18 = vld [vmem:[#allocation52_spill] sm:$0xff] }
 0x49b   : > { %10992 = vst.msk [vmem:[#allocation4 + $0x78] sm:$0xf] %vm6418_vm2, %v13589_v8  ;;  %v13587_v3 = vpack.c.bf16 %v19445_v32, %v19445_v32  ;;  %v11221_v55 = vsel %vm3131_vm6, %v11216_v30, %v11220_v59  ;;  %v10829_v22 = vmax.f32 %v10797_v60, 0.0  ;;  %v11224_v20 = vor.u32 %v11222_v16, %v11220_v59 }
 0x49c   : > { %14588 = vmatmul.mubr.msk.bf16.gmra.mxu0 %vm6736_vm7, %v11221_v55  ;;  %v11230_v56 = vshrl.u32 %v13414_v19, 16  ;;  %v10756_v21 = vmul.f32 %v19130_v35, %v10717_v12  ;;  %v10761_v10 = vmul.f32 %v19130_v35, %v10722_v52  ;;  %v10720_v25 = vadd.f32 %v10677_v61, %v19275_v41  ;;  %v14580_v54 = vpop.f32.mrf.mxu1  ;;  %14638 = vmatmul.mubr.msk.bf16.gmra.mxu1 %vm6736_vm7, %v10849_v44  ;;  %v21224_v44 = vld [vmem:[#allocation53_spill] sm:$0xff]  ;;  %v19498_v52 = vld [vmem:[#allocation4 + $0x50] sm:$0xf] }
 0x49d   : > { %10990 = vst.msk [vmem:[#allocation4 + $0x70] sm:$0xf] %vm6418_vm2, %v13587_v3  ;;  %v10851_v30 = vpack.c.bf16 %v10829_v22, %v19438_v17  ;;  %v13590_v31 = vpack.c.bf16 %v10829_v22, %v10829_v22  ;;  %v11229_v49 = vsel %vm3131_vm6, %v11224_v20, %v11228_v13  ;;  %v11043_v19 = vmul.bf16 %v19452_v0, %v21221_v11  ;;  %v19502_v22 = vld [vmem:[#allocation4 + $0x54] sm:$0xf] }
 0x49e   : > { %14591 = vmatprep.mubr.msk.bf16.mxu0 %vm6736_vm7, %v11229_v49  ;;  %v10795_v41 = vadd.f32 %v19152_v15, %v10756_v21  ;;  %v10800_v27 = vadd.f32 %v19152_v15, %v10761_v10  ;;  %v10759_v63 = vmul.f32 %v19130_v35, %v10720_v25  ;;  %v11044_v5 = vmul.bf16 %v19466_v42, %v21222_v23  ;;  %v10680_v17 = vpop.f32.mrf.mxu1  ;;  %v21225_v49 = vld [vmem:[#allocation54_spill] sm:$0xff] }
 0x49f   : > { %10993 = vst.msk [vmem:[#allocation4 + $0x7c] sm:$0xf] %vm6418_vm2, %v13590_v31  ;;  %v10723_v1 = vadd.f32 %v14580_v54, %v19283_v24  ;;  %v11045_v16 = vmul.bf16 %v19472_v62, %v21223_v18  ;;  %v11046_v38 = vmul.bf16 %v19474_v34, %v21224_v44  ;;  %v10721_v37 = vadd.f32 %v10680_v17, %v19312_v28 }
 0x4a0   : > { %v10827_v8 = vmax.f32 %v10795_v41, 0.0  ;;  %v19495_v59 = vmax.f32 %v10800_v27, 0.0  ;;  %v10798_v60 = vadd.f32 %v19152_v15, %v10759_v63  ;;  %v13415_v12 = vcombine.low %v11043_v19, %v11044_v5  ;;  %v19512_v19 = vld [vmem:[#allocation4 + $0x5c] sm:$0xf]  ;;  %v21226_v27 = vld [vmem:[#allocation55_spill] sm:$0xff] }
 0x4a1   : > { %v11232_v61 = vor.u32 %v11230_v56, %v11228_v13  ;;  %v10762_v3 = vmul.f32 %v19130_v35, %v10723_v1  ;;  %v13416_v24 = vcombine.low %v11045_v16, %v11046_v38  ;;  %v10760_v55 = vmul.f32 %v19130_v35, %v10721_v37  ;;  %v19510_v56 = vld [vmem:[#allocation4 + $0x58] sm:$0xf]  ;;  %v19521_v38 = vld [vmem:[#allocation4 + $0x60] sm:$0xf] }
 0x4a2   : > { %v10850_v20 = vpack.c.bf16 %v10827_v8, %v19445_v32  ;;  %v13588_v21 = vpack.c.bf16 %v10827_v8, %v10827_v8  ;;  %v13593_v28 = vpack.c.bf16 %v19495_v59, %v19495_v59  ;;  %v10830_v10 = vmax.f32 %v10798_v60, 0.0  ;;  %v21227_v60 = vld [vmem:[#allocation57_spill] sm:$0xff] }
 0x4a3   : > { %v11234_v25 = vshll.u32 %v13415_v12, 16  ;;  %v10801_v54 = vadd.f32 %v19152_v15, %v10762_v3  ;;  %v11242_v31 = vshll.u32 %v13416_v24, 16  ;;  %v11047_v13 = vmul.bf16 %v19498_v52, %v21225_v49 }
 0x4a4   : > { %10991 = vst.msk [vmem:[#allocation4 + $0x74] sm:$0xf] %vm6418_vm2, %v13588_v21  ;;  %10996 = vst.msk [vmem:[#allocation4 + $0x88] sm:$0xf] %vm6418_vm2, %v13593_v28  ;;  %v13591_v35 = vpack.c.bf16 %v10830_v10, %v10830_v10  ;;  %v11238_v32 = vshrl.u32 %v13415_v12, 16  ;;  %v10799_v41 = vadd.f32 %v19152_v15, %v10760_v55  ;;  %14641 = vmatprep.mubr.msk.bf16.mxu1 %vm6736_vm7, %v10850_v20  ;;  %v11246_v16 = vshrl.u32 %v13416_v24, 16 }
 0x4a5   : > { %v11048_v63 = vmul.bf16 %v19502_v22, %v21226_v27  ;;  %v11236_v5 = vrot.slane %v11234_v25, 1  ;;  %v10833_v17 = vmax.f32 %v10801_v54, 0.0  ;;  %v11244_v1 = vrot.slane %v11242_v31, 1  ;;  %14642 = vmatmul.mubr.msk.bf16.gmra.mxu1 %vm6736_vm7, %v10851_v30  ;;  %v21228_v12 = vld [vmem:[#allocation58_spill] sm:$0xff]  ;;  %v19528_v55 = vld [vmem:[#allocation4 + $0x64] sm:$0xf] }
 0x4a6   : > { %10994 = vst.msk [vmem:[#allocation4 + $0x80] sm:$0xf] %vm6418_vm2, %v13591_v35  ;;  %v10831_v37 = vmax.f32 %v10799_v41, 0.0  ;;  %v11049_v15 = vmul.bf16 %v19510_v56, %v21227_v60  ;;  %v11050_v3 = vmul.bf16 %v19512_v19, %v21228_v12  ;;  %v21229_v31 = vld [vmem:[#allocation59_spill] sm:$0xff] }
 0x4a7   : > { %v13417_v8 = vcombine.low %v11047_v13, %v11048_v63  ;;  %v11237_v20 = vsel %vm3131_vm6, %v11232_v61, %v11236_v5  ;;  %v10853_v24 = vpack.c.bf16 %v10833_v17, %v19495_v59  ;;  %v13594_v21 = vpack.c.bf16 %v10833_v17, %v10833_v17  ;;  %v19546_v17 = vld [vmem:[#allocation4 + $0x6c] sm:$0xf] }
 0x4a8   : > { %v11240_v30 = vor.u32 %v11238_v32, %v11236_v5  ;;  %14592 = vmatmul.mubr.msk.bf16.gmra.mxu0 %vm6736_vm7, %v11237_v20  ;;  %v10852_v28 = vpack.c.bf16 %v10831_v37, %v10830_v10  ;;  %v13592_v25 = vpack.c.bf16 %v10831_v37, %v10831_v37  ;;  %v11051_v13 = vmul.bf16 %v19521_v38, %v21229_v31 }
 0x4a9   : > { %v11250_v54 = vshll.u32 %v13417_v8, 16  ;;  %10997 = vst.msk [vmem:[#allocation4 + $0x8c] sm:$0xf] %vm6418_vm2, %v13594_v21  ;;  %v11248_v41 = vor.u32 %v11246_v16, %v11244_v1  ;;  %v13418_v63 = vcombine.low %v11049_v15, %v11050_v3  ;;  %v11052_v61 = vmul.bf16 %v19528_v55, %v21230_v57  ;;  %v19551_v3 = vld [vmem:[#allocation4 + $0x68] sm:$0xf] }
 0x4aa   : > { %v11245_v35 = vsel %vm3131_vm6, %v11240_v30, %v11244_v1  ;;  %10995 = vst.msk [vmem:[#allocation4 + $0x84] sm:$0xf] %vm6418_vm2, %v13592_v25  ;;  %v11254_v10 = vshrl.u32 %v13417_v8, 16  ;;  %14645 = vmatprep.mubr.msk.bf16.mxu1 %vm6736_vm7, %v10852_v28  ;;  %v11069_v32 = vmul.bf16 %v19340_v53, %v21206_v39  ;;  %v11070_v5 = vmul.bf16 %v19342_v7, %v21208_v4  ;;  %v21231_v25 = vld [vmem:[#allocation65_spill] sm:$0xff] }
 0x4ab   : > { %14595 = vmatprep.mubr.msk.bf16.mxu0 %vm6736_vm7, %v11245_v35  ;;  %v11252_v59 = vrot.slane %v11250_v54, 1  ;;  %v11072_v1 = vmul.bf16 %v19359_v51, %v21211_v26  ;;  %v11258_v16 = vshll.u32 %v13418_v63, 16  ;;  %v13419_v37 = vcombine.low %v11051_v13, %v11052_v61  ;;  %v19558_v54 = vld [vmem:[#allocation4 + $0x74] sm:$0xf]  ;;  %v21234_v51 = vld [vmem:[#allocation68_spill] sm:$0xff] }
 0x4ac   : > { %v12156_v15 = vshll.u32 %v19460_v40, 16  ;;  %v13493_v21 = vcombine.low %v11069_v32, %v11070_v5  ;;  %v12154_v39 = vshrl.u32 %v19460_v40, 16  ;;  %v11054_v26 = vmul.bf16 %v19546_v17, %v21231_v25 }
 0x4ad   : > { %v11253_v8 = vsel %vm3131_vm6, %v11248_v41, %v11252_v59  ;;  %v11256_v20 = vor.u32 %v11254_v10, %v11252_v59  ;;  %v11260_v30 = vrot.slane %v11258_v16, 1  ;;  %v11266_v28 = vshll.u32 %v13419_v37, 16  ;;  %14646 = vmatmul.mubr.msk.bf16.gmra.mxu1 %vm6736_vm7, %v10853_v24  ;;  %v21232_v41 = vld [vmem:[#allocation64_spill] sm:$0xff]  ;;  %v19564_v10 = vld [vmem:[#allocation4 + $0x70] sm:$0xf] }
 0x4ae   : > { %v12158_v4 = vrot.slane %v12156_v15, 1  ;;  %v11071_v13 = vmul.bf16 %v19368_v29, %v21210_v9  ;;  %v11262_v35 = vshrl.u32 %v13418_v63, 16  ;;  %v12161_v61 = vshll.u32 %v13493_v21, 16  ;;  %21233 = vst [vmem:[#allocation8_spill] sm:$0xff] %v19564_v10  ;;  %v21235_v29 = vld [vmem:[#allocation66_spill] sm:$0xff] }
 0x4af   : > { %v11053_v59 = vmul.bf16 %v19551_v3, %v21232_v41  ;;  %v11261_v40 = vsel %vm3131_vm6, %v11256_v20, %v11260_v30  ;;  %v11268_v32 = vrot.slane %v11266_v28, 1  ;;  %v11270_v5 = vshrl.u32 %v13419_v37, 16 }
 0x4b0   : > { %v12159_v24 = vor.u32 %v12158_v4, %v12154_v39  ;;  %14596 = vmatmul.mubr.msk.bf16.gmra.mxu0 %vm6736_vm7, %v11253_v8  ;;  %v12163_v16 = vrot.slane %v12161_v61, 1  ;;  %v11056_v45 = vmul.bf16 %v19558_v54, %v21234_v51  ;;  %v13494_v9 = vcombine.low %v11071_v13, %v11072_v1  ;;  %v19577_v39 = vld [vmem:[#allocation4 + $0x78] sm:$0xf]  ;;  %v19579_v8 = vld [vmem:[#allocation4 + $0x7c] sm:$0xf]  ;;  %v21238_v51 = vld [vmem:[#allocation74_spill] sm:$0xff] }
 0x4b1   : > { %v13420_v15 = vcombine.low %v11053_v59, %v11054_v26  ;;  %14599 = vmatprep.mubr.msk.bf16.mxu0 %vm6736_vm7, %v11261_v40  ;;  %v12165_v63 = vshrl.u32 %v13493_v21, 16  ;;  %v11055_v2 = vmul.bf16 %v19564_v10, %v21235_v29  ;;  %v11073_v20 = vmul.bf16 %v19397_v46, %v21215_v14  ;;  %21236 = vst [vmem:[#allocation5_spill] sm:$0xff] %v19577_v39  ;;  %v21237_v29 = vld [vmem:[#allocation73_spill] sm:$0xff] }
 0x4b2   : > { %v11074_v37 = vmul.bf16 %v19405_v36, %v21214_v6  ;;  %v11264_v28 = vor.u32 %v11262_v35, %v11260_v30  ;;  %v12164_v4 = vsel %vm3131_vm6, %v12159_v24, %v12163_v16  ;;  %v11272_v1 = vor.u32 %v11270_v5, %v11268_v32  ;;  %v19588_v30 = vld [vmem:[#allocation4 + $0x80] sm:$0xf] }
 0x4b3   : > { %v11274_v26 = vshll.u32 %v13420_v15, 16  ;;  %v12167_v13 = vor.u32 %v12165_v63, %v12163_v16  ;;  %14685 = vmatprep.mubr.msk.bf16.mxu1 %vm6736_vm7, %v12164_v4  ;;  %v13421_v21 = vcombine.low %v11055_v2, %v11056_v45  ;;  %v12169_v61 = vshll.u32 %v13494_v9, 16  ;;  %v19590_v63 = vld [vmem:[#allocation4 + $0x84] sm:$0xf] }
 0x4b4   : > { %v13495_v59 = vcombine.low %v11073_v20, %v11074_v37  ;;  %v11269_v14 = vsel %vm3131_vm6, %v11264_v28, %v11268_v32  ;;  %v11057_v6 = vmul.bf16 %v19577_v39, %v21237_v29  ;;  %v11058_v10 = vmul.bf16 %v19579_v8, %v21238_v51  ;;  %v11030_v32 = vld [vmem:[#allocation4 + $0x90] sm:$0x1]  ;;  %v21240_v39 = vld [vmem:[#allocation78_spill] sm:$0xff] }
 0x4b5   : > { %v11276_v40 = vrot.slane %v11274_v26, 1  ;;  %v11282_v35 = vshll.u32 %v13421_v21, 16  ;;  %v12171_v24 = vrot.slane %v12169_v61, 1  ;;  %v12173_v5 = vshrl.u32 %v13494_v9, 16  ;;  %v21239_v9 = vld [vmem:[#allocation76_spill] sm:$0xff] }
 0x4b6   : > { %v12177_v16 = vshll.u32 %v13495_v59, 16  ;;  %v11278_v45 = vshrl.u32 %v13420_v15, 16  ;;  %v13422_v20 = vcombine.low %v11057_v6, %v11058_v10  ;;  %v11286_v29 = vshrl.u32 %v13421_v21, 16  ;;  %v19600_v15 = vld [vmem:[#allocation4 + $0x88] sm:$0xf] }
 0x4b7   : > { %v11277_v2 = vsel %vm3131_vm6, %v11272_v1, %v11276_v40  ;;  %v11284_v37 = vrot.slane %v11282_v35, 1  ;;  %v12172_v28 = vsel %vm3131_vm6, %v12167_v13, %v12171_v24  ;;  %v12175_v4 = vor.u32 %v12173_v5, %v12171_v24  ;;  %21241 = vst [vmem:[#allocation7_spill] sm:$0xff] %v19600_v15  ;;  %v19602_v10 = vld [vmem:[#allocation4 + $0x8c] sm:$0xf]  ;;  %v21243_v35 = vld [vmem:[#allocation85_spill] sm:$0xff] }
 0x4b8   : > { %v12179_v26 = vrot.slane %v12177_v16, 1  ;;  %14600 = vmatmul.mubr.msk.bf16.gmra.mxu0 %vm6736_vm7, %v11269_v14  ;;  %14686 = vmatmul.mubr.msk.bf16.vlgmr.msra.gmra.mxu1 %vm6736_vm7, %v12172_v28  ;;  %v11290_v61 = vshll.u32 %v13422_v20, 16  ;;  %v11059_v51 = vmul.bf16 %v19588_v30, %v21239_v9  ;;  %v11060_v1 = vmul.bf16 %v19590_v63, %v21240_v39  ;;  %21242 = vst [vmem:[#allocation6_spill] sm:$0xff] %v19602_v10 }
 0x4b9   : > { %v11280_v6 = vor.u32 %v11278_v45, %v11276_v40  ;;  %14603 = vmatprep.mubr.msk.bf16.mxu0 %vm6736_vm7, %v11277_v2  ;;  %v12181_v14 = vshrl.u32 %v13495_v59, 16  ;;  %v11063_v24 = vmul.bf16 %v11030_v32, %v21243_v35  ;;  %v11288_v21 = vor.u32 %v11286_v29, %v11284_v37  ;;  %v21244_v45 = vld [vmem:[#allocation88_spill] sm:$0xff]  ;;  %v21245_v32 = vld [vmem:[#allocation89_spill] sm:$0xff] }
 0x4ba   : > { %v12180_v13 = vsel %vm3131_vm6, %v12175_v4, %v12179_v26  ;;  %v13423_v5 = vcombine.low %v11059_v51, %v11060_v1  ;;  %v11075_v16 = vmul.bf16 %v19414_v48, %v21217_v47  ;;  %v11076_v28 = vmul.bf16 %v19416_v58, %v21218_v50 }
 0x4bb   : > { %14689 = vmatprep.mubr.msk.bf16.mxu1 %vm6736_vm7, %v12180_v13  ;;  %v11077_v40 = vmul.bf16 %v19452_v0, %v21219_v33  ;;  %v11078_v2 = vmul.bf16 %v19466_v42, %v21220_v43  ;;  %v11061_v59 = vmul.bf16 %v19600_v15, %v21244_v45  ;;  %v11062_v4 = vmul.bf16 %v19602_v10, %v21245_v32 }
 0x4bc   : > { %v11285_v51 = vsel %vm3131_vm6, %v11280_v6, %v11284_v37  ;;  %v11292_v29 = vrot.slane %v11290_v61, 1  ;;  %v11298_v1 = vshll.u32 %v13423_v5, 16  ;;  %v13496_v47 = vcombine.low %v11075_v16, %v11076_v28 }
 0x4bd   : > { %v12183_v13 = vor.u32 %v12181_v14, %v12179_v26  ;;  %v13497_v35 = vcombine.low %v11077_v40, %v11078_v2  ;;  %v13424_v50 = vcombine.low %v11061_v59, %v11062_v4  ;;  %v11080_v33 = vmul.bf16 %v19474_v34, %v21222_v23 }
 0x4be   : > { %v11293_v9 = vsel %vm3131_vm6, %v11288_v21, %v11292_v29  ;;  %v11300_v43 = vrot.slane %v11298_v1, 1  ;;  %v12185_v39 = vshll.u32 %v13496_v47, 16  ;;  %v11079_v45 = vmul.bf16 %v19472_v62, %v21221_v11 }
 0x4bf   : > { %v11294_v15 = vshrl.u32 %v13422_v20, 16  ;;  %v12193_v32 = vshll.u32 %v13497_v35, 16  ;;  %v11302_v10 = vshrl.u32 %v13423_v5, 16  ;;  %v13425_v37 = vcombine.low %v11063_v24, %v11063_v24 }
 0x4c0   : > { %14604 = vmatmul.mubr.msk.bf16.gmra.mxu0 %vm6736_vm7, %v11285_v51  ;;  %v12187_v61 = vrot.slane %v12185_v39, 1  ;;  %v12189_v26 = vshrl.u32 %v13496_v47, 16  ;;  %v11306_v6 = vshll.u32 %v13424_v50, 16  ;;  %v13498_v14 = vcombine.low %v11079_v45, %v11080_v33 }
 0x4c1   : > { %14607 = vmatprep.mubr.msk.bf16.mxu0 %vm6736_vm7, %v11293_v9  ;;  %v12195_v23 = vrot.slane %v12193_v32, 1  ;;  %v11081_v21 = vmul.bf16 %v19498_v52, %v21223_v18  ;;  %v11082_v16 = vmul.bf16 %v19502_v22, %v21224_v44  ;;  %v13460_v11 = vcombine.low %v19340_v53, %v19342_v7  ;;  %v21262_v7 = vld [vmem:[#allocation89_spill] sm:$0xff] }
 0x4c2   : > { %v12188_v20 = vsel %vm3131_vm6, %v12183_v13, %v12187_v61  ;;  %v12191_v24 = vor.u32 %v12189_v26, %v12187_v61  ;;  %v11304_v5 = vor.u32 %v11302_v10, %v11300_v43  ;;  %v12201_v39 = vshll.u32 %v13498_v14, 16 }
 0x4c3   : > { %v11296_v28 = vor.u32 %v11294_v15, %v11292_v29  ;;  %14690 = vmatmul.mubr.msk.bf16.gmra.mxu1 %vm6736_vm7, %v12188_v20  ;;  %v12197_v40 = vshrl.u32 %v13497_v35, 16  ;;  %v13499_v9 = vcombine.low %v11081_v21, %v11082_v16  ;;  %v11308_v45 = vrot.slane %v11306_v6, 1 }
 0x4c4   : > { %v12196_v2 = vsel %vm3131_vm6, %v12191_v24, %v12195_v23  ;;  %v11083_v18 = vmul.bf16 %v19510_v56, %v21225_v49  ;;  %v11084_v44 = vmul.bf16 %v19512_v19, %v21226_v27  ;;  %v11314_v10 = vshll.u32 %v13425_v37, 16 }
 0x4c5   : > { %v11301_v59 = vsel %vm3131_vm6, %v11296_v28, %v11300_v43  ;;  %14693 = vmatprep.mubr.msk.bf16.mxu1 %vm6736_vm7, %v12196_v2  ;;  %v12203_v32 = vrot.slane %v12201_v39, 1  ;;  %v12209_v15 = vshll.u32 %v13499_v9, 16  ;;  %v12199_v4 = vor.u32 %v12197_v40, %v12195_v23 }
 0x4c6   : > { %v11309_v35 = vsel %vm3131_vm6, %v11304_v5, %v11308_v45  ;;  %v12205_v51 = vshrl.u32 %v13498_v14, 16  ;;  %v13500_v29 = vcombine.low %v11083_v18, %v11084_v44  ;;  %v11085_v47 = vmul.bf16 %v19521_v38, %v21227_v60  ;;  %v21246_v5 = vld [vmem:[#allocation8_spill] sm:$0xff] }
 0x4c7   : > { %v12211_v1 = vrot.slane %v12209_v15, 1  ;;  %v11086_v49 = vmul.bf16 %v19528_v55, %v21228_v12  ;;  %v13462_v27 = vcombine.low %v19397_v46, %v19405_v36  ;;  %v11088_v13 = vmul.bf16 %v19546_v17, %v21230_v57 }
 0x4c8   : > { %14608 = vmatmul.mubr.msk.bf16.gmra.mxu0 %vm6736_vm7, %v11301_v59  ;;  %v13463_v33 = vcombine.low %v19414_v48, %v19416_v58  ;;  %v11310_v43 = vshrl.u32 %v13424_v50, 16  ;;  %v12207_v37 = vor.u32 %v12205_v51, %v12203_v32  ;;  %v12217_v61 = vshll.u32 %v13500_v29, 16  ;;  %v21252_v51 = vld [vmem:[#allocation5_spill] sm:$0xff] }
 0x4c9   : > { %14611 = vmatprep.mubr.msk.bf16.mxu0 %vm6736_vm7, %v11309_v35  ;;  %v13501_v60 = vcombine.low %v11085_v47, %v11086_v49  ;;  %v11316_v26 = vrot.slane %v11314_v10, 1  ;;  %v12204_v12 = vsel %vm3131_vm6, %v12199_v4, %v12203_v32  ;;  %v11087_v6 = vmul.bf16 %v19551_v3, %v21229_v31  ;;  %v21248_v10 = vld [vmem:[#allocation37_spill] sm:$0xff]  ;;  %v21251_v35 = vld [vmem:[#allocation66_spill] sm:$0xff] }
 0x4ca   : > { %v13464_v14 = vcombine.low %v19452_v0, %v19466_v42  ;;  %v11312_v23 = vor.u32 %v11310_v43, %v11308_v45  ;;  %v12212_v57 = vsel %vm3131_vm6, %v12207_v37, %v12211_v1  ;;  %v11090_v21 = vmul.bf16 %v19558_v54, %v21231_v25 }
 0x4cb   : > { %14694 = vmatmul.mubr.msk.bf16.gmra.mxu1 %vm6736_vm7, %v12204_v12  ;;  %v12225_v50 = vshll.u32 %v13501_v60, 16  ;;  %v12213_v16 = vshrl.u32 %v13499_v9, 16  ;;  %v13502_v20 = vcombine.low %v11087_v6, %v11088_v13  ;;  %v12219_v24 = vrot.slane %v12217_v61, 1  ;;  %v21247_v9 = vld [vmem:[#allocation68_spill] sm:$0xff]  ;;  %v21253_v13 = vld [vmem:[#allocation74_spill] sm:$0xff]  ;;  %v21254_v6 = vld [vmem:[#allocation73_spill] sm:$0xff] }
 0x4cc   : > { %14697 = vmatprep.mubr.msk.bf16.mxu1 %vm6736_vm7, %v12212_v57  ;;  %v11089_v31 = vmul.bf16 %v21246_v5, %v21232_v41  ;;  %v13465_v39 = vcombine.low %v19472_v62, %v19474_v34  ;;  %v11317_v40 = vsel %vm3131_vm6, %v11312_v23, %v11316_v26  ;;  %v12221_v2 = vshrl.u32 %v13500_v29, 16  ;;  %v21249_v41 = vld [vmem:[#allocation121_spill] sm:$0xff] }
 0x4cd   : > { %v12215_v28 = vor.u32 %v12213_v16, %v12211_v1  ;;  %v12227_v45 = vrot.slane %v12225_v50, 1  ;;  %v12233_v25 = vshll.u32 %v13502_v20, 16  ;;  %v11092_v44 = vmul.bf16 %v19579_v8, %v21247_v9  ;;  %v21256_v16 = vld [vmem:[#allocation128_spill] sm:$0xff]  ;;  %v21257_v9 = vld [vmem:[#allocation78_spill] sm:$0xff] }
 0x4ce   : > { %v13503_v18 = vcombine.low %v11089_v31, %v11090_v21  ;;  %v13466_v59 = vcombine.low %v19498_v52, %v19502_v22  ;;  %v21250_v32 = vcombine.low %v21248_v10, %v21249_v41  ;;  %v12223_v15 = vor.u32 %v12221_v2, %v12219_v24  ;;  %v11064_v41 = vld [vmem:[#allocation4 + $0x90] sm:$0xf] }
 0x4cf   : > { %v12220_v4 = vsel %vm3131_vm6, %v12215_v28, %v12219_v24  ;;  %v11091_v29 = vmul.bf16 %v21252_v51, %v21251_v35  ;;  %v13467_v1 = vcombine.low %v19510_v56, %v19512_v19  ;;  %v11094_v43 = vmul.bf16 %v19590_v63, %v21253_v13 }
 0x4d0   : > { %14612 = vmatmul.mubr.msk.bf16.gmra.mxu0 %vm6736_vm7, %v11317_v40  ;;  %v12228_v47 = vsel %vm3131_vm6, %v12223_v15, %v12227_v45  ;;  %v12241_v49 = vshll.u32 %v13503_v18, 16  ;;  %v12229_v37 = vshrl.u32 %v13501_v60, 16  ;;  %v12235_v61 = vrot.slane %v12233_v25, 1  ;;  %v21255_v60 = vld [vmem:[#allocation117_spill] sm:$0xff] }
 0x4d1   : > { %14651 = vmatprep.mubr.msk.bf16.mxu0 %vm6736_vm7, %v21250_v32  ;;  %v13504_v26 = vcombine.low %v11091_v29, %v11092_v44  ;;  %v13468_v12 = vcombine.low %v19521_v38, %v19528_v55  ;;  %v11093_v23 = vmul.bf16 %v19588_v30, %v21254_v6  ;;  %v13469_v57 = vcombine.low %v19551_v3, %v19546_v17  ;;  %v21258_v44 = vld [vmem:[#allocation6_spill] sm:$0xff]  ;;  %v21259_v32 = vld [vmem:[#allocation7_spill] sm:$0xff]  ;;  %v21261_v29 = vld [vmem:[#allocation88_spill] sm:$0xff] }
 0x4d2   : > { %v13470_v50 = vcombine.low %v21246_v5, %v19558_v54  ;;  %v13471_v21 = vcombine.low %v21252_v51, %v19579_v8  ;;  %v13461_v24 = vcombine.low %v21256_v16, %v21255_v60  ;;  %v12231_v31 = vor.u32 %v12229_v37, %v12227_v45  ;;  %v11066_v6 = vld [vmem:[#allocation4 + $0x98] sm:$0x1] }
 0x4d3   : > { %14698 = vmatmul.mubr.msk.bf16.gmra.mxu1 %vm6736_vm7, %v12220_v4  ;;  %v12237_v28 = vshrl.u32 %v13502_v20, 16  ;;  %v13472_v40 = vcombine.low %v19588_v30, %v19590_v63  ;;  %v12243_v2 = vrot.slane %v12241_v49, 1  ;;  %v13505_v25 = vcombine.low %v11093_v23, %v11094_v43  ;;  %v11065_v4 = vld [vmem:[#allocation4 + $0x94] sm:$0xf]  ;;  %v21260_v30 = vld [vmem:[#allocation76_spill] sm:$0xff] }
 0x4d4   : > { %14701 = vmatprep.mubr.msk.bf16.mxu1 %vm6736_vm7, %v12228_v47  ;;  %v11096_v10 = vmul.bf16 %v21258_v44, %v21257_v9  ;;  %v13473_v15 = vcombine.low %v21259_v32, %v21258_v44  ;;  %v12249_v45 = vshll.u32 %v13504_v26, 16  ;;  %v11095_v63 = vmul.bf16 %v21259_v32, %v21260_v30 }
 0x4d5   : > { %v12239_v20 = vor.u32 %v12237_v28, %v12235_v61  ;;  %v12236_v35 = vsel %vm3131_vm6, %v12231_v31, %v12235_v61  ;;  %v11097_v47 = vmul.bf16 %v11064_v41, %v21261_v29  ;;  %v12257_v13 = vshll.u32 %v13505_v25, 16  ;;  %v21263_v31 = vld [vmem:[#allocation85_spill] sm:$0xff] }
 0x4d6   : > { %v13506_v53 = vcombine.low %v11095_v63, %v11096_v10  ;;  %v12245_v43 = vshrl.u32 %v13503_v18, 16  ;;  %v12251_v37 = vrot.slane %v12249_v45, 1  ;;  %v12253_v60 = vshrl.u32 %v13504_v26, 16 }
 0x4d7   : > { %v12244_v49 = vsel %vm3131_vm6, %v12239_v20, %v12243_v2  ;;  %v12259_v16 = vrot.slane %v12257_v13, 1  ;;  %v11099_v28 = vmul.bf16 %v11066_v6, %v21263_v31  ;;  %v12261_v10 = vshrl.u32 %v13505_v25, 16 }
 0x4d8   : > { %14652 = vmatmul.mubr.msk.bf16.vlgmr.msra.gmra.mxu0 %vm6736_vm7, %v13460_v11  ;;  %v11098_v11 = vmul.bf16 %v11065_v4, %v21262_v7  ;;  %v12247_v23 = vor.u32 %v12245_v43, %v12243_v2  ;;  %v12255_v18 = vor.u32 %v12253_v60, %v12251_v37  ;;  %v12269_v36 = vshrl.u32 %v13506_v53, 16 }
 0x4d9   : > { %14655 = vmatprep.mubr.msk.bf16.mxu0 %vm6736_vm7, %v13461_v24  ;;  %v12265_v24 = vshll.u32 %v13506_v53, 16  ;;  %v13508_v46 = vcombine.low %v11099_v28, %v11099_v28  ;;  %v13474_v42 = vcombine.low %v11064_v41, %v11065_v4  ;;  %vm12639_vm2 = vcmask 130048  }
 0x4da   : > { %v13507_v61 = vcombine.low %v11097_v47, %v11098_v11  ;;  %v12252_v9 = vsel %vm3131_vm6, %v12247_v23, %v12251_v37  ;;  %v12260_v26 = vsel %vm3131_vm6, %v12255_v18, %v12259_v16 }
 0x4db   : > { %14702 = vmatmul.mubr.msk.bf16.gmra.mxu1 %vm6736_vm7, %v12236_v35  ;;  %v12267_v2 = vrot.slane %v12265_v24, 1  ;;  %v12281_v58 = vshll.u32 %v13508_v46, 16 }
 0x4dc   : > { %14705 = vmatprep.mubr.msk.bf16.mxu1 %vm6736_vm7, %v12244_v49  ;;  %v12273_v44 = vshll.u32 %v13507_v61, 16  ;;  %v12277_v48 = vshrl.u32 %v13507_v61, 16 }
 0x4dd   : > { %v12271_v32 = vor.u32 %v12269_v36, %v12267_v2  ;;  %v12283_v30 = vrot.slane %v12281_v58, 1 }
 0x4de   : > { %v12275_v20 = vrot.slane %v12273_v44, 1 }
 0x4e0   : > { %14656 = vmatmul.mubr.msk.bf16.gmra.mxu0 %vm6736_vm7, %v13462_v27  ;;  %v12263_v27 = vor.u32 %v12261_v10, %v12259_v16  ;;  %v12276_v25 = vsel %vm3131_vm6, %v12271_v32, %v12275_v20  ;;  %v12279_v45 = vor.u32 %v12277_v48, %v12275_v20 }
 0x4e1   : > { %14659 = vmatprep.mubr.msk.bf16.mxu0 %vm6736_vm7, %v13463_v33 }
 0x4e2   : > { %v12268_v33 = vsel %vm3131_vm6, %v12263_v27, %v12267_v2  ;;  %v12284_v0 = vsel %vm3131_vm6, %v12279_v45, %v12283_v30 }
 0x4e3   : > { %14706 = vmatmul.mubr.msk.bf16.gmra.mxu1 %vm6736_vm7, %v12252_v9 }
 0x4e4   : > { %14709 = vmatprep.mubr.msk.bf16.mxu1 %vm6736_vm7, %v12260_v26 }
 0x4e8   : > { %14660 = vmatmul.mubr.msk.bf16.gmra.mxu0 %vm6736_vm7, %v13464_v14 }
 0x4e9   : > { %14663 = vmatprep.mubr.msk.bf16.mxu0 %vm6736_vm7, %v13465_v39 }
 0x4eb   : > { %14710 = vmatmul.mubr.msk.bf16.gmra.mxu1 %vm6736_vm7, %v12268_v33 }
 0x4ec   : > { %14713 = vmatprep.mubr.msk.bf16.mxu1 %vm6736_vm7, %v12276_v25 }
 0x4f0   : > { %14664 = vmatmul.mubr.msk.bf16.gmra.mxu0 %vm6736_vm7, %v13466_v59 }
 0x4f1   : > { %14667 = vmatprep.mubr.msk.bf16.mxu0 %vm6736_vm7, %v13467_v1 }
 0x4f3   : > { %14714 = vmatmul.mubr.msk.bf16.gmra.mxu1 %vm6736_vm7, %v12284_v0 }
 0x4f8   : > { %14668 = vmatmul.mubr.msk.bf16.gmra.mxu0 %vm6736_vm7, %v13468_v12 }
 0x4f9   : > { %14671 = vmatprep.mubr.msk.bf16.mxu0 %vm6736_vm7, %v13469_v57 }
 0x500   : > { %14672 = vmatmul.mubr.msk.bf16.gmra.mxu0 %vm6736_vm7, %v13470_v50 }
 0x501   : > { %14675 = vmatprep.mubr.msk.bf16.mxu0 %vm6736_vm7, %v13471_v21 }
 0x508   : > { %14676 = vmatmul.mubr.msk.bf16.gmra.mxu0 %vm6736_vm7, %v13472_v40 }
 0x509   : > { %14679 = vmatprep.mubr.msk.bf16.mxu0 %vm6736_vm7, %v13473_v15 }
 0x510   : > { %14680 = vmatmul.mubr.msk.bf16.gmra.mxu0 %vm6736_vm7, %v13474_v42 }
 0x532   : > { %v19775_v62 = vpop.f32.mrf.mxu1 }
 0x534   : > { %v19777_v34 = vpop.f32.mrf.mxu1 }
 0x536   : > { %v19779_v52 = vpop.f32.mrf.mxu1 }
 0x538   : > { %v19781_v22 = vpop.f32.mrf.mxu1 }
 0x53a   : > { %v19783_v56 = vpop.f32.mrf.mxu1 }
 0x53c   : > { %v19785_v19 = vpop.f32.mrf.mxu1 }
 0x53e   : > { %v19787_v38 = vpop.f32.mrf.mxu1 }
 0x540   : > { %v19789_v55 = vpop.f32.mrf.mxu1 }
 0x543   : > { %v19791_v17 = vpop.f32.mrf.mxu1 }
 0x545   : > { %v19793_v3 = vpop.f32.mrf.mxu1 }
 0x547   : > { %v19795_v54 = vpop.f32.mrf.mxu1 }
 0x549   : > { %v19797_v8 = vpop.f32.mrf.mxu1 }
 0x54b   : > { %v19799_v14 = vpop.f32.mrf.mxu1 }
 0x54d   : > { %v19801_v5 = vpop.f32.mrf.mxu0  ;;  %v19803_v39 = vpop.f32.mrf.mxu1 }
 0x54f   : > { %v19805_v59 = vpop.f32.mrf.mxu1  ;;  %v19807_v51 = vpop.f32.mrf.mxu0 }
 0x551   : > { %v19809_v1 = vpop.f32.mrf.mxu1  ;;  %v19811_v12 = vpop.f32.mrf.mxu0 }
 0x553   : > { %v19817_v21 = vpop.f32.mrf.mxu0 }
 0x554   : > { %v19813_v57 = vpop.f32.mrf.mxu1 }
 0x556   : > { %v19815_v50 = vpop.f32.mrf.mxu1 }
 0x558   : > { %v19819_v40 = vpop.f32.mrf.mxu1 }
 0x559   : > { %21264 = vst [vmem:[#allocation9_spill] sm:$0xff] %v19819_v40 }
 0x55a   : > { %v19821_v41 = vpop.f32.mrf.mxu1 }
 0x55b   : > { %21265 = vst [vmem:[#allocation10_spill] sm:$0xff] %v19821_v41 }
 0x55c   : > { %v19823_v15 = vpop.f32.mrf.mxu0  ;;  %v19825_v4 = vpop.f32.mrf.mxu1 }
 0x55d   : > { %21266 = vst [vmem:[#allocation12_spill] sm:$0xff] %v19825_v4 }
 0x55e   : > { %v19827_v63 = vpop.f32.mrf.mxu0  ;;  %v19829_v35 = vpop.f32.mrf.mxu1 }
 0x55f   : > { %21267 = vst [vmem:[#allocation11_spill] sm:$0xff] %v19829_v35 }
 0x560   : > { %v19831_v29 = vpop.f32.mrf.mxu0  ;;  %v19833_v47 = vpop.f32.mrf.mxu1 }
 0x561   : > { %21268 = vst [vmem:[#allocation13_spill] sm:$0xff] %v19833_v47 }
 0x562   : > { %v19835_v49 = vpop.f32.mrf.mxu1  ;;  %v19837_v13 = vpop.f32.mrf.mxu0 }
 0x563   : > { %21269 = vst [vmem:[#allocation16_spill] sm:$0xff] %v19835_v49 }
 0x565   : > { %v19839_v53 = vpop.f32.mrf.mxu1 }
 0x566   : > { %21270 = vst [vmem:[#allocation14_spill] sm:$0xff] %v19839_v53 }
 0x567   : > { %v19841_v7 = vpop.f32.mrf.mxu1 }
 0x568   : > { %21271 = vst [vmem:[#allocation15_spill] sm:$0xff] %v19841_v7  ;;  %v19843_v11 = vpop.f32.mrf.mxu0 }
 0x569   : > { %v19845_v43 = vpop.f32.mrf.mxu1 }
 0x56a   : > { %21272 = vst [vmem:[#allocation17_spill] sm:$0xff] %v19845_v43  ;;  %v19847_v37 = vpop.f32.mrf.mxu0 }
 0x56b   : > { %v19849_v6 = vpop.f32.mrf.mxu1 }
 0x56c   : > { %21273 = vst [vmem:[#allocation18_spill] sm:$0xff] %v19849_v6  ;;  %v19851_v23 = vpop.f32.mrf.mxu0 }
 0x56d   : > { %v19853_v60 = vpop.f32.mrf.mxu1 }
 0x56e   : > { %21274 = vst [vmem:[#allocation20_spill] sm:$0xff] %v19853_v60  ;;  %v19855_v16 = vpop.f32.mrf.mxu0 }
 0x56f   : > { %v19857_v24 = vpop.f32.mrf.mxu1 }
 0x570   : > { %21275 = vst [vmem:[#allocation19_spill] sm:$0xff] %v19857_v24  ;;  %v19859_v61 = vpop.f32.mrf.mxu0 }
 0x571   : > { %v19861_v31 = vpop.f32.mrf.mxu1 }
 0x572   : > { %21276 = vst [vmem:[#allocation21_spill] sm:$0xff] %v19861_v31  ;;  %v19863_v28 = vpop.f32.mrf.mxu0 }
 0x573   : > { %v19867_v9 = vpop.f32.mrf.mxu1 }
 0x574   : > { %v19865_v18 = vpop.f32.mrf.mxu0  ;;  %21277 = vst [vmem:[#allocation24_spill] sm:$0xff] %v19867_v9 }
 0x576   : > { %v19869_v26 = vpop.f32.mrf.mxu0 }
 0x578   : > { %v19871_v2 = vpop.f32.mrf.mxu0  ;;  %v14687_v44 = vpop.f32.mrf.mxu1 }
 0x57a   : > { %v19873_v10 = vpop.f32.mrf.mxu0  ;;  %v12370_v46 = vpop.f32.mrf.mxu1 }
 0x57c   : > { %v19875_v36 = vpop.f32.mrf.mxu0  ;;  %v14688_v27 = vpop.f32.mrf.mxu1 }
 0x57e   : > { %v19877_v32 = vpop.f32.mrf.mxu0  ;;  %v12373_v20 = vpop.f32.mrf.mxu1 }
 0x57f   : > { %21278 = vst [vmem:[#allocation22_spill] sm:$0xff] %v19877_v32 }
 0x580   : > { %v19879_v48 = vpop.f32.mrf.mxu0 }
 0x581   : > { %21279 = vst [vmem:[#allocation23_spill] sm:$0xff] %v19879_v48 }
 0x582   : > { %v19881_v58 = vpop.f32.mrf.mxu0 }
 0x583   : > { %21280 = vst [vmem:[#allocation25_spill] sm:$0xff] %v19881_v58  ;;  %v19883_v33 = vpop.f32.mrf.mxu1 }
 0x584   : > { %v19885_v25 = vpop.f32.mrf.mxu0 }
 0x585   : > { %21281 = vst [vmem:[#allocation28_spill] sm:$0xff] %v19885_v25  ;;  %v19887_v45 = vpop.f32.mrf.mxu1 }
 0x586   : > { %v19889_v30 = vpop.f32.mrf.mxu0 }
 0x587   : > { %21282 = vst [vmem:[#allocation26_spill] sm:$0xff] %v19889_v30  ;;  %v19891_v0 = vpop.f32.mrf.mxu1 }
 0x588   : > { %v19893_v42 = vpop.f32.mrf.mxu0 }
 0x589   : > { %21283 = vst [vmem:[#allocation27_spill] sm:$0xff] %v19893_v42  ;;  %v19895_v9 = vpop.f32.mrf.mxu1 }
 0x58a   : > { %v19897_v31 = vpop.f32.mrf.mxu0 }
 0x58b   : > { %21284 = vst [vmem:[#allocation29_spill] sm:$0xff] %v19897_v31  ;;  %v19899_v24 = vpop.f32.mrf.mxu1 }
 0x58c   : > { %v19901_v60 = vpop.f32.mrf.mxu0 }
 0x58d   : > { %21285 = vst [vmem:[#allocation30_spill] sm:$0xff] %v19901_v60  ;;  %v19903_v6 = vpop.f32.mrf.mxu1 }
 0x58e   : > { %v19905_v43 = vpop.f32.mrf.mxu0 }
 0x58f   : > { %21286 = vst [vmem:[#allocation32_spill] sm:$0xff] %v19905_v43  ;;  %v19907_v7 = vpop.f32.mrf.mxu1  ;;  %v11624_v43 = vadd.f32 %v19775_v62, %v19801_v5  ;;  %v19941_v5 = vld [vmem:[%s20183_s9] ss:$0 sm:$0xff] }
 0x590   : > { %v19909_v53 = vpop.f32.mrf.mxu0 }
 0x591   : > { %21287 = vst [vmem:[#allocation31_spill] sm:$0xff] %v19909_v53  ;;  %v19911_v49 = vpop.f32.mrf.mxu1  ;;  %v11616_v53 = vadd.f32 %v19777_v34, %v19807_v51  ;;  %v11619_v51 = vadd.f32 %v19781_v22, %v19817_v21  ;;  %v11632_v22 = vadd.f32 %v19785_v19, %v19827_v63 }
 0x592   : > { %v19913_v30 = vpop.f32.mrf.mxu0 }
 0x593   : > { %21288 = vst [vmem:[#allocation33_spill] sm:$0xff] %v19913_v30  ;;  %v19915_v42 = vpop.f32.mrf.mxu1  ;;  %v19932_v30 = vld [vmem:[%s20182_s8] ss:$0 sm:$0xff] }
 0x594   : > { %v19917_v47 = vpop.f32.mrf.mxu0 }
 0x595   : > { %21289 = vst [vmem:[#allocation34_spill] sm:$0xff] %v19917_v47  ;;  %v19919_v31 = vpop.f32.mrf.mxu1 }
 0x596   : > { %v19921_v60 = vpop.f32.mrf.mxu0 }
 0x597   : > { %21290 = vst [vmem:[#allocation35_spill] sm:$0xff] %v19921_v60  ;;  %v19925_v25 = vpop.f32.mrf.mxu1  ;;  %v11627_v60 = vadd.f32 %v19779_v52, %v19811_v12 }
 0x598   : > { %v14653_v35 = vpop.f32.mrf.mxu0 }
 0x599   : > { %v12038_v58 = vadd.f32 %v14653_v35, %v11624_v43  ;;  %v19934_v4 = vpop.f32.mrf.mxu1 }
 0x59a   : > { %v11909_v47 = vpop.f32.mrf.mxu0 }
 0x59b   : > { %v12499_v48 = vadd.f32 %v14687_v44, %v12038_v58  ;;  %v12036_v62 = vadd.f32 %v11909_v47, %v11616_v53  ;;  %v19947_v40 = vpop.f32.mrf.mxu1  ;;  %v11640_v44 = vadd.f32 %v19783_v56, %v19823_v15  ;;  %v11643_v56 = vadd.f32 %v19787_v38, %v19831_v29 }
 0x59c   : > { %v14654_v34 = vpop.f32.mrf.mxu0 }
 0x59d   : > { %v12538_v35 = vmul.f32 %v19932_v30, %v12499_v48  ;;  %v12497_v43 = vadd.f32 %v12370_v46, %v12036_v62  ;;  %v12039_v41 = vadd.f32 %v14654_v34, %v11627_v60  ;;  %v19964_v63 = vpop.f32.mrf.mxu1  ;;  %v11635_v34 = vadd.f32 %v19789_v55, %v19837_v13 }
 0x59e   : > { %v11912_v32 = vpop.f32.mrf.mxu0 }
 0x59f   : > { %v12577_v52 = vadd.f32 %v19941_v5, %v12538_v35  ;;  %v12536_v12 = vmul.f32 %v19932_v30, %v12497_v43  ;;  %v12500_v47 = vadd.f32 %v14688_v27, %v12039_v41  ;;  %v12037_v53 = vadd.f32 %v11912_v32, %v11619_v51 }
 0x5a0   : > { %v14657_v21 = vpop.f32.mrf.mxu0 }
 0x5a1   : > { %v12609_v60 = vmax.f32 %v12577_v52, 0.0  ;;  %v12575_v46 = vadd.f32 %v19941_v5, %v12536_v12  ;;  %v12539_v41 = vmul.f32 %v19932_v30, %v12500_v47  ;;  %v12498_v27 = vadd.f32 %v12373_v20, %v12037_v53  ;;  %v19980_v47 = vpop.f32.mrf.mxu1 }
 0x5a2   : > { %v12042_v15 = vadd.f32 %v14657_v21, %v11640_v44  ;;  %v11925_v19 = vpop.f32.mrf.mxu0  ;;  %v11656_v52 = vadd.f32 %v19791_v17, %v19843_v11 }
 0x5a3   : > { %12642 = vst.msk [vmem:[%s19958_s27 + $0x10] sm:$0xff] %vm12639_vm2, %v12609_v60  ;;  %v12607_v32 = vmax.f32 %v12575_v46, 0.0  ;;  %v12578_v48 = vadd.f32 %v19941_v5, %v12539_v41  ;;  %v12537_v58 = vmul.f32 %v19932_v30, %v12498_v27  ;;  %v12040_v62 = vadd.f32 %v11925_v19, %v11632_v22  ;;  %v19996_v27 = vpop.f32.mrf.mxu1 }
 0x5a4   : > { %v12503_v20 = vadd.f32 %v19883_v33, %v12042_v15  ;;  %v14658_v51 = vpop.f32.mrf.mxu0  ;;  %v11648_v46 = vadd.f32 %v19793_v3, %v19847_v37 }
 0x5a5   : > { %12640 = vst.msk [vmem:[%s19958_s27] sm:$0xff] %vm12639_vm2, %v12607_v32  ;;  %v12610_v38 = vmax.f32 %v12578_v48, 0.0  ;;  %v12576_v29 = vadd.f32 %v19941_v5, %v12537_v58  ;;  %v12501_v35 = vadd.f32 %v19887_v45, %v12040_v62  ;;  %v12043_v43 = vadd.f32 %v14658_v51, %v11643_v56 }
 0x5a6   : > { %v12542_v12 = vmul.f32 %v19932_v30, %v12503_v20  ;;  %v11928_v55 = vpop.f32.mrf.mxu0 }
 0x5a7   : > { %12643 = vst.msk [vmem:[%s19958_s27 + $0x18] sm:$0xff] %vm12639_vm2, %v12610_v38  ;;  %v12608_v13 = vmax.f32 %v12576_v29, 0.0  ;;  %v12540_v33 = vmul.f32 %v19932_v30, %v12501_v35  ;;  %v12504_v53 = vadd.f32 %v19891_v0, %v12043_v43  ;;  %v12041_v44 = vadd.f32 %v11928_v55, %v11635_v34 }
 0x5a8   : > { %v12581_v22 = vadd.f32 %v19941_v5, %v12542_v12  ;;  %v14661_v45 = vpop.f32.mrf.mxu0  ;;  %v11659_v0 = vadd.f32 %v19795_v54, %v19851_v23  ;;  %v11672_v34 = vadd.f32 %v19799_v14, %v19859_v61  ;;  %v11664_v35 = vadd.f32 %v19803_v39, %v19863_v28 }
 0x5a9   : > { %12641 = vst.msk [vmem:[%s19958_s27 + $0x8] sm:$0xff] %vm12639_vm2, %v12608_v13  ;;  %v12579_v17 = vadd.f32 %v19941_v5, %v12540_v33  ;;  %v12543_v11 = vmul.f32 %v19932_v30, %v12504_v53  ;;  %v12502_v21 = vadd.f32 %v19895_v9, %v12041_v44  ;;  %v12046_v60 = vadd.f32 %v14661_v45, %v11656_v52 }
 0x5aa   : > { %v12613_v41 = vmax.f32 %v12581_v22, 0.0  ;;  %v11941_v56 = vpop.f32.mrf.mxu0  ;;  %v11651_v9 = vadd.f32 %v19797_v8, %v19855_v16  ;;  %v11667_v44 = vadd.f32 %v19809_v1, %v19869_v26 }
 0x5ab   : > { %v12611_v15 = vmax.f32 %v12579_v17, 0.0  ;;  %v12582_v19 = vadd.f32 %v19941_v5, %v12543_v11  ;;  %v12541_v32 = vmul.f32 %v19932_v30, %v12502_v21  ;;  %v12507_v48 = vadd.f32 %v19899_v24, %v12046_v60  ;;  %v20011_v24 = vpop.f32.mrf.mxu1 }
 0x5ac   : > { %12646 = vst.msk [vmem:[%s19958_s27 + $0x30] sm:$0xff] %vm12639_vm2, %v12613_v41  ;;  %v12044_v3 = vadd.f32 %v11941_v56, %v11648_v46  ;;  %v14662_v37 = vpop.f32.mrf.mxu0 }
 0x5ad   : > { %12644 = vst.msk [vmem:[%s19958_s27 + $0x20] sm:$0xff] %vm12639_vm2, %v12611_v15  ;;  %v12614_v54 = vmax.f32 %v12582_v19, 0.0  ;;  %v12580_v23 = vadd.f32 %v19941_v5, %v12541_v32  ;;  %v12546_v58 = vmul.f32 %v19932_v30, %v12507_v48  ;;  %v12047_v62 = vadd.f32 %v14662_v37, %v11659_v0  ;;  %v20026_v13 = vpop.f32.mrf.mxu1  ;;  %v21291_v48 = vld [vmem:[#allocation9_spill] sm:$0xff] }
 0x5ae   : > { %v12505_v8 = vadd.f32 %v19903_v6, %v12044_v3  ;;  %v11944_v16 = vpop.f32.mrf.mxu0 }
 0x5af   : > { %12647 = vst.msk [vmem:[%s19958_s27 + $0x38] sm:$0xff] %vm12639_vm2, %v12614_v54  ;;  %v12612_v20 = vmax.f32 %v12580_v23, 0.0  ;;  %v12585_v51 = vadd.f32 %v19941_v5, %v12546_v58  ;;  %v12508_v38 = vadd.f32 %v19907_v7, %v12047_v62  ;;  %v12045_v29 = vadd.f32 %v11944_v16, %v11651_v9  ;;  %v20044_v46 = vpop.f32.mrf.mxu1  ;;  %v21292_v16 = vld [vmem:[#allocation22_spill] sm:$0xff] }
 0x5b0   : > { %v12544_v43 = vmul.f32 %v19932_v30, %v12505_v8  ;;  %v14665_v14 = vpop.f32.mrf.mxu0  ;;  %v11691_v9 = vadd.f32 %v21291_v48, %v19875_v36 }
 0x5b1   : > { %12645 = vst.msk [vmem:[%s19958_s27 + $0x28] sm:$0xff] %vm12639_vm2, %v12612_v20  ;;  %v12617_v61 = vmax.f32 %v12585_v51, 0.0  ;;  %v12547_v6 = vmul.f32 %v19932_v30, %v12508_v38  ;;  %v12506_v52 = vadd.f32 %v19911_v49, %v12045_v29  ;;  %v12050_v12 = vadd.f32 %v14665_v14, %v11672_v34  ;;  %v20059_v3 = vpop.f32.mrf.mxu1  ;;  %v21293_v20 = vld [vmem:[#allocation10_spill] sm:$0xff]  ;;  %v21294_v38 = vld [vmem:[#allocation23_spill] sm:$0xff] }
 0x5b2   : > { %v12583_v55 = vadd.f32 %v19941_v5, %v12544_v43  ;;  %v11957_v7 = vpop.f32.mrf.mxu0  ;;  %v11675_v49 = vadd.f32 %v19805_v59, %v19865_v18  ;;  %v11683_v51 = vadd.f32 %v21293_v20, %v21292_v16  ;;  %v21306_v16 = vld [vmem:[#allocation30_spill] sm:$0xff]  ;;  %v21307_v20 = vld [vmem:[#allocation17_spill] sm:$0xff] }
 0x5b3   : > { %12650 = vst.msk [vmem:[%s19958_s27 + $0x50] sm:$0xff] %vm12639_vm2, %v12617_v61  ;;  %v12586_v39 = vadd.f32 %v19941_v5, %v12547_v6  ;;  %v12545_v28 = vmul.f32 %v19932_v30, %v12506_v52  ;;  %v12511_v33 = vadd.f32 %v19915_v42, %v12050_v12  ;;  %v12048_v53 = vadd.f32 %v11957_v7, %v11664_v35  ;;  %v14711_v35 = vpop.f32.mrf.mxu1 }
 0x5b4   : > { %v12615_v22 = vmax.f32 %v12583_v55, 0.0  ;;  %v14666_v45 = vpop.f32.mrf.mxu0  ;;  %v11688_v42 = vadd.f32 %v19813_v57, %v19871_v2  ;;  %v21296_v55 = vld [vmem:[#allocation25_spill] sm:$0xff] }
 0x5b5   : > { %v12618_v17 = vmax.f32 %v12586_v39, 0.0  ;;  %v12584_v11 = vadd.f32 %v19941_v5, %v12545_v28  ;;  %v12550_v21 = vmul.f32 %v19932_v30, %v12511_v33  ;;  %v12509_v60 = vadd.f32 %v19919_v31, %v12048_v53 }
 0x5b6   : > { %12648 = vst.msk [vmem:[%s19958_s27 + $0x40] sm:$0xff] %vm12639_vm2, %v12615_v22  ;;  %v12051_v59 = vadd.f32 %v14666_v45, %v11675_v49  ;;  %v11960_v18 = vpop.f32.mrf.mxu0  ;;  %v11680_v31 = vadd.f32 %v19815_v50, %v19873_v10  ;;  %v21298_v22 = vld [vmem:[#allocation28_spill] sm:$0xff]  ;;  %v21299_v45 = vld [vmem:[#allocation13_spill] sm:$0xff] }
 0x5b7   : > { %12651 = vst.msk [vmem:[%s19958_s27 + $0x58] sm:$0xff] %vm12639_vm2, %v12618_v17  ;;  %v12616_v1 = vmax.f32 %v12584_v11, 0.0  ;;  %v12589_v26 = vadd.f32 %v19941_v5, %v12550_v21  ;;  %v12548_v0 = vmul.f32 %v19932_v30, %v12509_v60  ;;  %v12049_v41 = vadd.f32 %v11960_v18, %v11667_v44 }
 0x5b8   : > { %v12512_v57 = vadd.f32 %v19925_v25, %v12051_v59  ;;  %v14669_v2 = vpop.f32.mrf.mxu0  ;;  %v11707_v17 = vadd.f32 %v21299_v45, %v21298_v22 }
 0x5b9   : > { %12649 = vst.msk [vmem:[%s19958_s27 + $0x48] sm:$0xff] %vm12639_vm2, %v12616_v1  ;;  %v12621_v56 = vmax.f32 %v12589_v26, 0.0  ;;  %v12587_v15 = vadd.f32 %v19941_v5, %v12548_v0  ;;  %v12510_v19 = vadd.f32 %v19934_v4, %v12049_v41  ;;  %v12054_v32 = vadd.f32 %v14669_v2, %v11688_v42  ;;  %v21300_v1 = vld [vmem:[#allocation26_spill] sm:$0xff]  ;;  %v21301_v26 = vld [vmem:[#allocation16_spill] sm:$0xff] }
 0x5ba   : > { %v12551_v37 = vmul.f32 %v19932_v30, %v12512_v57  ;;  %v11973_v50 = vpop.f32.mrf.mxu0  ;;  %v11699_v0 = vadd.f32 %v21301_v26, %v21300_v1 }
 0x5bb   : > { %12654 = vst.msk [vmem:[%s19958_s27 + $0x70] sm:$0xff] %vm12639_vm2, %v12621_v56  ;;  %v12619_v10 = vmax.f32 %v12587_v15, 0.0  ;;  %v12549_v25 = vmul.f32 %v19932_v30, %v12510_v19  ;;  %v12515_v54 = vadd.f32 %v19947_v40, %v12054_v32  ;;  %v12052_v23 = vadd.f32 %v11973_v50, %v11680_v31  ;;  %v21295_v40 = vld [vmem:[#allocation12_spill] sm:$0xff]  ;;  %v21302_v50 = vld [vmem:[#allocation27_spill] sm:$0xff] }
 0x5bc   : > { %v12590_v58 = vadd.f32 %v19941_v5, %v12551_v37  ;;  %v14670_v4 = vpop.f32.mrf.mxu0  ;;  %v11704_v29 = vadd.f32 %v21295_v40, %v21294_v38 }
 0x5bd   : > { %12652 = vst.msk [vmem:[%s19958_s27 + $0x60] sm:$0xff] %vm12639_vm2, %v12619_v10  ;;  %v12588_v36 = vadd.f32 %v19941_v5, %v12549_v25  ;;  %v12554_v62 = vmul.f32 %v19932_v30, %v12515_v54  ;;  %v12513_v34 = vadd.f32 %v19964_v63, %v12052_v23  ;;  %v12055_v8 = vadd.f32 %v14670_v4, %v11691_v9  ;;  %v21297_v63 = vld [vmem:[#allocation11_spill] sm:$0xff]  ;;  %v21303_v10 = vld [vmem:[#allocation14_spill] sm:$0xff] }
 0x5be   : > { %v12622_v43 = vmax.f32 %v12590_v58, 0.0  ;;  %v11976_v14 = vpop.f32.mrf.mxu0  ;;  %v11696_v7 = vadd.f32 %v21297_v63, %v21296_v55  ;;  %v11720_v25 = vadd.f32 %v21303_v10, %v21302_v50  ;;  %v21305_v54 = vld [vmem:[#allocation15_spill] sm:$0xff] }
 0x5bf   : > { %v12620_v61 = vmax.f32 %v12588_v36, 0.0  ;;  %v12593_v6 = vadd.f32 %v19941_v5, %v12554_v62  ;;  %v12552_v52 = vmul.f32 %v19932_v30, %v12513_v34  ;;  %v12516_v12 = vadd.f32 %v19980_v47, %v12055_v8  ;;  %v12466_v47 = vpop.f32.mrf.mxu1 }
 0x5c0   : > { %12655 = vst.msk [vmem:[%s19958_s27 + $0x78] sm:$0xff] %vm12639_vm2, %v12622_v43  ;;  %v12053_v39 = vadd.f32 %v11976_v14, %v11683_v51  ;;  %v14673_v28 = vpop.f32.mrf.mxu0 }
 0x5c1   : > { %12653 = vst.msk [vmem:[%s19958_s27 + $0x68] sm:$0xff] %vm12639_vm2, %v12620_v61  ;;  %v12625_v33 = vmax.f32 %v12593_v6, 0.0  ;;  %v12591_v53 = vadd.f32 %v19941_v5, %v12552_v52  ;;  %v12555_v49 = vmul.f32 %v19932_v30, %v12516_v12  ;;  %v12058_v44 = vadd.f32 %v14673_v28, %v11704_v29  ;;  %v14712_v15 = vpop.f32.mrf.mxu1  ;;  %v21308_v6 = vld [vmem:[#allocation32_spill] sm:$0xff]  ;;  %v21309_v52 = vld [vmem:[#allocation18_spill] sm:$0xff] }
 0x5c2   : > { %v12514_v11 = vadd.f32 %v19996_v27, %v12053_v39  ;;  %v11989_v21 = vpop.f32.mrf.mxu0 }
 0x5c3   : > { %12658 = vst.msk [vmem:[%s19958_s27 + $0x90] sm:$0xff] %vm12639_vm2, %v12625_v33  ;;  %v12623_v60 = vmax.f32 %v12591_v53, 0.0  ;;  %v12594_v42 = vadd.f32 %v19941_v5, %v12555_v49  ;;  %v12519_v59 = vadd.f32 %v20011_v24, %v12058_v44  ;;  %v12056_v18 = vadd.f32 %v11989_v21, %v11696_v7  ;;  %v12469_v51 = vpop.f32.mrf.mxu1  ;;  %v21310_v53 = vld [vmem:[#allocation31_spill] sm:$0xff]  ;;  %v21311_v49 = vld [vmem:[#allocation20_spill] sm:$0xff] }
 0x5c4   : > { %v12553_v41 = vmul.f32 %v19932_v30, %v12514_v11  ;;  %v14674_v31 = vpop.f32.mrf.mxu0  ;;  %v11736_v44 = vadd.f32 %v21311_v49, %v21310_v53 }
 0x5c5   : > { %12656 = vst.msk [vmem:[%s19958_s27 + $0x80] sm:$0xff] %vm12639_vm2, %v12623_v60  ;;  %v12626_v57 = vmax.f32 %v12594_v42, 0.0  ;;  %v12558_v27 = vmul.f32 %v19932_v30, %v12519_v59  ;;  %v12517_v2 = vadd.f32 %v20026_v13, %v12056_v18  ;;  %v12059_v56 = vadd.f32 %v14674_v31, %v11707_v17  ;;  %v21304_v13 = vld [vmem:[#allocation29_spill] sm:$0xff]  ;;  %v14715_v63 = vpop.f32.mrf.mxu1 }
 0x5c6   : > { %v12592_v19 = vadd.f32 %v19941_v5, %v12553_v41  ;;  %v11992_v32 = vpop.f32.mrf.mxu0  ;;  %v11712_v23 = vadd.f32 %v21305_v54, %v21304_v13  ;;  %v21313_v41 = vld [vmem:[#allocation19_spill] sm:$0xff] }
 0x5c7   : > { %12659 = vst.msk [vmem:[%s19958_s27 + $0x98] sm:$0xff] %vm12639_vm2, %v12626_v57  ;;  %v12597_v24 = vadd.f32 %v19941_v5, %v12558_v27  ;;  %v12556_v48 = vmul.f32 %v19932_v30, %v12517_v2  ;;  %v12520_v9 = vadd.f32 %v20044_v46, %v12059_v56  ;;  %v12057_v37 = vadd.f32 %v11992_v32, %v11699_v0  ;;  %v12482_v42 = vpop.f32.mrf.mxu1  ;;  %v21312_v0 = vld [vmem:[#allocation33_spill] sm:$0xff]  ;;  %v21314_v57 = vld [vmem:[#allocation34_spill] sm:$0xff] }
 0x5c8   : > { %v12624_v58 = vmax.f32 %v12592_v19, 0.0  ;;  %v14677_v4 = vpop.f32.mrf.mxu0  ;;  %v11723_v46 = vadd.f32 %v21307_v20, %v21306_v16  ;;  %v11728_v31 = vadd.f32 %v21313_v41, %v21312_v0  ;;  %v21315_v27 = vld [vmem:[#allocation21_spill] sm:$0xff] }
 0x5c9   : > { %v12629_v36 = vmax.f32 %v12597_v24, 0.0  ;;  %v12595_v62 = vadd.f32 %v19941_v5, %v12556_v48  ;;  %v12559_v34 = vmul.f32 %v19932_v30, %v12520_v9  ;;  %v12518_v8 = vadd.f32 %v20059_v3, %v12057_v37  ;;  %v21316_v9 = vld [vmem:[#allocation35_spill] sm:$0xff]  ;;  %v21317_v37 = vld [vmem:[#allocation24_spill] sm:$0xff]  ;;  %v14716_v10 = vpop.f32.mrf.mxu1 }
 0x5ca   : > { %12657 = vst.msk [vmem:[%s19958_s27 + $0x88] sm:$0xff] %vm12639_vm2, %v12624_v58  ;;  %v12062_v38 = vadd.f32 %v14677_v4, %v11720_v25  ;;  %v12005_v40 = vpop.f32.mrf.mxu0  ;;  %v11715_v3 = vadd.f32 %v21309_v52, %v21308_v6  ;;  %v11739_v2 = vadd.f32 %v21315_v27, %v21314_v57  ;;  %v11731_v50 = vadd.f32 %v21317_v37, %v21316_v9 }
 0x5cb   : > { %12662 = vst.msk [vmem:[%s19958_s27 + $0xb0] sm:$0xff] %vm12639_vm2, %v12629_v36  ;;  %v12627_v29 = vmax.f32 %v12595_v62, 0.0  ;;  %v12598_v43 = vadd.f32 %v19941_v5, %v12559_v34  ;;  %v12557_v14 = vmul.f32 %v19932_v30, %v12518_v8  ;;  %v12060_v61 = vadd.f32 %v12005_v40, %v11712_v23 }
 0x5cc   : > { %v12523_v12 = vadd.f32 %v14711_v35, %v12062_v38  ;;  %v14678_v55 = vpop.f32.mrf.mxu0 }
 0x5cd   : > { %12660 = vst.msk [vmem:[%s19958_s27 + $0xa0] sm:$0xff] %vm12639_vm2, %v12627_v29  ;;  %v12630_v7 = vmax.f32 %v12598_v43, 0.0  ;;  %v12596_v39 = vadd.f32 %v19941_v5, %v12557_v14  ;;  %v12521_v28 = vadd.f32 %v12466_v47, %v12060_v61  ;;  %v12063_v33 = vadd.f32 %v14678_v55, %v11723_v46 }
 0x5ce   : > { %v12562_v22 = vmul.f32 %v19932_v30, %v12523_v12  ;;  %v12008_v45 = vpop.f32.mrf.mxu0 }
 0x5cf   : > { %12663 = vst.msk [vmem:[%s19958_s27 + $0xb8] sm:$0xff] %vm12639_vm2, %v12630_v7  ;;  %v12628_v17 = vmax.f32 %v12596_v39, 0.0  ;;  %v12560_v35 = vmul.f32 %v19932_v30, %v12521_v28  ;;  %v12524_v11 = vadd.f32 %v14712_v15, %v12063_v33  ;;  %v12061_v21 = vadd.f32 %v12008_v45, %v11715_v3 }
 0x5d0   : > { %v12601_v60 = vadd.f32 %v19941_v5, %v12562_v22  ;;  %v14681_v59 = vpop.f32.mrf.mxu0 }
 0x5d1   : > { %12661 = vst.msk [vmem:[%s19958_s27 + $0xa8] sm:$0xff] %vm12639_vm2, %v12628_v17  ;;  %v12599_v47 = vadd.f32 %v19941_v5, %v12560_v35  ;;  %v12563_v18 = vmul.f32 %v19932_v30, %v12524_v11  ;;  %v12522_v1 = vadd.f32 %v12469_v51, %v12061_v21  ;;  %v12066_v26 = vadd.f32 %v14681_v59, %v11736_v44  ;;  %v12485_v51 = vpop.f32.mrf.mxu1 }
 0x5d2   : > { %v12633_v56 = vmax.f32 %v12601_v60, 0.0  ;;  %v12021_v15 = vpop.f32.mrf.mxu0 }
 0x5d3   : > { %v12631_v19 = vmax.f32 %v12599_v47, 0.0  ;;  %v12602_v32 = vadd.f32 %v19941_v5, %v12563_v18  ;;  %v12561_v24 = vmul.f32 %v19932_v30, %v12522_v1  ;;  %v12527_v48 = vadd.f32 %v14715_v63, %v12066_v26 }
 0x5d4   : > { %12666 = vst.msk [vmem:[%s19958_s27 + $0xd0] sm:$0xff] %vm12639_vm2, %v12633_v56  ;;  %v12064_v25 = vadd.f32 %v12021_v15, %v11728_v31  ;;  %v14682_v13 = vpop.f32.mrf.mxu0 }
 0x5d5   : > { %12664 = vst.msk [vmem:[%s19958_s27 + $0xc0] sm:$0xff] %vm12639_vm2, %v12631_v19  ;;  %v12634_v54 = vmax.f32 %v12602_v32, 0.0  ;;  %v12600_v23 = vadd.f32 %v19941_v5, %v12561_v24  ;;  %v12566_v58 = vmul.f32 %v19932_v30, %v12527_v48  ;;  %v12067_v4 = vadd.f32 %v14682_v13, %v11739_v2 }
 0x5d6   : > { %v12525_v36 = vadd.f32 %v12482_v42, %v12064_v25  ;;  %v12024_v62 = vpop.f32.mrf.mxu0 }
 0x5d7   : > { %12667 = vst.msk [vmem:[%s19958_s27 + $0xd8] sm:$0xff] %vm12639_vm2, %v12634_v54  ;;  %v12632_v34 = vmax.f32 %v12600_v23, 0.0  ;;  %v12605_v8 = vadd.f32 %v19941_v5, %v12566_v58  ;;  %v12528_v16 = vadd.f32 %v14716_v10, %v12067_v4  ;;  %v12065_v20 = vadd.f32 %v12024_v62, %v11731_v50 }
 0x5d8   : > { %v12564_v46 = vmul.f32 %v19932_v30, %v12525_v36 }
 0x5d9   : > { %12665 = vst.msk [vmem:[%s19958_s27 + $0xc8] sm:$0xff] %vm12639_vm2, %v12632_v34  ;;  %v12637_v38 = vmax.f32 %v12605_v8, 0.0  ;;  %v12567_v40 = vmul.f32 %v19932_v30, %v12528_v16  ;;  %v12526_v29 = vadd.f32 %v12485_v51, %v12065_v20 }
 0x5da   : > { %v12603_v43 = vadd.f32 %v19941_v5, %v12564_v46 }
 0x5db   : > { %12670 = vst.msk [vmem:[%s19958_s27 + $0xf0] sm:$0xff] %vm12639_vm2, %v12637_v38  ;;  %v12606_v14 = vadd.f32 %v19941_v5, %v12567_v40  ;;  %v12565_v61 = vmul.f32 %v19932_v30, %v12526_v29 }
 0x5dc   : > { %v12635_v6 = vmax.f32 %v12603_v43, 0.0 }
 0x5dd   : > { %v12638_v52 = vmax.f32 %v12606_v14, 0.0  ;;  %v12604_v3 = vadd.f32 %v19941_v5, %v12565_v61 }
 0x5de   : > { %12668 = vst.msk [vmem:[%s19958_s27 + $0xe0] sm:$0xff] %vm12639_vm2, %v12635_v6 }
 0x5df   : > { %12671 = vst.msk [vmem:[%s19958_s27 + $0xf8] sm:$0xff] %vm12639_vm2, %v12638_v52  ;;  %v12636_v12 = vmax.f32 %v12604_v3, 0.0 }
 0x5e1   : > { %12669 = vst.msk [vmem:[%s19958_s27 + $0xe8] sm:$0xff] %vm12639_vm2, %v12636_v12 }
 0x5e2 PF: > { %s20_s13 = sadd.s32 1, %s14850_s13  }
 0x5e3   : > { %p17_p4 = scmp.ge.s32.totalorder %s20_s13, 4  }
 0x5e5   :  { %19 = sbr.rel (!%p17_p4) target bundleno = 1 (0x1), region = 109 }

</bundles_post_ra>
